<compile_context>
chip_gen: v6e
topology: v6e:2x2x1
jax: 0.10.0
libtpu: 0.0.40
codegen_flags: <defaults>
</compile_context>

<pallas_src>
import functools

import jax
import jax.numpy as jnp
from jax import lax
from jax.experimental import pallas as pl
from jax.experimental.pallas import tpu as pltpu

jax.config.update("jax_default_matmul_precision", "highest")


# ----------------------------------------------------------------------------
# Kernel: one grid step == TT timesteps of the recurrence.
# ----------------------------------------------------------------------------
def st_block5_kernel(cheb_ref, x_ref, wxbd_ref, whbd_ref, bias_ref,
                     out_ref, h_sc, c_sc):
    tb = pl.program_id(0)
    K = cheb_ref.shape[0]
    TT = x_ref.shape[0]
    Bco = h_sc.shape[0]                 # B * c_out
    N = out_ref.shape[2]

    # ---- first time-block: zero the recurrent state ----
    @pl.when(tb == 0)
    def _init():
        h_sc[...] = jnp.zeros_like(h_sc)
        c_sc[...] = jnp.zeros_like(c_sc)

    # Hoisted out of the time loop (JAX does not CSE broadcast_in_dim).
    bias_b = jnp.broadcast_to(bias_ref[...], (bias_ref.shape[0], N))

    def step(t_loc, carry):
        x_t = x_ref[t_loc]              # [B*c_in,  N]
        h_prev = h_sc[...]              # [B*c_out, N]

        acc = bias_b                    # [4*B*c_out, N]
        for k in range(K):              # K is small & static (unrolled)
            lk = cheb_ref[k]            # [N, N] = T_k(A)^T
            gx = jnp.dot(x_t, lk, preferred_element_type=jnp.float32)
            gh = jnp.dot(h_prev, lk, preferred_element_type=jnp.float32)
            acc = acc + jnp.dot(wxbd_ref[k], gx,
                                preferred_element_type=jnp.float32)
            acc = acc + jnp.dot(whbd_ref[k], gh,
                                preferred_element_type=jnp.float32)

        # LSTM gating; gates are contiguous sublane row blocks (i, j, f, o).
        i_g = acc[0 * Bco:1 * Bco]
        j_g = acc[1 * Bco:2 * Bco]
        f_g = acc[2 * Bco:3 * Bco]
        o_g = acc[3 * Bco:4 * Bco]
        new_c = (c_sc[...] * jax.nn.sigmoid(f_g)
                 + jax.nn.sigmoid(i_g) * jnp.tanh(j_g))
        new_h = jnp.tanh(new_c) * jax.nn.sigmoid(o_g)

        c_sc[...] = new_c
        h_sc[...] = new_h
        out_ref[t_loc] = new_h.astype(out_ref.dtype)   # one block store / step
        return carry

    lax.fori_loop(0, TT, step, 0, unroll=True)


# ----------------------------------------------------------------------------
# Wrapper: layout plumbing + weight repacking + pallas_call.
# ----------------------------------------------------------------------------
def _pick_tt(T, tt_max=8):
    for t in range(min(T, tt_max), 0, -1):
        if T % t == 0:
            return t
    return 1


def st_block_5_pallas(x, supports, w_conv, b_conv, *, c_out, K, tt_block=None):
    """x: [B, c_in, N, T] (PyTorch NCHW).  w_conv: [4*c_out, K*(c_in+c_out)]
    (Conv1d weight, kernel-size-1 axis squeezed, channel index p = c*K + k).
    Returns [B, c_out, N, T]."""
    B, c_in, N, T = x.shape
    M = 4 * c_out
    c_tot = c_in + c_out
    assert K >= 2, "gcn_conv_hop assumes K >= 2"
    assert w_conv.shape == (M, K * c_tot)

    TT = tt_block if tt_block is not None else _pick_tt(T)
    assert T % TT == 0
    nT = T // TT

    f32 = jnp.float32
    supports = supports.astype(f32)

    # --- Chebyshev stack T_k(A), transposed so the kernel right-multiplies ---
    eye = jnp.eye(N, dtype=f32)
    Ls = [eye, supports]
    for _ in range(2, K):
        Ls.append(2.0 * supports @ Ls[-1] - Ls[-2])
    cheb = jnp.stack(Ls[:K], 0)                       # [K, N, N]
    cheb_t = jnp.transpose(cheb, (0, 2, 1))           # cheb_t[k] = T_k(A)^T

    # --- weight repack: [M, c*K+k] -> per-k x/h weights, then a gate-major,
    #     batch-block-diagonal matrix so the weight stage needs no per-b loop.
    w_ckm = w_conv.astype(f32).reshape(M, c_tot, K)             # [M, Ctot, K]
    wx = jnp.transpose(w_ckm[:, :c_in, :], (2, 0, 1))           # [K, M, c_in]
    wh = jnp.transpose(w_ckm[:, c_in:, :], (2, 0, 1))           # [K, M, c_out]
    eye_b = jnp.eye(B, dtype=f32)
    # row index r = gate*(B*c_out) + b*c_out + m', column index = b*C + c
    wx_bd = jnp.einsum('kgmc,bd->kgbmdc',
                       wx.reshape(K, 4, c_out, c_in), eye_b
                       ).reshape(K, 4 * B * c_out, B * c_in)
    wh_bd = jnp.einsum('kgmc,bd->kgbmdc',
                       wh.reshape(K, 4, c_out, c_out), eye_b
                       ).reshape(K, 4 * B * c_out, B * c_out)
    bias_bd = jnp.broadcast_to(b_conv.astype(f32).reshape(4, 1, c_out),
                               (4, B, c_out)).reshape(4 * B * c_out, 1)

    # --- activations: node dim N on lanes, (batch, channel) on sublanes ---
    x_k = jnp.transpose(x.astype(f32), (3, 0, 1, 2)).reshape(T, B * c_in, N)

    out_tm = pl.pallas_call(
        st_block5_kernel,
        out_shape=jax.ShapeDtypeStruct((T, B * c_out, N), f32),
        grid_spec=pltpu.PrefetchScalarGridSpec(
            num_scalar_prefetch=0,
            grid=(nT,),
            in_specs=[
                pl.BlockSpec((K, N, N), lambda tb: (0, 0, 0)),            # cheb^T
                pl.BlockSpec((TT, B * c_in, N), lambda tb: (tb, 0, 0)),   # x
                pl.BlockSpec((K, 4 * B * c_out, B * c_in),
                             lambda tb: (0, 0, 0)),                       # Wx
                pl.BlockSpec((K, 4 * B * c_out, B * c_out),
                             lambda tb: (0, 0, 0)),                       # Wh
                pl.BlockSpec((4 * B * c_out, 1), lambda tb: (0, 0)),      # bias
            ],
            out_specs=pl.BlockSpec((TT, B * c_out, N), lambda tb: (tb, 0, 0)),
            scratch_shapes=[
                pltpu.VMEM((B * c_out, N), f32),   # h state
                pltpu.VMEM((B * c_out, N), f32),   # c state
            ],
        ),
        compiler_params=pltpu.CompilerParams(
            dimension_semantics=("arbitrary",)),   # sequential recurrence
    )(cheb_t, x_k, wx_bd, wh_bd, bias_bd)

    return jnp.transpose(out_tm.reshape(T, B, c_out, N), (1, 2, 3, 0))


# ----------------------------------------------------------------------------
# Pure-JAX reference mirroring the PyTorch forward exactly (for validation).
# ----------------------------------------------------------------------------
def st_block_5_reference(x, supports, w_conv, b_conv, *, c_out, K):
    B, c_in, N, T = x.shape
    Ls = [jnp.eye(N, dtype=jnp.float32), supports]
    for _ in range(2, K):
        Ls.append(2.0 * supports @ Ls[-1] - Ls[-2])
    lap = jnp.stack(Ls, 0)                        # [K, N, N]
    lap_t = jnp.transpose(lap, (0, 2, 1))         # Lap.transpose(-1, -2)

    h = jnp.zeros((B, c_out, N), jnp.float32)
    c = jnp.zeros((B, c_out, N), jnp.float32)
    outs = []
    for t in range(T):
        tem1 = jnp.concatenate([x[:, :, :, t], h], axis=1)          # [B,Ctot,N]
        xg = jnp.einsum('bcn,knq->bckq', tem1, lap_t)
        xg = xg.reshape(B, -1, N)                                   # [B,Ctot*K,N]
        fea = jnp.einsum('mp,bpn->bmn', w_conv, xg) + b_conv[None, :, None]
        i_g, j_g, f_g, o_g = jnp.split(fea, 4, axis=1)
        c = c * jax.nn.sigmoid(f_g) + jax.nn.sigmoid(i_g) * jnp.tanh(j_g)
        h = jnp.tanh(c) * jax.nn.sigmoid(o_g)
        outs.append(h)
    return jnp.stack(outs, -1)                                      # [B,c_out,N,T]


# ----------------------------------------------------------------------------
if __name__ == "__main__":
    B, c_in, c_out = 2, 4, 4
    num_nodes, tem_size, K = 16, 8, 3

    key = jax.random.PRNGKey(0)
    k_x, k_a, k_w, k_b = jax.random.split(key, 4)

    x = jax.random.normal(k_x, (B, c_in, num_nodes, tem_size), jnp.float32)
    supports = jax.random.uniform(k_a, (num_nodes, num_nodes), jnp.float32)
    supports = supports / jnp.sum(supports, axis=-1, keepdims=True)   # row-norm adj

    c_tot = c_in + c_out
    w_conv = 0.1 * jax.random.normal(k_w, (4 * c_out, K * c_tot), jnp.float32)
    b_conv = 0.1 * jax.random.normal(k_b, (4 * c_out,), jnp.float32)

    run = jax.jit(functools.partial(st_block_5_pallas, c_out=c_out, K=K,
                                    tt_block=4))
    out = jax.block_until_ready(run(x, supports, w_conv, b_conv))

    ref = st_block_5_reference(x, supports, w_conv, b_conv, c_out=c_out, K=K)
    assert out.shape == (B, c_out, num_nodes, tem_size)
    err = float(jnp.max(jnp.abs(out - ref)))
    assert jnp.allclose(out, ref, atol=1e-3, rtol=1e-3), err
    print("KERNEL_OK")
</pallas_src>

<mosaic_0001>
module attributes {stable_mosaic.version = 11 : i64} {
  func.func @st_block5_kernel(%arg0: i32, %arg1: memref<3x16x16xf32, #tpu.memory_space<vmem>>, %arg2: memref<4x8x16xf32, #tpu.memory_space<vmem>>, %arg3: memref<3x32x8xf32, #tpu.memory_space<vmem>>, %arg4: memref<3x32x8xf32, #tpu.memory_space<vmem>>, %arg5: memref<32x1xf32, #tpu.memory_space<vmem>>, %arg6: memref<4x8x16xf32, #tpu.memory_space<vmem>>, %arg7: memref<8x16xf32, #tpu.memory_space<vmem>>, %arg8: memref<8x16xf32, #tpu.memory_space<vmem>>) attributes {dimension_semantics = [#tpu.dimension_semantics<arbitrary>], iteration_bounds = array<i64: 2>, scalar_prefetch = 0 : i64, scratch_operands = 2 : i64, tpu.core_type = #tpu.core_type<tc>, window_params = [{pipeline_mode = #tpu.pipeline_mode<synchronous>, transform_indices = @transform_0, window_bounds = array<i64: 3, 16, 16>}, {transform_indices = @transform_1, window_bounds = array<i64: 4, 8, 16>}, {pipeline_mode = #tpu.pipeline_mode<synchronous>, transform_indices = @transform_2, window_bounds = array<i64: 3, 32, 8>}, {pipeline_mode = #tpu.pipeline_mode<synchronous>, transform_indices = @transform_3, window_bounds = array<i64: 3, 32, 8>}, {pipeline_mode = #tpu.pipeline_mode<synchronous>, transform_indices = @transform_4, window_bounds = array<i64: 32, 1>}, {transform_indices = @transform_5, window_bounds = array<i64: 4, 8, 16>}]} {
    %c0_i32 = arith.constant 0 : i32
    %0 = arith.cmpi eq, %arg0, %c0_i32 : i32
    %1 = arith.extui %0 : i1 to i32
    %c0_i32_0 = arith.constant 0 : i32
    %2 = arith.cmpi ne, %1, %c0_i32_0 : i32
    scf.if %2 {
      %cst_216 = arith.constant 0.000000e+00 : f32
      %294 = vector.broadcast %cst_216 : f32 to vector<8x16xf32>
      %c0_217 = arith.constant 0 : index
      %c0_218 = arith.constant 0 : index
      %295 = vector.load %arg7[%c0_217, %c0_218] : memref<8x16xf32, #tpu.memory_space<vmem>>, vector<8x16xf32>
      tpu.vector_store %arg7[%c0_217, %c0_218], %294 {strides = array<i32>} : memref<8x16xf32, #tpu.memory_space<vmem>>, vector<8x16xf32>,
      %cst_219 = arith.constant 0.000000e+00 : f32
      %296 = vector.broadcast %cst_219 : f32 to vector<8x16xf32>
      %c0_220 = arith.constant 0 : index
      %c0_221 = arith.constant 0 : index
      %297 = vector.load %arg8[%c0_220, %c0_221] : memref<8x16xf32, #tpu.memory_space<vmem>>, vector<8x16xf32>
      tpu.vector_store %arg8[%c0_220, %c0_221], %296 {strides = array<i32>} : memref<8x16xf32, #tpu.memory_space<vmem>>, vector<8x16xf32>,
    } else {
    }
    %c0 = arith.constant 0 : index
    %c0_1 = arith.constant 0 : index
    %3 = vector.load %arg5[%c0, %c0_1] : memref<32x1xf32, #tpu.memory_space<vmem>>, vector<32x1xf32>
    %4 = vector.shape_cast %3 : vector<32x1xf32> to vector<32x1xf32>
    %5 = vector.broadcast %4 : vector<32x1xf32> to vector<32x16xf32>
    %c0_i32_2 = arith.constant 0 : i32
    %6 = arith.index_cast %c0_i32_2 : i32 to index
    %c0_3 = arith.constant 0 : index
    %c0_4 = arith.constant 0 : index
    %7 = vector.load %arg2[%6, %c0_3, %c0_4] : memref<4x8x16xf32, #tpu.memory_space<vmem>>, vector<1x8x16xf32>
    %8 = vector.shape_cast %7 : vector<1x8x16xf32> to vector<8x16xf32>
    %c0_5 = arith.constant 0 : index
    %c0_6 = arith.constant 0 : index
    %9 = vector.load %arg7[%c0_5, %c0_6] : memref<8x16xf32, #tpu.memory_space<vmem>>, vector<8x16xf32>
    %c0_7 = arith.constant 0 : index
    %c0_8 = arith.constant 0 : index
    %c0_9 = arith.constant 0 : index
    %10 = vector.load %arg1[%c0_7, %c0_8, %c0_9] : memref<3x16x16xf32, #tpu.memory_space<vmem>>, vector<1x16x16xf32>
    %11 = vector.shape_cast %10 : vector<1x16x16xf32> to vector<16x16xf32>
    %cst = arith.constant dense<0.000000e+00> : vector<8x16xf32>
    %12 = tpu.matmul %8, %11, %cst {dimension_numbers = #tpu.dot_dimension_numbers<[1], [0], [0], [1], [0, 0, 1, 1], [], []>, precision = #tpu.contract_precision<fp32>} : vector<8x16xf32>, vector<16x16xf32>, vector<8x16xf32> -> vector<8x16xf32>
    %cst_10 = arith.constant dense<0.000000e+00> : vector<8x16xf32>
    %13 = tpu.matmul %9, %11, %cst_10 {dimension_numbers = #tpu.dot_dimension_numbers<[1], [0], [0], [1], [0, 0, 1, 1], [], []>, precision = #tpu.contract_precision<fp32>} : vector<8x16xf32>, vector<16x16xf32>, vector<8x16xf32> -> vector<8x16xf32>
    %c0_11 = arith.constant 0 : index
    %c0_12 = arith.constant 0 : index
    %c0_13 = arith.constant 0 : index
    %14 = vector.load %arg3[%c0_11, %c0_12, %c0_13] : memref<3x32x8xf32, #tpu.memory_space<vmem>>, vector<1x32x8xf32>
    %15 = vector.shape_cast %14 : vector<1x32x8xf32> to vector<32x8xf32>
    %cst_14 = arith.constant dense<0.000000e+00> : vector<32x16xf32>
    %16 = tpu.matmul %15, %12, %cst_14 {dimension_numbers = #tpu.dot_dimension_numbers<[1], [0], [0], [1], [0, 0, 1, 1], [], []>, precision = #tpu.contract_precision<fp32>} : vector<32x8xf32>, vector<8x16xf32>, vector<32x16xf32> -> vector<32x16xf32>
    %17 = arith.addf %5, %16 : vector<32x16xf32>
    %c0_15 = arith.constant 0 : index
    %c0_16 = arith.constant 0 : index
    %c0_17 = arith.constant 0 : index
    %18 = vector.load %arg4[%c0_15, %c0_16, %c0_17] : memref<3x32x8xf32, #tpu.memory_space<vmem>>, vector<1x32x8xf32>
    %19 = vector.shape_cast %18 : vector<1x32x8xf32> to vector<32x8xf32>
    %cst_18 = arith.constant dense<0.000000e+00> : vector<32x16xf32>
    %20 = tpu.matmul %19, %13, %cst_18 {dimension_numbers = #tpu.dot_dimension_numbers<[1], [0], [0], [1], [0, 0, 1, 1], [], []>, precision = #tpu.contract_precision<fp32>} : vector<32x8xf32>, vector<8x16xf32>, vector<32x16xf32> -> vector<32x16xf32>
    %21 = arith.addf %17, %20 : vector<32x16xf32>
    %c1 = arith.constant 1 : index
    %c0_19 = arith.constant 0 : index
    %c0_20 = arith.constant 0 : index
    %22 = vector.load %arg1[%c1, %c0_19, %c0_20] : memref<3x16x16xf32, #tpu.memory_space<vmem>>, vector<1x16x16xf32>
    %23 = vector.shape_cast %22 : vector<1x16x16xf32> to vector<16x16xf32>
    %cst_21 = arith.constant dense<0.000000e+00> : vector<8x16xf32>
    %24 = tpu.matmul %8, %23, %cst_21 {dimension_numbers = #tpu.dot_dimension_numbers<[1], [0], [0], [1], [0, 0, 1, 1], [], []>, precision = #tpu.contract_precision<fp32>} : vector<8x16xf32>, vector<16x16xf32>, vector<8x16xf32> -> vector<8x16xf32>
    %cst_22 = arith.constant dense<0.000000e+00> : vector<8x16xf32>
    %25 = tpu.matmul %9, %23, %cst_22 {dimension_numbers = #tpu.dot_dimension_numbers<[1], [0], [0], [1], [0, 0, 1, 1], [], []>, precision = #tpu.contract_precision<fp32>} : vector<8x16xf32>, vector<16x16xf32>, vector<8x16xf32> -> vector<8x16xf32>
    %c1_23 = arith.constant 1 : index
    %c0_24 = arith.constant 0 : index
    %c0_25 = arith.constant 0 : index
    %26 = vector.load %arg3[%c1_23, %c0_24, %c0_25] : memref<3x32x8xf32, #tpu.memory_space<vmem>>, vector<1x32x8xf32>
    %27 = vector.shape_cast %26 : vector<1x32x8xf32> to vector<32x8xf32>
    %cst_26 = arith.constant dense<0.000000e+00> : vector<32x16xf32>
    %28 = tpu.matmul %27, %24, %cst_26 {dimension_numbers = #tpu.dot_dimension_numbers<[1], [0], [0], [1], [0, 0, 1, 1], [], []>, precision = #tpu.contract_precision<fp32>} : vector<32x8xf32>, vector<8x16xf32>, vector<32x16xf32> -> vector<32x16xf32>
    %29 = arith.addf %21, %28 : vector<32x16xf32>
    %c1_27 = arith.constant 1 : index
    %c0_28 = arith.constant 0 : index
    %c0_29 = arith.constant 0 : index
    %30 = vector.load %arg4[%c1_27, %c0_28, %c0_29] : memref<3x32x8xf32, #tpu.memory_space<vmem>>, vector<1x32x8xf32>
    %31 = vector.shape_cast %30 : vector<1x32x8xf32> to vector<32x8xf32>
    %cst_30 = arith.constant dense<0.000000e+00> : vector<32x16xf32>
    %32 = tpu.matmul %31, %25, %cst_30 {dimension_numbers = #tpu.dot_dimension_numbers<[1], [0], [0], [1], [0, 0, 1, 1], [], []>, precision = #tpu.contract_precision<fp32>} : vector<32x8xf32>, vector<8x16xf32>, vector<32x16xf32> -> vector<32x16xf32>
    %33 = arith.addf %29, %32 : vector<32x16xf32>
    %c2 = arith.constant 2 : index
    %c0_31 = arith.constant 0 : index
    %c0_32 = arith.constant 0 : index
    %34 = vector.load %arg1[%c2, %c0_31, %c0_32] : memref<3x16x16xf32, #tpu.memory_space<vmem>>, vector<1x16x16xf32>
    %35 = vector.shape_cast %34 : vector<1x16x16xf32> to vector<16x16xf32>
    %cst_33 = arith.constant dense<0.000000e+00> : vector<8x16xf32>
    %36 = tpu.matmul %8, %35, %cst_33 {dimension_numbers = #tpu.dot_dimension_numbers<[1], [0], [0], [1], [0, 0, 1, 1], [], []>, precision = #tpu.contract_precision<fp32>} : vector<8x16xf32>, vector<16x16xf32>, vector<8x16xf32> -> vector<8x16xf32>
    %cst_34 = arith.constant dense<0.000000e+00> : vector<8x16xf32>
    %37 = tpu.matmul %9, %35, %cst_34 {dimension_numbers = #tpu.dot_dimension_numbers<[1], [0], [0], [1], [0, 0, 1, 1], [], []>, precision = #tpu.contract_precision<fp32>} : vector<8x16xf32>, vector<16x16xf32>, vector<8x16xf32> -> vector<8x16xf32>
    %c2_35 = arith.constant 2 : index
    %c0_36 = arith.constant 0 : index
    %c0_37 = arith.constant 0 : index
    %38 = vector.load %arg3[%c2_35, %c0_36, %c0_37] : memref<3x32x8xf32, #tpu.memory_space<vmem>>, vector<1x32x8xf32>
    %39 = vector.shape_cast %38 : vector<1x32x8xf32> to vector<32x8xf32>
    %cst_38 = arith.constant dense<0.000000e+00> : vector<32x16xf32>
    %40 = tpu.matmul %39, %36, %cst_38 {dimension_numbers = #tpu.dot_dimension_numbers<[1], [0], [0], [1], [0, 0, 1, 1], [], []>, precision = #tpu.contract_precision<fp32>} : vector<32x8xf32>, vector<8x16xf32>, vector<32x16xf32> -> vector<32x16xf32>
    %41 = arith.addf %33, %40 : vector<32x16xf32>
    %c2_39 = arith.constant 2 : index
    %c0_40 = arith.constant 0 : index
    %c0_41 = arith.constant 0 : index
    %42 = vector.load %arg4[%c2_39, %c0_40, %c0_41] : memref<3x32x8xf32, #tpu.memory_space<vmem>>, vector<1x32x8xf32>
    %43 = vector.shape_cast %42 : vector<1x32x8xf32> to vector<32x8xf32>
    %cst_42 = arith.constant dense<0.000000e+00> : vector<32x16xf32>
    %44 = tpu.matmul %43, %37, %cst_42 {dimension_numbers = #tpu.dot_dimension_numbers<[1], [0], [0], [1], [0, 0, 1, 1], [], []>, precision = #tpu.contract_precision<fp32>} : vector<32x8xf32>, vector<8x16xf32>, vector<32x16xf32> -> vector<32x16xf32>
    %45 = arith.addf %41, %44 : vector<32x16xf32>
    %46 = vector.extract_strided_slice %45 {offsets = [0, 0], sizes = [8, 16], strides = [1, 1]} : vector<32x16xf32> to vector<8x16xf32>
    %47 = vector.extract_strided_slice %45 {offsets = [8, 0], sizes = [8, 16], strides = [1, 1]} : vector<32x16xf32> to vector<8x16xf32>
    %48 = vector.extract_strided_slice %45 {offsets = [16, 0], sizes = [8, 16], strides = [1, 1]} : vector<32x16xf32> to vector<8x16xf32>
    %49 = vector.extract_strided_slice %45 {offsets = [24, 0], sizes = [8, 16], strides = [1, 1]} : vector<32x16xf32> to vector<8x16xf32>
    %c0_43 = arith.constant 0 : index
    %c0_44 = arith.constant 0 : index
    %50 = vector.load %arg8[%c0_43, %c0_44] : memref<8x16xf32, #tpu.memory_space<vmem>>, vector<8x16xf32>
    %51 = arith.negf %48 : vector<8x16xf32>
    %52 = math.exp %51 : vector<8x16xf32>
    %cst_45 = arith.constant 1.000000e+00 : f32
    %53 = vector.broadcast %cst_45 : f32 to vector<8x16xf32>
    %54 = arith.addf %53, %52 : vector<8x16xf32>
    %55 = arith.divf %53, %54 : vector<8x16xf32>
    %56 = arith.mulf %50, %55 : vector<8x16xf32>
    %57 = arith.negf %46 : vector<8x16xf32>
    %58 = math.exp %57 : vector<8x16xf32>
    %cst_46 = arith.constant 1.000000e+00 : f32
    %59 = vector.broadcast %cst_46 : f32 to vector<8x16xf32>
    %60 = arith.addf %59, %58 : vector<8x16xf32>
    %61 = arith.divf %59, %60 : vector<8x16xf32>
    %62 = math.tanh %47 : vector<8x16xf32>
    %63 = arith.mulf %61, %62 : vector<8x16xf32>
    %64 = arith.addf %56, %63 : vector<8x16xf32>
    %65 = math.tanh %64 : vector<8x16xf32>
    %66 = arith.negf %49 : vector<8x16xf32>
    %67 = math.exp %66 : vector<8x16xf32>
    %cst_47 = arith.constant 1.000000e+00 : f32
    %68 = vector.broadcast %cst_47 : f32 to vector<8x16xf32>
    %69 = arith.addf %68, %67 : vector<8x16xf32>
    %70 = arith.divf %68, %69 : vector<8x16xf32>
    %71 = arith.mulf %65, %70 : vector<8x16xf32>
    %c0_48 = arith.constant 0 : index
    %c0_49 = arith.constant 0 : index
    %72 = vector.load %arg8[%c0_48, %c0_49] : memref<8x16xf32, #tpu.memory_space<vmem>>, vector<8x16xf32>
    tpu.vector_store %arg8[%c0_48, %c0_49], %64 {strides = array<i32>} : memref<8x16xf32, #tpu.memory_space<vmem>>, vector<8x16xf32>,
    %c0_50 = arith.constant 0 : index
    %c0_51 = arith.constant 0 : index
    %73 = vector.load %arg7[%c0_50, %c0_51] : memref<8x16xf32, #tpu.memory_space<vmem>>, vector<8x16xf32>
    tpu.vector_store %arg7[%c0_50, %c0_51], %71 {strides = array<i32>} : memref<8x16xf32, #tpu.memory_space<vmem>>, vector<8x16xf32>,
    %74 = arith.index_cast %c0_i32_2 : i32 to index
    %c0_52 = arith.constant 0 : index
    %c0_53 = arith.constant 0 : index
    %75 = vector.load %arg6[%74, %c0_52, %c0_53] : memref<4x8x16xf32, #tpu.memory_space<vmem>>, vector<1x8x16xf32>
    %76 = vector.shape_cast %75 : vector<1x8x16xf32> to vector<8x16xf32>
    %77 = vector.shape_cast %71 : vector<8x16xf32> to vector<1x8x16xf32>
    tpu.vector_store %arg6[%74, %c0_52, %c0_53], %77 {strides = array<i32>} : memref<4x8x16xf32, #tpu.memory_space<vmem>>, vector<1x8x16xf32>,
    %c1_i32 = arith.constant 1 : i32
    %78 = arith.index_cast %c1_i32 : i32 to index
    %c0_54 = arith.constant 0 : index
    %c0_55 = arith.constant 0 : index
    %79 = vector.load %arg2[%78, %c0_54, %c0_55] : memref<4x8x16xf32, #tpu.memory_space<vmem>>, vector<1x8x16xf32>
    %80 = vector.shape_cast %79 : vector<1x8x16xf32> to vector<8x16xf32>
    %c0_56 = arith.constant 0 : index
    %c0_57 = arith.constant 0 : index
    %81 = vector.load %arg7[%c0_56, %c0_57] : memref<8x16xf32, #tpu.memory_space<vmem>>, vector<8x16xf32>
    %c0_58 = arith.constant 0 : index
    %c0_59 = arith.constant 0 : index
    %c0_60 = arith.constant 0 : index
    %82 = vector.load %arg1[%c0_58, %c0_59, %c0_60] : memref<3x16x16xf32, #tpu.memory_space<vmem>>, vector<1x16x16xf32>
    %83 = vector.shape_cast %82 : vector<1x16x16xf32> to vector<16x16xf32>
    %cst_61 = arith.constant dense<0.000000e+00> : vector<8x16xf32>
    %84 = tpu.matmul %80, %83, %cst_61 {dimension_numbers = #tpu.dot_dimension_numbers<[1], [0], [0], [1], [0, 0, 1, 1], [], []>, precision = #tpu.contract_precision<fp32>} : vector<8x16xf32>, vector<16x16xf32>, vector<8x16xf32> -> vector<8x16xf32>
    %cst_62 = arith.constant dense<0.000000e+00> : vector<8x16xf32>
    %85 = tpu.matmul %81, %83, %cst_62 {dimension_numbers = #tpu.dot_dimension_numbers<[1], [0], [0], [1], [0, 0, 1, 1], [], []>, precision = #tpu.contract_precision<fp32>} : vector<8x16xf32>, vector<16x16xf32>, vector<8x16xf32> -> vector<8x16xf32>
    %c0_63 = arith.constant 0 : index
    %c0_64 = arith.constant 0 : index
    %c0_65 = arith.constant 0 : index
    %86 = vector.load %arg3[%c0_63, %c0_64, %c0_65] : memref<3x32x8xf32, #tpu.memory_space<vmem>>, vector<1x32x8xf32>
    %87 = vector.shape_cast %86 : vector<1x32x8xf32> to vector<32x8xf32>
    %cst_66 = arith.constant dense<0.000000e+00> : vector<32x16xf32>
    %88 = tpu.matmul %87, %84, %cst_66 {dimension_numbers = #tpu.dot_dimension_numbers<[1], [0], [0], [1], [0, 0, 1, 1], [], []>, precision = #tpu.contract_precision<fp32>} : vector<32x8xf32>, vector<8x16xf32>, vector<32x16xf32> -> vector<32x16xf32>
    %89 = arith.addf %5, %88 : vector<32x16xf32>
    %c0_67 = arith.constant 0 : index
    %c0_68 = arith.constant 0 : index
    %c0_69 = arith.constant 0 : index
    %90 = vector.load %arg4[%c0_67, %c0_68, %c0_69] : memref<3x32x8xf32, #tpu.memory_space<vmem>>, vector<1x32x8xf32>
    %91 = vector.shape_cast %90 : vector<1x32x8xf32> to vector<32x8xf32>
    %cst_70 = arith.constant dense<0.000000e+00> : vector<32x16xf32>
    %92 = tpu.matmul %91, %85, %cst_70 {dimension_numbers = #tpu.dot_dimension_numbers<[1], [0], [0], [1], [0, 0, 1, 1], [], []>, precision = #tpu.contract_precision<fp32>} : vector<32x8xf32>, vector<8x16xf32>, vector<32x16xf32> -> vector<32x16xf32>
    %93 = arith.addf %89, %92 : vector<32x16xf32>
    %c1_71 = arith.constant 1 : index
    %c0_72 = arith.constant 0 : index
    %c0_73 = arith.constant 0 : index
    %94 = vector.load %arg1[%c1_71, %c0_72, %c0_73] : memref<3x16x16xf32, #tpu.memory_space<vmem>>, vector<1x16x16xf32>
    %95 = vector.shape_cast %94 : vector<1x16x16xf32> to vector<16x16xf32>
    %cst_74 = arith.constant dense<0.000000e+00> : vector<8x16xf32>
    %96 = tpu.matmul %80, %95, %cst_74 {dimension_numbers = #tpu.dot_dimension_numbers<[1], [0], [0], [1], [0, 0, 1, 1], [], []>, precision = #tpu.contract_precision<fp32>} : vector<8x16xf32>, vector<16x16xf32>, vector<8x16xf32> -> vector<8x16xf32>
    %cst_75 = arith.constant dense<0.000000e+00> : vector<8x16xf32>
    %97 = tpu.matmul %81, %95, %cst_75 {dimension_numbers = #tpu.dot_dimension_numbers<[1], [0], [0], [1], [0, 0, 1, 1], [], []>, precision = #tpu.contract_precision<fp32>} : vector<8x16xf32>, vector<16x16xf32>, vector<8x16xf32> -> vector<8x16xf32>
    %c1_76 = arith.constant 1 : index
    %c0_77 = arith.constant 0 : index
    %c0_78 = arith.constant 0 : index
    %98 = vector.load %arg3[%c1_76, %c0_77, %c0_78] : memref<3x32x8xf32, #tpu.memory_space<vmem>>, vector<1x32x8xf32>
    %99 = vector.shape_cast %98 : vector<1x32x8xf32> to vector<32x8xf32>
    %cst_79 = arith.constant dense<0.000000e+00> : vector<32x16xf32>
    %100 = tpu.matmul %99, %96, %cst_79 {dimension_numbers = #tpu.dot_dimension_numbers<[1], [0], [0], [1], [0, 0, 1, 1], [], []>, precision = #tpu.contract_precision<fp32>} : vector<32x8xf32>, vector<8x16xf32>, vector<32x16xf32> -> vector<32x16xf32>
    %101 = arith.addf %93, %100 : vector<32x16xf32>
    %c1_80 = arith.constant 1 : index
    %c0_81 = arith.constant 0 : index
    %c0_82 = arith.constant 0 : index
    %102 = vector.load %arg4[%c1_80, %c0_81, %c0_82] : memref<3x32x8xf32, #tpu.memory_space<vmem>>, vector<1x32x8xf32>
    %103 = vector.shape_cast %102 : vector<1x32x8xf32> to vector<32x8xf32>
    %cst_83 = arith.constant dense<0.000000e+00> : vector<32x16xf32>
    %104 = tpu.matmul %103, %97, %cst_83 {dimension_numbers = #tpu.dot_dimension_numbers<[1], [0], [0], [1], [0, 0, 1, 1], [], []>, precision = #tpu.contract_precision<fp32>} : vector<32x8xf32>, vector<8x16xf32>, vector<32x16xf32> -> vector<32x16xf32>
    %105 = arith.addf %101, %104 : vector<32x16xf32>
    %c2_84 = arith.constant 2 : index
    %c0_85 = arith.constant 0 : index
    %c0_86 = arith.constant 0 : index
    %106 = vector.load %arg1[%c2_84, %c0_85, %c0_86] : memref<3x16x16xf32, #tpu.memory_space<vmem>>, vector<1x16x16xf32>
    %107 = vector.shape_cast %106 : vector<1x16x16xf32> to vector<16x16xf32>
    %cst_87 = arith.constant dense<0.000000e+00> : vector<8x16xf32>
    %108 = tpu.matmul %80, %107, %cst_87 {dimension_numbers = #tpu.dot_dimension_numbers<[1], [0], [0], [1], [0, 0, 1, 1], [], []>, precision = #tpu.contract_precision<fp32>} : vector<8x16xf32>, vector<16x16xf32>, vector<8x16xf32> -> vector<8x16xf32>
    %cst_88 = arith.constant dense<0.000000e+00> : vector<8x16xf32>
    %109 = tpu.matmul %81, %107, %cst_88 {dimension_numbers = #tpu.dot_dimension_numbers<[1], [0], [0], [1], [0, 0, 1, 1], [], []>, precision = #tpu.contract_precision<fp32>} : vector<8x16xf32>, vector<16x16xf32>, vector<8x16xf32> -> vector<8x16xf32>
    %c2_89 = arith.constant 2 : index
    %c0_90 = arith.constant 0 : index
    %c0_91 = arith.constant 0 : index
    %110 = vector.load %arg3[%c2_89, %c0_90, %c0_91] : memref<3x32x8xf32, #tpu.memory_space<vmem>>, vector<1x32x8xf32>
    %111 = vector.shape_cast %110 : vector<1x32x8xf32> to vector<32x8xf32>
    %cst_92 = arith.constant dense<0.000000e+00> : vector<32x16xf32>
    %112 = tpu.matmul %111, %108, %cst_92 {dimension_numbers = #tpu.dot_dimension_numbers<[1], [0], [0], [1], [0, 0, 1, 1], [], []>, precision = #tpu.contract_precision<fp32>} : vector<32x8xf32>, vector<8x16xf32>, vector<32x16xf32> -> vector<32x16xf32>
    %113 = arith.addf %105, %112 : vector<32x16xf32>
    %c2_93 = arith.constant 2 : index
    %c0_94 = arith.constant 0 : index
    %c0_95 = arith.constant 0 : index
    %114 = vector.load %arg4[%c2_93, %c0_94, %c0_95] : memref<3x32x8xf32, #tpu.memory_space<vmem>>, vector<1x32x8xf32>
    %115 = vector.shape_cast %114 : vector<1x32x8xf32> to vector<32x8xf32>
    %cst_96 = arith.constant dense<0.000000e+00> : vector<32x16xf32>
    %116 = tpu.matmul %115, %109, %cst_96 {dimension_numbers = #tpu.dot_dimension_numbers<[1], [0], [0], [1], [0, 0, 1, 1], [], []>, precision = #tpu.contract_precision<fp32>} : vector<32x8xf32>, vector<8x16xf32>, vector<32x16xf32> -> vector<32x16xf32>
    %117 = arith.addf %113, %116 : vector<32x16xf32>
    %118 = vector.extract_strided_slice %117 {offsets = [0, 0], sizes = [8, 16], strides = [1, 1]} : vector<32x16xf32> to vector<8x16xf32>
    %119 = vector.extract_strided_slice %117 {offsets = [8, 0], sizes = [8, 16], strides = [1, 1]} : vector<32x16xf32> to vector<8x16xf32>
    %120 = vector.extract_strided_slice %117 {offsets = [16, 0], sizes = [8, 16], strides = [1, 1]} : vector<32x16xf32> to vector<8x16xf32>
    %121 = vector.extract_strided_slice %117 {offsets = [24, 0], sizes = [8, 16], strides = [1, 1]} : vector<32x16xf32> to vector<8x16xf32>
    %c0_97 = arith.constant 0 : index
    %c0_98 = arith.constant 0 : index
    %122 = vector.load %arg8[%c0_97, %c0_98] : memref<8x16xf32, #tpu.memory_space<vmem>>, vector<8x16xf32>
    %123 = arith.negf %120 : vector<8x16xf32>
    %124 = math.exp %123 : vector<8x16xf32>
    %cst_99 = arith.constant 1.000000e+00 : f32
    %125 = vector.broadcast %cst_99 : f32 to vector<8x16xf32>
    %126 = arith.addf %125, %124 : vector<8x16xf32>
    %127 = arith.divf %125, %126 : vector<8x16xf32>
    %128 = arith.mulf %122, %127 : vector<8x16xf32>
    %129 = arith.negf %118 : vector<8x16xf32>
    %130 = math.exp %129 : vector<8x16xf32>
    %cst_100 = arith.constant 1.000000e+00 : f32
    %131 = vector.broadcast %cst_100 : f32 to vector<8x16xf32>
    %132 = arith.addf %131, %130 : vector<8x16xf32>
    %133 = arith.divf %131, %132 : vector<8x16xf32>
    %134 = math.tanh %119 : vector<8x16xf32>
    %135 = arith.mulf %133, %134 : vector<8x16xf32>
    %136 = arith.addf %128, %135 : vector<8x16xf32>
    %137 = math.tanh %136 : vector<8x16xf32>
    %138 = arith.negf %121 : vector<8x16xf32>
    %139 = math.exp %138 : vector<8x16xf32>
    %cst_101 = arith.constant 1.000000e+00 : f32
    %140 = vector.broadcast %cst_101 : f32 to vector<8x16xf32>
    %141 = arith.addf %140, %139 : vector<8x16xf32>
    %142 = arith.divf %140, %141 : vector<8x16xf32>
    %143 = arith.mulf %137, %142 : vector<8x16xf32>
    %c0_102 = arith.constant 0 : index
    %c0_103 = arith.constant 0 : index
    %144 = vector.load %arg8[%c0_102, %c0_103] : memref<8x16xf32, #tpu.memory_space<vmem>>, vector<8x16xf32>
    tpu.vector_store %arg8[%c0_102, %c0_103], %136 {strides = array<i32>} : memref<8x16xf32, #tpu.memory_space<vmem>>, vector<8x16xf32>,
    %c0_104 = arith.constant 0 : index
    %c0_105 = arith.constant 0 : index
    %145 = vector.load %arg7[%c0_104, %c0_105] : memref<8x16xf32, #tpu.memory_space<vmem>>, vector<8x16xf32>
    tpu.vector_store %arg7[%c0_104, %c0_105], %143 {strides = array<i32>} : memref<8x16xf32, #tpu.memory_space<vmem>>, vector<8x16xf32>,
    %146 = arith.index_cast %c1_i32 : i32 to index
    %c0_106 = arith.constant 0 : index
    %c0_107 = arith.constant 0 : index
    %147 = vector.load %arg6[%146, %c0_106, %c0_107] : memref<4x8x16xf32, #tpu.memory_space<vmem>>, vector<1x8x16xf32>
    %148 = vector.shape_cast %147 : vector<1x8x16xf32> to vector<8x16xf32>
    %149 = vector.shape_cast %143 : vector<8x16xf32> to vector<1x8x16xf32>
    tpu.vector_store %arg6[%146, %c0_106, %c0_107], %149 {strides = array<i32>} : memref<4x8x16xf32, #tpu.memory_space<vmem>>, vector<1x8x16xf32>,
    %c2_i32 = arith.constant 2 : i32
    %150 = arith.index_cast %c2_i32 : i32 to index
    %c0_108 = arith.constant 0 : index
    %c0_109 = arith.constant 0 : index
    %151 = vector.load %arg2[%150, %c0_108, %c0_109] : memref<4x8x16xf32, #tpu.memory_space<vmem>>, vector<1x8x16xf32>
    %152 = vector.shape_cast %151 : vector<1x8x16xf32> to vector<8x16xf32>
    %c0_110 = arith.constant 0 : index
    %c0_111 = arith.constant 0 : index
    %153 = vector.load %arg7[%c0_110, %c0_111] : memref<8x16xf32, #tpu.memory_space<vmem>>, vector<8x16xf32>
    %c0_112 = arith.constant 0 : index
    %c0_113 = arith.constant 0 : index
    %c0_114 = arith.constant 0 : index
    %154 = vector.load %arg1[%c0_112, %c0_113, %c0_114] : memref<3x16x16xf32, #tpu.memory_space<vmem>>, vector<1x16x16xf32>
    %155 = vector.shape_cast %154 : vector<1x16x16xf32> to vector<16x16xf32>
    %cst_115 = arith.constant dense<0.000000e+00> : vector<8x16xf32>
    %156 = tpu.matmul %152, %155, %cst_115 {dimension_numbers = #tpu.dot_dimension_numbers<[1], [0], [0], [1], [0, 0, 1, 1], [], []>, precision = #tpu.contract_precision<fp32>} : vector<8x16xf32>, vector<16x16xf32>, vector<8x16xf32> -> vector<8x16xf32>
    %cst_116 = arith.constant dense<0.000000e+00> : vector<8x16xf32>
    %157 = tpu.matmul %153, %155, %cst_116 {dimension_numbers = #tpu.dot_dimension_numbers<[1], [0], [0], [1], [0, 0, 1, 1], [], []>, precision = #tpu.contract_precision<fp32>} : vector<8x16xf32>, vector<16x16xf32>, vector<8x16xf32> -> vector<8x16xf32>
    %c0_117 = arith.constant 0 : index
    %c0_118 = arith.constant 0 : index
    %c0_119 = arith.constant 0 : index
    %158 = vector.load %arg3[%c0_117, %c0_118, %c0_119] : memref<3x32x8xf32, #tpu.memory_space<vmem>>, vector<1x32x8xf32>
    %159 = vector.shape_cast %158 : vector<1x32x8xf32> to vector<32x8xf32>
    %cst_120 = arith.constant dense<0.000000e+00> : vector<32x16xf32>
    %160 = tpu.matmul %159, %156, %cst_120 {dimension_numbers = #tpu.dot_dimension_numbers<[1], [0], [0], [1], [0, 0, 1, 1], [], []>, precision = #tpu.contract_precision<fp32>} : vector<32x8xf32>, vector<8x16xf32>, vector<32x16xf32> -> vector<32x16xf32>
    %161 = arith.addf %5, %160 : vector<32x16xf32>
    %c0_121 = arith.constant 0 : index
    %c0_122 = arith.constant 0 : index
    %c0_123 = arith.constant 0 : index
    %162 = vector.load %arg4[%c0_121, %c0_122, %c0_123] : memref<3x32x8xf32, #tpu.memory_space<vmem>>, vector<1x32x8xf32>
    %163 = vector.shape_cast %162 : vector<1x32x8xf32> to vector<32x8xf32>
    %cst_124 = arith.constant dense<0.000000e+00> : vector<32x16xf32>
    %164 = tpu.matmul %163, %157, %cst_124 {dimension_numbers = #tpu.dot_dimension_numbers<[1], [0], [0], [1], [0, 0, 1, 1], [], []>, precision = #tpu.contract_precision<fp32>} : vector<32x8xf32>, vector<8x16xf32>, vector<32x16xf32> -> vector<32x16xf32>
    %165 = arith.addf %161, %164 : vector<32x16xf32>
    %c1_125 = arith.constant 1 : index
    %c0_126 = arith.constant 0 : index
    %c0_127 = arith.constant 0 : index
    %166 = vector.load %arg1[%c1_125, %c0_126, %c0_127] : memref<3x16x16xf32, #tpu.memory_space<vmem>>, vector<1x16x16xf32>
    %167 = vector.shape_cast %166 : vector<1x16x16xf32> to vector<16x16xf32>
    %cst_128 = arith.constant dense<0.000000e+00> : vector<8x16xf32>
    %168 = tpu.matmul %152, %167, %cst_128 {dimension_numbers = #tpu.dot_dimension_numbers<[1], [0], [0], [1], [0, 0, 1, 1], [], []>, precision = #tpu.contract_precision<fp32>} : vector<8x16xf32>, vector<16x16xf32>, vector<8x16xf32> -> vector<8x16xf32>
    %cst_129 = arith.constant dense<0.000000e+00> : vector<8x16xf32>
    %169 = tpu.matmul %153, %167, %cst_129 {dimension_numbers = #tpu.dot_dimension_numbers<[1], [0], [0], [1], [0, 0, 1, 1], [], []>, precision = #tpu.contract_precision<fp32>} : vector<8x16xf32>, vector<16x16xf32>, vector<8x16xf32> -> vector<8x16xf32>
    %c1_130 = arith.constant 1 : index
    %c0_131 = arith.constant 0 : index
    %c0_132 = arith.constant 0 : index
    %170 = vector.load %arg3[%c1_130, %c0_131, %c0_132] : memref<3x32x8xf32, #tpu.memory_space<vmem>>, vector<1x32x8xf32>
    %171 = vector.shape_cast %170 : vector<1x32x8xf32> to vector<32x8xf32>
    %cst_133 = arith.constant dense<0.000000e+00> : vector<32x16xf32>
    %172 = tpu.matmul %171, %168, %cst_133 {dimension_numbers = #tpu.dot_dimension_numbers<[1], [0], [0], [1], [0, 0, 1, 1], [], []>, precision = #tpu.contract_precision<fp32>} : vector<32x8xf32>, vector<8x16xf32>, vector<32x16xf32> -> vector<32x16xf32>
    %173 = arith.addf %165, %172 : vector<32x16xf32>
    %c1_134 = arith.constant 1 : index
    %c0_135 = arith.constant 0 : index
    %c0_136 = arith.constant 0 : index
    %174 = vector.load %arg4[%c1_134, %c0_135, %c0_136] : memref<3x32x8xf32, #tpu.memory_space<vmem>>, vector<1x32x8xf32>
    %175 = vector.shape_cast %174 : vector<1x32x8xf32> to vector<32x8xf32>
    %cst_137 = arith.constant dense<0.000000e+00> : vector<32x16xf32>
    %176 = tpu.matmul %175, %169, %cst_137 {dimension_numbers = #tpu.dot_dimension_numbers<[1], [0], [0], [1], [0, 0, 1, 1], [], []>, precision = #tpu.contract_precision<fp32>} : vector<32x8xf32>, vector<8x16xf32>, vector<32x16xf32> -> vector<32x16xf32>
    %177 = arith.addf %173, %176 : vector<32x16xf32>
    %c2_138 = arith.constant 2 : index
    %c0_139 = arith.constant 0 : index
    %c0_140 = arith.constant 0 : index
    %178 = vector.load %arg1[%c2_138, %c0_139, %c0_140] : memref<3x16x16xf32, #tpu.memory_space<vmem>>, vector<1x16x16xf32>
    %179 = vector.shape_cast %178 : vector<1x16x16xf32> to vector<16x16xf32>
    %cst_141 = arith.constant dense<0.000000e+00> : vector<8x16xf32>
    %180 = tpu.matmul %152, %179, %cst_141 {dimension_numbers = #tpu.dot_dimension_numbers<[1], [0], [0], [1], [0, 0, 1, 1], [], []>, precision = #tpu.contract_precision<fp32>} : vector<8x16xf32>, vector<16x16xf32>, vector<8x16xf32> -> vector<8x16xf32>
    %cst_142 = arith.constant dense<0.000000e+00> : vector<8x16xf32>
    %181 = tpu.matmul %153, %179, %cst_142 {dimension_numbers = #tpu.dot_dimension_numbers<[1], [0], [0], [1], [0, 0, 1, 1], [], []>, precision = #tpu.contract_precision<fp32>} : vector<8x16xf32>, vector<16x16xf32>, vector<8x16xf32> -> vector<8x16xf32>
    %c2_143 = arith.constant 2 : index
    %c0_144 = arith.constant 0 : index
    %c0_145 = arith.constant 0 : index
    %182 = vector.load %arg3[%c2_143, %c0_144, %c0_145] : memref<3x32x8xf32, #tpu.memory_space<vmem>>, vector<1x32x8xf32>
    %183 = vector.shape_cast %182 : vector<1x32x8xf32> to vector<32x8xf32>
    %cst_146 = arith.constant dense<0.000000e+00> : vector<32x16xf32>
    %184 = tpu.matmul %183, %180, %cst_146 {dimension_numbers = #tpu.dot_dimension_numbers<[1], [0], [0], [1], [0, 0, 1, 1], [], []>, precision = #tpu.contract_precision<fp32>} : vector<32x8xf32>, vector<8x16xf32>, vector<32x16xf32> -> vector<32x16xf32>
    %185 = arith.addf %177, %184 : vector<32x16xf32>
    %c2_147 = arith.constant 2 : index
    %c0_148 = arith.constant 0 : index
    %c0_149 = arith.constant 0 : index
    %186 = vector.load %arg4[%c2_147, %c0_148, %c0_149] : memref<3x32x8xf32, #tpu.memory_space<vmem>>, vector<1x32x8xf32>
    %187 = vector.shape_cast %186 : vector<1x32x8xf32> to vector<32x8xf32>
    %cst_150 = arith.constant dense<0.000000e+00> : vector<32x16xf32>
    %188 = tpu.matmul %187, %181, %cst_150 {dimension_numbers = #tpu.dot_dimension_numbers<[1], [0], [0], [1], [0, 0, 1, 1], [], []>, precision = #tpu.contract_precision<fp32>} : vector<32x8xf32>, vector<8x16xf32>, vector<32x16xf32> -> vector<32x16xf32>
    %189 = arith.addf %185, %188 : vector<32x16xf32>
    %190 = vector.extract_strided_slice %189 {offsets = [0, 0], sizes = [8, 16], strides = [1, 1]} : vector<32x16xf32> to vector<8x16xf32>
    %191 = vector.extract_strided_slice %189 {offsets = [8, 0], sizes = [8, 16], strides = [1, 1]} : vector<32x16xf32> to vector<8x16xf32>
    %192 = vector.extract_strided_slice %189 {offsets = [16, 0], sizes = [8, 16], strides = [1, 1]} : vector<32x16xf32> to vector<8x16xf32>
    %193 = vector.extract_strided_slice %189 {offsets = [24, 0], sizes = [8, 16], strides = [1, 1]} : vector<32x16xf32> to vector<8x16xf32>
    %c0_151 = arith.constant 0 : index
    %c0_152 = arith.constant 0 : index
    %194 = vector.load %arg8[%c0_151, %c0_152] : memref<8x16xf32, #tpu.memory_space<vmem>>, vector<8x16xf32>
    %195 = arith.negf %192 : vector<8x16xf32>
    %196 = math.exp %195 : vector<8x16xf32>
    %cst_153 = arith.constant 1.000000e+00 : f32
    %197 = vector.broadcast %cst_153 : f32 to vector<8x16xf32>
    %198 = arith.addf %197, %196 : vector<8x16xf32>
    %199 = arith.divf %197, %198 : vector<8x16xf32>
    %200 = arith.mulf %194, %199 : vector<8x16xf32>
    %201 = arith.negf %190 : vector<8x16xf32>
    %202 = math.exp %201 : vector<8x16xf32>
    %cst_154 = arith.constant 1.000000e+00 : f32
    %203 = vector.broadcast %cst_154 : f32 to vector<8x16xf32>
    %204 = arith.addf %203, %202 : vector<8x16xf32>
    %205 = arith.divf %203, %204 : vector<8x16xf32>
    %206 = math.tanh %191 : vector<8x16xf32>
    %207 = arith.mulf %205, %206 : vector<8x16xf32>
    %208 = arith.addf %200, %207 : vector<8x16xf32>
    %209 = math.tanh %208 : vector<8x16xf32>
    %210 = arith.negf %193 : vector<8x16xf32>
    %211 = math.exp %210 : vector<8x16xf32>
    %cst_155 = arith.constant 1.000000e+00 : f32
    %212 = vector.broadcast %cst_155 : f32 to vector<8x16xf32>
    %213 = arith.addf %212, %211 : vector<8x16xf32>
    %214 = arith.divf %212, %213 : vector<8x16xf32>
    %215 = arith.mulf %209, %214 : vector<8x16xf32>
    %c0_156 = arith.constant 0 : index
    %c0_157 = arith.constant 0 : index
    %216 = vector.load %arg8[%c0_156, %c0_157] : memref<8x16xf32, #tpu.memory_space<vmem>>, vector<8x16xf32>
    tpu.vector_store %arg8[%c0_156, %c0_157], %208 {strides = array<i32>} : memref<8x16xf32, #tpu.memory_space<vmem>>, vector<8x16xf32>,
    %c0_158 = arith.constant 0 : index
    %c0_159 = arith.constant 0 : index
    %217 = vector.load %arg7[%c0_158, %c0_159] : memref<8x16xf32, #tpu.memory_space<vmem>>, vector<8x16xf32>
    tpu.vector_store %arg7[%c0_158, %c0_159], %215 {strides = array<i32>} : memref<8x16xf32, #tpu.memory_space<vmem>>, vector<8x16xf32>,
    %218 = arith.index_cast %c2_i32 : i32 to index
    %c0_160 = arith.constant 0 : index
    %c0_161 = arith.constant 0 : index
    %219 = vector.load %arg6[%218, %c0_160, %c0_161] : memref<4x8x16xf32, #tpu.memory_space<vmem>>, vector<1x8x16xf32>
    %220 = vector.shape_cast %219 : vector<1x8x16xf32> to vector<8x16xf32>
    %221 = vector.shape_cast %215 : vector<8x16xf32> to vector<1x8x16xf32>
    tpu.vector_store %arg6[%218, %c0_160, %c0_161], %221 {strides = array<i32>} : memref<4x8x16xf32, #tpu.memory_space<vmem>>, vector<1x8x16xf32>,
    %c3_i32 = arith.constant 3 : i32
    %222 = arith.index_cast %c3_i32 : i32 to index
    %c0_162 = arith.constant 0 : index
    %c0_163 = arith.constant 0 : index
    %223 = vector.load %arg2[%222, %c0_162, %c0_163] : memref<4x8x16xf32, #tpu.memory_space<vmem>>, vector<1x8x16xf32>
    %224 = vector.shape_cast %223 : vector<1x8x16xf32> to vector<8x16xf32>
    %c0_164 = arith.constant 0 : index
    %c0_165 = arith.constant 0 : index
    %225 = vector.load %arg7[%c0_164, %c0_165] : memref<8x16xf32, #tpu.memory_space<vmem>>, vector<8x16xf32>
    %c0_166 = arith.constant 0 : index
    %c0_167 = arith.constant 0 : index
    %c0_168 = arith.constant 0 : index
    %226 = vector.load %arg1[%c0_166, %c0_167, %c0_168] : memref<3x16x16xf32, #tpu.memory_space<vmem>>, vector<1x16x16xf32>
    %227 = vector.shape_cast %226 : vector<1x16x16xf32> to vector<16x16xf32>
    %cst_169 = arith.constant dense<0.000000e+00> : vector<8x16xf32>
    %228 = tpu.matmul %224, %227, %cst_169 {dimension_numbers = #tpu.dot_dimension_numbers<[1], [0], [0], [1], [0, 0, 1, 1], [], []>, precision = #tpu.contract_precision<fp32>} : vector<8x16xf32>, vector<16x16xf32>, vector<8x16xf32> -> vector<8x16xf32>
    %cst_170 = arith.constant dense<0.000000e+00> : vector<8x16xf32>
    %229 = tpu.matmul %225, %227, %cst_170 {dimension_numbers = #tpu.dot_dimension_numbers<[1], [0], [0], [1], [0, 0, 1, 1], [], []>, precision = #tpu.contract_precision<fp32>} : vector<8x16xf32>, vector<16x16xf32>, vector<8x16xf32> -> vector<8x16xf32>
    %c0_171 = arith.constant 0 : index
    %c0_172 = arith.constant 0 : index
    %c0_173 = arith.constant 0 : index
    %230 = vector.load %arg3[%c0_171, %c0_172, %c0_173] : memref<3x32x8xf32, #tpu.memory_space<vmem>>, vector<1x32x8xf32>
    %231 = vector.shape_cast %230 : vector<1x32x8xf32> to vector<32x8xf32>
    %cst_174 = arith.constant dense<0.000000e+00> : vector<32x16xf32>
    %232 = tpu.matmul %231, %228, %cst_174 {dimension_numbers = #tpu.dot_dimension_numbers<[1], [0], [0], [1], [0, 0, 1, 1], [], []>, precision = #tpu.contract_precision<fp32>} : vector<32x8xf32>, vector<8x16xf32>, vector<32x16xf32> -> vector<32x16xf32>
    %233 = arith.addf %5, %232 : vector<32x16xf32>
    %c0_175 = arith.constant 0 : index
    %c0_176 = arith.constant 0 : index
    %c0_177 = arith.constant 0 : index
    %234 = vector.load %arg4[%c0_175, %c0_176, %c0_177] : memref<3x32x8xf32, #tpu.memory_space<vmem>>, vector<1x32x8xf32>
    %235 = vector.shape_cast %234 : vector<1x32x8xf32> to vector<32x8xf32>
    %cst_178 = arith.constant dense<0.000000e+00> : vector<32x16xf32>
    %236 = tpu.matmul %235, %229, %cst_178 {dimension_numbers = #tpu.dot_dimension_numbers<[1], [0], [0], [1], [0, 0, 1, 1], [], []>, precision = #tpu.contract_precision<fp32>} : vector<32x8xf32>, vector<8x16xf32>, vector<32x16xf32> -> vector<32x16xf32>
    %237 = arith.addf %233, %236 : vector<32x16xf32>
    %c1_179 = arith.constant 1 : index
    %c0_180 = arith.constant 0 : index
    %c0_181 = arith.constant 0 : index
    %238 = vector.load %arg1[%c1_179, %c0_180, %c0_181] : memref<3x16x16xf32, #tpu.memory_space<vmem>>, vector<1x16x16xf32>
    %239 = vector.shape_cast %238 : vector<1x16x16xf32> to vector<16x16xf32>
    %cst_182 = arith.constant dense<0.000000e+00> : vector<8x16xf32>
    %240 = tpu.matmul %224, %239, %cst_182 {dimension_numbers = #tpu.dot_dimension_numbers<[1], [0], [0], [1], [0, 0, 1, 1], [], []>, precision = #tpu.contract_precision<fp32>} : vector<8x16xf32>, vector<16x16xf32>, vector<8x16xf32> -> vector<8x16xf32>
    %cst_183 = arith.constant dense<0.000000e+00> : vector<8x16xf32>
    %241 = tpu.matmul %225, %239, %cst_183 {dimension_numbers = #tpu.dot_dimension_numbers<[1], [0], [0], [1], [0, 0, 1, 1], [], []>, precision = #tpu.contract_precision<fp32>} : vector<8x16xf32>, vector<16x16xf32>, vector<8x16xf32> -> vector<8x16xf32>
    %c1_184 = arith.constant 1 : index
    %c0_185 = arith.constant 0 : index
    %c0_186 = arith.constant 0 : index
    %242 = vector.load %arg3[%c1_184, %c0_185, %c0_186] : memref<3x32x8xf32, #tpu.memory_space<vmem>>, vector<1x32x8xf32>
    %243 = vector.shape_cast %242 : vector<1x32x8xf32> to vector<32x8xf32>
    %cst_187 = arith.constant dense<0.000000e+00> : vector<32x16xf32>
    %244 = tpu.matmul %243, %240, %cst_187 {dimension_numbers = #tpu.dot_dimension_numbers<[1], [0], [0], [1], [0, 0, 1, 1], [], []>, precision = #tpu.contract_precision<fp32>} : vector<32x8xf32>, vector<8x16xf32>, vector<32x16xf32> -> vector<32x16xf32>
    %245 = arith.addf %237, %244 : vector<32x16xf32>
    %c1_188 = arith.constant 1 : index
    %c0_189 = arith.constant 0 : index
    %c0_190 = arith.constant 0 : index
    %246 = vector.load %arg4[%c1_188, %c0_189, %c0_190] : memref<3x32x8xf32, #tpu.memory_space<vmem>>, vector<1x32x8xf32>
    %247 = vector.shape_cast %246 : vector<1x32x8xf32> to vector<32x8xf32>
    %cst_191 = arith.constant dense<0.000000e+00> : vector<32x16xf32>
    %248 = tpu.matmul %247, %241, %cst_191 {dimension_numbers = #tpu.dot_dimension_numbers<[1], [0], [0], [1], [0, 0, 1, 1], [], []>, precision = #tpu.contract_precision<fp32>} : vector<32x8xf32>, vector<8x16xf32>, vector<32x16xf32> -> vector<32x16xf32>
    %249 = arith.addf %245, %248 : vector<32x16xf32>
    %c2_192 = arith.constant 2 : index
    %c0_193 = arith.constant 0 : index
    %c0_194 = arith.constant 0 : index
    %250 = vector.load %arg1[%c2_192, %c0_193, %c0_194] : memref<3x16x16xf32, #tpu.memory_space<vmem>>, vector<1x16x16xf32>
    %251 = vector.shape_cast %250 : vector<1x16x16xf32> to vector<16x16xf32>
    %cst_195 = arith.constant dense<0.000000e+00> : vector<8x16xf32>
    %252 = tpu.matmul %224, %251, %cst_195 {dimension_numbers = #tpu.dot_dimension_numbers<[1], [0], [0], [1], [0, 0, 1, 1], [], []>, precision = #tpu.contract_precision<fp32>} : vector<8x16xf32>, vector<16x16xf32>, vector<8x16xf32> -> vector<8x16xf32>
    %cst_196 = arith.constant dense<0.000000e+00> : vector<8x16xf32>
    %253 = tpu.matmul %225, %251, %cst_196 {dimension_numbers = #tpu.dot_dimension_numbers<[1], [0], [0], [1], [0, 0, 1, 1], [], []>, precision = #tpu.contract_precision<fp32>} : vector<8x16xf32>, vector<16x16xf32>, vector<8x16xf32> -> vector<8x16xf32>
    %c2_197 = arith.constant 2 : index
    %c0_198 = arith.constant 0 : index
    %c0_199 = arith.constant 0 : index
    %254 = vector.load %arg3[%c2_197, %c0_198, %c0_199] : memref<3x32x8xf32, #tpu.memory_space<vmem>>, vector<1x32x8xf32>
    %255 = vector.shape_cast %254 : vector<1x32x8xf32> to vector<32x8xf32>
    %cst_200 = arith.constant dense<0.000000e+00> : vector<32x16xf32>
    %256 = tpu.matmul %255, %252, %cst_200 {dimension_numbers = #tpu.dot_dimension_numbers<[1], [0], [0], [1], [0, 0, 1, 1], [], []>, precision = #tpu.contract_precision<fp32>} : vector<32x8xf32>, vector<8x16xf32>, vector<32x16xf32> -> vector<32x16xf32>
    %257 = arith.addf %249, %256 : vector<32x16xf32>
    %c2_201 = arith.constant 2 : index
    %c0_202 = arith.constant 0 : index
    %c0_203 = arith.constant 0 : index
    %258 = vector.load %arg4[%c2_201, %c0_202, %c0_203] : memref<3x32x8xf32, #tpu.memory_space<vmem>>, vector<1x32x8xf32>
    %259 = vector.shape_cast %258 : vector<1x32x8xf32> to vector<32x8xf32>
    %cst_204 = arith.constant dense<0.000000e+00> : vector<32x16xf32>
    %260 = tpu.matmul %259, %253, %cst_204 {dimension_numbers = #tpu.dot_dimension_numbers<[1], [0], [0], [1], [0, 0, 1, 1], [], []>, precision = #tpu.contract_precision<fp32>} : vector<32x8xf32>, vector<8x16xf32>, vector<32x16xf32> -> vector<32x16xf32>
    %261 = arith.addf %257, %260 : vector<32x16xf32>
    %262 = vector.extract_strided_slice %261 {offsets = [0, 0], sizes = [8, 16], strides = [1, 1]} : vector<32x16xf32> to vector<8x16xf32>
    %263 = vector.extract_strided_slice %261 {offsets = [8, 0], sizes = [8, 16], strides = [1, 1]} : vector<32x16xf32> to vector<8x16xf32>
    %264 = vector.extract_strided_slice %261 {offsets = [16, 0], sizes = [8, 16], strides = [1, 1]} : vector<32x16xf32> to vector<8x16xf32>
    %265 = vector.extract_strided_slice %261 {offsets = [24, 0], sizes = [8, 16], strides = [1, 1]} : vector<32x16xf32> to vector<8x16xf32>
    %c0_205 = arith.constant 0 : index
    %c0_206 = arith.constant 0 : index
    %266 = vector.load %arg8[%c0_205, %c0_206] : memref<8x16xf32, #tpu.memory_space<vmem>>, vector<8x16xf32>
    %267 = arith.negf %264 : vector<8x16xf32>
    %268 = math.exp %267 : vector<8x16xf32>
    %cst_207 = arith.constant 1.000000e+00 : f32
    %269 = vector.broadcast %cst_207 : f32 to vector<8x16xf32>
    %270 = arith.addf %269, %268 : vector<8x16xf32>
    %271 = arith.divf %269, %270 : vector<8x16xf32>
    %272 = arith.mulf %266, %271 : vector<8x16xf32>
    %273 = arith.negf %262 : vector<8x16xf32>
    %274 = math.exp %273 : vector<8x16xf32>
    %cst_208 = arith.constant 1.000000e+00 : f32
    %275 = vector.broadcast %cst_208 : f32 to vector<8x16xf32>
    %276 = arith.addf %275, %274 : vector<8x16xf32>
    %277 = arith.divf %275, %276 : vector<8x16xf32>
    %278 = math.tanh %263 : vector<8x16xf32>
    %279 = arith.mulf %277, %278 : vector<8x16xf32>
    %280 = arith.addf %272, %279 : vector<8x16xf32>
    %281 = math.tanh %280 : vector<8x16xf32>
    %282 = arith.negf %265 : vector<8x16xf32>
    %283 = math.exp %282 : vector<8x16xf32>
    %cst_209 = arith.constant 1.000000e+00 : f32
    %284 = vector.broadcast %cst_209 : f32 to vector<8x16xf32>
    %285 = arith.addf %284, %283 : vector<8x16xf32>
    %286 = arith.divf %284, %285 : vector<8x16xf32>
    %287 = arith.mulf %281, %286 : vector<8x16xf32>
    %c0_210 = arith.constant 0 : index
    %c0_211 = arith.constant 0 : index
    %288 = vector.load %arg8[%c0_210, %c0_211] : memref<8x16xf32, #tpu.memory_space<vmem>>, vector<8x16xf32>
    tpu.vector_store %arg8[%c0_210, %c0_211], %280 {strides = array<i32>} : memref<8x16xf32, #tpu.memory_space<vmem>>, vector<8x16xf32>,
    %c0_212 = arith.constant 0 : index
    %c0_213 = arith.constant 0 : index
    %289 = vector.load %arg7[%c0_212, %c0_213] : memref<8x16xf32, #tpu.memory_space<vmem>>, vector<8x16xf32>
    tpu.vector_store %arg7[%c0_212, %c0_213], %287 {strides = array<i32>} : memref<8x16xf32, #tpu.memory_space<vmem>>, vector<8x16xf32>,
    %290 = arith.index_cast %c3_i32 : i32 to index
    %c0_214 = arith.constant 0 : index
    %c0_215 = arith.constant 0 : index
    %291 = vector.load %arg6[%290, %c0_214, %c0_215] : memref<4x8x16xf32, #tpu.memory_space<vmem>>, vector<1x8x16xf32>
    %292 = vector.shape_cast %291 : vector<1x8x16xf32> to vector<8x16xf32>
    %293 = vector.shape_cast %287 : vector<8x16xf32> to vector<1x8x16xf32>
    tpu.vector_store %arg6[%290, %c0_214, %c0_215], %293 {strides = array<i32>} : memref<4x8x16xf32, #tpu.memory_space<vmem>>, vector<1x8x16xf32>,
    %c4_i32 = arith.constant 4 : i32
    return
  }
  func.func @transform_0(%arg0: i32) -> (i32, i32, i32) {
    %c0_i32 = arith.constant 0 : i32
    %c0_i32_0 = arith.constant 0 : i32
    %c0_i32_1 = arith.constant 0 : i32
    %c0_i32_2 = arith.constant 0 : i32
    return %c0_i32, %c0_i32_0, %c0_i32_1 : i32, i32, i32
  }
  func.func @transform_1(%arg0: i32) -> (i32, i32, i32) {
    %c0_i32 = arith.constant 0 : i32
    %c0_i32_0 = arith.constant 0 : i32
    %c0_i32_1 = arith.constant 0 : i32
    return %arg0, %c0_i32, %c0_i32_0 : i32, i32, i32
  }
  func.func @transform_2(%arg0: i32) -> (i32, i32, i32) {
    %c0_i32 = arith.constant 0 : i32
    %c0_i32_0 = arith.constant 0 : i32
    %c0_i32_1 = arith.constant 0 : i32
    %c0_i32_2 = arith.constant 0 : i32
    return %c0_i32, %c0_i32_0, %c0_i32_1 : i32, i32, i32
  }
  func.func @transform_3(%arg0: i32) -> (i32, i32, i32) {
    %c0_i32 = arith.constant 0 : i32
    %c0_i32_0 = arith.constant 0 : i32
    %c0_i32_1 = arith.constant 0 : i32
    %c0_i32_2 = arith.constant 0 : i32
    return %c0_i32, %c0_i32_0, %c0_i32_1 : i32, i32, i32
  }
  func.func @transform_4(%arg0: i32) -> (i32, i32) {
    %c0_i32 = arith.constant 0 : i32
    %c0_i32_0 = arith.constant 0 : i32
    %c0_i32_1 = arith.constant 0 : i32
    return %c0_i32, %c0_i32_0 : i32, i32
  }
  func.func @transform_5(%arg0: i32) -> (i32, i32, i32) {
    %c0_i32 = arith.constant 0 : i32
    %c0_i32_0 = arith.constant 0 : i32
    %c0_i32_1 = arith.constant 0 : i32
    return %arg0, %c0_i32, %c0_i32_0 : i32, i32, i32
  }
}

</mosaic_0001>

<bundles_post_ra>
// kernel: st_block_5_pallas.1
= control target key start
LH: loop header
LB: loop body
LE: loop exit
PB: predicated region body
PF: predicated region fallthrough
CT: control target
= control target key end

     0   :  { %s29335_s18 = smov 0   ;;  %s33394_s0 = inlined_call_operand.vmem [shape: f32[3,16,16], index: 0, kind: input, shape index: {}]   ;;  %s33395_s1 = inlined_call_operand.vmem [shape: f32[8,8,16], index: 1, kind: input, shape index: {}]   ;;  %s33396_s2 = inlined_call_operand.vmem [shape: f32[3,32,8], index: 2, kind: input, shape index: {}]   ;;  %s33397_s3 = inlined_call_operand.vmem [shape: f32[3,32,8], index: 3, kind: input, shape index: {}]   ;;  %s33398_s4 = inlined_call_operand.vmem [shape: f32[32,1], index: 4, kind: input, shape index: {}]   ;;  %s33399_s5 = inlined_call_operand.vmem [shape: f32[8,8,16], index: 5, kind: output, shape index: {}]  }
   0x1 LB: > { %s25793_s19 = sadd.s32 4294967295, %s29299_s18   ;;  %p25797_p0 = scmp.ge.s32.totalorder %s29299_s18, 1  ;;  %s29299_s18 = sphi %s29335_s18, %s15_s18  }
   0x2   : > { %p188_p1 = scmp.lt.s32.totalorder %s29299_s18, 3 }
   0x4   : > { %p189_p2 = pnand %p25797_p0, %p188_p1 }
   0x6   : > { %192 = sbr.rel (%p189_p2) target bundleno = 4206 (0x106e), region = 40 }
   0xb   : > { %s25798_s20 = sshll.u32 %s25793_s19, 2  ;;  %p25802_p4 = scmp.ne.s32.totalorder %s25793_s19, 0 }
   0xc   : > { %p217_p3 = scmp.lt.s32.totalorder %s25798_s20, 7 }
   0xd   : > { %231 = sbr.rel (%p25802_p4) target bundleno = 20 (0x14), region = 44 }
   0xe   : > { %s33714_s20 = smov (!%p217_p3, %s25798_s20), 7 }
   0xf   : > { %s25799_s21 = sshll.u32 %s33714_s20, 3 }
  0x10   : > { %s29346_s24 = scalar_lea.vmem %s33395_s1, %s25799_s21  ;;  %s29351_s27 = scalar_lea.vmem %s33399_s5, %s25799_s21 }
  0x12   : > { %vm232_vm0 = vcmask 130048   ;;  %v29301_v0 = vmov 0.0  }
  0x13   : > { %233 = vst.msk [vmem:[#allocation2] sm:$0xff] %vm232_vm0, %v29301_v0  ;;  %234 = vst.msk [vmem:[#allocation3] sm:$0xff] %vm232_vm0, %v29301_v0 }
  0x14 PF: > { %v262_v1 = vld [vmem:[%s33394_s0 + $0x8] sm:$0xff]  ;;  %v261_v2 = vld [vmem:[%s33394_s0] sm:$0xff]  ;;  %vm263_vm1 = vcmask 130048   ;;  %v33400_v4 = vmov 0.0   ;;  %vm29303_vm2 = vmmov 0   ;;  %vm1192_vm3 = vcmask 64512  }
  0x15   : > { %v259_v3 = vld [vmem:[%s29346_s24] sm:$0xff]  ;;  %27055 = vmatprep.subr.mxu0 %v33400_v4  ;;  %v29361_v5 = vand.u32 4294901760, %v262_v1  ;;  %27062 = vmatprep.subr.mxu1 %v33400_v4  ;;  %v29364_v6 = vand.u32 4294901760, %v261_v2  ;;  %v236_v35 = vld [vmem:[%s33398_s4 + $0x8] sm:$0xff]  ;;  %v29304_v37 = vmov 0   ;;  %v238_v38 = vld [vmem:[%s33398_s4 + $0x18] sm:$0xff] }
  0x16   : > { %v265_v7 = vsel %vm263_vm1, %v259_v3, 0  ;;  %27059 = vmatprep.mubr.msk.f32.mxu0 %vm29303_vm2, %v33400_v4  ;;  %27066 = vmatprep.mubr.msk.f32.mxu1 %vm29303_vm2, %v33400_v4  ;;  %v1188_v28 = vld [vmem:[%s33396_s2] sm:$0xff]  ;;  %v237_v39 = vld [vmem:[%s33398_s4 + $0x10] sm:$0xff]  ;;  %v1189_v40 = vld [vmem:[%s33396_s2 + $0x8] sm:$0xff] }
  0x17   : > { %v29369_v8 = vand.u32 4294901760, %v265_v7  ;;  %27056 = vmatpush3.msra.mxu0 %v29361_v5  ;;  %v374_v9 = vsub.f32 %v262_v1, %v29361_v5  ;;  %v29376_v10 = vsub.f32 %v261_v2, %v29364_v6  ;;  %v1194_v29 = vsel %vm1192_vm3, %v1188_v28, 0  ;;  %v235_v36 = vld [vmem:[%s33398_s4] sm:$0xff]  ;;  %29228 = vset.pattern.permute.xlu1 %v29304_v37  ;;  %v1190_v41 = vld [vmem:[%s33396_s2 + $0x10] sm:$0xff]  ;;  %v1191_v44 = vld [vmem:[%s33396_s2 + $0x18] sm:$0xff] }
  0x18   : > { %27057 = vmatprep.subr.mxu0 %v33400_v4  ;;  %v29484_v30 = vand.u32 4294901760, %v1194_v29  ;;  %29227 = vset.pattern.permute.xlu0 %v29304_v37  ;;  %v1197_v42 = vsel %vm1192_vm3, %v1189_v40, 0  ;;  %v1200_v43 = vsel %vm1192_vm3, %v1190_v41, 0  ;;  %v1203_v48 = vsel %vm1192_vm3, %v1191_v44, 0  ;;  %v1785_v28 = vld [vmem:[%s33397_s3 + $0x8] sm:$0xff]  ;;  %v1786_v40 = vld [vmem:[%s33397_s3 + $0x10] sm:$0xff] }
  0x19   : > { %v29380_v12 = vsub.f32 %v265_v7, %v29369_v8  ;;  %27058 = vmatpush3.msra.mxu0 %v29364_v6  ;;  %v29383_v13 = vand.u32 4294901760, %v374_v9  ;;  %v29386_v14 = vand.u32 4294901760, %v29376_v10  ;;  %246 = vperm.xlu1 %29228, %v236_v35   ;;  %v29517_v46 = vand.u32 4294901760, %v1197_v42 }
  0x1a   : > { %v260_v11 = vld [vmem:[#allocation2] sm:$0xff]  ;;  %27069 = vmatprep.subr.mxu0 %v33400_v4  ;;  %v29487_v31 = vsub.f32 %v1194_v29, %v29484_v30  ;;  %241 = vperm.xlu0 %29227, %v235_v36   ;;  %v29519_v47 = vand.u32 4294901760, %v1200_v43  ;;  %v29525_v54 = vand.u32 4294901760, %v1203_v48 }
  0x1b   : > { %v29389_v15 = vand.u32 4294901760, %v29380_v12  ;;  %v727_v16 = vsel %vm263_vm1, %v260_v11, 0  ;;  %v376_v17 = vsub.f32 %v374_v9, %v29383_v13  ;;  %v383_v18 = vsub.f32 %v29376_v10, %v29386_v14 }
  0x1c   : > { %v29398_v22 = vand.u32 4294901760, %v727_v16  ;;  %v1273_v32 = vand.u32 4294901760, %v29487_v31  ;;  %v29523_v53 = vsub.f32 %v1197_v42, %v29517_v46  ;;  %v29528_v56 = vsub.f32 %v1200_v43, %v29519_v47  ;;  %v1787_v42 = vld [vmem:[%s33397_s3 + $0x18] sm:$0xff] }
  0x1d   : > { %v337_v19 = vsub.f32 %v29380_v12, %v29389_v15  ;;  %v377_v20 = vand.u32 4294901760, %v376_v17  ;;  %v384_v21 = vand.u32 4294901760, %v383_v18  ;;  %256 = vperm.xlu1 %29228, %v238_v38   ;;  %v29532_v61 = vsub.f32 %v1203_v48, %v29525_v54  ;;  %v1784_v17 = vld [vmem:[%s33397_s3] sm:$0xff] }
  0x1e   : > { %v29405_v24 = vsub.f32 %v727_v16, %v29398_v22  ;;  %v1274_v33 = vsub.f32 %v29487_v31, %v1273_v32  ;;  %251 = vperm.xlu0 %29227, %v237_v39   ;;  %v1283_v60 = vand.u32 4294901760, %v29523_v53  ;;  %v1293_v63 = vand.u32 4294901760, %v29528_v56 }
  0x1f   : > { %v29400_v23 = vand.u32 4294901760, %v337_v19  ;;  %27063 = vmatpush3.msra.mxu1 %v377_v20  ;;  %v1792_v39 = vsel %vm1192_vm3, %v1785_v28, 0 }
  0x20   : > { %27064 = vmatprep.subr.mxu1 %v33400_v4  ;;  %v29417_v25 = vand.u32 4294901760, %v29405_v24  ;;  %v1275_v34 = vand.u32 4294901760, %v1274_v33  ;;  %v1284_v3 = vsub.f32 %v29523_v53, %v1283_v60  ;;  %v29567_v48 = vand.u32 4294901760, %v1792_v39 }
  0x21   : > { %27060 = vmatmul.mubr.f32.vlgmr.msra.gmra.mxu0 %v29400_v23  ;;  %27065 = vmatpush3.msra.mxu1 %v384_v21 }
  0x22   : > { %27070 = vmatpush3.msra.mxu0 %v374_v9  ;;  %27067 = vmatmul.mubr.f32.vlgmr.msra.gmra.mxu1 %v29369_v8  ;;  %v799_v26 = vsub.f32 %v29405_v24, %v29417_v25 }
  0x23   : > { %27071 = vmatprep.subr.mxu0 %v33400_v4  ;;  %27076 = vmatprep.subr.mxu1 %v33400_v4 }
  0x24   : > { %27072 = vmatpush3.msra.mxu0 %v29376_v10  ;;  %27073 = vmatprep.mubr.msk.f32.mxu0 %vm29303_vm2, %v33400_v4  ;;  %v29440_v27 = vand.u32 4294901760, %v799_v26  ;;  %v1789_v26 = vsel %vm1192_vm3, %v1784_v17, 0 }
  0x25   : > { %27077 = vmatpush3.msra.mxu1 %v29361_v5  ;;  %27074 = vmatmul.mubr.f32.vlgmr.msra.gmra.mxu0 %v29380_v12  ;;  %v29557_v38 = vand.u32 4294901760, %v1789_v26 }
  0x26   : > { %27078 = vmatprep.subr.mxu1 %v33400_v4  ;;  %27083 = vmatprep.subr.mxu0 %v33400_v4 }
  0x27   : > { %27079 = vmatpush3.msra.mxu1 %v29364_v6  ;;  %27080 = vmatprep.mubr.msk.f32.mxu1 %vm29303_vm2, %v33400_v4 }
  0x28   : > { %27084 = vmatpush3.msra.mxu0 %v29383_v13  ;;  %27081 = vmatmul.mubr.f32.vlgmr.msra.gmra.mxu1 %v29389_v15 }
  0x29   : > { %27085 = vmatprep.subr.mxu0 %v33400_v4  ;;  %27090 = vmatprep.subr.mxu1 %v33400_v4 }
  0x2a   : > { %27086 = vmatpush3.msra.mxu0 %v29386_v14  ;;  %27087 = vmatprep.mubr.msk.f32.mxu0 %vm29303_vm2, %v33400_v4 }
  0x2b   : > { %27091 = vmatpush3.msra.mxu1 %v29361_v5  ;;  %27088 = vmatmul.mubr.f32.vlgmr.msra.gmra.mxu0 %v29369_v8 }
  0x2c   : > { %27092 = vmatprep.subr.mxu1 %v33400_v4  ;;  %27094 = vmatprep.mubr.msk.f32.mxu1 %vm29303_vm2, %v33400_v4 }
  0x2d   : > { %27093 = vmatpush3.msra.mxu1 %v29364_v6  ;;  %27097 = vmatprep.subr.mxu0 %v33400_v4 }
  0x2e   : > { %27095 = vmatmul.mubr.f32.vlgmr.msra.gmra.mxu1 %v29369_v8  ;;  %27098 = vmatpush3.msra.mxu0 %v29361_v5 }
  0x2f   : > { %27104 = vmatprep.subr.mxu1 %v33400_v4  ;;  %27099 = vmatprep.subr.mxu0 %v33400_v4 }
  0x30   : > { %27101 = vmatprep.mubr.msk.f32.mxu0 %vm29303_vm2, %v33400_v4  ;;  %27100 = vmatpush3.msra.mxu0 %v29364_v6 }
  0x31   : > { %27105 = vmatpush3.msra.mxu1 %v377_v20  ;;  %27102 = vmatmul.mubr.f32.vlgmr.msra.gmra.mxu0 %v29440_v27 }
  0x32   : > { %27106 = vmatprep.subr.mxu1 %v33400_v4  ;;  %27111 = vmatprep.subr.mxu0 %v33400_v4 }
  0x33   : > { %27107 = vmatpush3.msra.mxu1 %v384_v21  ;;  %27108 = vmatprep.mubr.msk.f32.mxu1 %vm29303_vm2, %v33400_v4 }
  0x34   : > { %27112 = vmatpush3.msra.mxu0 %v374_v9  ;;  %27109 = vmatmul.mubr.f32.vlgmr.msra.gmra.mxu1 %v29398_v22  ;;  %v1294_v9 = vsub.f32 %v29528_v56, %v1293_v63 }
  0x35   : > { %27113 = vmatprep.subr.mxu0 %v33400_v4  ;;  %27118 = vmatprep.subr.mxu1 %v33400_v4 }
  0x36   : > { %27114 = vmatpush3.msra.mxu0 %v29376_v10  ;;  %27115 = vmatprep.mubr.msk.f32.mxu0 %vm29303_vm2, %v33400_v4  ;;  %v1295_v19 = vand.u32 4294901760, %v1294_v9 }
  0x37   : > { %27119 = vmatpush3.msra.mxu1 %v29361_v5  ;;  %27116 = vmatmul.mubr.f32.vlgmr.msra.gmra.mxu0 %v29405_v24 }
  0x38   : > { %27120 = vmatprep.subr.mxu1 %v33400_v4  ;;  %27125 = vmatprep.subr.mxu0 %v33400_v4 }
  0x39   : > { %27121 = vmatpush3.msra.mxu1 %v29364_v6  ;;  %27122 = vmatprep.mubr.msk.f32.mxu1 %vm29303_vm2, %v33400_v4 }
  0x3a   : > { %27126 = vmatpush3.msra.mxu0 %v29383_v13  ;;  %27123 = vmatmul.mubr.f32.vlgmr.msra.gmra.mxu1 %v29417_v25 }
  0x3b   : > { %27127 = vmatprep.subr.mxu0 %v33400_v4  ;;  %27132 = vmatprep.subr.mxu1 %v33400_v4 }
  0x3c   : > { %27128 = vmatpush3.msra.mxu0 %v29386_v14  ;;  %27129 = vmatprep.mubr.msk.f32.mxu0 %vm29303_vm2, %v33400_v4  ;;  %v1285_v14 = vand.u32 4294901760, %v1284_v3 }
  0x3d   : > { %27133 = vmatpush3.msra.mxu1 %v29361_v5  ;;  %27130 = vmatmul.mubr.f32.vlgmr.msra.gmra.mxu0 %v29398_v22  ;;  %v1303_v5 = vand.u32 4294901760, %v29532_v61 }
  0x3e   : > { %27134 = vmatprep.subr.mxu1 %v33400_v4  ;;  %27136 = vmatprep.mubr.msk.f32.mxu1 %vm29303_vm2, %v33400_v4 }
  0x3f   : > { %27135 = vmatpush3.msra.mxu1 %v29364_v6  ;;  %27141 = vmatprep.mubr.f32.mxu0 %v1275_v34  ;;  %v1304_v16 = vsub.f32 %v29532_v61, %v1303_v5 }
  0x40   : > { %27137 = vmatmul.mubr.f32.vlgmr.msra.gmra.mxu1 %v29398_v22 }
  0x41   : > { %27149 = vmatprep.mubr.f32.mxu1 %v29484_v30  ;;  %v1305_v34 = vand.u32 4294901760, %v1304_v16 }
  0xe1   : > { %v340_v45 = vpop.f32.mrf.mxu0 }
  0xe2   : > { %v421_v50 = vpop.f32.mrf.mxu1 }
  0xe3   : > { %v27061_v49 = vpop.f32.mrf.mxu0  ;;  %v422_v51 = vadd.f32 %v421_v50, %v340_v45 }
  0xe4   : > { %v27068_v52 = vpop.f32.mrf.mxu1  ;;  %v1795_v49 = vsel %vm1192_vm3, %v1786_v40, 0 }
  0xe5   : > { %v497_v55 = vpop.f32.mrf.mxu0  ;;  %v1798_v52 = vsel %vm1192_vm3, %v1787_v42, 0 }
  0xe6   : > { %v498_v57 = vadd.f32 %v497_v55, %v422_v51  ;;  %v29571_v51 = vsub.f32 %v1789_v26, %v29557_v38 }
  0xe7   : > { %v27075_v58 = vpop.f32.mrf.mxu0 }
  0xe8   : > { %v572_v59 = vpop.f32.mrf.mxu1  ;;  %v29576_v58 = vand.u32 4294901760, %v1795_v49 }
  0xe9   : > { %v573_v62 = vadd.f32 %v572_v59, %v498_v57 }
  0xea   : > { %v27082_v0 = vpop.f32.mrf.mxu1  ;;  %v29592_v9 = vsub.f32 %v1795_v49, %v29576_v58 }
  0xeb   : > { %v649_v1 = vpop.f32.mrf.mxu0  ;;  %v29582_v0 = vand.u32 4294901760, %v1798_v52 }
  0xec   : > { %v650_v2 = vadd.f32 %v649_v1, %v573_v62  ;;  %v29580_v62 = vsub.f32 %v1792_v39, %v29567_v48 }
  0xed   : > { %v27089_v6 = vpop.f32.mrf.mxu0 }
  0xee   : > { %v722_v7 = vpop.f32.mrf.mxu1 }
  0xef   : > { %v723_v10 = vadd.f32 %v722_v7, %v650_v2  ;;  %v1868_v2 = vand.u32 4294901760, %v29571_v51 }
  0xf0   : > { %v27096_v11 = vpop.f32.mrf.mxu1 }
  0xf1   : > { %v29542_v13 = vand.u32 4294901760, %v723_v10  ;;  %v802_v18 = vpop.f32.mrf.mxu0  ;;  %v1878_v11 = vand.u32 4294901760, %v29580_v62  ;;  %v1869_v17 = vsub.f32 %v29571_v51, %v1868_v2 }
  0xf3   : > { %v1343_v20 = vsub.f32 %v723_v10, %v29542_v13  ;;  %27139 = vmatprep.subr.mxu0 %v29542_v13  ;;  %v27103_v21 = vpop.f32.mrf.mxu0 }
  0xf4   : > { %27140 = vmatpush3.msra.mxu0 %v29542_v13  ;;  %v883_v29 = vpop.f32.mrf.mxu1 }
  0xf5   : > { %27142 = vmatmul.mubr.f32.vlgmr.msra.gmra.mxu0 %v1285_v14  ;;  %27155 = vmatprep.subr.mxu0 %v1343_v20  ;;  %v1344_v33 = vand.u32 4294901760, %v1343_v20  ;;  %v884_v35 = vadd.f32 %v883_v29, %v802_v18  ;;  %v29599_v14 = vsub.f32 %v1798_v52, %v29582_v0 }
  0xf6   : > { %27156 = vmatpush3.msra.mxu0 %v1343_v20  ;;  %27144 = vmatprep.mubr.f32.mxu0 %v1295_v19  ;;  %v27110_v36 = vpop.f32.mrf.mxu1 }
  0xf7   : > { %27171 = vmatprep.subr.mxu0 %v1344_v33  ;;  %v1345_v37 = vsub.f32 %v1343_v20, %v1344_v33  ;;  %v959_v41 = vpop.f32.mrf.mxu0  ;;  %v1898_v19 = vand.u32 4294901760, %v29599_v14  ;;  %v1870_v20 = vand.u32 4294901760, %v1869_v17 }
  0xf8   : > { %v960_v43 = vadd.f32 %v959_v41, %v884_v35 }
  0xf9   : > { %27145 = vmatmul.mubr.f32.gmra.mxu0 %v1305_v34  ;;  %v1346_v44 = vand.u32 4294901760, %v1345_v37  ;;  %v27117_v45 = vpop.f32.mrf.mxu0 }
  0xfa   : > { %27157 = vmatprep.mubr.f32.mxu0 %v29487_v31  ;;  %v1034_v50 = vpop.f32.mrf.mxu1  ;;  %v1888_v31 = vand.u32 4294901760, %v29592_v9 }
  0xfb   : > { %27147 = vmatprep.subr.mxu1 %v1346_v44  ;;  %v1035_v55 = vadd.f32 %v1034_v50, %v960_v43 }
  0xfc   : > { %27148 = vmatpush3.msra.mxu1 %v1346_v44  ;;  %v27124_v57 = vpop.f32.mrf.mxu1 }
  0xfd   : > { %27150 = vmatmul.mubr.f32.vlgmr.msra.gmra.mxu1 %v29517_v46  ;;  %27158 = vmatmul.mubr.f32.vlgmr.msra.gmra.mxu0 %v29523_v53  ;;  %v1111_v59 = vpop.f32.mrf.mxu0 }
  0xfe   : > { %27163 = vmatprep.subr.mxu1 %v29542_v13  ;;  %27172 = vmatpush3.msra.mxu0 %v1344_v33  ;;  %v1112_v1 = vadd.f32 %v1111_v59, %v1035_v55 }
  0xff   : > { %27164 = vmatpush3.msra.mxu1 %v29542_v13  ;;  %27152 = vmatprep.mubr.f32.mxu1 %v29519_v47  ;;  %v27131_v6 = vpop.f32.mrf.mxu0 }
 0x100   : > { %v1184_v3 = vpop.f32.mrf.mxu1  ;;  %27179 = vmatprep.subr.mxu1 %v29542_v13  ;;  %27160 = vmatprep.mubr.f32.mxu0 %v29528_v56  ;;  %v1899_v56 = vsub.f32 %v29599_v14, %v1898_v19 }
 0x101   : > { %v1185_v7 = vadd.f32 %v1184_v3, %v1112_v1  ;;  %27153 = vmatmul.mubr.f32.gmra.mxu1 %v29525_v54  ;;  %27161 = vmatmul.mubr.f32.gmra.mxu0 %v29532_v61 }
 0x102   : > { %27165 = vmatprep.mubr.f32.mxu1 %v1273_v32  ;;  %27173 = vmatprep.mubr.f32.mxu0 %v29484_v30  ;;  %v27138_v10 = vpop.f32.mrf.mxu1  ;;  %v1879_v32 = vsub.f32 %v29580_v62, %v1878_v11  ;;  %v1900_v61 = vand.u32 4294901760, %v1899_v56 }
 0x103   : > { %v1831_v16 = vand.u32 4294901760, %v1185_v7 }
 0x105   : > { %v1938_v18 = vsub.f32 %v1185_v7, %v1831_v16  ;;  %27166 = vmatmul.mubr.f32.vlgmr.msra.gmra.mxu1 %v1283_v60  ;;  %27174 = vmatmul.mubr.f32.vlgmr.msra.gmra.mxu0 %v29517_v46  ;;  %v1889_v60 = vsub.f32 %v29592_v9, %v1888_v31 }
 0x106   : > { %27180 = vmatpush3.msra.mxu1 %v29542_v13  ;;  %27187 = vmatprep.subr.mxu0 %v1831_v16  ;;  %v1880_v13 = vand.u32 4294901760, %v1879_v32 }
 0x107   : > { %27168 = vmatprep.mubr.f32.mxu1 %v1293_v63  ;;  %27176 = vmatprep.mubr.f32.mxu0 %v29519_v47  ;;  %v1939_v21 = vand.u32 4294901760, %v1938_v18  ;;  %v1890_v26 = vand.u32 4294901760, %v1889_v60 }
 0x108   : > { %27188 = vmatpush3.msra.mxu0 %v1831_v16 }
 0x109   : > { %27169 = vmatmul.mubr.f32.gmra.mxu1 %v1303_v5  ;;  %27177 = vmatmul.mubr.f32.gmra.mxu0 %v29525_v54  ;;  %v1940_v53 = vsub.f32 %v1938_v18, %v1939_v21  ;;  %v25803_v5 = vld [vmem:[%s33394_s0 + $0x10] sm:$0xff] }
 0x10a   : > { %27203 = vmatprep.subr.mxu0 %v1938_v18  ;;  %27181 = vmatprep.mubr.f32.mxu1 %v29484_v30  ;;  %v25804_v30 = vld [vmem:[%s33394_s0 + $0x18] sm:$0xff] }
 0x10b   : > { %27189 = vmatprep.mubr.f32.mxu0 %v1870_v20  ;;  %v1941_v63 = vand.u32 4294901760, %v1940_v53 }
 0x10d   : > { %27195 = vmatprep.subr.mxu1 %v1941_v63  ;;  %27182 = vmatmul.mubr.f32.vlgmr.msra.gmra.mxu1 %v29517_v46  ;;  %v29628_v46 = vand.u32 4294901760, %v25804_v30 }
 0x10e   : > { %27190 = vmatmul.mubr.f32.vlgmr.msra.gmra.mxu0 %v1880_v13  ;;  %27196 = vmatpush3.msra.mxu1 %v1941_v63 }
 0x10f   : > { %27204 = vmatpush3.msra.mxu0 %v1938_v18  ;;  %27211 = vmatprep.subr.mxu1 %v1831_v16 }
 0x110   : > { %27219 = vmatprep.subr.mxu0 %v1939_v21  ;;  %27184 = vmatprep.mubr.f32.mxu1 %v29519_v47  ;;  %v29635_v47 = vand.u32 4294901760, %v25803_v5 }
 0x111   : > { %27192 = vmatprep.mubr.f32.mxu0 %v1890_v26  ;;  %27185 = vmatmul.mubr.f32.gmra.mxu1 %v29525_v54  ;;  %v29638_v54 = vsub.f32 %v25804_v30, %v29628_v46 }
 0x112   : > { %27193 = vmatmul.mubr.f32.gmra.mxu0 %v1900_v61  ;;  %27197 = vmatprep.mubr.f32.mxu1 %v29557_v38  ;;  %v29648_v28 = vsub.f32 %v25803_v5, %v29635_v47 }
 0x113   : > { %27205 = vmatprep.mubr.f32.mxu0 %v29571_v51  ;;  %v29652_v29 = vand.u32 4294901760, %v29638_v54 }
 0x114   : > { %v29656_v33 = vand.u32 4294901760, %v29648_v28 }
 0x115   : > { %27198 = vmatmul.mubr.f32.vlgmr.msra.gmra.mxu1 %v29567_v48  ;;  %v2491_v34 = vsub.f32 %v29638_v54, %v29652_v29 }
 0x116   : > { %27206 = vmatmul.mubr.f32.vlgmr.msra.gmra.mxu0 %v29580_v62  ;;  %27212 = vmatpush3.msra.mxu1 %v1831_v16  ;;  %v2498_v35 = vsub.f32 %v29648_v28, %v29656_v33 }
 0x117   : > { %27220 = vmatpush3.msra.mxu0 %v1939_v21  ;;  %27227 = vmatprep.subr.mxu1 %v1831_v16  ;;  %v2492_v36 = vand.u32 4294901760, %v2491_v34 }
 0x118   : > { %27200 = vmatprep.mubr.f32.mxu1 %v29576_v58  ;;  %27208 = vmatprep.mubr.f32.mxu0 %v29592_v9  ;;  %v2499_v37 = vand.u32 4294901760, %v2498_v35 }
 0x119   : > { %27201 = vmatmul.mubr.f32.gmra.mxu1 %v29582_v0  ;;  %27235 = vmatprep.subr.mxu0 %v33400_v4 }
 0x11a   : > { %27209 = vmatmul.mubr.f32.gmra.mxu0 %v29599_v14  ;;  %27213 = vmatprep.mubr.f32.mxu1 %v1868_v2 }
 0x11b   : > { %27221 = vmatprep.mubr.f32.mxu0 %v29557_v38 }
 0x11d   : > { %27214 = vmatmul.mubr.f32.vlgmr.msra.gmra.mxu1 %v1878_v11 }
 0x11e   : > { %27228 = vmatpush3.msra.mxu1 %v1831_v16  ;;  %27222 = vmatmul.mubr.f32.vlgmr.msra.gmra.mxu0 %v29567_v48 }
 0x11f   : > { %27216 = vmatprep.mubr.f32.mxu1 %v1888_v31  ;;  %27224 = vmatprep.mubr.f32.mxu0 %v29576_v58 }
 0x120   : > { %27236 = vmatpush3.msra.mxu0 %v29628_v46  ;;  %27242 = vmatprep.subr.mxu1 %v33400_v4 }
 0x121   : > { %27217 = vmatmul.mubr.f32.gmra.mxu1 %v1898_v19  ;;  %27237 = vmatprep.subr.mxu0 %v33400_v4 }
 0x122   : > { %27225 = vmatmul.mubr.f32.gmra.mxu0 %v29582_v0  ;;  %27229 = vmatprep.mubr.f32.mxu1 %v29557_v38  ;;  %v25805_v38 = vld [vmem:[%s33396_s2 + $0x20] sm:$0xff] }
 0x123   : > { %27238 = vmatpush3.msra.mxu0 %v29635_v47  ;;  %27239 = vmatprep.mubr.msk.f32.mxu0 %vm29303_vm2, %v33400_v4  ;;  %v3306_v39 = vsel %vm1192_vm3, %v25805_v38, 0 }
 0x124   : > { %27249 = vmatprep.subr.mxu0 %v33400_v4  ;;  %v29751_v40 = vand.u32 4294901760, %v3306_v39 }
 0x125   : > { %27230 = vmatmul.mubr.f32.vlgmr.msra.gmra.mxu1 %v29567_v48 }
 0x126   : > { %27232 = vmatprep.mubr.f32.mxu1 %v29576_v58  ;;  %27240 = vmatmul.mubr.f32.vlgmr.msra.gmra.mxu0 %v29400_v23  ;;  %v29754_v41 = vsub.f32 %v3306_v39, %v29751_v40 }
 0x127   : > { %27243 = vmatpush3.msra.mxu1 %v2492_v36  ;;  %27250 = vmatpush3.msra.mxu0 %v29638_v54 }
 0x128   : > { %27244 = vmatprep.subr.mxu1 %v33400_v4  ;;  %27251 = vmatprep.subr.mxu0 %v33400_v4  ;;  %v33405_v42 = vand.u32 4294901760, %v29754_v41 }
 0x129   : > { %27233 = vmatmul.mubr.f32.gmra.mxu1 %v29582_v0  ;;  %27252 = vmatpush3.msra.mxu0 %v29648_v28 }
 0x12a   : > { %27245 = vmatpush3.msra.mxu1 %v2499_v37  ;;  %27246 = vmatprep.mubr.msk.f32.mxu1 %vm29303_vm2, %v33400_v4  ;;  %v3386_v43 = vsub.f32 %v29754_v41, %v33405_v42 }
 0x12b   : > { %27253 = vmatprep.mubr.msk.f32.mxu0 %vm29303_vm2, %v33400_v4  ;;  %27256 = vmatprep.subr.mxu1 %v33400_v4 }
 0x12c   : > { %27254 = vmatmul.mubr.f32.vlgmr.msra.gmra.mxu0 %v29380_v12  ;;  %27263 = vmatprep.subr.mxu0 %v33400_v4  ;;  %v3387_v44 = vand.u32 4294901760, %v3386_v43 }
 0x12d   : > { %27247 = vmatmul.mubr.f32.vlgmr.msra.gmra.mxu1 %v29369_v8  ;;  %27264 = vmatpush3.msra.mxu0 %v29652_v29 }
 0x12e   : > { %27257 = vmatpush3.msra.mxu1 %v29628_v46  ;;  %27265 = vmatprep.subr.mxu0 %v33400_v4 }
 0x12f   : > { %27258 = vmatprep.subr.mxu1 %v33400_v4  ;;  %27260 = vmatprep.mubr.msk.f32.mxu1 %vm29303_vm2, %v33400_v4 }
 0x130   : > { %27259 = vmatpush3.msra.mxu1 %v29635_v47  ;;  %27266 = vmatpush3.msra.mxu0 %v29656_v33 }
 0x131   : > { %27267 = vmatprep.mubr.msk.f32.mxu0 %vm29303_vm2, %v33400_v4  ;;  %27261 = vmatmul.mubr.f32.vlgmr.msra.gmra.mxu1 %v29389_v15 }
 0x132   : > { %27268 = vmatmul.mubr.f32.vlgmr.msra.gmra.mxu0 %v29369_v8  ;;  %27270 = vmatprep.subr.mxu1 %v33400_v4 }
 0x133   : > { %27271 = vmatpush3.msra.mxu1 %v29628_v46  ;;  %27274 = vmatprep.mubr.msk.f32.mxu1 %vm29303_vm2, %v33400_v4 }
 0x134   : > { %27272 = vmatprep.subr.mxu1 %v33400_v4  ;;  %27277 = vmatprep.subr.mxu0 %v33400_v4 }
 0x135   : > { %27273 = vmatpush3.msra.mxu1 %v29635_v47  ;;  %27278 = vmatpush3.msra.mxu0 %v29628_v46 }
 0x136   : > { %27275 = vmatmul.mubr.f32.vlgmr.msra.gmra.mxu1 %v29369_v8  ;;  %27279 = vmatprep.subr.mxu0 %v33400_v4 }
 0x137   : > { %27284 = vmatprep.subr.mxu1 %v33400_v4  ;;  %27280 = vmatpush3.msra.mxu0 %v29635_v47 }
 0x138   : > { %27281 = vmatprep.mubr.msk.f32.mxu0 %vm29303_vm2, %v33400_v4  ;;  %27285 = vmatpush3.msra.mxu1 %v2492_v36 }
 0x139   : > { %27282 = vmatmul.mubr.f32.vlgmr.msra.gmra.mxu0 %v29440_v27  ;;  %27286 = vmatprep.subr.mxu1 %v33400_v4 }
 0x13a   : > { %27291 = vmatprep.subr.mxu0 %v33400_v4  ;;  %27287 = vmatpush3.msra.mxu1 %v2499_v37 }
 0x13b   : > { %27288 = vmatprep.mubr.msk.f32.mxu1 %vm29303_vm2, %v33400_v4  ;;  %27292 = vmatpush3.msra.mxu0 %v29638_v54 }
 0x13c   : > { %27289 = vmatmul.mubr.f32.vlgmr.msra.gmra.mxu1 %v29398_v22  ;;  %27293 = vmatprep.subr.mxu0 %v33400_v4 }
 0x13d   : > { %27298 = vmatprep.subr.mxu1 %v33400_v4  ;;  %27294 = vmatpush3.msra.mxu0 %v29648_v28 }
 0x13e   : > { %27295 = vmatprep.mubr.msk.f32.mxu0 %vm29303_vm2, %v33400_v4  ;;  %27299 = vmatpush3.msra.mxu1 %v29628_v46 }
 0x13f   : > { %27296 = vmatmul.mubr.f32.vlgmr.msra.gmra.mxu0 %v29405_v24  ;;  %27300 = vmatprep.subr.mxu1 %v33400_v4 }
 0x140   : > { %27305 = vmatprep.subr.mxu0 %v33400_v4  ;;  %27301 = vmatpush3.msra.mxu1 %v29635_v47 }
 0x141   : > { %27302 = vmatprep.mubr.msk.f32.mxu1 %vm29303_vm2, %v33400_v4  ;;  %27306 = vmatpush3.msra.mxu0 %v29652_v29 }
 0x142   : > { %27303 = vmatmul.mubr.f32.vlgmr.msra.gmra.mxu1 %v29417_v25  ;;  %27307 = vmatprep.subr.mxu0 %v33400_v4 }
 0x143   : > { %27312 = vmatprep.subr.mxu1 %v33400_v4  ;;  %27308 = vmatpush3.msra.mxu0 %v29656_v33 }
 0x144   : > { %27309 = vmatprep.mubr.msk.f32.mxu0 %vm29303_vm2, %v33400_v4  ;;  %27313 = vmatpush3.msra.mxu1 %v29628_v46 }
 0x145   : > { %27310 = vmatmul.mubr.f32.vlgmr.msra.gmra.mxu0 %v29398_v22  ;;  %27314 = vmatprep.subr.mxu1 %v33400_v4 }
 0x146   : > { %27315 = vmatpush3.msra.mxu1 %v29635_v47  ;;  %27316 = vmatprep.mubr.msk.f32.mxu1 %vm29303_vm2, %v33400_v4 }
 0x147   : > { %27317 = vmatmul.mubr.f32.vlgmr.msra.gmra.mxu1 %v29398_v22  ;;  %27321 = vmatprep.mubr.f32.mxu0 %v3387_v44 }
 0x148   : > { %27329 = vmatprep.mubr.f32.mxu1 %v29751_v40 }
 0x1b5   : > { %v27143_v45 = vpop.f32.mrf.mxu0 }
 0x1b7   : > { %v29761_v48 = vpop.f32.mrf.mxu0 }
 0x1b9   : > { %v27146_v49 = vpop.f32.mrf.mxu0 }
 0x1bb   : > { %v29763_v50 = vpop.f32.mrf.mxu0 }
 0x1bd   : > { %v27151_v51 = vpop.f32.mrf.mxu1  ;;  %v27159_v52 = vpop.f32.mrf.mxu0 }
 0x1be   : > { %v1390_v55 = vadd.f32 %v27151_v51, %v27143_v45 }
 0x1bf   : > { %v29765_v57 = vpop.f32.mrf.mxu1  ;;  %v29767_v58 = vpop.f32.mrf.mxu0 }
 0x1c0   : > { %v1483_v59 = vadd.f32 %v27159_v52, %v1390_v55  ;;  %v29801_v55 = vpop.permute.xlu1 %246 }
 0x1c1   : > { %v27154_v62 = vpop.f32.mrf.mxu1  ;;  %v27162_v0 = vpop.f32.mrf.mxu0  ;;  %33494 = vst [vmem:[#allocation5_spill] sm:$0xff] %v29801_v55 }
 0x1c2   : > { %v1402_v1 = vadd.f32 %v27154_v62, %v27146_v49 }
 0x1c3   : > { %v29769_v2 = vpop.f32.mrf.mxu1  ;;  %v29771_v3 = vpop.f32.mrf.mxu0 }
 0x1c4   : > { %v1497_v6 = vadd.f32 %v27162_v0, %v1402_v1 }
 0x1c5   : > { %v27167_v7 = vpop.f32.mrf.mxu1  ;;  %v27175_v9 = vpop.f32.mrf.mxu0 }
 0x1c6   : > { %v1579_v10 = vadd.f32 %v27167_v7, %v1483_v59 }
 0x1c7   : > { %v29773_v11 = vpop.f32.mrf.mxu1  ;;  %v29775_v14 = vpop.f32.mrf.mxu0 }
 0x1c8   : > { %v1675_v16 = vadd.f32 %v27175_v9, %v1579_v10  ;;  %v25807_v10 = vld [vmem:[%s33396_s2 + $0x30] sm:$0xff] }
 0x1c9   : > { %v27170_v17 = vpop.f32.mrf.mxu1  ;;  %v27178_v18 = vpop.f32.mrf.mxu0 }
 0x1ca   : > { %v1595_v31 = vadd.f32 %v27170_v17, %v1497_v6  ;;  %v25806_v6 = vld [vmem:[%s33396_s2 + $0x28] sm:$0xff] }
 0x1cb   : > { %v29777_v32 = vpop.f32.mrf.mxu1  ;;  %v29779_v19 = vpop.f32.mrf.mxu0 }
 0x1cc   : > { %v1687_v20 = vadd.f32 %v27178_v18, %v1595_v31 }
 0x1cd   : > { %v27183_v21 = vpop.f32.mrf.mxu1 }
 0x1ce   : > { %v1765_v53 = vadd.f32 %v27183_v21, %v1675_v16  ;;  %v27191_v60 = vpop.f32.mrf.mxu0  ;;  %v29815_v21 = vpop.permute.xlu1 %256 }
 0x1cf   : > { %v29781_v13 = vpop.f32.mrf.mxu1  ;;  %33496 = vst [vmem:[#allocation7_spill] sm:$0xff] %v29815_v21 }
 0x1d0   : > { %v29783_v56 = vpop.f32.mrf.mxu0  ;;  %v1781_v17 = vadd.f32 %v1765_v53, %v29801_v55 }
 0x1d1   : > { %v27186_v63 = vpop.f32.mrf.mxu1 }
 0x1d2   : > { %v1777_v26 = vadd.f32 %v27186_v63, %v1687_v20  ;;  %v27194_v61 = vpop.f32.mrf.mxu0  ;;  %v3309_v20 = vsel %vm1192_vm3, %v25806_v6, 0  ;;  %v3312_v63 = vsel %vm1192_vm3, %v25807_v10, 0 }
 0x1d3   : > { %v29785_v30 = vpop.f32.mrf.mxu1 }
 0x1d4   : > { %33493 = vst [vmem:[#allocation4_spill] sm:$0xff] %v29785_v30  ;;  %v29787_v46 = vpop.f32.mrf.mxu0  ;;  %v1783_v53 = vadd.f32 %v1777_v26, %v29815_v21 }
 0x1d5   : > { %v27199_v5 = vpop.f32.mrf.mxu1 }
 0x1d6   : > { %v1985_v47 = vadd.f32 %v27199_v5, %v27191_v60  ;;  %v27207_v54 = vpop.f32.mrf.mxu0 }
 0x1d7   : > { %v29789_v28 = vpop.f32.mrf.mxu1 }
 0x1d8   : > { %v2078_v29 = vadd.f32 %v27207_v54, %v1985_v47  ;;  %v29791_v33 = vpop.f32.mrf.mxu0 }
 0x1d9   : > { %v27202_v34 = vpop.f32.mrf.mxu1 }
 0x1da   : > { %v1997_v35 = vadd.f32 %v27202_v34, %v27194_v61  ;;  %v27210_v36 = vpop.f32.mrf.mxu0  ;;  %v25808_v61 = vld [vmem:[%s33396_s2 + $0x38] sm:$0xff] }
 0x1db   : > { %v29793_v37 = vpop.f32.mrf.mxu1 }
 0x1dc   : > { %v2092_v38 = vadd.f32 %v27210_v36, %v1997_v35  ;;  %v29795_v39 = vpop.f32.mrf.mxu0  ;;  %v29828_v35 = vand.u32 4294901760, %v3312_v63  ;;  %v3315_v36 = vsel %vm1192_vm3, %v25808_v61, 0 }
 0x1dd   : > { %v27215_v43 = vpop.f32.mrf.mxu1 }
 0x1de   : > { %v2174_v44 = vadd.f32 %v27215_v43, %v2078_v29  ;;  %v27223_v45 = vpop.f32.mrf.mxu0  ;;  %v29825_v29 = vand.u32 4294901760, %v3309_v20  ;;  %v29841_v26 = vsub.f32 %v3312_v63, %v29828_v35 }
 0x1df   : > { %v29797_v49 = vpop.f32.mrf.mxu1 }
 0x1e0   : > { %v2270_v51 = vadd.f32 %v27223_v45, %v2174_v44  ;;  %v29799_v52 = vpop.f32.mrf.mxu0 }
 0x1e1   : > { %v27218_v59 = vpop.f32.mrf.mxu1 }
 0x1e2   : > { %v2190_v62 = vadd.f32 %v27218_v59, %v2092_v38  ;;  %v27226_v0 = vpop.f32.mrf.mxu0  ;;  %v29838_v59 = vand.u32 4294901760, %v3315_v36 }
 0x1e3   : > { %v29803_v1 = vpop.f32.mrf.mxu1 }
 0x1e4   : > { %v2282_v7 = vadd.f32 %v27226_v0, %v2190_v62  ;;  %v29808_v9 = vpop.f32.mrf.mxu0 }
 0x1e5   : > { %33495 = vst [vmem:[#allocation6_spill] sm:$0xff] %v29808_v9  ;;  %v27231_v16 = vpop.f32.mrf.mxu1 }
 0x1e6   : > { %v2360_v18 = vadd.f32 %v27231_v16, %v2270_v51  ;;  %v2455_v31 = vpop.f32.mrf.mxu0  ;;  %v29836_v51 = vsub.f32 %v3309_v20, %v29825_v29  ;;  %v33403_v20 = vand.u32 4294901760, %v29841_v26 }
 0x1e7   : > { %v29817_v60 = vpop.f32.mrf.mxu1 }
 0x1e8   : > { %v29823_v5 = vadd.f32 %v2360_v18, %v1781_v17  ;;  %v27241_v47 = vpop.f32.mrf.mxu0  ;;  %v33404_v16 = vand.u32 4294901760, %v29836_v51  ;;  %v29845_v17 = vsub.f32 %v3315_v36, %v29838_v59 }
 0x1e9   : > { %v27234_v54 = vpop.f32.mrf.mxu1 }
 0x1ea   : > { %v2372_v34 = vadd.f32 %v27234_v54, %v2282_v7  ;;  %v33402_v63 = vand.u32 4294901760, %v29845_v17 }
 0x1eb   : > { %v29831_v38 = vpop.f32.mrf.mxu1 }
 0x1ec   : > { %33497 = vst [vmem:[#allocation8_spill] sm:$0xff] %v29831_v38  ;;  %v29833_v43 = vadd.f32 %v2372_v34, %v1783_v53  ;;  %v2612_v44 = vpop.f32.mrf.mxu0 }
 0x1ed   : > { %v2536_v45 = vpop.f32.mrf.mxu1 }
 0x1ee   : > { %v2537_v62 = vadd.f32 %v2536_v45, %v2455_v31  ;;  %v27255_v0 = vpop.f32.mrf.mxu0  ;;  %v3396_v31 = vsub.f32 %v29836_v51, %v33404_v16 }
 0x1ef   : > { %v27248_v6 = vpop.f32.mrf.mxu1 }
 0x1f0   : > { %v2613_v7 = vadd.f32 %v2612_v44, %v2537_v62  ;;  %v3406_v44 = vsub.f32 %v29841_v26, %v33403_v20  ;;  %v25809_v62 = vld [vmem:[%s33397_s3 + $0x20] sm:$0xff] }
 0x1f1   : > { %v2687_v10 = vpop.f32.mrf.mxu1 }
 0x1f2   : > { %v2688_v18 = vadd.f32 %v2687_v10, %v2613_v7  ;;  %v2764_v61 = vpop.f32.mrf.mxu0  ;;  %v3397_v7 = vand.u32 4294901760, %v3396_v31  ;;  %v3416_v10 = vsub.f32 %v29845_v17, %v33402_v63 }
 0x1f3   : > { %v27262_v47 = vpop.f32.mrf.mxu1 }
 0x1f4   : > { %v2765_v54 = vadd.f32 %v2764_v61, %v2688_v18  ;;  %v27269_v53 = vpop.f32.mrf.mxu0  ;;  %v3407_v18 = vand.u32 4294901760, %v3406_v44  ;;  %v3417_v4 = vand.u32 4294901760, %v3416_v10 }
 0x1f5   : > { %v25810_v53 = vld [vmem:[%s33397_s3 + $0x28] sm:$0xff] }
 0x1f6   : > { %v2837_v34 = vpop.f32.mrf.mxu1 }
 0x1f7   : > { %v2838_v36 = vadd.f32 %v2837_v34, %v2765_v54  ;;  %v3902_v54 = vsel %vm1192_vm3, %v25809_v62, 0  ;;  %v25811_v62 = vld [vmem:[%s33397_s3 + $0x30] sm:$0xff] }
 0x1f8   : > { %v27276_v45 = vpop.f32.mrf.mxu1 }
 0x1f9   : > { %v29858_v0 = vand.u32 4294901760, %v2838_v36  ;;  %v2914_v6 = vpop.f32.mrf.mxu0 }
 0x1fb   : > { %v3455_v61 = vsub.f32 %v2838_v36, %v29858_v0  ;;  %27319 = vmatprep.subr.mxu0 %v29858_v0  ;;  %v27283_v47 = vpop.f32.mrf.mxu0  ;;  %v29870_v36 = vand.u32 4294901760, %v3902_v54 }
 0x1fc   : > { %27320 = vmatpush3.msra.mxu0 %v29858_v0  ;;  %v2995_v34 = vpop.f32.mrf.mxu1  ;;  %v3905_v47 = vsel %vm1192_vm3, %v25810_v53, 0 }
 0x1fd   : > { %27322 = vmatmul.mubr.f32.vlgmr.msra.gmra.mxu0 %v3397_v7  ;;  %27335 = vmatprep.subr.mxu0 %v3455_v61  ;;  %v2996_v31 = vadd.f32 %v2995_v34, %v2914_v6  ;;  %v3456_v45 = vand.u32 4294901760, %v3455_v61  ;;  %v25812_v6 = vld [vmem:[%s33397_s3 + $0x38] sm:$0xff]  ;;  %v29879_v34 = vand.u32 4294901760, %v3905_v47  ;;  %v29884_v16 = vsub.f32 %v3902_v54, %v29870_v36 }
 0x1fe   : > { %27336 = vmatpush3.msra.mxu0 %v3455_v61  ;;  %27324 = vmatprep.mubr.f32.mxu0 %v3407_v18  ;;  %v27290_v44 = vpop.f32.mrf.mxu1 }
 0x1ff   : > { %27351 = vmatprep.subr.mxu0 %v3456_v45  ;;  %v3071_v63 = vpop.f32.mrf.mxu0  ;;  %v3457_v20 = vsub.f32 %v3455_v61, %v3456_v45  ;;  %v3908_v44 = vsel %vm1192_vm3, %v25811_v62, 0  ;;  %v3911_v61 = vsel %vm1192_vm3, %v25812_v6, 0  ;;  %v3981_v62 = vand.u32 4294901760, %v29884_v16 }
 0x200   : > { %v3072_v7 = vadd.f32 %v3071_v63, %v2996_v31  ;;  %v29887_v63 = vand.u32 4294901760, %v3908_v44  ;;  %v29894_v31 = vand.u32 4294901760, %v3911_v61 }
 0x201   : > { %27325 = vmatmul.mubr.f32.gmra.mxu0 %v3417_v4  ;;  %v27297_v10 = vpop.f32.mrf.mxu0  ;;  %v3458_v18 = vand.u32 4294901760, %v3457_v20  ;;  %v29892_v20 = vsub.f32 %v3905_v47, %v29879_v34 }
 0x202   : > { %v3146_v53 = vpop.f32.mrf.mxu1  ;;  %27337 = vmatprep.mubr.f32.mxu0 %v29754_v41  ;;  %v29903_v47 = vsub.f32 %v3908_v44, %v29887_v63  ;;  %v29909_v10 = vsub.f32 %v3911_v61, %v29894_v31  ;;  %v3982_v44 = vsub.f32 %v29884_v16, %v3981_v62  ;;  %v33499_v61 = vand.u32 4294901760, %v29836_v51 }
 0x203   : > { %v3147_v42 = vadd.f32 %v3146_v53, %v3072_v7  ;;  %27327 = vmatprep.subr.mxu1 %v3458_v18  ;;  %v33498_v53 = vand.u32 4294901760, %v29754_v41 }
 0x204   : > { %27328 = vmatpush3.msra.mxu1 %v3458_v18  ;;  %v27304_v21 = vpop.f32.mrf.mxu1 }
 0x205   : > { %v3223_v4 = vpop.f32.mrf.mxu0  ;;  %27330 = vmatmul.mubr.f32.vlgmr.msra.gmra.mxu1 %v29825_v29  ;;  %27338 = vmatmul.mubr.f32.vlgmr.msra.gmra.mxu0 %v29836_v51 }
 0x206   : > { %v3224_v54 = vadd.f32 %v3223_v4, %v3147_v42  ;;  %27343 = vmatprep.subr.mxu1 %v29858_v0  ;;  %27352 = vmatpush3.msra.mxu0 %v3456_v45  ;;  %v33408_v45 = vand.u32 4294901760, %v29892_v20 }
 0x207   : > { %27344 = vmatpush3.msra.mxu1 %v29858_v0  ;;  %v3296_v21 = vpop.f32.mrf.mxu1  ;;  %27332 = vmatprep.mubr.f32.mxu1 %v29828_v35  ;;  %v27311_v6 = vpop.f32.mrf.mxu0 }
 0x208   : > { %v3297_v7 = vadd.f32 %v3296_v21, %v3224_v54  ;;  %27359 = vmatprep.subr.mxu1 %v29858_v0  ;;  %27340 = vmatprep.mubr.f32.mxu0 %v29841_v26  ;;  %v4001_v54 = vand.u32 4294901760, %v29903_v47  ;;  %v3992_v41 = vsub.f32 %v29892_v20, %v33408_v45  ;;  %v4011_v21 = vand.u32 4294901760, %v29909_v10 }
 0x209   : > { %27333 = vmatmul.mubr.f32.gmra.mxu1 %v29838_v59  ;;  %27341 = vmatmul.mubr.f32.gmra.mxu0 %v29845_v17  ;;  %v27318_v42 = vpop.f32.mrf.mxu1  ;;  %v33500_v6 = vand.u32 4294901760, %v29841_v26 }
 0x20a   : > { %v29911_v18 = vand.u32 4294901760, %v3297_v7  ;;  %27345 = vmatprep.mubr.f32.mxu1 %v33498_v53  ;;  %27353 = vmatprep.mubr.f32.mxu0 %v29751_v40  ;;  %v4002_v53 = vsub.f32 %v29903_v47, %v4001_v54  ;;  %v3993_v45 = vand.u32 4294901760, %v3992_v41 }
 0x20c   : > { %v4051_v4 = vsub.f32 %v3297_v7, %v29911_v18  ;;  %27367 = vmatprep.subr.mxu0 %v29911_v18  ;;  %v3983_v7 = vand.u32 4294901760, %v3982_v44  ;;  %v4003_v44 = vand.u32 4294901760, %v4002_v53 }
 0x20d   : > { %27346 = vmatmul.mubr.f32.vlgmr.msra.gmra.mxu1 %v33499_v61  ;;  %27354 = vmatmul.mubr.f32.vlgmr.msra.gmra.mxu0 %v29825_v29  ;;  %v33501_v61 = vand.u32 4294901760, %v29845_v17  ;;  %v25814_v17 = vld [vmem:[%s33394_s0 + $0x28] sm:$0xff] }
 0x20e   : > { %27360 = vmatpush3.msra.mxu1 %v29858_v0  ;;  %27348 = vmatprep.mubr.f32.mxu1 %v33500_v6  ;;  %v4052_v42 = vand.u32 4294901760, %v4051_v4  ;;  %v4012_v0 = vsub.f32 %v29909_v10, %v4011_v21 }
 0x20f   : > { %27356 = vmatprep.mubr.f32.mxu0 %v29828_v35  ;;  %27368 = vmatpush3.msra.mxu0 %v29911_v18 }
 0x210   : > { %27383 = vmatprep.subr.mxu0 %v4051_v4  ;;  %v4053_v51 = vsub.f32 %v4051_v4, %v4052_v42  ;;  %v4013_v6 = vand.u32 4294901760, %v4012_v0 }
 0x211   : > { %27349 = vmatmul.mubr.f32.gmra.mxu1 %v33501_v61  ;;  %27357 = vmatmul.mubr.f32.gmra.mxu0 %v29838_v59 }
 0x212   : > { %27361 = vmatprep.mubr.f32.mxu1 %v29751_v40  ;;  %27369 = vmatprep.mubr.f32.mxu0 %v3983_v7  ;;  %v4054_v26 = vand.u32 4294901760, %v4053_v51  ;;  %v25813_v40 = vld [vmem:[%s33394_s0 + $0x20] sm:$0xff] }
 0x214   : > { %27375 = vmatprep.subr.mxu1 %v4054_v26 }
 0x215   : > { %27362 = vmatmul.mubr.f32.vlgmr.msra.gmra.mxu1 %v29825_v29  ;;  %27370 = vmatmul.mubr.f32.vlgmr.msra.gmra.mxu0 %v3993_v45  ;;  %v29952_v29 = vand.u32 4294901760, %v25814_v17  ;;  %v29954_v45 = vand.u32 4294901760, %v25813_v40 }
 0x216   : > { %27376 = vmatpush3.msra.mxu1 %v4054_v26  ;;  %27384 = vmatpush3.msra.mxu0 %v4051_v4 }
 0x217   : > { %27391 = vmatprep.subr.mxu1 %v29911_v18  ;;  %27399 = vmatprep.subr.mxu0 %v4052_v42  ;;  %v29967_v4 = vsub.f32 %v25813_v40, %v29954_v45 }
 0x218   : > { %27364 = vmatprep.mubr.f32.mxu1 %v29828_v35  ;;  %27372 = vmatprep.mubr.f32.mxu0 %v4003_v44  ;;  %v29960_v35 = vsub.f32 %v25814_v17, %v29952_v29 }
 0x219   : > { %27365 = vmatmul.mubr.f32.gmra.mxu1 %v29838_v59  ;;  %27373 = vmatmul.mubr.f32.gmra.mxu0 %v4013_v6  ;;  %v33502_v59 = vmov 0.0   ;;  %v29978_v7 = vand.u32 4294901760, %v29967_v4 }
 0x21a   : > { %27377 = vmatprep.mubr.f32.mxu1 %v29870_v36  ;;  %27385 = vmatprep.mubr.f32.mxu0 %v29884_v16  ;;  %v29975_v41 = vand.u32 4294901760, %v29960_v35 }
 0x21c   : > { %v4604_v16 = vsub.f32 %v29960_v35, %v29975_v41 }
 0x21d   : > { %27378 = vmatmul.mubr.f32.vlgmr.msra.gmra.mxu1 %v29879_v34  ;;  %27386 = vmatmul.mubr.f32.vlgmr.msra.gmra.mxu0 %v29892_v20 }
 0x21e   : > { %27392 = vmatpush3.msra.mxu1 %v29911_v18  ;;  %27400 = vmatpush3.msra.mxu0 %v4052_v42 }
 0x21f   : > { %27407 = vmatprep.subr.mxu1 %v29911_v18  ;;  %27380 = vmatprep.mubr.f32.mxu1 %v29887_v63 }
 0x220   : > { %27388 = vmatprep.mubr.f32.mxu0 %v29903_v47  ;;  %27415 = vmatprep.subr.mxu0 %v33502_v59  ;;  %v33503_v47 = vand.u32 4294901760, %v29892_v20  ;;  %v4611_v20 = vsub.f32 %v29967_v4, %v29978_v7 }
 0x221   : > { %27381 = vmatmul.mubr.f32.gmra.mxu1 %v29894_v31  ;;  %27389 = vmatmul.mubr.f32.gmra.mxu0 %v29909_v10 }
 0x222   : > { %27393 = vmatprep.mubr.f32.mxu1 %v3981_v62  ;;  %27401 = vmatprep.mubr.f32.mxu0 %v29870_v36  ;;  %v4605_v62 = vand.u32 4294901760, %v4604_v16  ;;  %v4612_v10 = vand.u32 4294901760, %v4611_v20 }
 0x225   : > { %27394 = vmatmul.mubr.f32.vlgmr.msra.gmra.mxu1 %v33503_v47  ;;  %27402 = vmatmul.mubr.f32.vlgmr.msra.gmra.mxu0 %v29879_v34 }
 0x226   : > { %27408 = vmatpush3.msra.mxu1 %v29911_v18  ;;  %27396 = vmatprep.mubr.f32.mxu1 %v4001_v54 }
 0x227   : > { %27404 = vmatprep.mubr.f32.mxu0 %v29887_v63  ;;  %27416 = vmatpush3.msra.mxu0 %v29952_v29 }
 0x228   : > { %27417 = vmatprep.subr.mxu0 %v33502_v59  ;;  %27422 = vmatprep.subr.mxu1 %v33502_v59 }
 0x229   : > { %27397 = vmatmul.mubr.f32.gmra.mxu1 %v4011_v21  ;;  %27405 = vmatmul.mubr.f32.gmra.mxu0 %v29894_v31 }
 0x22a   : > { %27409 = vmatprep.mubr.f32.mxu1 %v29870_v36  ;;  %27418 = vmatpush3.msra.mxu0 %v29954_v45 }
 0x22b   : > { %27419 = vmatprep.mubr.msk.f32.mxu0 %vm29303_vm2, %v33502_v59  ;;  %27429 = vmatprep.subr.mxu0 %v33502_v59 }
 0x22d   : > { %27410 = vmatmul.mubr.f32.vlgmr.msra.gmra.mxu1 %v29879_v34  ;;  %27420 = vmatmul.mubr.f32.vlgmr.msra.gmra.mxu0 %v29400_v23 }
 0x22e   : > { %27412 = vmatprep.mubr.f32.mxu1 %v29887_v63  ;;  %27423 = vmatpush3.msra.mxu1 %v4605_v62 }
 0x22f   : > { %27430 = vmatpush3.msra.mxu0 %v29960_v35  ;;  %27424 = vmatprep.subr.mxu1 %v33502_v59 }
 0x230   : > { %27431 = vmatprep.subr.mxu0 %v33502_v59  ;;  %27425 = vmatpush3.msra.mxu1 %v4612_v10 }
 0x231   : > { %27413 = vmatmul.mubr.f32.gmra.mxu1 %v29894_v31  ;;  %27432 = vmatpush3.msra.mxu0 %v29967_v4 }
 0x232   : > { %27426 = vmatprep.mubr.msk.f32.mxu1 %vm29303_vm2, %v33502_v59  ;;  %27433 = vmatprep.mubr.msk.f32.mxu0 %vm29303_vm2, %v33502_v59 }
 0x233   : > { %27434 = vmatmul.mubr.f32.vlgmr.msra.gmra.mxu0 %v29380_v12  ;;  %27436 = vmatprep.subr.mxu1 %v33502_v59 }
 0x234   : > { %27443 = vmatprep.subr.mxu0 %v33502_v59  ;;  %27447 = vmatprep.mubr.msk.f32.mxu0 %vm29303_vm2, %v33502_v59 }
 0x235   : > { %27427 = vmatmul.mubr.f32.vlgmr.msra.gmra.mxu1 %v29369_v8  ;;  %27444 = vmatpush3.msra.mxu0 %v29975_v41 }
 0x236   : > { %27437 = vmatpush3.msra.mxu1 %v29952_v29  ;;  %27445 = vmatprep.subr.mxu0 %v33502_v59 }
 0x237   : > { %27438 = vmatprep.subr.mxu1 %v33502_v59  ;;  %27440 = vmatprep.mubr.msk.f32.mxu1 %vm29303_vm2, %v33502_v59 }
 0x238   : > { %27439 = vmatpush3.msra.mxu1 %v29954_v45  ;;  %27446 = vmatpush3.msra.mxu0 %v29978_v7 }
 0x239   : > { %27441 = vmatmul.mubr.f32.vlgmr.msra.gmra.mxu1 %v29389_v15  ;;  %27448 = vmatmul.mubr.f32.vlgmr.msra.gmra.mxu0 %v29369_v8 }
 0x23a   : > { %27450 = vmatprep.subr.mxu1 %v33502_v59  ;;  %27454 = vmatprep.mubr.msk.f32.mxu1 %vm29303_vm2, %v33502_v59 }
 0x23b   : > { %27451 = vmatpush3.msra.mxu1 %v29952_v29  ;;  %27457 = vmatprep.subr.mxu0 %v33502_v59 }
 0x23c   : > { %27452 = vmatprep.subr.mxu1 %v33502_v59  ;;  %27458 = vmatpush3.msra.mxu0 %v29952_v29 }
 0x23d   : > { %27453 = vmatpush3.msra.mxu1 %v29954_v45  ;;  %27459 = vmatprep.subr.mxu0 %v33502_v59 }
 0x23e   : > { %27455 = vmatmul.mubr.f32.vlgmr.msra.gmra.mxu1 %v29369_v8  ;;  %27464 = vmatprep.subr.mxu1 %v33502_v59  ;;  %v25815_v8 = vld [vmem:[%s33396_s2 + $0x40] sm:$0xff] }
 0x23f   : > { %27460 = vmatpush3.msra.mxu0 %v29954_v45  ;;  %27461 = vmatprep.mubr.msk.f32.mxu0 %vm29303_vm2, %v33502_v59  ;;  %v5419_v12 = vsel %vm1192_vm3, %v25815_v8, 0 }
 0x240   : > { %27465 = vmatpush3.msra.mxu1 %v4605_v62  ;;  %27462 = vmatmul.mubr.f32.vlgmr.msra.gmra.mxu0 %v29440_v27  ;;  %v30077_v15 = vand.u32 4294901760, %v5419_v12 }
 0x241   : > { %27466 = vmatprep.subr.mxu1 %v33502_v59  ;;  %27471 = vmatprep.subr.mxu0 %v33502_v59 }
 0x242   : > { %27467 = vmatpush3.msra.mxu1 %v4612_v10  ;;  %27468 = vmatprep.mubr.msk.f32.mxu1 %vm29303_vm2, %v33502_v59  ;;  %v30080_v23 = vsub.f32 %v5419_v12, %v30077_v15 }
 0x243   : > { %27472 = vmatpush3.msra.mxu0 %v29960_v35  ;;  %27469 = vmatmul.mubr.f32.vlgmr.msra.gmra.mxu1 %v29398_v22 }
 0x244   : > { %27473 = vmatprep.subr.mxu0 %v33502_v59  ;;  %27478 = vmatprep.subr.mxu1 %v33502_v59 }
 0x245   : > { %27474 = vmatpush3.msra.mxu0 %v29967_v4  ;;  %27475 = vmatprep.mubr.msk.f32.mxu0 %vm29303_vm2, %v33502_v59 }
 0x246   : > { %27479 = vmatpush3.msra.mxu1 %v29952_v29  ;;  %27476 = vmatmul.mubr.f32.vlgmr.msra.gmra.mxu0 %v29405_v24  ;;  %v33409_v24 = vand.u32 4294901760, %v30080_v23 }
 0x247   : > { %27480 = vmatprep.subr.mxu1 %v33502_v59  ;;  %27485 = vmatprep.subr.mxu0 %v33502_v59 }
 0x248   : > { %27481 = vmatpush3.msra.mxu1 %v29954_v45  ;;  %27482 = vmatprep.mubr.msk.f32.mxu1 %vm29303_vm2, %v33502_v59 }
 0x249   : > { %27486 = vmatpush3.msra.mxu0 %v29975_v41  ;;  %27483 = vmatmul.mubr.f32.vlgmr.msra.gmra.mxu1 %v29417_v25  ;;  %v5499_v25 = vsub.f32 %v30080_v23, %v33409_v24 }
 0x24a   : > { %27487 = vmatprep.subr.mxu0 %v33502_v59  ;;  %27492 = vmatprep.subr.mxu1 %v33502_v59 }
 0x24b   : > { %27488 = vmatpush3.msra.mxu0 %v29978_v7  ;;  %27489 = vmatprep.mubr.msk.f32.mxu0 %vm29303_vm2, %v33502_v59 }
 0x24c   : > { %27493 = vmatpush3.msra.mxu1 %v29952_v29  ;;  %27490 = vmatmul.mubr.f32.vlgmr.msra.gmra.mxu0 %v29398_v22 }
 0x24d   : > { %27494 = vmatprep.subr.mxu1 %v33502_v59  ;;  %27496 = vmatprep.mubr.msk.f32.mxu1 %vm29303_vm2, %v33502_v59 }
 0x24e   : > { %27495 = vmatpush3.msra.mxu1 %v29954_v45 }
 0x24f   : > { %27497 = vmatmul.mubr.f32.vlgmr.msra.gmra.mxu1 %v29398_v22  ;;  %v5500_v22 = vand.u32 4294901760, %v5499_v25 }
 0x250   : > { %27509 = vmatprep.mubr.f32.mxu1 %v30077_v15 }
 0x251   : > { %27501 = vmatprep.mubr.f32.mxu0 %v5500_v22 }
 0x2bd   : > { %v27323_v27 = vpop.f32.mrf.mxu0 }
 0x2bf   : > { %v30087_v36 = vpop.f32.mrf.mxu0 }
 0x2c1   : > { %v27326_v34 = vpop.f32.mrf.mxu0 }
 0x2c3   : > { %v30089_v63 = vpop.f32.mrf.mxu0 }
 0x2c5   : > { %v27331_v31 = vpop.f32.mrf.mxu1  ;;  %v27339_v18 = vpop.f32.mrf.mxu0 }
 0x2c6   : > { %v3502_v54 = vadd.f32 %v27331_v31, %v27323_v27 }
 0x2c7   : > { %v30091_v21 = vpop.f32.mrf.mxu1  ;;  %v30093_v42 = vpop.f32.mrf.mxu0 }
 0x2c8   : > { %v3595_v51 = vadd.f32 %v27339_v18, %v3502_v54 }
 0x2c9   : > { %v27334_v53 = vpop.f32.mrf.mxu1  ;;  %v27342_v61 = vpop.f32.mrf.mxu0 }
 0x2ca   : > { %v3514_v0 = vadd.f32 %v27334_v53, %v27326_v34 }
 0x2cb   : > { %v30095_v26 = vpop.f32.mrf.mxu1  ;;  %v30097_v44 = vpop.f32.mrf.mxu0 }
 0x2cc   : > { %v3609_v6 = vadd.f32 %v27342_v61, %v3514_v0 }
 0x2cd   : > { %v27347_v17 = vpop.f32.mrf.mxu1  ;;  %v27355_v40 = vpop.f32.mrf.mxu0 }
 0x2ce   : > { %v3691_v29 = vadd.f32 %v27347_v17, %v3595_v51 }
 0x2cf   : > { %v30099_v45 = vpop.f32.mrf.mxu1  ;;  %v30101_v35 = vpop.f32.mrf.mxu0 }
 0x2d0   : > { %v3787_v4 = vadd.f32 %v27355_v40, %v3691_v29 }
 0x2d1   : > { %v27350_v41 = vpop.f32.mrf.mxu1  ;;  %v27358_v7 = vpop.f32.mrf.mxu0 }
 0x2d2   : > { %v3707_v47 = vadd.f32 %v27350_v41, %v3609_v6 }
 0x2d3   : > { %v30103_v16 = vpop.f32.mrf.mxu1  ;;  %v30105_v20 = vpop.f32.mrf.mxu0 }
 0x2d4   : > { %33504 = vst [vmem:[#allocation9_spill] sm:$0xff] %v30103_v16  ;;  %33505 = vst [vmem:[#allocation10_spill] sm:$0xff] %v30105_v20  ;;  %v3799_v62 = vadd.f32 %v27358_v7, %v3707_v47 }
 0x2d5   : > { %v27363_v10 = vpop.f32.mrf.mxu1  ;;  %v27371_v8 = vpop.f32.mrf.mxu0 }
 0x2d6   : > { %v3877_v12 = vadd.f32 %v27363_v10, %v3787_v4 }
 0x2d7   : > { %v30107_v25 = vpop.f32.mrf.mxu1  ;;  %v30109_v22 = vpop.f32.mrf.mxu0 }
 0x2d8   : > { %33506 = vst [vmem:[#allocation11_spill] sm:$0xff] %v30107_v25  ;;  %v3893_v27 = vadd.f32 %v3877_v12, %v29823_v5 }
 0x2d9   : > { %v27366_v34 = vpop.f32.mrf.mxu1  ;;  %v27374_v31 = vpop.f32.mrf.mxu0 }
 0x2da   : > { %v3889_v18 = vadd.f32 %v27366_v34, %v3799_v62 }
 0x2db   : > { %v30112_v54 = vpop.f32.mrf.mxu1  ;;  %v30114_v51 = vpop.f32.mrf.mxu0 }
 0x2dc   : > { %33507 = vst [vmem:[#allocation12_spill] sm:$0xff] %v30112_v54  ;;  %v3895_v53 = vadd.f32 %v3889_v18, %v29833_v43 }
 0x2dd   : > { %v27379_v61 = vpop.f32.mrf.mxu1  ;;  %v27387_v0 = vpop.f32.mrf.mxu0 }
 0x2de   : > { %v4098_v6 = vadd.f32 %v27379_v61, %v27371_v8 }
 0x2df   : > { %v30117_v17 = vpop.f32.mrf.mxu1  ;;  %v30119_v40 = vpop.f32.mrf.mxu0 }
 0x2e0   : > { %v4191_v29 = vadd.f32 %v27387_v0, %v4098_v6 }
 0x2e1   : > { %v27382_v4 = vpop.f32.mrf.mxu1  ;;  %v27390_v41 = vpop.f32.mrf.mxu0 }
 0x2e2   : > { %v4110_v5 = vadd.f32 %v27382_v4, %v27374_v31  ;;  %v25816_v31 = vld [vmem:[%s33396_s2 + $0x48] sm:$0xff] }
 0x2e3   : > { %v30121_v7 = vpop.f32.mrf.mxu1  ;;  %v30123_v47 = vpop.f32.mrf.mxu0 }
 0x2e4   : > { %33508 = vst [vmem:[#allocation13_spill] sm:$0xff] %v30123_v47  ;;  %v4205_v62 = vadd.f32 %v27390_v41, %v4110_v5 }
 0x2e5   : > { %v27395_v10 = vpop.f32.mrf.mxu1  ;;  %v27403_v12 = vpop.f32.mrf.mxu0 }
 0x2e6   : > { %v4287_v34 = vadd.f32 %v27395_v10, %v4191_v29  ;;  %v25817_v29 = vld [vmem:[%s33396_s2 + $0x50] sm:$0xff] }
 0x2e7   : > { %v30125_v43 = vpop.f32.mrf.mxu1  ;;  %v30127_v18 = vpop.f32.mrf.mxu0 }
 0x2e8   : > { %33509 = vst [vmem:[#allocation14_spill] sm:$0xff] %v30127_v18  ;;  %v4383_v8 = vadd.f32 %v27403_v12, %v4287_v34  ;;  %v5422_v12 = vsel %vm1192_vm3, %v25816_v31, 0 }
 0x2e9   : > { %v27398_v61 = vpop.f32.mrf.mxu1  ;;  %v27406_v24 = vpop.f32.mrf.mxu0 }
 0x2ea   : > { %v4303_v55 = vadd.f32 %v27398_v61, %v4205_v62  ;;  %v5425_v61 = vsel %vm1192_vm3, %v25817_v29, 0 }
 0x2eb   : > { %v30129_v0 = vpop.f32.mrf.mxu1  ;;  %v30131_v6 = vpop.f32.mrf.mxu0  ;;  %v30150_v38 = vand.u32 4294901760, %v5425_v61 }
 0x2ec   : > { %33510 = vst [vmem:[#allocation15_spill] sm:$0xff] %v30129_v0  ;;  %33511 = vst [vmem:[#allocation16_spill] sm:$0xff] %v30131_v6  ;;  %v4395_v4 = vadd.f32 %v27406_v24, %v4303_v55  ;;  %v25818_v6 = vld [vmem:[%s33396_s2 + $0x58] sm:$0xff]  ;;  %v30148_v24 = vand.u32 4294901760, %v5422_v12 }
 0x2ed   : > { %v27411_v41 = vpop.f32.mrf.mxu1  ;;  %v4568_v5 = vpop.f32.mrf.mxu0 }
 0x2ee   : > { %v4473_v10 = vadd.f32 %v27411_v41, %v4383_v8  ;;  %v5428_v8 = vsel %vm1192_vm3, %v25818_v6, 0  ;;  %v30158_v0 = vsub.f32 %v5422_v12, %v30148_v24 }
 0x2ef   : > { %v30140_v34 = vpop.f32.mrf.mxu1  ;;  %v27421_v62 = vpop.f32.mrf.mxu0 }
 0x2f0   : > { %33512 = vst [vmem:[#allocation17_spill] sm:$0xff] %v30140_v34  ;;  %v30146_v54 = vadd.f32 %v4473_v10, %v3893_v27  ;;  %v30160_v27 = vand.u32 4294901760, %v5428_v8 }
 0x2f1   : > { %v27414_v55 = vpop.f32.mrf.mxu1 }
 0x2f2   : > { %33513 = vst [vmem:[#allocation18_spill] sm:$0xff] %v30146_v54  ;;  %v4485_v20 = vadd.f32 %v27414_v55, %v4395_v4  ;;  %v30163_v54 = vsub.f32 %v5425_v61, %v30150_v38 }
 0x2f3   : > { %v30153_v31 = vpop.f32.mrf.mxu1  ;;  %v4725_v41 = vpop.f32.mrf.mxu0 }
 0x2f4   : > { %33514 = vst [vmem:[#allocation19_spill] sm:$0xff] %v30153_v31  ;;  %v30155_v62 = vadd.f32 %v4485_v20, %v3895_v53  ;;  %v33412_v31 = vand.u32 4294901760, %v30158_v0  ;;  %v30167_v20 = vsub.f32 %v5428_v8, %v30160_v27 }
 0x2f5   : > { %v4649_v29 = vpop.f32.mrf.mxu1  ;;  %v27435_v34 = vpop.f32.mrf.mxu0 }
 0x2f6   : > { %33515 = vst [vmem:[#allocation20_spill] sm:$0xff] %v30155_v62  ;;  %v4650_v10 = vadd.f32 %v4649_v29, %v4568_v5  ;;  %v33413_v34 = vand.u32 4294901760, %v30163_v54  ;;  %v5509_v5 = vsub.f32 %v30158_v0, %v33412_v31  ;;  %v33414_v61 = vand.u32 4294901760, %v30167_v20 }
 0x2f7   : > { %v27428_v4 = vpop.f32.mrf.mxu1 }
 0x2f8   : > { %v4726_v55 = vadd.f32 %v4725_v41, %v4650_v10  ;;  %v5519_v29 = vsub.f32 %v30163_v54, %v33413_v34 }
 0x2f9   : > { %v4800_v18 = vpop.f32.mrf.mxu1  ;;  %v4877_v6 = vpop.f32.mrf.mxu0 }
 0x2fa   : > { %v4801_v53 = vadd.f32 %v4800_v18, %v4726_v55  ;;  %v25819_v18 = vld [vmem:[%s33397_s3 + $0x40] sm:$0xff]  ;;  %v5510_v55 = vand.u32 4294901760, %v5509_v5 }
 0x2fb   : > { %v27442_v12 = vpop.f32.mrf.mxu1  ;;  %v27449_v62 = vpop.f32.mrf.mxu0 }
 0x2fc   : > { %v4878_v25 = vadd.f32 %v4877_v6, %v4801_v53  ;;  %v5529_v6 = vsub.f32 %v30167_v20, %v33414_v61  ;;  %v5520_v12 = vand.u32 4294901760, %v5519_v29 }
 0x2fe   : > { %v4950_v41 = vpop.f32.mrf.mxu1 }
 0x2ff   : > { %v4951_v10 = vadd.f32 %v4950_v41, %v4878_v25  ;;  %v6015_v41 = vsel %vm1192_vm3, %v25819_v18, 0  ;;  %v25821_v18 = vld [vmem:[%s33397_s3 + $0x50] sm:$0xff] }
 0x300   : > { %v27456_v8 = vpop.f32.mrf.mxu1  ;;  %v5027_v4 = vpop.f32.mrf.mxu0 }
 0x301   : > { %v30180_v62 = vand.u32 4294901760, %v4951_v10  ;;  %v25820_v8 = vld [vmem:[%s33397_s3 + $0x48] sm:$0xff] }
 0x302   : > { %v27463_v53 = vpop.f32.mrf.mxu0  ;;  %v6018_v9 = vsel %vm1192_vm3, %v25820_v8, 0 }
 0x303   : > { %v5568_v31 = vsub.f32 %v4951_v10, %v30180_v62  ;;  %27499 = vmatprep.subr.mxu0 %v30180_v62  ;;  %v5108_v25 = vpop.f32.mrf.mxu1  ;;  %v5530_v53 = vand.u32 4294901760, %v5529_v6  ;;  %v30192_v10 = vand.u32 4294901760, %v6015_v41 }
 0x304   : > { %27500 = vmatpush3.msra.mxu0 %v30180_v62  ;;  %v5109_v5 = vadd.f32 %v5108_v25, %v5027_v4  ;;  %v25822_v4 = vld [vmem:[%s33397_s3 + $0x58] sm:$0xff]  ;;  %v6021_v25 = vsel %vm1192_vm3, %v25821_v18, 0 }
 0x305   : > { %27502 = vmatmul.mubr.f32.vlgmr.msra.gmra.mxu0 %v5510_v55  ;;  %27515 = vmatprep.subr.mxu0 %v5568_v31  ;;  %v5569_v34 = vand.u32 4294901760, %v5568_v31  ;;  %v27470_v61 = vpop.f32.mrf.mxu1  ;;  %v30206_v16 = vsub.f32 %v6015_v41, %v30192_v10 }
 0x306   : > { %27516 = vmatpush3.msra.mxu0 %v5568_v31  ;;  %27504 = vmatprep.mubr.f32.mxu0 %v5520_v12  ;;  %v5184_v29 = vpop.f32.mrf.mxu0  ;;  %v30201_v12 = vand.u32 4294901760, %v6018_v9 }
 0x307   : > { %27531 = vmatprep.subr.mxu0 %v5569_v34  ;;  %v5185_v30 = vadd.f32 %v5184_v29, %v5109_v5  ;;  %v5570_v47 = vsub.f32 %v5568_v31, %v5569_v34  ;;  %v6024_v31 = vsel %vm1192_vm3, %v25822_v4, 0  ;;  %v33416_v18 = vand.u32 4294901760, %v30206_v16 }
 0x308   : > { %v27477_v61 = vpop.f32.mrf.mxu0 }
 0x309   : > { %27505 = vmatmul.mubr.f32.gmra.mxu0 %v5530_v53  ;;  %v5259_v55 = vpop.f32.mrf.mxu1  ;;  %v5571_v6 = vand.u32 4294901760, %v5570_v47  ;;  %v30209_v61 = vand.u32 4294901760, %v6021_v25  ;;  %v30216_v47 = vand.u32 4294901760, %v6024_v31 }
 0x30a   : > { %v5260_v8 = vadd.f32 %v5259_v55, %v5185_v30  ;;  %27517 = vmatprep.mubr.f32.mxu0 %v30080_v23  ;;  %v30214_v30 = vsub.f32 %v6018_v9, %v30201_v12 }
 0x30b   : > { %27507 = vmatprep.subr.mxu1 %v5571_v6  ;;  %v27484_v5 = vpop.f32.mrf.mxu1  ;;  %v30225_v9 = vsub.f32 %v6021_v25, %v30209_v61  ;;  %v6095_v25 = vsub.f32 %v30206_v16, %v33416_v18 }
 0x30c   : > { %27508 = vmatpush3.msra.mxu1 %v5571_v6  ;;  %v5336_v29 = vpop.f32.mrf.mxu0  ;;  %v33415_v6 = vand.u32 4294901760, %v30214_v30 }
 0x30d   : > { %v5337_v53 = vadd.f32 %v5336_v29, %v5260_v8  ;;  %27510 = vmatmul.mubr.f32.vlgmr.msra.gmra.mxu1 %v30148_v24  ;;  %27518 = vmatmul.mubr.f32.vlgmr.msra.gmra.mxu0 %v30158_v0  ;;  %v30231_v8 = vsub.f32 %v6024_v31, %v30216_v47  ;;  %v33516_v29 = vand.u32 4294901760, %v30080_v23  ;;  %v33517_v31 = vand.u32 4294901760, %v30158_v0 }
 0x30e   : > { %27523 = vmatprep.subr.mxu1 %v30180_v62  ;;  %27532 = vmatpush3.msra.mxu0 %v5569_v34  ;;  %v27491_v41 = vpop.f32.mrf.mxu0  ;;  %v6105_v23 = vsub.f32 %v30214_v30, %v33415_v6  ;;  %v33519_v6 = vand.u32 4294901760, %v30167_v20 }
 0x30f   : > { %27524 = vmatpush3.msra.mxu1 %v30180_v62  ;;  %v5409_v4 = vpop.f32.mrf.mxu1  ;;  %27512 = vmatprep.mubr.f32.mxu1 %v30150_v38  ;;  %v33417_v41 = vand.u32 4294901760, %v30225_v9 }
 0x310   : > { %v5410_v55 = vadd.f32 %v5409_v4, %v5337_v53  ;;  %27539 = vmatprep.subr.mxu1 %v30180_v62  ;;  %27520 = vmatprep.mubr.f32.mxu0 %v30163_v54  ;;  %v6124_v4 = vand.u32 4294901760, %v30231_v8 }
 0x311   : > { %27513 = vmatmul.mubr.f32.gmra.mxu1 %v30160_v27  ;;  %27521 = vmatmul.mubr.f32.gmra.mxu0 %v30167_v20  ;;  %v27498_v34 = vpop.f32.mrf.mxu1 }
 0x312   : > { %v30233_v5 = vand.u32 4294901760, %v5410_v55  ;;  %27525 = vmatprep.mubr.f32.mxu1 %v33516_v29  ;;  %27533 = vmatprep.mubr.f32.mxu0 %v30077_v15  ;;  %v33518_v34 = vand.u32 4294901760, %v30163_v54  ;;  %v6106_v54 = vand.u32 4294901760, %v6105_v23 }
 0x314   : > { %v6164_v53 = vsub.f32 %v5410_v55, %v30233_v5  ;;  %27547 = vmatprep.subr.mxu0 %v30233_v5  ;;  %v6096_v55 = vand.u32 4294901760, %v6095_v25 }
 0x315   : > { %27526 = vmatmul.mubr.f32.vlgmr.msra.gmra.mxu1 %v33517_v31  ;;  %27534 = vmatmul.mubr.f32.vlgmr.msra.gmra.mxu0 %v30148_v24  ;;  %v6115_v31 = vsub.f32 %v30225_v9, %v33417_v41 }
 0x316   : > { %27540 = vmatpush3.msra.mxu1 %v30180_v62  ;;  %27528 = vmatprep.mubr.f32.mxu1 %v33518_v34  ;;  %v6165_v29 = vand.u32 4294901760, %v6164_v53  ;;  %v6125_v62 = vsub.f32 %v30231_v8, %v6124_v4  ;;  %v25826_v34 = vld [vmem:[%s29346_s24 + $0x8] sm:$0xff] }
 0x317   : > { %27536 = vmatprep.mubr.f32.mxu0 %v30150_v38  ;;  %27548 = vmatpush3.msra.mxu0 %v30233_v5  ;;  %v6116_v18 = vand.u32 4294901760, %v6115_v31  ;;  %v6639_v20 = vsel %vm263_vm1, %v25826_v34, 0  ;;  %v33530_v31 = vand.u32 4294901760, %v30214_v30 }
 0x318   : > { %27563 = vmatprep.subr.mxu0 %v6164_v53  ;;  %v6166_v0 = vsub.f32 %v6164_v53, %v6165_v29  ;;  %v6126_v41 = vand.u32 4294901760, %v6125_v62 }
 0x319   : > { %27529 = vmatmul.mubr.f32.gmra.mxu1 %v33519_v6  ;;  %27537 = vmatmul.mubr.f32.gmra.mxu0 %v30160_v27  ;;  %v30278_v6 = vand.u32 4294901760, %v6639_v20 }
 0x31a   : > { %27541 = vmatprep.mubr.f32.mxu1 %v30077_v15  ;;  %27549 = vmatprep.mubr.f32.mxu0 %v6096_v55  ;;  %v6167_v25 = vand.u32 4294901760, %v6166_v0  ;;  %v6637_v15 = vld [vmem:[%s33394_s0 + $0x8] sm:$0xff]  ;;  %v33527_v55 = vand.u32 4294901760, %v30206_v16 }
 0x31b   : > { %33520 = vst [vmem:[#allocation21_spill] sm:$0xff] %v30278_v6 }
 0x31c   : > { %27555 = vmatprep.subr.mxu1 %v6167_v25 }
 0x31d   : > { %27542 = vmatmul.mubr.f32.vlgmr.msra.gmra.mxu1 %v30148_v24  ;;  %27550 = vmatmul.mubr.f32.vlgmr.msra.gmra.mxu0 %v6106_v54  ;;  %v6636_v24 = vld [vmem:[%s33394_s0] sm:$0xff] }
 0x31e   : > { %27556 = vmatpush3.msra.mxu1 %v6167_v25  ;;  %27564 = vmatpush3.msra.mxu0 %v6164_v53  ;;  %v30282_v53 = vand.u32 4294901760, %v6637_v15  ;;  %v30284_v23 = vand.u32 4294901760, %v6636_v24 }
 0x31f   : > { %27571 = vmatprep.subr.mxu1 %v30233_v5  ;;  %27579 = vmatprep.subr.mxu0 %v6165_v29 }
 0x320   : > { %27544 = vmatprep.mubr.f32.mxu1 %v30150_v38  ;;  %27552 = vmatprep.mubr.f32.mxu0 %v6116_v18  ;;  %33521 = vst [vmem:[#allocation22_spill] sm:$0xff] %v30282_v53  ;;  %33522 = vst [vmem:[#allocation23_spill] sm:$0xff] %v30284_v23  ;;  %v30289_v38 = vsub.f32 %v6639_v20, %v30278_v6  ;;  %v30300_v18 = vsub.f32 %v6636_v24, %v30284_v23 }
 0x321   : > { %27545 = vmatmul.mubr.f32.gmra.mxu1 %v30160_v27  ;;  %27553 = vmatmul.mubr.f32.gmra.mxu0 %v6126_v41  ;;  %v30293_v27 = vsub.f32 %v6637_v15, %v30282_v53 }
 0x322   : > { %27557 = vmatprep.mubr.f32.mxu1 %v30192_v10  ;;  %27565 = vmatprep.mubr.f32.mxu0 %v30206_v16  ;;  %33523 = vst [vmem:[#allocation24_spill] sm:$0xff] %v30289_v38  ;;  %33525 = vst [vmem:[#allocation26_spill] sm:$0xff] %v30300_v18  ;;  %v30305_v41 = vand.u32 4294901760, %v30289_v38  ;;  %v30314_v0 = vand.u32 4294901760, %v30300_v18  ;;  %v33531_v16 = vand.u32 4294901760, %v30225_v9 }
 0x323   : > { %33524 = vst [vmem:[#allocation25_spill] sm:$0xff] %v30293_v27 }
 0x324   : > { %33526 = vst [vmem:[#allocation27_spill] sm:$0xff] %v30305_v41  ;;  %33529 = vst [vmem:[#allocation29_spill] sm:$0xff] %v30314_v0  ;;  %v6711_v54 = vsub.f32 %v30289_v38, %v30305_v41 }
 0x325   : > { %27558 = vmatmul.mubr.f32.vlgmr.msra.gmra.mxu1 %v30201_v12  ;;  %27566 = vmatmul.mubr.f32.vlgmr.msra.gmra.mxu0 %v30214_v30  ;;  %v6757_v30 = vsub.f32 %v30300_v18, %v30314_v0 }
 0x326   : > { %27572 = vmatpush3.msra.mxu1 %v30233_v5  ;;  %27580 = vmatpush3.msra.mxu0 %v6165_v29  ;;  %v30311_v29 = vand.u32 4294901760, %v30293_v27 }
 0x327   : > { %27587 = vmatprep.subr.mxu1 %v30233_v5  ;;  %27560 = vmatprep.mubr.f32.mxu1 %v30209_v61  ;;  %v6758_v25 = vand.u32 4294901760, %v6757_v30 }
 0x328   : > { %27568 = vmatprep.mubr.f32.mxu0 %v30225_v9  ;;  %27595 = vmatprep.subr.mxu0 %v33502_v59  ;;  %33528 = vst [vmem:[#allocation28_spill] sm:$0xff] %v30311_v29  ;;  %v6750_v62 = vsub.f32 %v30293_v27, %v30311_v29  ;;  %v30335_v9 = vand.u32 4294901760, %v6711_v54 }
 0x329   : > { %27561 = vmatmul.mubr.f32.gmra.mxu1 %v30216_v47  ;;  %27569 = vmatmul.mubr.f32.gmra.mxu0 %v30231_v8 }
 0x32a   : > { %27573 = vmatprep.mubr.f32.mxu1 %v33527_v55  ;;  %27581 = vmatprep.mubr.f32.mxu0 %v30192_v10  ;;  %33532 = vst [vmem:[#allocation30_spill] sm:$0xff] %v30335_v9 }
 0x32d   : > { %27574 = vmatmul.mubr.f32.vlgmr.msra.gmra.mxu1 %v33530_v31  ;;  %27582 = vmatmul.mubr.f32.vlgmr.msra.gmra.mxu0 %v30201_v12 }
 0x32e   : > { %27588 = vmatpush3.msra.mxu1 %v30233_v5  ;;  %27576 = vmatprep.mubr.f32.mxu1 %v33531_v16  ;;  %v6751_v5 = vand.u32 4294901760, %v6750_v62 }
 0x32f   : > { %27584 = vmatprep.mubr.f32.mxu0 %v30209_v61  ;;  %27596 = vmatpush3.msra.mxu0 %v30282_v53 }
 0x330   : > { %27597 = vmatprep.subr.mxu0 %v33502_v59  ;;  %27602 = vmatprep.subr.mxu1 %v33502_v59 }
 0x331   : > { %27577 = vmatmul.mubr.f32.gmra.mxu1 %v6124_v4  ;;  %27585 = vmatmul.mubr.f32.gmra.mxu0 %v30216_v47 }
 0x332   : > { %27589 = vmatprep.mubr.f32.mxu1 %v30192_v10  ;;  %27598 = vmatpush3.msra.mxu0 %v30284_v23 }
 0x333   : > { %27599 = vmatprep.mubr.msk.f32.mxu0 %vm29303_vm2, %v33502_v59  ;;  %27609 = vmatprep.subr.mxu0 %v33502_v59 }
 0x335   : > { %27590 = vmatmul.mubr.f32.vlgmr.msra.gmra.mxu1 %v30201_v12  ;;  %27600 = vmatmul.mubr.f32.vlgmr.msra.gmra.mxu0 %v30335_v9 }
 0x336   : > { %27592 = vmatprep.mubr.f32.mxu1 %v30209_v61  ;;  %27603 = vmatpush3.msra.mxu1 %v6751_v5 }
 0x337   : > { %27604 = vmatprep.subr.mxu1 %v33502_v59  ;;  %27610 = vmatpush3.msra.mxu0 %v30293_v27  ;;  %v1979_v27 = vadd.f32 %v29789_v28, %v29783_v56  ;;  %v1991_v56 = vadd.f32 %v29793_v37, %v29787_v46  ;;  %v4092_v28 = vadd.f32 %v30117_v17, %v30109_v22 }
 0x338   : > { %27605 = vmatpush3.msra.mxu1 %v6758_v25  ;;  %27611 = vmatprep.subr.mxu0 %v33502_v59  ;;  %v3508_v46 = vadd.f32 %v30095_v26, %v30089_v63 }
 0x339   : > { %27593 = vmatmul.mubr.f32.gmra.mxu1 %v30216_v47  ;;  %27616 = vmatprep.subr.mxu1 %v33502_v59  ;;  %v2085_v17 = vadd.f32 %v29795_v39, %v1991_v56  ;;  %v33539_v56 = vld [vmem:[#allocation13_spill] sm:$0xff] }
 0x33a   : > { %27606 = vmatprep.mubr.msk.f32.mxu1 %vm29303_vm2, %v33502_v59  ;;  %27612 = vmatpush3.msra.mxu0 %v30300_v18 }
 0x33b   : > { %27613 = vmatprep.mubr.msk.f32.mxu0 %vm29303_vm2, %v33502_v59  ;;  %27623 = vmatprep.subr.mxu0 %v33502_v59 }
 0x33c   : > { %27614 = vmatmul.mubr.f32.vlgmr.msra.gmra.mxu0 %v30289_v38 }
 0x33d   : > { %27607 = vmatmul.mubr.f32.vlgmr.msra.gmra.mxu1 %v30278_v6  ;;  %27624 = vmatpush3.msra.mxu0 %v30311_v29 }
 0x33e   : > { %27617 = vmatpush3.msra.mxu1 %v30282_v53  ;;  %27620 = vmatprep.mubr.msk.f32.mxu1 %vm29303_vm2, %v33502_v59 }
 0x33f   : > { %27618 = vmatprep.subr.mxu1 %v33502_v59  ;;  %27625 = vmatprep.subr.mxu0 %v33502_v59 }
 0x340   : > { %27619 = vmatpush3.msra.mxu1 %v30284_v23  ;;  %27626 = vmatpush3.msra.mxu0 %v30314_v0  ;;  %v1384_v0 = vadd.f32 %v29765_v57, %v29761_v48 }
 0x341   : > { %27621 = vmatmul.mubr.f32.vlgmr.msra.gmra.mxu1 %v30305_v41  ;;  %27630 = vmatprep.subr.mxu1 %v33502_v59 }
 0x342   : > { %27627 = vmatprep.mubr.msk.f32.mxu0 %vm29303_vm2, %v33502_v59  ;;  %27631 = vmatpush3.msra.mxu1 %v30282_v53 }
 0x343   : > { %27628 = vmatmul.mubr.f32.vlgmr.msra.gmra.mxu0 %v30278_v6  ;;  %27632 = vmatprep.subr.mxu1 %v33502_v59 }
 0x344   : > { %27633 = vmatpush3.msra.mxu1 %v30284_v23  ;;  %27634 = vmatprep.mubr.msk.f32.mxu1 %vm29303_vm2, %v33502_v59 }
 0x345   : > { %27635 = vmatmul.mubr.f32.vlgmr.msra.gmra.mxu1 %v30278_v6  ;;  %27644 = vmatprep.subr.mxu1 %v33502_v59 }
 0x346   : > { %27645 = vmatpush3.msra.mxu1 %v6751_v5  ;;  %27648 = vmatprep.mubr.msk.f32.mxu1 %vm29303_vm2, %v33502_v59 }
 0x347   : > { %27646 = vmatprep.subr.mxu1 %v33502_v59  ;;  %27637 = vmatprep.subr.mxu0 %v33502_v59 }
 0x348   : > { %27647 = vmatpush3.msra.mxu1 %v6758_v25  ;;  %27638 = vmatpush3.msra.mxu0 %v30282_v53  ;;  %v1476_v53 = vadd.f32 %v29767_v58, %v1384_v0 }
 0x349   : > { %27658 = vmatprep.subr.mxu1 %v33502_v59  ;;  %27639 = vmatprep.subr.mxu0 %v33502_v59 }
 0x34a   : > { %27640 = vmatpush3.msra.mxu0 %v30284_v23  ;;  %27641 = vmatprep.mubr.msk.f32.mxu0 %vm29303_vm2, %v33502_v59  ;;  %v1571_v57 = vadd.f32 %v29773_v11, %v1476_v53 }
 0x34b   : > { %27651 = vmatprep.subr.mxu0 %v33502_v59 }
 0x3c5   : > { %v30389_v10 = vpop.f32.mrf.mxu0 }
 0x3c7   : > { %v5502_v12 = vpop.f32.mrf.mxu0 }
 0x3c9   : > { %v30391_v61 = vpop.f32.mrf.mxu0 }
 0x3cb   : > { %v5522_v47 = vpop.f32.mrf.mxu0 }
 0x3cd   : > { %v30393_v8 = vpop.f32.mrf.mxu1  ;;  %v30395_v4 = vpop.f32.mrf.mxu0 }
 0x3cf   : > { %v5608_v34 = vpop.f32.mrf.mxu1  ;;  %v5700_v20 = vpop.f32.mrf.mxu0 }
 0x3d0   : > { %v5609_v37 = vadd.f32 %v5608_v34, %v5502_v12 }
 0x3d1   : > { %v30397_v15 = vpop.f32.mrf.mxu1  ;;  %v30399_v24 = vpop.f32.mrf.mxu0 }
 0x3d2   : > { %v5701_v12 = vadd.f32 %v5700_v20, %v5609_v37  ;;  %v33540_v20 = vld [vmem:[#allocation4_spill] sm:$0xff] }
 0x3d3   : > { %v5620_v55 = vpop.f32.mrf.mxu1  ;;  %v30401_v31 = vpop.f32.mrf.mxu0 }
 0x3d4   : > { %v5621_v34 = vadd.f32 %v5620_v55, %v5522_v47 }
 0x3d5   : > { %v30403_v54 = vpop.f32.mrf.mxu1  ;;  %v30405_v16 = vpop.f32.mrf.mxu0 }
 0x3d6   : > { %33533 = vst [vmem:[#allocation31_spill] sm:$0xff] %v30403_v54  ;;  %33534 = vst [vmem:[#allocation32_spill] sm:$0xff] %v30405_v16  ;;  %v3496_v16 = vadd.f32 %v30091_v21, %v30087_v36  ;;  %v5715_v37 = vadd.f32 %v30401_v31, %v5621_v34  ;;  %v33550_v34 = vld [vmem:[#allocation16_spill] sm:$0xff] }
 0x3d7   : > { %v5795_v62 = vpop.f32.mrf.mxu1  ;;  %v30407_v30 = vpop.f32.mrf.mxu0 }
 0x3d8   : > { %v3588_v36 = vadd.f32 %v30093_v42, %v3496_v16 }
 0x3d9   : > { %v30409_v5 = vpop.f32.mrf.mxu1  ;;  %v30411_v25 = vpop.f32.mrf.mxu0 }
 0x3da   : > { %33535 = vst [vmem:[#allocation33_spill] sm:$0xff] %v30411_v25  ;;  %v2071_v25 = vadd.f32 %v29791_v33, %v1979_v27  ;;  %v1669_v33 = vadd.f32 %v29775_v14, %v1571_v57  ;;  %v3683_v53 = vadd.f32 %v30099_v45, %v3588_v36  ;;  %v30461_v27 = vpop.permute.xlu0 %241  ;;  %v4104_v14 = vadd.f32 %v30121_v7, %v30114_v51  ;;  %v33538_v7 = vld [vmem:[#allocation9_spill] sm:$0xff] }
 0x3db   : > { %v30413_v41 = vpop.f32.mrf.mxu1  ;;  %v30415_v6 = vpop.f32.mrf.mxu0  ;;  %33537 = vst [vmem:[#allocation35_spill] sm:$0xff] %v30461_v27 }
 0x3dc   : > { %v1759_v42 = vadd.f32 %v29781_v13, %v1669_v33  ;;  %v3781_v57 = vadd.f32 %v30101_v35, %v3683_v53  ;;  %v33545_v33 = vld [vmem:[#allocation15_spill] sm:$0xff] }
 0x3dd   : > { %v30417_v38 = vpop.f32.mrf.mxu1  ;;  %v30419_v9 = vpop.f32.mrf.mxu0 }
 0x3de   : > { %33536 = vst [vmem:[#allocation34_spill] sm:$0xff] %v30417_v38  ;;  %v1396_v38 = vadd.f32 %v29769_v2, %v29763_v50  ;;  %v2166_v2 = vadd.f32 %v29797_v49, %v2071_v25 }
 0x3df   : > { %v30423_v29 = vpop.f32.mrf.mxu1  ;;  %v6098_v18 = vpop.f32.mrf.mxu0 }
 0x3e0   : > { %v1490_v50 = vadd.f32 %v29771_v3, %v1396_v38  ;;  %v4184_v3 = vadd.f32 %v30119_v40, %v4092_v28  ;;  %v2264_v63 = vadd.f32 %v29799_v52, %v2166_v2  ;;  %v3602_v40 = vadd.f32 %v30097_v44, %v3508_v46 }
 0x3e1   : > { %v30427_v23 = vpop.f32.mrf.mxu1  ;;  %v30429_v59 = vpop.f32.mrf.mxu0  ;;  %v4198_v28 = vadd.f32 %v33539_v56, %v4104_v14  ;;  %v5796_v44 = vadd.f32 %v5795_v62, %v5701_v12  ;;  %v33546_v62 = vld [vmem:[#allocation8_spill] sm:$0xff] }
 0x3e2   : > { %v1587_v22 = vadd.f32 %v29777_v32, %v1490_v50  ;;  %v2182_v32 = vadd.f32 %v29803_v1, %v2085_v17  ;;  %v4279_v39 = vadd.f32 %v30125_v43, %v4184_v3  ;;  %v2354_v25 = vadd.f32 %v29817_v60, %v2264_v63  ;;  %v33543_v60 = vld [vmem:[#allocation14_spill] sm:$0xff] }
 0x3e3   : > { %v30436_v54 = vpop.f32.mrf.mxu1  ;;  %v6118_v48 = vpop.f32.mrf.mxu0  ;;  %v1780_v1 = vadd.f32 %v1759_v42, %v30461_v27  ;;  %v3699_v43 = vadd.f32 %v33538_v7, %v3602_v40  ;;  %v4295_v46 = vadd.f32 %v33545_v33, %v4198_v28  ;;  %v33547_v42 = vld [vmem:[#allocation17_spill] sm:$0xff]  ;;  %v33548_v40 = vld [vmem:[#allocation10_spill] sm:$0xff] }
 0x3e4   : > { %v1681_v13 = vadd.f32 %v29779_v19, %v1587_v22  ;;  %v33542_v19 = vld [vmem:[#allocation11_spill] sm:$0xff]  ;;  %v4377_v2 = vadd.f32 %v33543_v60, %v4279_v39  ;;  %v5894_v39 = vadd.f32 %v30407_v30, %v5796_v44  ;;  %v5627_v30 = vadd.f32 %v30397_v15, %v30391_v61 }
 0x3e5   : > { %v30444_v58 = vpop.f32.mrf.mxu1  ;;  %v30446_v0 = vpop.f32.mrf.mxu0  ;;  %v3871_v50 = vadd.f32 %v33542_v19, %v3781_v57  ;;  %v2375_v53 = vadd.f32 %v2354_v25, %v1780_v1  ;;  %v3793_v12 = vadd.f32 %v33548_v40, %v3699_v43  ;;  %v33551_v44 = vld [vmem:[#allocation19_spill] sm:$0xff] }
 0x3e6   : > { %v1771_v47 = vadd.f32 %v33540_v20, %v1681_v13  ;;  %v4467_v14 = vadd.f32 %v33547_v42, %v4377_v2  ;;  %v5812_v13 = vadd.f32 %v30413_v41, %v5715_v37  ;;  %v5984_v25 = vadd.f32 %v30423_v29, %v5894_v39 }
 0x3e7   : > { %v6204_v21 = vpop.f32.mrf.mxu1  ;;  %v6296_v11 = vpop.f32.mrf.mxu0  ;;  %v3892_v56 = vadd.f32 %v3871_v50, %v2375_v53  ;;  %v5722_v61 = vadd.f32 %v30399_v24, %v5627_v30 }
 0x3e8   : > { %v6205_v16 = vadd.f32 %v6204_v21, %v6098_v18  ;;  %v33541_v18 = vld [vmem:[#allocation6_spill] sm:$0xff]  ;;  %v30483_v21 = vpop.permute.xlu0 %251 }
 0x3e9   : > { %v27562_v38 = vpop.f32.mrf.mxu1  ;;  %v30458_v49 = vpop.f32.mrf.mxu0  ;;  %v2276_v55 = vadd.f32 %v33541_v18, %v2182_v32  ;;  %33544 = vst [vmem:[#allocation9_spill] sm:$0xff] %v30483_v21  ;;  %v1782_v7 = vadd.f32 %v1771_v47, %v30483_v21  ;;  %v4488_v20 = vadd.f32 %v4467_v14, %v3892_v56  ;;  %v5906_v18 = vadd.f32 %v30415_v6, %v5812_v13 }
 0x3ea   : > { %v6297_v22 = vadd.f32 %v6296_v11, %v6205_v16  ;;  %v4389_v16 = vadd.f32 %v33550_v34, %v4295_v46  ;;  %v6223_v50 = vadd.f32 %v27562_v38, %v30429_v59  ;;  %v5615_v6 = vadd.f32 %v30393_v8, %v30389_v10  ;;  %v33552_v10 = vld [vmem:[#allocation33_spill] sm:$0xff] }
 0x3eb   : > { %v6216_v26 = vpop.f32.mrf.mxu1  ;;  %v6310_v45 = vpop.f32.mrf.mxu0  ;;  %v2366_v3 = vadd.f32 %v33546_v62, %v2276_v55 }
 0x3ec   : > { %v6217_v17 = vadd.f32 %v6216_v26, %v6118_v48  ;;  %v33549_v48 = vld [vmem:[#allocation12_spill] sm:$0xff]  ;;  %v4479_v47 = vadd.f32 %v33551_v44, %v4389_v16  ;;  %v6318_v59 = vadd.f32 %v30458_v49, %v6223_v50  ;;  %v33553_v49 = vld [vmem:[#allocation31_spill] sm:$0xff]  ;;  %v33557_v44 = vld [vmem:[#allocation18_spill] sm:$0xff] }
 0x3ed   : > { %v30472_v51 = vpop.f32.mrf.mxu1  ;;  %v30474_v52 = vpop.f32.mrf.mxu0  ;;  %v3883_v26 = vadd.f32 %v33549_v48, %v3793_v12  ;;  %v2377_v28 = vadd.f32 %v2366_v3, %v1782_v7  ;;  %v5708_v12 = vadd.f32 %v30395_v4, %v5615_v6  ;;  %v33554_v48 = vld [vmem:[#allocation32_spill] sm:$0xff] }
 0x3ee   : > { %v6311_v1 = vadd.f32 %v6310_v45, %v6217_v17  ;;  %v6005_v45 = vadd.f32 %v5984_v25, %v4488_v20 }
 0x3ef   : > { %v6391_v35 = vpop.f32.mrf.mxu1  ;;  %v6489_v36 = vpop.f32.mrf.mxu0  ;;  %v3894_v29 = vadd.f32 %v3883_v26, %v2377_v28  ;;  %v5804_v13 = vadd.f32 %v33553_v49, %v5708_v12  ;;  %v33555_v26 = vld [vmem:[#allocation20_spill] sm:$0xff] }
 0x3f0   : > { %v6392_v57 = vadd.f32 %v6391_v35, %v6297_v22  ;;  %v5996_v35 = vadd.f32 %v30436_v54, %v5906_v18  ;;  %v6211_v54 = vadd.f32 %v30444_v58, %v30419_v9 }
 0x3f1   : > { %v27578_v63 = vpop.f32.mrf.mxu1  ;;  %v27586_v32 = vpop.f32.mrf.mxu0  ;;  %v4490_v46 = vadd.f32 %v4479_v47, %v3894_v29  ;;  %v5900_v4 = vadd.f32 %v33554_v48, %v5804_v13  ;;  %v6605_v29 = vld [vmem:[#allocation3] sm:$0xff]  ;;  %v33558_v13 = vld [vmem:[#allocation22_spill] sm:$0xff] }
 0x3f2   : > { %v6490_v55 = vadd.f32 %v6489_v36, %v6392_v57  ;;  %v5820_v36 = vadd.f32 %v30409_v5, %v5722_v61  ;;  %v6416_v24 = vadd.f32 %v27578_v63, %v6318_v59  ;;  %v6304_v7 = vadd.f32 %v30446_v0, %v6211_v54  ;;  %v7564_v54 = vld [vmem:[%s33396_s2 + $0x10] sm:$0xff] }
 0x3f3   : > { %v6407_v31 = vpop.f32.mrf.mxu1  ;;  %v6501_v11 = vpop.f32.mrf.mxu0  ;;  %v6007_v17 = vadd.f32 %v5996_v35, %v4490_v46 }
 0x3f4   : > { %v6408_v19 = vadd.f32 %v6407_v31, %v6311_v1  ;;  %v5912_v8 = vadd.f32 %v33552_v10, %v5820_v36  ;;  %v6508_v56 = vadd.f32 %v27586_v32, %v6416_v24  ;;  %v6400_v9 = vadd.f32 %v30472_v51, %v6304_v7  ;;  %v33556_v1 = vld [vmem:[#allocation34_spill] sm:$0xff] }
 0x3f5   : > { %v27591_v43 = vpop.f32.mrf.mxu1  ;;  %v30498_v41 = vpop.f32.mrf.mxu0  ;;  %v5990_v28 = vadd.f32 %v33556_v1, %v5900_v4 }
 0x3f6   : > { %v6502_v37 = vadd.f32 %v6501_v11, %v6408_v19  ;;  %v6002_v57 = vadd.f32 %v30427_v23, %v5912_v8  ;;  %v6496_v23 = vadd.f32 %v30474_v52, %v6400_v9  ;;  %v7573_v8 = vsel %vm1192_vm3, %v7564_v54, 0 }
 0x3f7   : > { %v6579_v60 = vpop.f32.mrf.mxu1  ;;  %v27601_v2 = vpop.f32.mrf.mxu0  ;;  %v6006_v47 = vadd.f32 %v5990_v28, %v33557_v44 }
 0x3f8   : > { %v6580_v33 = vadd.f32 %v6579_v60, %v6490_v55  ;;  %v6008_v34 = vadd.f32 %v6002_v57, %v33555_v26  ;;  %v6586_v32 = vadd.f32 %v27591_v43, %v6496_v23  ;;  %v33559_v57 = vmov 0.0   ;;  %v33561_v23 = vld [vmem:[#allocation25_spill] sm:$0xff] }
 0x3f9   : > { %v27594_v15 = vpop.f32.mrf.mxu1 }
 0x3fa   : > { %v6601_v22 = vadd.f32 %v6580_v33, %v6005_v45  ;;  %v6598_v58 = vadd.f32 %v27594_v15, %v6508_v56  ;;  %v6602_v55 = vadd.f32 %v6586_v32, %v6006_v47  ;;  %v30567_v56 = vand.u32 4294901760, %v7573_v8  ;;  %v33562_v32 = vld [vmem:[#allocation26_spill] sm:$0xff]  ;;  %v33563_v47 = vld [vmem:[#allocation28_spill] sm:$0xff] }
 0x3fb   : > { %v6591_v38 = vpop.f32.mrf.mxu1 }
 0x3fc   : > { %v25824_v53 = vmul.f32 -1.442695, %v6601_v22  ;;  %v6592_v62 = vadd.f32 %v6591_v38, %v6502_v37  ;;  %v6871_v3 = vpop.f32.mrf.mxu0  ;;  %v6604_v20 = vadd.f32 %v6598_v58, %v6008_v34  ;;  %v7665_v34 = vsub.f32 %v7573_v8, %v30567_v56 }
 0x3fd   : > { %v6795_v42 = vpop.f32.mrf.mxu1 }
 0x3fe   : > { %29229 = vpow2.f32 %v25824_v53  ;;  %v6603_v14 = vadd.f32 %v6592_v62, %v6007_v17  ;;  %v27615_v40 = vpop.f32.mrf.mxu0  ;;  %v25825_v51 = vmul.f32 -1.442695, %v6604_v20  ;;  %v6796_v61 = vadd.f32 %v6795_v42, %v30498_v41  ;;  %v7562_v41 = vld [vmem:[%s33396_s2] sm:$0xff] }
 0x3ff   : > { %v27608_v5 = vpop.f32.mrf.mxu1  ;;  %v7567_v62 = vsel %vm1192_vm3, %v7562_v41, 0 }
 0x400   : > { %v25823_v39 = vmul.f32 -1.442695, %v6603_v14  ;;  %v6872_v46 = vadd.f32 %v6871_v3, %v6796_v61  ;;  %v7563_v3 = vld [vmem:[%s33396_s2 + $0x8] sm:$0xff]  ;;  %v30543_v14 = vand.u32 4294901760, %v7567_v62  ;;  %v7565_v5 = vld [vmem:[%s33396_s2 + $0x18] sm:$0xff] }
 0x401   : > { %v6946_v31 = vpop.f32.mrf.mxu1  ;;  %v7570_v40 = vsel %vm1192_vm3, %v7563_v3, 0 }
 0x402   : > { %29231 = vpow2.f32 %v25823_v39  ;;  %v6947_v37 = vadd.f32 %v6946_v31, %v6872_v46  ;;  %v30559_v49 = vand.u32 4294901760, %v7570_v40  ;;  %v30565_v7 = vsub.f32 %v7567_v62, %v30543_v14 }
 0x403   : > { %v27622_v63 = vpop.f32.mrf.mxu1  ;;  %v7023_v11 = vpop.f32.mrf.mxu0  ;;  %29233 = vpow2.f32 %v25825_v51  ;;  %v7576_v31 = vsel %vm1192_vm3, %v7565_v5, 0 }
 0x404   : > { %v7024_v22 = vadd.f32 %v7023_v11, %v6947_v37  ;;  %v33560_v63 = vld [vmem:[#allocation23_spill] sm:$0xff]  ;;  %v7655_v48 = vsub.f32 %v7570_v40, %v30559_v49  ;;  %v30582_v4 = vand.u32 4294901760, %v7576_v31  ;;  %v7646_v26 = vand.u32 4294901760, %v30565_v7  ;;  %v8159_v37 = vld [vmem:[%s33397_s3 + $0x10] sm:$0xff] }
 0x405   : > { %v7096_v16 = vpop.f32.mrf.mxu1  ;;  %v27629_v25 = vpop.f32.mrf.mxu0 }
 0x406   : > { %v7097_v59 = vadd.f32 %v7096_v16, %v7024_v22  ;;  %v7656_v1 = vand.u32 4294901760, %v7655_v48  ;;  %v7675_v28 = vsub.f32 %v7576_v31, %v30582_v4  ;;  %v7647_v20 = vsub.f32 %v30565_v7, %v7646_v26 }
 0x407   : > { %v27636_v0 = vpop.f32.mrf.mxu1 }
 0x408   : > { %v30527_v17 = vand.u32 4294901760, %v7097_v59  ;;  %v7666_v0 = vand.u32 4294901760, %v7665_v34  ;;  %v7676_v44 = vand.u32 4294901760, %v7675_v28  ;;  %v7648_v51 = vand.u32 4294901760, %v7647_v20 }
 0x40a   : > { %v30533_v53 = vsub.f32 %v7097_v59, %v30527_v17  ;;  %v8160_v59 = vld [vmem:[%s33397_s3 + $0x18] sm:$0xff] }
 0x40b   : > { %v29230_v30 = vpop.eup %29229  ;;  %v8171_v62 = vsel %vm1192_vm3, %v8160_v59, 0 }
 0x40c   : > { %v6616_v18 = vadd.f32 1.0, %v29230_v30  ;;  %v30549_v10 = vand.u32 4294901760, %v30533_v53  ;;  %v7657_v30 = vsub.f32 %v7655_v48, %v7656_v1 }
 0x40e   : > { %29235 = vrcp.f32 %v6616_v18  ;;  %v7718_v58 = vsub.f32 %v30533_v53, %v30549_v10  ;;  %v7667_v18 = vsub.f32 %v7665_v34, %v7666_v0 }
 0x40f   : > { %v29232_v19 = vpop.eup %29231  ;;  %29237 = vtanh.f32 %v6602_v55  ;;  %v33564_v55 = vld [vmem:[#allocation29_spill] sm:$0xff] }
 0x410   : > { %v6609_v50 = vadd.f32 1.0, %v29232_v19  ;;  %v29234_v60 = vpop.eup %29233  ;;  %v7719_v25 = vand.u32 4294901760, %v7718_v58  ;;  %v7658_v19 = vand.u32 4294901760, %v7657_v30 }
 0x411   : > { %v6626_v35 = vadd.f32 1.0, %v29234_v60  ;;  %v7668_v60 = vand.u32 4294901760, %v7667_v18 }
 0x412   : > { %29239 = vrcp.f32 %v6609_v50  ;;  %v7677_v50 = vsub.f32 %v7675_v28, %v7676_v44 }
 0x413   : > { %29241 = vrcp.f32 %v6626_v35 }
 0x41b   : > { %v29236_v2 = vpop.eup %29235 }
 0x41c   : > { %v29238_v45 = vpop.eup %29237 }
 0x41d   : > { %v6620_v43 = vmul.f32 %v29238_v45, %v29236_v2  ;;  %v7678_v2 = vand.u32 4294901760, %v7677_v50 }
 0x41f   : > { %v29240_v52 = vpop.eup %29239 }
 0x420   : > { %v6612_v33 = vmul.f32 %v29240_v52, %v6605_v29  ;;  %v29242_v6 = vpop.eup %29241  ;;  %v8157_v29 = vld [vmem:[%s33397_s3] sm:$0xff] }
 0x421   : > { %v8162_v45 = vsel %vm1192_vm3, %v8157_v29, 0 }
 0x422   : > { %v6621_v15 = vadd.f32 %v6620_v43, %v6612_v33  ;;  %v30637_v52 = vand.u32 4294901760, %v8162_v45 }
 0x424   : > { %29243 = vtanh.f32 %v6621_v15  ;;  %6630 = vst.msk [vmem:[#allocation3] sm:$0xff] %vm263_vm1, %v6621_v15  ;;  %v30640_v35 = vsub.f32 %v8162_v45, %v30637_v52  ;;  %v8158_v15 = vld [vmem:[%s33397_s3 + $0x8] sm:$0xff] }
 0x426   : > { %v8241_v43 = vand.u32 4294901760, %v30640_v35 }
 0x428   : > { %v8242_v33 = vsub.f32 %v30640_v35, %v8241_v43 }
 0x42a   : > { %v8243_v61 = vand.u32 4294901760, %v8242_v33 }
 0x431   : > { %v29244_v36 = vpop.eup %29243 }
 0x432   : > { %v6629_v38 = vmul.f32 %v29244_v36, %v29242_v6  ;;  %v8165_v6 = vsel %vm1192_vm3, %v8158_v15, 0  ;;  %v8168_v36 = vsel %vm1192_vm3, %v8159_v37, 0 }
 0x434   : > { %6631 = vst.msk [vmem:[#allocation2] sm:$0xff] %vm263_vm1, %v6629_v38  ;;  %6632 = vst.msk [vmem:[%s29351_s27] sm:$0xff] %vm263_vm1, %v6629_v38 }
 0x43b   : > { %v6635_v24 = vld [vmem:[#allocation2] sm:$0xff] }
 0x43c   : > { %v7101_v42 = vsel %vm263_vm1, %v6635_v24, 0 }
 0x43d   : > { %v30546_v12 = vand.u32 4294901760, %v7101_v42 }
 0x43f   : > { %27649 = vmatmul.mubr.f32.vlgmr.msra.gmra.mxu1 %v30546_v12  ;;  %v30557_v39 = vsub.f32 %v7101_v42, %v30546_v12  ;;  %v30666_v42 = vand.u32 4294901760, %v8171_v62 }
 0x440   : > { %27659 = vmatpush3.msra.mxu1 %v33558_v13  ;;  %27662 = vmatprep.mubr.msk.f32.mxu1 %vm29303_vm2, %v33559_v57 }
 0x441   : > { %27660 = vmatprep.subr.mxu1 %v33559_v57  ;;  %v30572_v9 = vand.u32 4294901760, %v30557_v39 }
 0x442   : > { %27661 = vmatpush3.msra.mxu1 %v33560_v63 }
 0x443   : > { %27663 = vmatmul.mubr.f32.vlgmr.msra.gmra.mxu1 %v30572_v9  ;;  %27672 = vmatprep.subr.mxu1 %v33559_v57  ;;  %v7173_v11 = vsub.f32 %v30557_v39, %v30572_v9 }
 0x444   : > { %27673 = vmatpush3.msra.mxu1 %v33558_v13  ;;  %27676 = vmatprep.mubr.msk.f32.mxu1 %vm29303_vm2, %v33559_v57 }
 0x445   : > { %27674 = vmatprep.subr.mxu1 %v33559_v57  ;;  %v30590_v16 = vand.u32 4294901760, %v7173_v11 }
 0x446   : > { %27675 = vmatpush3.msra.mxu1 %v33560_v63 }
 0x447   : > { %27642 = vmatmul.mubr.f32.vlgmr.msra.gmra.mxu0 %v30590_v16  ;;  %27677 = vmatmul.mubr.f32.vlgmr.msra.gmra.mxu1 %v30546_v12 }
 0x448   : > { %27652 = vmatpush3.msra.mxu0 %v33561_v23  ;;  %27655 = vmatprep.mubr.msk.f32.mxu0 %vm29303_vm2, %v33559_v57 }
 0x449   : > { %27653 = vmatprep.subr.mxu0 %v33559_v57  ;;  %27687 = vmatprep.subr.mxu1 %v7719_v25 }
 0x44a   : > { %27654 = vmatpush3.msra.mxu0 %v33562_v32  ;;  %27688 = vmatpush3.msra.mxu1 %v7719_v25 }
 0x44b   : > { %27656 = vmatmul.mubr.f32.vlgmr.msra.gmra.mxu0 %v30557_v39  ;;  %27665 = vmatprep.subr.mxu0 %v33559_v57 }
 0x44c   : > { %27666 = vmatpush3.msra.mxu0 %v33563_v47  ;;  %27669 = vmatprep.mubr.msk.f32.mxu0 %vm29303_vm2, %v33559_v57 }
 0x44d   : > { %27667 = vmatprep.subr.mxu0 %v33559_v57  ;;  %27689 = vmatprep.mubr.f32.mxu1 %v30543_v14 }
 0x44e   : > { %27668 = vmatpush3.msra.mxu0 %v33564_v55  ;;  %27690 = vmatmul.mubr.f32.vlgmr.msra.gmra.mxu1 %v30559_v49 }
 0x44f   : > { %27670 = vmatmul.mubr.f32.vlgmr.msra.gmra.mxu0 %v30546_v12  ;;  %27679 = vmatprep.subr.mxu0 %v30527_v17 }
 0x450   : > { %27680 = vmatpush3.msra.mxu0 %v30527_v17  ;;  %27681 = vmatprep.mubr.f32.mxu0 %v7648_v51 }
 0x451   : > { %27692 = vmatprep.mubr.f32.mxu1 %v30567_v56  ;;  %27695 = vmatprep.subr.mxu0 %v30533_v53 }
 0x452   : > { %27693 = vmatmul.mubr.f32.gmra.mxu1 %v30582_v4  ;;  %27703 = vmatprep.subr.mxu1 %v30527_v17 }
 0x453   : > { %27682 = vmatmul.mubr.f32.vlgmr.msra.gmra.mxu0 %v7658_v19  ;;  %27704 = vmatpush3.msra.mxu1 %v30527_v17 }
 0x454   : > { %27684 = vmatprep.mubr.f32.mxu0 %v7668_v60  ;;  %27696 = vmatpush3.msra.mxu0 %v30533_v53  ;;  %v30660_v53 = vand.u32 4294901760, %v8168_v36 }
 0x455   : > { %27705 = vmatprep.mubr.f32.mxu1 %v7646_v26  ;;  %27711 = vmatprep.subr.mxu0 %v30549_v10 }
 0x456   : > { %27706 = vmatmul.mubr.f32.vlgmr.msra.gmra.mxu1 %v7656_v1  ;;  %27719 = vmatprep.subr.mxu1 %v30527_v17 }
 0x457   : > { %27685 = vmatmul.mubr.f32.gmra.mxu0 %v7678_v2  ;;  %27708 = vmatprep.mubr.f32.mxu1 %v7666_v0 }
 0x458   : > { %27697 = vmatprep.mubr.f32.mxu0 %v30565_v7  ;;  %27720 = vmatpush3.msra.mxu1 %v30527_v17  ;;  %v30658_v17 = vand.u32 4294901760, %v8165_v6  ;;  %v30673_v7 = vsub.f32 %v8171_v62, %v30666_v42 }
 0x45a   : > { %27709 = vmatmul.mubr.f32.gmra.mxu1 %v7676_v44  ;;  %v30664_v24 = vsub.f32 %v8165_v6, %v30658_v17 }
 0x45b   : > { %27698 = vmatmul.mubr.f32.vlgmr.msra.gmra.mxu0 %v7655_v48  ;;  %27721 = vmatprep.mubr.f32.mxu1 %v30543_v14 }
 0x45c   : > { %27700 = vmatprep.mubr.f32.mxu0 %v7665_v34  ;;  %27712 = vmatpush3.msra.mxu0 %v30549_v10  ;;  %v30669_v10 = vsub.f32 %v8168_v36, %v30660_v53  ;;  %v8251_v13 = vand.u32 4294901760, %v30664_v24  ;;  %v8271_v34 = vand.u32 4294901760, %v30673_v7  ;;  %v25828_v36 = vld [vmem:[%s33394_s0 + $0x18] sm:$0xff] }
 0x45e   : > { %27722 = vmatmul.mubr.f32.vlgmr.msra.gmra.mxu1 %v30559_v49  ;;  %v8261_v31 = vand.u32 4294901760, %v30669_v10  ;;  %v8252_v26 = vsub.f32 %v30664_v24, %v8251_v13  ;;  %v8272_v47 = vsub.f32 %v30673_v7, %v8271_v34 }
 0x45f   : > { %27701 = vmatmul.mubr.f32.gmra.mxu0 %v7675_v28  ;;  %27724 = vmatprep.mubr.f32.mxu1 %v30567_v56 }
 0x460   : > { %27713 = vmatprep.mubr.f32.mxu0 %v30543_v14  ;;  %v8262_v1 = vsub.f32 %v30669_v10, %v8261_v31  ;;  %v8253_v30 = vand.u32 4294901760, %v8252_v26  ;;  %v8273_v29 = vand.u32 4294901760, %v8272_v47 }
 0x462   : > { %27725 = vmatmul.mubr.f32.gmra.mxu1 %v30582_v4  ;;  %v8263_v18 = vand.u32 4294901760, %v8262_v1 }
 0x463   : > { %27714 = vmatmul.mubr.f32.vlgmr.msra.gmra.mxu0 %v30559_v49  ;;  %27737 = vmatprep.mubr.f32.mxu1 %v30637_v52 }
 0x464   : > { %27716 = vmatprep.mubr.f32.mxu0 %v30567_v56 }
 0x467   : > { %27717 = vmatmul.mubr.f32.gmra.mxu0 %v30582_v4 }
 0x468   : > { %27729 = vmatprep.mubr.f32.mxu0 %v8243_v61 }
 0x4ff   : > { %v7257_v46 = vpop.f32.mrf.mxu1 }
 0x501   : > { %v27650_v22 = vpop.f32.mrf.mxu1 }
 0x503   : > { %v7408_v38 = vpop.f32.mrf.mxu1 }
 0x505   : > { %v27664_v41 = vpop.f32.mrf.mxu1 }
 0x507   : > { %v7176_v3 = vpop.f32.mrf.mxu0  ;;  %v7558_v54 = vpop.f32.mrf.mxu1 }
 0x508   : > { %v7258_v8 = vadd.f32 %v7257_v46, %v7176_v3  ;;  %v30709_v3 = vand.u32 4294901760, %v25828_v36 }
 0x509   : > { %v27643_v14 = vpop.f32.mrf.mxu0  ;;  %v27678_v40 = vpop.f32.mrf.mxu1 }
 0x50b   : > { %v7333_v5 = vpop.f32.mrf.mxu0 }
 0x50c   : > { %v7334_v49 = vadd.f32 %v7333_v5, %v7258_v8 }
 0x50d   : > { %v27657_v56 = vpop.f32.mrf.mxu0 }
 0x50e   : > { %v7409_v58 = vadd.f32 %v7408_v38, %v7334_v49  ;;  %v27691_v63 = vpop.f32.mrf.mxu1 }
 0x50f   : > { %v7485_v11 = vpop.f32.mrf.mxu0 }
 0x510   : > { %v7486_v48 = vadd.f32 %v7485_v11, %v7409_v58  ;;  %v30676_v4 = vpop.f32.mrf.mxu1  ;;  %v30728_v58 = vsub.f32 %v25828_v36, %v30709_v3 }
 0x511   : > { %v27671_v25 = vpop.f32.mrf.mxu0 }
 0x512   : > { %v7559_v28 = vadd.f32 %v7558_v54, %v7486_v48  ;;  %v27694_v23 = vpop.f32.mrf.mxu1  ;;  %v25827_v54 = vld [vmem:[%s33394_s0 + $0x10] sm:$0xff] }
 0x513   : > { %v27683_v20 = vpop.f32.mrf.mxu0  ;;  %v30721_v5 = vand.u32 4294901760, %v25827_v54 }
 0x514   : > { %v30685_v0 = vand.u32 4294901760, %v7559_v28  ;;  %v7763_v32 = vadd.f32 %v27691_v63, %v27683_v20  ;;  %v30687_v44 = vpop.f32.mrf.mxu1 }
 0x515   : > { %v30692_v51 = vpop.f32.mrf.mxu0  ;;  %v30741_v26 = vsub.f32 %v25827_v54, %v30721_v5 }
 0x516   : > { %v8311_v55 = vsub.f32 %v7559_v28, %v30685_v0  ;;  %27727 = vmatprep.subr.mxu0 %v30685_v0  ;;  %v27707_v19 = vpop.f32.mrf.mxu1  ;;  %v30744_v28 = vand.u32 4294901760, %v30728_v58 }
 0x517   : > { %v27686_v50 = vpop.f32.mrf.mxu0  ;;  %27728 = vmatpush3.msra.mxu0 %v30685_v0 }
 0x518   : > { %27730 = vmatmul.mubr.f32.vlgmr.msra.gmra.mxu0 %v8253_v30  ;;  %27743 = vmatprep.subr.mxu0 %v8311_v55  ;;  %v7775_v60 = vadd.f32 %v27694_v23, %v27686_v50  ;;  %v8312_v2 = vand.u32 4294901760, %v8311_v55  ;;  %v30697_v45 = vpop.f32.mrf.mxu1 }
 0x519   : > { %v30699_v33 = vpop.f32.mrf.mxu0  ;;  %27744 = vmatpush3.msra.mxu0 %v8311_v55  ;;  %27732 = vmatprep.mubr.f32.mxu0 %v8263_v18 }
 0x51a   : > { %27759 = vmatprep.subr.mxu0 %v8312_v2  ;;  %v8313_v61 = vsub.f32 %v8311_v55, %v8312_v2  ;;  %v27710_v15 = vpop.f32.mrf.mxu1 }
 0x51b   : > { %v27699_v46 = vpop.f32.mrf.mxu0 }
 0x51c   : > { %v7856_v37 = vadd.f32 %v27699_v46, %v7763_v32  ;;  %27733 = vmatmul.mubr.f32.gmra.mxu0 %v8273_v29  ;;  %v8314_v22 = vand.u32 4294901760, %v8313_v61  ;;  %v30701_v6 = vpop.f32.mrf.mxu1 }
 0x51d   : > { %v30706_v59 = vpop.f32.mrf.mxu0  ;;  %27745 = vmatprep.mubr.f32.mxu0 %v30640_v35 }
 0x51e   : > { %v7952_v38 = vadd.f32 %v27707_v19, %v7856_v37  ;;  %27735 = vmatprep.subr.mxu1 %v8314_v22  ;;  %v27723_v62 = vpop.f32.mrf.mxu1 }
 0x51f   : > { %v27702_v41 = vpop.f32.mrf.mxu0  ;;  %27736 = vmatpush3.msra.mxu1 %v8314_v22 }
 0x520   : > { %v7870_v14 = vadd.f32 %v27702_v41, %v7775_v60  ;;  %27738 = vmatmul.mubr.f32.vlgmr.msra.gmra.mxu1 %v30658_v17  ;;  %27746 = vmatmul.mubr.f32.vlgmr.msra.gmra.mxu0 %v30664_v24  ;;  %v30725_v56 = vpop.f32.mrf.mxu1  ;;  %v8863_v24 = vsub.f32 %v30728_v58, %v30744_v28 }
 0x521   : > { %27751 = vmatprep.subr.mxu1 %v30685_v0  ;;  %27760 = vmatpush3.msra.mxu0 %v8312_v2  ;;  %v30717_v40 = vpop.f32.mrf.mxu0 }
 0x522   : > { %v7968_v8 = vadd.f32 %v27710_v15, %v7870_v14  ;;  %27752 = vmatpush3.msra.mxu1 %v30685_v0  ;;  %27740 = vmatprep.mubr.f32.mxu1 %v30660_v53  ;;  %v27726_v1 = vpop.f32.mrf.mxu1 }
 0x523   : > { %27767 = vmatprep.subr.mxu1 %v30685_v0  ;;  %v27715_v49 = vpop.f32.mrf.mxu0  ;;  %27748 = vmatprep.mubr.f32.mxu0 %v30669_v10 }
 0x524   : > { %v8048_v63 = vadd.f32 %v27715_v49, %v7952_v38  ;;  %27741 = vmatmul.mubr.f32.gmra.mxu1 %v30666_v42  ;;  %27749 = vmatmul.mubr.f32.gmra.mxu0 %v30673_v7  ;;  %v33566_v7 = vld [vmem:[#allocation24_spill] sm:$0xff]  ;;  %v30866_v60 = vpop.f32.mrf.mxu1 }
 0x525   : > { %v30732_v11 = vpop.f32.mrf.mxu0  ;;  %27753 = vmatprep.mubr.f32.mxu1 %v8241_v43  ;;  %27761 = vmatprep.mubr.f32.mxu0 %v30637_v52  ;;  %v30757_v43 = vand.u32 4294901760, %v30741_v26  ;;  %33569 = vst [vmem:[#allocation13_spill] sm:$0xff] %v30866_v60 }
 0x526   : > { %v30737_v48 = vadd.f32 %v27723_v62, %v8048_v63  ;;  %27775 = vmatprep.subr.mxu0 %v33559_v57 }
 0x527   : > { %v27718_v25 = vpop.f32.mrf.mxu0  ;;  %v8870_v10 = vsub.f32 %v30741_v26, %v30757_v43 }
 0x528   : > { %v8060_v23 = vadd.f32 %v27718_v25, %v7968_v8  ;;  %27754 = vmatmul.mubr.f32.vlgmr.msra.gmra.mxu1 %v8251_v13  ;;  %27762 = vmatmul.mubr.f32.vlgmr.msra.gmra.mxu0 %v30658_v17  ;;  %v8864_v13 = vand.u32 4294901760, %v8863_v24 }
 0x529   : > { %27768 = vmatpush3.msra.mxu1 %v30685_v0  ;;  %27756 = vmatprep.mubr.f32.mxu1 %v8261_v31  ;;  %v33565_v31 = vld [vmem:[#allocation30_spill] sm:$0xff]  ;;  %v30862_v18 = vpop.f32.mrf.mxu0 }
 0x52a   : > { %v30752_v35 = vadd.f32 %v27726_v1, %v8060_v23  ;;  %27764 = vmatprep.mubr.f32.mxu0 %v30660_v53  ;;  %27776 = vmatpush3.msra.mxu0 %v30709_v3 }
 0x52b   : > { %27777 = vmatprep.subr.mxu0 %v33559_v57  ;;  %27782 = vmatprep.subr.mxu1 %v33559_v57 }
 0x52c   : > { %27757 = vmatmul.mubr.f32.gmra.mxu1 %v8271_v34  ;;  %27765 = vmatmul.mubr.f32.gmra.mxu0 %v30666_v42 }
 0x52d   : > { %27769 = vmatprep.mubr.f32.mxu1 %v30637_v52  ;;  %27778 = vmatpush3.msra.mxu0 %v30721_v5  ;;  %v8871_v52 = vand.u32 4294901760, %v8870_v10 }
 0x52e   : > { %27779 = vmatprep.mubr.msk.f32.mxu0 %vm29303_vm2, %v33559_v57  ;;  %27789 = vmatprep.subr.mxu0 %v33559_v57 }
 0x530   : > { %27770 = vmatmul.mubr.f32.vlgmr.msra.gmra.mxu1 %v30658_v17  ;;  %27780 = vmatmul.mubr.f32.vlgmr.msra.gmra.mxu0 %v33565_v31  ;;  %v33567_v17 = vld [vmem:[#allocation21_spill] sm:$0xff] }
 0x531   : > { %27790 = vmatpush3.msra.mxu0 %v30728_v58  ;;  %27772 = vmatprep.mubr.f32.mxu1 %v30660_v53  ;;  %v33568_v53 = vld [vmem:[#allocation27_spill] sm:$0xff] }
 0x532   : > { %27791 = vmatprep.subr.mxu0 %v33559_v57  ;;  %27793 = vmatprep.mubr.msk.f32.mxu0 %vm29303_vm2, %v33559_v57 }
 0x533   : > { %27792 = vmatpush3.msra.mxu0 %v30741_v26  ;;  %27783 = vmatpush3.msra.mxu1 %v8864_v13 }
 0x534   : > { %27773 = vmatmul.mubr.f32.gmra.mxu1 %v30666_v42  ;;  %27794 = vmatmul.mubr.f32.vlgmr.msra.gmra.mxu0 %v33566_v7  ;;  %v25829_v42 = vld [vmem:[%s33396_s2 + $0x20] sm:$0xff] }
 0x535   : > { %27803 = vmatprep.subr.mxu0 %v33559_v57  ;;  %27784 = vmatprep.subr.mxu1 %v33559_v57  ;;  %v9677_v34 = vsel %vm1192_vm3, %v25829_v42, 0 }
 0x536   : > { %27804 = vmatpush3.msra.mxu0 %v30744_v28  ;;  %27785 = vmatpush3.msra.mxu1 %v8871_v52  ;;  %v30852_v20 = vand.u32 4294901760, %v9677_v34 }
 0x537   : > { %27805 = vmatprep.subr.mxu0 %v33559_v57  ;;  %27786 = vmatprep.mubr.msk.f32.mxu1 %vm29303_vm2, %v33559_v57 }
 0x538   : > { %27806 = vmatpush3.msra.mxu0 %v30757_v43  ;;  %27807 = vmatprep.mubr.msk.f32.mxu0 %vm29303_vm2, %v33559_v57  ;;  %v30855_v0 = vsub.f32 %v9677_v34, %v30852_v20 }
 0x539   : > { %27787 = vmatmul.mubr.f32.vlgmr.msra.gmra.mxu1 %v33567_v17  ;;  %27796 = vmatprep.subr.mxu1 %v33559_v57 }
 0x53a   : > { %27808 = vmatmul.mubr.f32.vlgmr.msra.gmra.mxu0 %v33567_v17  ;;  %27817 = vmatprep.subr.mxu0 %v33559_v57  ;;  %v33435_v32 = vand.u32 4294901760, %v30855_v0 }
 0x53b   : > { %27797 = vmatpush3.msra.mxu1 %v30709_v3  ;;  %27818 = vmatpush3.msra.mxu0 %v30709_v3 }
 0x53c   : > { %27798 = vmatprep.subr.mxu1 %v33559_v57  ;;  %27819 = vmatprep.subr.mxu0 %v33559_v57  ;;  %v9757_v30 = vsub.f32 %v30855_v0, %v33435_v32 }
 0x53d   : > { %27799 = vmatpush3.msra.mxu1 %v30721_v5  ;;  %27800 = vmatprep.mubr.msk.f32.mxu1 %vm29303_vm2, %v33559_v57 }
 0x53e   : > { %27820 = vmatpush3.msra.mxu0 %v30721_v5  ;;  %27821 = vmatprep.mubr.msk.f32.mxu0 %vm29303_vm2, %v33559_v57  ;;  %v9758_v47 = vand.u32 4294901760, %v9757_v30 }
 0x53f   : > { %27801 = vmatmul.mubr.f32.vlgmr.msra.gmra.mxu1 %v33568_v53  ;;  %27810 = vmatprep.subr.mxu1 %v33559_v57 }
 0x540   : > { %27822 = vmatmul.mubr.f32.vlgmr.msra.gmra.mxu0 %v30590_v16  ;;  %27831 = vmatprep.subr.mxu0 %v33559_v57 }
 0x541   : > { %27811 = vmatpush3.msra.mxu1 %v30709_v3  ;;  %27832 = vmatpush3.msra.mxu0 %v30728_v58 }
 0x542   : > { %27812 = vmatprep.subr.mxu1 %v33559_v57  ;;  %27833 = vmatprep.subr.mxu0 %v33559_v57 }
 0x543   : > { %27813 = vmatpush3.msra.mxu1 %v30721_v5  ;;  %27814 = vmatprep.mubr.msk.f32.mxu1 %vm29303_vm2, %v33559_v57 }
 0x544   : > { %27834 = vmatpush3.msra.mxu0 %v30741_v26  ;;  %27835 = vmatprep.mubr.msk.f32.mxu0 %vm29303_vm2, %v33559_v57 }
 0x545   : > { %27815 = vmatmul.mubr.f32.vlgmr.msra.gmra.mxu1 %v33567_v17  ;;  %27824 = vmatprep.subr.mxu1 %v33559_v57 }
 0x546   : > { %27836 = vmatmul.mubr.f32.vlgmr.msra.gmra.mxu0 %v30557_v39  ;;  %27845 = vmatprep.subr.mxu0 %v33559_v57 }
 0x547   : > { %27825 = vmatpush3.msra.mxu1 %v8864_v13  ;;  %27846 = vmatpush3.msra.mxu0 %v30744_v28  ;;  %v33571_v13 = vld [vmem:[#allocation5_spill] sm:$0xff] }
 0x548   : > { %27826 = vmatprep.subr.mxu1 %v33559_v57  ;;  %27847 = vmatprep.subr.mxu0 %v33559_v57 }
 0x549   : > { %27827 = vmatpush3.msra.mxu1 %v8871_v52  ;;  %27828 = vmatprep.mubr.msk.f32.mxu1 %vm29303_vm2, %v33559_v57  ;;  %v8154_v52 = vadd.f32 %v30737_v48, %v33571_v13 }
 0x54a   : > { %27848 = vmatpush3.msra.mxu0 %v30757_v43  ;;  %27849 = vmatprep.mubr.msk.f32.mxu0 %vm29303_vm2, %v33559_v57 }
 0x54b   : > { %27829 = vmatmul.mubr.f32.vlgmr.msra.gmra.mxu1 %v30546_v12  ;;  %27838 = vmatprep.subr.mxu1 %v33559_v57 }
 0x54c   : > { %27850 = vmatmul.mubr.f32.vlgmr.msra.gmra.mxu0 %v30546_v12  ;;  %27839 = vmatpush3.msra.mxu1 %v30709_v3 }
 0x54d   : > { %27840 = vmatprep.subr.mxu1 %v33559_v57  ;;  %27842 = vmatprep.mubr.msk.f32.mxu1 %vm29303_vm2, %v33559_v57 }
 0x54e   : > { %27841 = vmatpush3.msra.mxu1 %v30721_v5  ;;  %27861 = vmatprep.mubr.f32.mxu0 %v9758_v47  ;;  %v25830_v47 = vld [vmem:[%s33396_s2 + $0x28] sm:$0xff] }
 0x54f   : > { %27843 = vmatmul.mubr.f32.vlgmr.msra.gmra.mxu1 %v30572_v9  ;;  %27852 = vmatprep.subr.mxu1 %v33559_v57 }
 0x550   : > { %27853 = vmatpush3.msra.mxu1 %v30709_v3  ;;  %27856 = vmatprep.mubr.msk.f32.mxu1 %vm29303_vm2, %v33559_v57 }
 0x551   : > { %27854 = vmatprep.subr.mxu1 %v33559_v57 }
 0x552   : > { %27855 = vmatpush3.msra.mxu1 %v30721_v5 }
 0x553   : > { %27857 = vmatmul.mubr.f32.vlgmr.msra.gmra.mxu1 %v30546_v12 }
 0x554   : > { %27869 = vmatprep.mubr.f32.mxu1 %v30852_v20 }
 0x5d8   : > { %v27731_v55 = vpop.f32.mrf.mxu0 }
 0x5da   : > { %v30864_v19 = vpop.f32.mrf.mxu0 }
 0x5dc   : > { %v27734_v50 = vpop.f32.mrf.mxu0 }
 0x5de   : > { %v30868_v2 = vpop.f32.mrf.mxu0 }
 0x5e0   : > { %v27739_v29 = vpop.f32.mrf.mxu1  ;;  %v27747_v61 = vpop.f32.mrf.mxu0 }
 0x5e1   : > { %v8358_v15 = vadd.f32 %v27739_v29, %v27731_v55 }
 0x5e2   : > { %v30870_v46 = vpop.f32.mrf.mxu1  ;;  %v30872_v37 = vpop.f32.mrf.mxu0 }
 0x5e3   : > { %v8451_v22 = vadd.f32 %v27747_v61, %v8358_v15  ;;  %v33572_v15 = vld [vmem:[#allocation7_spill] sm:$0xff] }
 0x5e4   : > { %v27742_v36 = vpop.f32.mrf.mxu1  ;;  %v27750_v38 = vpop.f32.mrf.mxu0 }
 0x5e5   : > { %v8370_v41 = vadd.f32 %v27742_v36, %v27734_v50  ;;  %v25831_v50 = vld [vmem:[%s33396_s2 + $0x30] sm:$0xff]  ;;  %v9680_v36 = vsel %vm1192_vm3, %v25830_v47, 0 }
 0x5e6   : > { %v30874_v62 = vpop.f32.mrf.mxu1  ;;  %v30876_v3 = vpop.f32.mrf.mxu0 }
 0x5e7   : > { %v8465_v54 = vadd.f32 %v27750_v38, %v8370_v41 }
 0x5e8   : > { %v27755_v14 = vpop.f32.mrf.mxu1  ;;  %v27763_v8 = vpop.f32.mrf.mxu0 }
 0x5e9   : > { %v8547_v5 = vadd.f32 %v27755_v14, %v8451_v22  ;;  %v8156_v22 = vadd.f32 %v30752_v35, %v33572_v15  ;;  %v25832_v14 = vld [vmem:[%s33396_s2 + $0x38] sm:$0xff] }
 0x5ea   : > { %v30878_v49 = vpop.f32.mrf.mxu1  ;;  %v30880_v58 = vpop.f32.mrf.mxu0  ;;  %v9686_v35 = vsel %vm1192_vm3, %v25832_v14, 0 }
 0x5eb   : > { %v8643_v63 = vadd.f32 %v27763_v8, %v8547_v5  ;;  %v30909_v5 = vand.u32 4294901760, %v9680_v36 }
 0x5ec   : > { %v27758_v26 = vpop.f32.mrf.mxu1  ;;  %v27766_v25 = vpop.f32.mrf.mxu0 }
 0x5ed   : > { %v8563_v1 = vadd.f32 %v27758_v26, %v8465_v54  ;;  %v9683_v54 = vsel %vm1192_vm3, %v25831_v50, 0 }
 0x5ee   : > { %v30882_v28 = vpop.f32.mrf.mxu1  ;;  %v30884_v23 = vpop.f32.mrf.mxu0  ;;  %v30911_v26 = vand.u32 4294901760, %v9683_v54 }
 0x5ef   : > { %33570 = vst [vmem:[#allocation4_spill] sm:$0xff] %v30884_v23  ;;  %v8655_v43 = vadd.f32 %v27766_v25, %v8563_v1 }
 0x5f0   : > { %v27771_v24 = vpop.f32.mrf.mxu1  ;;  %v8827_v10 = vpop.f32.mrf.mxu0  ;;  %v30920_v47 = vsub.f32 %v9683_v54, %v30911_v26 }
 0x5f1   : > { %v8733_v42 = vadd.f32 %v27771_v24, %v8643_v63 }
 0x5f2   : > { %v30888_v34 = vpop.f32.mrf.mxu1  ;;  %v27781_v30 = vpop.f32.mrf.mxu0  ;;  %v33438_v14 = vand.u32 4294901760, %v30920_v47 }
 0x5f3   : > { %v30893_v55 = vadd.f32 %v8733_v42, %v8154_v52  ;;  %v30915_v42 = vsub.f32 %v9680_v36, %v30909_v5  ;;  %v30917_v30 = vand.u32 4294901760, %v9686_v35 }
 0x5f4   : > { %v27774_v29 = vpop.f32.mrf.mxu1  ;;  %v8984_v61 = vpop.f32.mrf.mxu0 }
 0x5f5   : > { %v8745_v48 = vadd.f32 %v27774_v29, %v8655_v43 }
 0x5f6   : > { %v30901_v38 = vpop.f32.mrf.mxu1  ;;  %v27795_v41 = vpop.f32.mrf.mxu0 }
 0x5f7   : > { %33573 = vst [vmem:[#allocation6_spill] sm:$0xff] %v30901_v38  ;;  %v30907_v8 = vadd.f32 %v8745_v48, %v8156_v22  ;;  %v33436_v48 = vand.u32 4294901760, %v30915_v42  ;;  %v30924_v41 = vsub.f32 %v9686_v35, %v30917_v30 }
 0x5f9   : > { %v8908_v63 = vpop.f32.mrf.mxu1  ;;  %v9767_v36 = vsub.f32 %v30915_v42, %v33436_v48  ;;  %v33437_v54 = vand.u32 4294901760, %v30924_v41 }
 0x5fa   : > { %v8909_v25 = vadd.f32 %v8908_v63, %v8827_v10  ;;  %v9136_v1 = vpop.f32.mrf.mxu0 }
 0x5fb   : > { %v27788_v43 = vpop.f32.mrf.mxu1  ;;  %v9768_v32 = vand.u32 4294901760, %v9767_v36  ;;  %v25834_v36 = vld [vmem:[%s33397_s3 + $0x28] sm:$0xff] }
 0x5fc   : > { %v27809_v24 = vpop.f32.mrf.mxu0  ;;  %v8985_v52 = vadd.f32 %v8984_v61, %v8909_v25  ;;  %v9777_v43 = vsub.f32 %v30920_v47, %v33438_v14 }
 0x5ff   : > { %v9059_v50 = vpop.f32.mrf.mxu1 }
 0x600   : > { %v9060_v29 = vadd.f32 %v9059_v50, %v8985_v52  ;;  %v9286_v22 = vpop.f32.mrf.mxu0 }
 0x601   : > { %v27802_v10 = vpop.f32.mrf.mxu1 }
 0x602   : > { %v27823_v61 = vpop.f32.mrf.mxu0  ;;  %v9137_v63 = vadd.f32 %v9136_v1, %v9060_v29  ;;  %v9787_v1 = vsub.f32 %v30924_v41, %v33437_v54  ;;  %v25833_v29 = vld [vmem:[%s33397_s3 + $0x20] sm:$0xff] }
 0x603   : > { %v9778_v61 = vand.u32 4294901760, %v9777_v43 }
 0x604   : > { %v9788_v14 = vand.u32 4294901760, %v9787_v1 }
 0x605   : > { %v9209_v25 = vpop.f32.mrf.mxu1 }
 0x606   : > { %v9210_v24 = vadd.f32 %v9209_v25, %v9137_v63  ;;  %v9443_v52 = vpop.f32.mrf.mxu0  ;;  %v10272_v25 = vsel %vm1192_vm3, %v25833_v29, 0  ;;  %v10275_v29 = vsel %vm1192_vm3, %v25834_v36, 0 }
 0x607   : > { %v27816_v35 = vpop.f32.mrf.mxu1  ;;  %v30949_v21 = vand.u32 4294901760, %v10272_v25 }
 0x608   : > { %v30934_v50 = vand.u32 4294901760, %v9210_v24  ;;  %v27837_v10 = vpop.f32.mrf.mxu0 }
 0x60a   : > { %v9826_v48 = vsub.f32 %v9210_v24, %v30934_v50  ;;  %27859 = vmatprep.subr.mxu0 %v30934_v50 }
 0x60b   : > { %v9367_v63 = vpop.f32.mrf.mxu1  ;;  %27860 = vmatpush3.msra.mxu0 %v30934_v50 }
 0x60c   : > { %v9368_v35 = vadd.f32 %v9367_v63, %v9286_v22  ;;  %v9595_v10 = vpop.f32.mrf.mxu0  ;;  %27862 = vmatmul.mubr.f32.vlgmr.msra.gmra.mxu0 %v9768_v32  ;;  %27875 = vmatprep.subr.mxu0 %v9826_v48  ;;  %v9827_v54 = vand.u32 4294901760, %v9826_v48  ;;  %v25835_v22 = vld [vmem:[%s33397_s3 + $0x30] sm:$0xff]  ;;  %v25836_v32 = vld [vmem:[%s33397_s3 + $0x38] sm:$0xff] }
 0x60d   : > { %v27830_v43 = vpop.f32.mrf.mxu1  ;;  %27876 = vmatpush3.msra.mxu0 %v9826_v48  ;;  %27864 = vmatprep.mubr.f32.mxu0 %v9778_v61 }
 0x60e   : > { %v27851_v24 = vpop.f32.mrf.mxu0  ;;  %v9444_v15 = vadd.f32 %v9443_v52, %v9368_v35  ;;  %27891 = vmatprep.subr.mxu0 %v9827_v54  ;;  %v9828_v13 = vsub.f32 %v9826_v48, %v9827_v54  ;;  %v30959_v48 = vand.u32 4294901760, %v10275_v29  ;;  %v10278_v52 = vsel %vm1192_vm3, %v25835_v22, 0 }
 0x60f   : > { %v9518_v63 = vpop.f32.mrf.mxu1  ;;  %v30963_v35 = vsub.f32 %v10272_v25, %v30949_v21  ;;  %v10281_v24 = vsel %vm1192_vm3, %v25836_v32, 0 }
 0x610   : > { %v9519_v1 = vadd.f32 %v9518_v63, %v9444_v15  ;;  %27865 = vmatmul.mubr.f32.gmra.mxu0 %v9788_v14  ;;  %v9829_v61 = vand.u32 4294901760, %v9828_v13  ;;  %v30968_v13 = vand.u32 4294901760, %v10278_v52  ;;  %v30972_v14 = vsub.f32 %v10275_v29, %v30959_v48 }
 0x611   : > { %v27844_v43 = vpop.f32.mrf.mxu1  ;;  %27877 = vmatprep.mubr.f32.mxu0 %v30855_v0  ;;  %v30974_v25 = vand.u32 4294901760, %v10281_v24  ;;  %v33574_v29 = vand.u32 4294901760, %v30855_v0 }
 0x612   : > { %v9596_v36 = vadd.f32 %v9595_v10, %v9519_v1  ;;  %27867 = vmatprep.subr.mxu1 %v9829_v61  ;;  %v10361_v63 = vand.u32 4294901760, %v30972_v14 }
 0x613   : > { %v9668_v38 = vpop.f32.mrf.mxu1  ;;  %27868 = vmatpush3.msra.mxu1 %v9829_v61  ;;  %v30994_v32 = vsub.f32 %v10281_v24, %v30974_v25  ;;  %v33575_v61 = vand.u32 4294901760, %v30915_v42 }
 0x614   : > { %v9669_v23 = vadd.f32 %v9668_v38, %v9596_v36  ;;  %27870 = vmatmul.mubr.f32.vlgmr.msra.gmra.mxu1 %v30909_v5  ;;  %27878 = vmatmul.mubr.f32.vlgmr.msra.gmra.mxu0 %v30915_v42  ;;  %v10351_v38 = vand.u32 4294901760, %v30963_v35  ;;  %v10362_v0 = vsub.f32 %v30972_v14, %v10361_v63  ;;  %v33577_v42 = vand.u32 4294901760, %v30924_v41 }
 0x615   : > { %v27858_v15 = vpop.f32.mrf.mxu1  ;;  %27883 = vmatprep.subr.mxu1 %v30934_v50  ;;  %27892 = vmatpush3.msra.mxu0 %v9827_v54  ;;  %v30987_v54 = vsub.f32 %v10278_v52, %v30968_v13  ;;  %v10381_v36 = vand.u32 4294901760, %v30994_v32 }
 0x616   : > { %v30976_v10 = vand.u32 4294901760, %v9669_v23  ;;  %27884 = vmatpush3.msra.mxu1 %v30934_v50  ;;  %27872 = vmatprep.mubr.f32.mxu1 %v30911_v26  ;;  %v10352_v1 = vsub.f32 %v30963_v35, %v10351_v38  ;;  %v33576_v15 = vand.u32 4294901760, %v30920_v47 }
 0x617   : > { %27899 = vmatprep.subr.mxu1 %v30934_v50  ;;  %27880 = vmatprep.mubr.f32.mxu0 %v30920_v47  ;;  %v10371_v52 = vand.u32 4294901760, %v30987_v54 }
 0x618   : > { %v10421_v22 = vsub.f32 %v9669_v23, %v30976_v10  ;;  %27907 = vmatprep.subr.mxu0 %v30976_v10  ;;  %27873 = vmatmul.mubr.f32.gmra.mxu1 %v30917_v30 }
 0x619   : > { %27881 = vmatmul.mubr.f32.gmra.mxu0 %v30924_v41  ;;  %27885 = vmatprep.mubr.f32.mxu1 %v33574_v29  ;;  %v10353_v29 = vand.u32 4294901760, %v10352_v1 }
 0x61a   : > { %27893 = vmatprep.mubr.f32.mxu0 %v30852_v20  ;;  %v10422_v23 = vand.u32 4294901760, %v10421_v22 }
 0x61c   : > { %27886 = vmatmul.mubr.f32.vlgmr.msra.gmra.mxu1 %v33575_v61  ;;  %v10423_v43 = vsub.f32 %v10421_v22, %v10422_v23  ;;  %v10363_v61 = vand.u32 4294901760, %v10362_v0 }
 0x61d   : > { %27894 = vmatmul.mubr.f32.vlgmr.msra.gmra.mxu0 %v30909_v5  ;;  %27900 = vmatpush3.msra.mxu1 %v30934_v50  ;;  %v10372_v50 = vsub.f32 %v30987_v54, %v10371_v52 }
 0x61e   : > { %27908 = vmatpush3.msra.mxu0 %v30976_v10  ;;  %v10424_v24 = vand.u32 4294901760, %v10423_v43  ;;  %27888 = vmatprep.mubr.f32.mxu1 %v33576_v15  ;;  %v10382_v43 = vsub.f32 %v30994_v32, %v10381_v36 }
 0x61f   : > { %27923 = vmatprep.subr.mxu0 %v10421_v22  ;;  %27896 = vmatprep.mubr.f32.mxu0 %v30911_v26  ;;  %v10373_v47 = vand.u32 4294901760, %v10372_v50 }
 0x620   : > { %27915 = vmatprep.subr.mxu1 %v10424_v24  ;;  %27889 = vmatmul.mubr.f32.gmra.mxu1 %v33577_v42  ;;  %v10383_v1 = vand.u32 4294901760, %v10382_v43 }
 0x621   : > { %27897 = vmatmul.mubr.f32.gmra.mxu0 %v30917_v30  ;;  %27901 = vmatprep.mubr.f32.mxu1 %v30852_v20  ;;  %v25838_v20 = vld [vmem:[%s33394_s0 + $0x28] sm:$0xff] }
 0x622   : > { %27909 = vmatprep.mubr.f32.mxu0 %v10353_v29 }
 0x624   : > { %27902 = vmatmul.mubr.f32.vlgmr.msra.gmra.mxu1 %v30909_v5  ;;  %v31026_v5 = vand.u32 4294901760, %v25838_v20 }
 0x625   : > { %27910 = vmatmul.mubr.f32.vlgmr.msra.gmra.mxu0 %v10363_v61  ;;  %27916 = vmatpush3.msra.mxu1 %v10424_v24 }
 0x626   : > { %27924 = vmatpush3.msra.mxu0 %v10421_v22  ;;  %27931 = vmatprep.subr.mxu1 %v30976_v10  ;;  %v10971_v41 = vsub.f32 %v25838_v20, %v31026_v5 }
 0x627   : > { %27939 = vmatprep.subr.mxu0 %v10422_v23  ;;  %27904 = vmatprep.mubr.f32.mxu1 %v30911_v26  ;;  %v25837_v26 = vld [vmem:[%s33394_s0 + $0x20] sm:$0xff] }
 0x628   : > { %27912 = vmatprep.mubr.f32.mxu0 %v10373_v47  ;;  %27905 = vmatmul.mubr.f32.gmra.mxu1 %v30917_v30  ;;  %v31037_v30 = vand.u32 4294901760, %v25837_v26  ;;  %v31047_v22 = vand.u32 4294901760, %v10971_v41 }
 0x629   : > { %27913 = vmatmul.mubr.f32.gmra.mxu0 %v10383_v1  ;;  %27917 = vmatprep.mubr.f32.mxu1 %v30949_v21 }
 0x62a   : > { %27925 = vmatprep.mubr.f32.mxu0 %v30963_v35  ;;  %v10973_v35 = vsub.f32 %v10971_v41, %v31047_v22 }
 0x62c   : > { %27918 = vmatmul.mubr.f32.vlgmr.msra.gmra.mxu1 %v30959_v48 }
 0x62d   : > { %27926 = vmatmul.mubr.f32.vlgmr.msra.gmra.mxu0 %v30972_v14  ;;  %27932 = vmatpush3.msra.mxu1 %v30976_v10  ;;  %v10978_v14 = vsub.f32 %v25837_v26, %v31037_v30 }
 0x62e   : > { %27940 = vmatpush3.msra.mxu0 %v10422_v23  ;;  %27947 = vmatprep.subr.mxu1 %v30976_v10 }
 0x62f   : > { %27920 = vmatprep.mubr.f32.mxu1 %v30968_v13  ;;  %27928 = vmatprep.mubr.f32.mxu0 %v30987_v54 }
 0x630   : > { %27921 = vmatmul.mubr.f32.gmra.mxu1 %v30974_v25  ;;  %27955 = vmatprep.subr.mxu0 %v33559_v57 }
 0x631   : > { %27929 = vmatmul.mubr.f32.gmra.mxu0 %v30994_v32  ;;  %27933 = vmatprep.mubr.f32.mxu1 %v10351_v38  ;;  %v31055_v38 = vand.u32 4294901760, %v10978_v14 }
 0x632   : > { %27941 = vmatprep.mubr.f32.mxu0 %v30949_v21 }
 0x633   : > { %v10980_v54 = vsub.f32 %v10978_v14, %v31055_v38 }
 0x634   : > { %27934 = vmatmul.mubr.f32.vlgmr.msra.gmra.mxu1 %v10361_v63 }
 0x635   : > { %27942 = vmatmul.mubr.f32.vlgmr.msra.gmra.mxu0 %v30959_v48  ;;  %27948 = vmatpush3.msra.mxu1 %v30976_v10  ;;  %v10974_v10 = vand.u32 4294901760, %v10973_v35 }
 0x636   : > { %27936 = vmatprep.mubr.f32.mxu1 %v10371_v52  ;;  %27944 = vmatprep.mubr.f32.mxu0 %v30968_v13 }
 0x637   : > { %27956 = vmatpush3.msra.mxu0 %v31026_v5  ;;  %27962 = vmatprep.subr.mxu1 %v33559_v57 }
 0x638   : > { %27937 = vmatmul.mubr.f32.gmra.mxu1 %v10381_v36  ;;  %27957 = vmatprep.subr.mxu0 %v33559_v57 }
 0x639   : > { %27945 = vmatmul.mubr.f32.gmra.mxu0 %v30974_v25  ;;  %27949 = vmatprep.mubr.f32.mxu1 %v30949_v21  ;;  %v10981_v21 = vand.u32 4294901760, %v10980_v54 }
 0x63a   : > { %27958 = vmatpush3.msra.mxu0 %v31037_v30  ;;  %27959 = vmatprep.mubr.msk.f32.mxu0 %vm29303_vm2, %v33559_v57 }
 0x63b   : > { %27969 = vmatprep.subr.mxu0 %v33559_v57 }
 0x63c   : > { %27950 = vmatmul.mubr.f32.vlgmr.msra.gmra.mxu1 %v30959_v48 }
 0x63d   : > { %27960 = vmatmul.mubr.f32.vlgmr.msra.gmra.mxu0 %v33565_v31  ;;  %27952 = vmatprep.mubr.f32.mxu1 %v30968_v13 }
 0x63e   : > { %27970 = vmatpush3.msra.mxu0 %v10971_v41  ;;  %27973 = vmatprep.mubr.msk.f32.mxu0 %vm29303_vm2, %v33559_v57 }
 0x63f   : > { %27971 = vmatprep.subr.mxu0 %v33559_v57  ;;  %27963 = vmatpush3.msra.mxu1 %v10974_v10 }
 0x640   : > { %27972 = vmatpush3.msra.mxu0 %v10978_v14  ;;  %27953 = vmatmul.mubr.f32.gmra.mxu1 %v30974_v25 }
 0x641   : > { %27974 = vmatmul.mubr.f32.vlgmr.msra.gmra.mxu0 %v33566_v7  ;;  %27983 = vmatprep.subr.mxu0 %v33559_v57 }
 0x642   : > { %27984 = vmatpush3.msra.mxu0 %v31047_v22  ;;  %27964 = vmatprep.subr.mxu1 %v33559_v57 }
 0x643   : > { %27985 = vmatprep.subr.mxu0 %v33559_v57  ;;  %27965 = vmatpush3.msra.mxu1 %v10981_v21 }
 0x644   : > { %27966 = vmatprep.mubr.msk.f32.mxu1 %vm29303_vm2, %v33559_v57  ;;  %27986 = vmatpush3.msra.mxu0 %v31055_v38 }
 0x645   : > { %27987 = vmatprep.mubr.msk.f32.mxu0 %vm29303_vm2, %v33559_v57  ;;  %27967 = vmatmul.mubr.f32.vlgmr.msra.gmra.mxu1 %v33567_v17 }
 0x646   : > { %27976 = vmatprep.subr.mxu1 %v33559_v57  ;;  %27988 = vmatmul.mubr.f32.vlgmr.msra.gmra.mxu0 %v33567_v17 }
 0x647   : > { %27997 = vmatprep.subr.mxu0 %v33559_v57  ;;  %27977 = vmatpush3.msra.mxu1 %v31026_v5 }
 0x648   : > { %27998 = vmatpush3.msra.mxu0 %v31026_v5  ;;  %27978 = vmatprep.subr.mxu1 %v33559_v57 }
 0x649   : > { %27999 = vmatprep.subr.mxu0 %v33559_v57  ;;  %27979 = vmatpush3.msra.mxu1 %v31037_v30 }
 0x64a   : > { %27980 = vmatprep.mubr.msk.f32.mxu1 %vm29303_vm2, %v33559_v57  ;;  %28000 = vmatpush3.msra.mxu0 %v31037_v30 }
 0x64b   : > { %28001 = vmatprep.mubr.msk.f32.mxu0 %vm29303_vm2, %v33559_v57  ;;  %27981 = vmatmul.mubr.f32.vlgmr.msra.gmra.mxu1 %v33568_v53 }
 0x64c   : > { %27990 = vmatprep.subr.mxu1 %v33559_v57  ;;  %28002 = vmatmul.mubr.f32.vlgmr.msra.gmra.mxu0 %v30590_v16 }
 0x64d   : > { %28011 = vmatprep.subr.mxu0 %v33559_v57  ;;  %27991 = vmatpush3.msra.mxu1 %v31026_v5 }
 0x64e   : > { %28012 = vmatpush3.msra.mxu0 %v10971_v41  ;;  %27992 = vmatprep.subr.mxu1 %v33559_v57 }
 0x64f   : > { %28013 = vmatprep.subr.mxu0 %v33559_v57  ;;  %27993 = vmatpush3.msra.mxu1 %v31037_v30 }
 0x650   : > { %27994 = vmatprep.mubr.msk.f32.mxu1 %vm29303_vm2, %v33559_v57  ;;  %28014 = vmatpush3.msra.mxu0 %v10978_v14 }
 0x651   : > { %28015 = vmatprep.mubr.msk.f32.mxu0 %vm29303_vm2, %v33559_v57  ;;  %27995 = vmatmul.mubr.f32.vlgmr.msra.gmra.mxu1 %v33567_v17 }
 0x652   : > { %28004 = vmatprep.subr.mxu1 %v33559_v57  ;;  %28016 = vmatmul.mubr.f32.vlgmr.msra.gmra.mxu0 %v30557_v39  ;;  %v25839_v39 = vld [vmem:[%s33396_s2 + $0x40] sm:$0xff] }
 0x653   : > { %28025 = vmatprep.subr.mxu0 %v33559_v57  ;;  %28005 = vmatpush3.msra.mxu1 %v10974_v10  ;;  %v11787_v16 = vsel %vm1192_vm3, %v25839_v39, 0 }
 0x654   : > { %28026 = vmatpush3.msra.mxu0 %v31047_v22  ;;  %28006 = vmatprep.subr.mxu1 %v33559_v57 }
 0x655   : > { %28027 = vmatprep.subr.mxu0 %v33559_v57  ;;  %28007 = vmatpush3.msra.mxu1 %v10981_v21 }
 0x656   : > { %28008 = vmatprep.mubr.msk.f32.mxu1 %vm29303_vm2, %v33559_v57  ;;  %28028 = vmatpush3.msra.mxu0 %v31055_v38 }
 0x657   : > { %28029 = vmatprep.mubr.msk.f32.mxu0 %vm29303_vm2, %v33559_v57  ;;  %28009 = vmatmul.mubr.f32.vlgmr.msra.gmra.mxu1 %v30546_v12 }
 0x658   : > { %28018 = vmatprep.subr.mxu1 %v33559_v57  ;;  %28030 = vmatmul.mubr.f32.vlgmr.msra.gmra.mxu0 %v30546_v12 }
 0x659   : > { %28019 = vmatpush3.msra.mxu1 %v31026_v5  ;;  %28022 = vmatprep.mubr.msk.f32.mxu1 %vm29303_vm2, %v33559_v57 }
 0x65a   : > { %28020 = vmatprep.subr.mxu1 %v33559_v57 }
 0x65b   : > { %28021 = vmatpush3.msra.mxu1 %v31037_v30 }
 0x65c   : > { %28023 = vmatmul.mubr.f32.vlgmr.msra.gmra.mxu1 %v30572_v9  ;;  %28032 = vmatprep.subr.mxu1 %v33559_v57  ;;  %v31140_v9 = vand.u32 4294901760, %v11787_v16 }
 0x65d   : > { %28033 = vmatpush3.msra.mxu1 %v31026_v5  ;;  %28036 = vmatprep.mubr.msk.f32.mxu1 %vm29303_vm2, %v33559_v57 }
 0x65e   : > { %28034 = vmatprep.subr.mxu1 %v33559_v57  ;;  %v31143_v31 = vsub.f32 %v11787_v16, %v31140_v9 }
 0x65f   : > { %28035 = vmatpush3.msra.mxu1 %v31037_v30 }
 0x660   : > { %28037 = vmatmul.mubr.f32.vlgmr.msra.gmra.mxu1 %v30546_v12  ;;  %v33441_v7 = vand.u32 4294901760, %v31143_v31 }
 0x661   : > { %28049 = vmatprep.mubr.f32.mxu1 %v31140_v9 }
 0x662   : > { %v11867_v17 = vsub.f32 %v31143_v31, %v33441_v7 }
 0x664   : > { %v11868_v12 = vand.u32 4294901760, %v11867_v17 }
 0x666   : > { %28041 = vmatprep.mubr.f32.mxu0 %v11868_v12 }
 0x6cc   : > { %v27863_v53 = vpop.f32.mrf.mxu0 }
 0x6ce   : > { %v31150_v48 = vpop.f32.mrf.mxu0 }
 0x6d0   : > { %v27866_v13 = vpop.f32.mrf.mxu0 }
 0x6d2   : > { %v31152_v25 = vpop.f32.mrf.mxu0 }
 0x6d4   : > { %v27871_v63 = vpop.f32.mrf.mxu1  ;;  %v27879_v32 = vpop.f32.mrf.mxu0 }
 0x6d5   : > { %v9873_v23 = vadd.f32 %v27871_v63, %v27863_v53 }
 0x6d6   : > { %v31154_v52 = vpop.f32.mrf.mxu1  ;;  %v31156_v0 = vpop.f32.mrf.mxu0 }
 0x6d7   : > { %v9966_v36 = vadd.f32 %v27879_v32, %v9873_v23 }
 0x6d8   : > { %v27874_v24 = vpop.f32.mrf.mxu1 }
 0x6d9   : > { %v9885_v15 = vadd.f32 %v27874_v24, %v27866_v13  ;;  %v27882_v29 = vpop.f32.mrf.mxu0 }
 0x6da   : > { %v31158_v42 = vpop.f32.mrf.mxu1 }
 0x6db   : > { %v9980_v50 = vadd.f32 %v27882_v29, %v9885_v15  ;;  %v31160_v61 = vpop.f32.mrf.mxu0 }
 0x6dc   : > { %v27887_v43 = vpop.f32.mrf.mxu1 }
 0x6dd   : > { %v10062_v47 = vadd.f32 %v27887_v43, %v9966_v36  ;;  %v27895_v1 = vpop.f32.mrf.mxu0 }
 0x6de   : > { %v31162_v20 = vpop.f32.mrf.mxu1 }
 0x6df   : > { %v10158_v5 = vadd.f32 %v27895_v1, %v10062_v47  ;;  %v31164_v26 = vpop.f32.mrf.mxu0 }
 0x6e0   : > { %33578 = vst [vmem:[#allocation11_spill] sm:$0xff] %v31164_v26  ;;  %v27890_v30 = vpop.f32.mrf.mxu1 }
 0x6e1   : > { %v10078_v41 = vadd.f32 %v27890_v30, %v9980_v50  ;;  %v27898_v14 = vpop.f32.mrf.mxu0 }
 0x6e2   : > { %v31166_v22 = vpop.f32.mrf.mxu1 }
 0x6e3   : > { %33579 = vst [vmem:[#allocation14_spill] sm:$0xff] %v31166_v22  ;;  %v10170_v35 = vadd.f32 %v27898_v14, %v10078_v41  ;;  %v31168_v38 = vpop.f32.mrf.mxu0 }
 0x6e4   : > { %33580 = vst [vmem:[#allocation15_spill] sm:$0xff] %v31168_v38  ;;  %v27903_v10 = vpop.f32.mrf.mxu1 }
 0x6e5   : > { %v10248_v54 = vadd.f32 %v27903_v10, %v10158_v5  ;;  %v27911_v21 = vpop.f32.mrf.mxu0 }
 0x6e6   : > { %v31170_v39 = vpop.f32.mrf.mxu1 }
 0x6e7   : > { %33581 = vst [vmem:[#allocation8_spill] sm:$0xff] %v31170_v39  ;;  %v10264_v16 = vadd.f32 %v10248_v54, %v30893_v55  ;;  %v31173_v17 = vpop.f32.mrf.mxu0 }
 0x6e8   : > { %v27906_v12 = vpop.f32.mrf.mxu1 }
 0x6e9   : > { %v10260_v53 = vadd.f32 %v27906_v12, %v10170_v35  ;;  %v27914_v13 = vpop.f32.mrf.mxu0 }
 0x6ea   : > { %v31175_v63 = vpop.f32.mrf.mxu1 }
 0x6eb   : > { %33582 = vst [vmem:[#allocation17_spill] sm:$0xff] %v31175_v63  ;;  %v10266_v32 = vadd.f32 %v10260_v53, %v30907_v8  ;;  %v31178_v23 = vpop.f32.mrf.mxu0 }
 0x6ec   : > { %v27919_v36 = vpop.f32.mrf.mxu1 }
 0x6ed   : > { %v10468_v24 = vadd.f32 %v27919_v36, %v27911_v21  ;;  %v27927_v15 = vpop.f32.mrf.mxu0 }
 0x6ee   : > { %v31180_v29 = vpop.f32.mrf.mxu1 }
 0x6ef   : > { %v10561_v50 = vadd.f32 %v27927_v15, %v10468_v24  ;;  %v31182_v43 = vpop.f32.mrf.mxu0 }
 0x6f0   : > { %v27922_v55 = vpop.f32.mrf.mxu1 }
 0x6f1   : > { %v10480_v47 = vadd.f32 %v27922_v55, %v27914_v13  ;;  %v27930_v1 = vpop.f32.mrf.mxu0 }
 0x6f2   : > { %v31184_v5 = vpop.f32.mrf.mxu1 }
 0x6f3   : > { %v10575_v30 = vadd.f32 %v27930_v1, %v10480_v47  ;;  %v31186_v41 = vpop.f32.mrf.mxu0 }
 0x6f4   : > { %33583 = vst [vmem:[#allocation10_spill] sm:$0xff] %v31186_v41  ;;  %v27935_v14 = vpop.f32.mrf.mxu1  ;;  %v25845_v41 = vld [vmem:[%s33397_s3 + $0x50] sm:$0xff] }
 0x6f5   : > { %v10657_v8 = vadd.f32 %v27935_v14, %v10561_v50  ;;  %v27943_v35 = vpop.f32.mrf.mxu0  ;;  %v25840_v50 = vld [vmem:[%s33396_s2 + $0x48] sm:$0xff] }
 0x6f6   : > { %v31188_v10 = vpop.f32.mrf.mxu1 }
 0x6f7   : > { %v10753_v54 = vadd.f32 %v27943_v35, %v10657_v8  ;;  %v31190_v21 = vpop.f32.mrf.mxu0 }
 0x6f8   : > { %33584 = vst [vmem:[#allocation12_spill] sm:$0xff] %v31190_v21  ;;  %v27938_v12 = vpop.f32.mrf.mxu1 }
 0x6f9   : > { %v10673_v53 = vadd.f32 %v27938_v12, %v10575_v30  ;;  %v27946_v36 = vpop.f32.mrf.mxu0  ;;  %v25841_v30 = vld [vmem:[%s33396_s2 + $0x50] sm:$0xff] }
 0x6fa   : > { %v31192_v24 = vpop.f32.mrf.mxu1 }
 0x6fb   : > { %33585 = vst [vmem:[#allocation16_spill] sm:$0xff] %v31192_v24  ;;  %v10765_v13 = vadd.f32 %v27946_v36, %v10673_v53  ;;  %v31194_v15 = vpop.f32.mrf.mxu0  ;;  %v11790_v36 = vsel %vm1192_vm3, %v25840_v50, 0 }
 0x6fc   : > { %33586 = vst [vmem:[#allocation19_spill] sm:$0xff] %v31194_v15  ;;  %v27951_v55 = vpop.f32.mrf.mxu1  ;;  %v25842_v15 = vld [vmem:[%s33396_s2 + $0x58] sm:$0xff] }
 0x6fd   : > { %v10843_v47 = vadd.f32 %v27951_v55, %v10753_v54  ;;  %v10937_v1 = vpop.f32.mrf.mxu0  ;;  %v11793_v55 = vsel %vm1192_vm3, %v25841_v30, 0 }
 0x6fe   : > { %v31196_v7 = vpop.f32.mrf.mxu1  ;;  %v31217_v63 = vand.u32 4294901760, %v11793_v55 }
 0x6ff   : > { %33587 = vst [vmem:[#allocation33_spill] sm:$0xff] %v31196_v7  ;;  %v31201_v14 = vadd.f32 %v10843_v47, %v10264_v16  ;;  %v27961_v8 = vpop.f32.mrf.mxu0 }
 0x700   : > { %v27954_v35 = vpop.f32.mrf.mxu1  ;;  %v31215_v8 = vand.u32 4294901760, %v11790_v36 }
 0x701   : > { %33588 = vst [vmem:[#allocation31_spill] sm:$0xff] %v31201_v14  ;;  %v10855_v12 = vadd.f32 %v27954_v35, %v10765_v13  ;;  %v11094_v53 = vpop.f32.mrf.mxu0  ;;  %v11796_v13 = vsel %vm1192_vm3, %v25842_v15, 0 }
 0x702   : > { %v31207_v54 = vpop.f32.mrf.mxu1  ;;  %v31221_v30 = vsub.f32 %v11790_v36, %v31215_v8  ;;  %v31223_v24 = vand.u32 4294901760, %v11796_v13 }
 0x703   : > { %33589 = vst [vmem:[#allocation32_spill] sm:$0xff] %v31207_v54  ;;  %v31213_v16 = vadd.f32 %v10855_v12, %v10266_v32  ;;  %v27975_v47 = vpop.f32.mrf.mxu0  ;;  %v31226_v32 = vsub.f32 %v11793_v55, %v31217_v63 }
 0x704   : > { %v33442_v21 = vand.u32 4294901760, %v31221_v30  ;;  %v31230_v15 = vsub.f32 %v11796_v13, %v31223_v24 }
 0x705   : > { %33590 = vst [vmem:[#allocation20_spill] sm:$0xff] %v31213_v16  ;;  %v11018_v14 = vpop.f32.mrf.mxu1 }
 0x706   : > { %v11019_v35 = vadd.f32 %v11018_v14, %v10937_v1  ;;  %v11246_v50 = vpop.f32.mrf.mxu0  ;;  %v11877_v36 = vsub.f32 %v31221_v30, %v33442_v21 }
 0x707   : > { %v27968_v38 = vpop.f32.mrf.mxu1 }
 0x708   : > { %v27989_v54 = vpop.f32.mrf.mxu0  ;;  %v11095_v7 = vadd.f32 %v11094_v53, %v11019_v35  ;;  %v33444_v38 = vand.u32 4294901760, %v31226_v32  ;;  %v11878_v60 = vand.u32 4294901760, %v11877_v36 }
 0x709   : > { %v33443_v54 = vand.u32 4294901760, %v31230_v15 }
 0x70b   : > { %v11169_v12 = vpop.f32.mrf.mxu1 }
 0x70c   : > { %v11170_v47 = vadd.f32 %v11169_v12, %v11095_v7  ;;  %v11396_v16 = vpop.f32.mrf.mxu0  ;;  %v11887_v7 = vsub.f32 %v31226_v32, %v33444_v38 }
 0x70d   : > { %v27982_v1 = vpop.f32.mrf.mxu1 }
 0x70e   : > { %v28003_v14 = vpop.f32.mrf.mxu0  ;;  %v11247_v53 = vadd.f32 %v11246_v50, %v11170_v47  ;;  %v11897_v50 = vsub.f32 %v31230_v15, %v33443_v54  ;;  %v25843_v47 = vld [vmem:[%s33397_s3 + $0x40] sm:$0xff] }
 0x70f   : > { %v11888_v14 = vand.u32 4294901760, %v11887_v7  ;;  %v12382_v36 = vsel %vm1192_vm3, %v25843_v47, 0 }
 0x710   : > { %v11898_v38 = vand.u32 4294901760, %v11897_v50  ;;  %v31259_v47 = vand.u32 4294901760, %v12382_v36 }
 0x711   : > { %v11319_v55 = vpop.f32.mrf.mxu1 }
 0x712   : > { %v11320_v35 = vadd.f32 %v11319_v55, %v11247_v53  ;;  %v11553_v12 = vpop.f32.mrf.mxu0  ;;  %v25844_v53 = vld [vmem:[%s33397_s3 + $0x48] sm:$0xff] }
 0x713   : > { %v27996_v13 = vpop.f32.mrf.mxu1 }
 0x714   : > { %v31240_v39 = vand.u32 4294901760, %v11320_v35  ;;  %v28017_v1 = vpop.f32.mrf.mxu0 }
 0x716   : > { %v11936_v21 = vsub.f32 %v11320_v35, %v31240_v39  ;;  %28039 = vmatprep.subr.mxu0 %v31240_v39  ;;  %v12385_v35 = vsel %vm1192_vm3, %v25844_v53, 0  ;;  %v12388_v53 = vsel %vm1192_vm3, %v25845_v41, 0 }
 0x717   : > { %v11477_v55 = vpop.f32.mrf.mxu1  ;;  %28040 = vmatpush3.msra.mxu0 %v31240_v39 }
 0x718   : > { %v11478_v13 = vadd.f32 %v11477_v55, %v11396_v16  ;;  %v11705_v1 = vpop.f32.mrf.mxu0  ;;  %28042 = vmatmul.mubr.f32.vlgmr.msra.gmra.mxu0 %v11878_v60  ;;  %28055 = vmatprep.subr.mxu0 %v11936_v21  ;;  %v11937_v54 = vand.u32 4294901760, %v11936_v21  ;;  %v25846_v60 = vld [vmem:[%s33397_s3 + $0x58] sm:$0xff] }
 0x719   : > { %v28010_v7 = vpop.f32.mrf.mxu1  ;;  %28056 = vmatpush3.msra.mxu0 %v11936_v21  ;;  %28044 = vmatprep.mubr.f32.mxu0 %v11888_v14  ;;  %v31264_v14 = vand.u32 4294901760, %v12385_v35 }
 0x71a   : > { %v28031_v22 = vpop.f32.mrf.mxu0  ;;  %v11554_v27 = vadd.f32 %v11553_v12, %v11478_v13  ;;  %28071 = vmatprep.subr.mxu0 %v11937_v54  ;;  %v11938_v26 = vsub.f32 %v11936_v21, %v11937_v54  ;;  %v31270_v21 = vsub.f32 %v12382_v36, %v31259_v47  ;;  %v31272_v7 = vand.u32 4294901760, %v12388_v53 }
 0x71b   : > { %v12391_v22 = vsel %vm1192_vm3, %v25846_v60, 0 }
 0x71c   : > { %v11628_v16 = vpop.f32.mrf.mxu1  ;;  %28045 = vmatmul.mubr.f32.gmra.mxu0 %v11898_v38  ;;  %v11939_v50 = vand.u32 4294901760, %v11938_v26  ;;  %v31279_v26 = vand.u32 4294901760, %v12391_v22 }
 0x71d   : > { %v11629_v55 = vadd.f32 %v11628_v16, %v11554_v27  ;;  %28057 = vmatprep.mubr.f32.mxu0 %v31143_v31  ;;  %v31277_v27 = vsub.f32 %v12385_v35, %v31264_v14  ;;  %v31290_v35 = vsub.f32 %v12388_v53, %v31272_v7 }
 0x71e   : > { %v28024_v12 = vpop.f32.mrf.mxu1  ;;  %28047 = vmatprep.subr.mxu1 %v11939_v50  ;;  %v31296_v16 = vsub.f32 %v12391_v22, %v31279_v26 }
 0x71f   : > { %v11706_v13 = vadd.f32 %v11705_v1, %v11629_v55  ;;  %28048 = vmatpush3.msra.mxu1 %v11939_v50  ;;  %v33448_v1 = vand.u32 4294901760, %v31270_v21  ;;  %v33591_v55 = vand.u32 4294901760, %v31143_v31 }
 0x720   : > { %v11778_v38 = vpop.f32.mrf.mxu1  ;;  %28050 = vmatmul.mubr.f32.vlgmr.msra.gmra.mxu1 %v31215_v8  ;;  %28058 = vmatmul.mubr.f32.vlgmr.msra.gmra.mxu0 %v31221_v30  ;;  %v12491_v31 = vand.u32 4294901760, %v31296_v16 }
 0x721   : > { %v11779_v41 = vadd.f32 %v11778_v38, %v11706_v13  ;;  %28063 = vmatprep.subr.mxu1 %v31240_v39  ;;  %28072 = vmatpush3.msra.mxu0 %v11937_v54  ;;  %v33447_v54 = vand.u32 4294901760, %v31277_v27  ;;  %v12462_v53 = vsub.f32 %v31270_v21, %v33448_v1  ;;  %v12481_v13 = vand.u32 4294901760, %v31290_v35 }
 0x722   : > { %v28038_v36 = vpop.f32.mrf.mxu1  ;;  %28064 = vmatpush3.msra.mxu1 %v31240_v39  ;;  %28052 = vmatprep.mubr.f32.mxu1 %v31217_v63  ;;  %v33592_v38 = vand.u32 4294901760, %v31221_v30  ;;  %v12492_v1 = vsub.f32 %v31296_v16, %v12491_v31 }
 0x723   : > { %v31285_v60 = vand.u32 4294901760, %v11779_v41  ;;  %28079 = vmatprep.subr.mxu1 %v31240_v39  ;;  %28060 = vmatprep.mubr.f32.mxu0 %v31226_v32  ;;  %v12472_v22 = vsub.f32 %v31277_v27, %v33447_v54  ;;  %v33593_v36 = vand.u32 4294901760, %v31226_v32  ;;  %v12463_v30 = vand.u32 4294901760, %v12462_v53  ;;  %v25851_v32 = vld [vmem:[%s29346_s24 + $0x10] sm:$0xff] }
 0x724   : > { %28053 = vmatmul.mubr.f32.gmra.mxu1 %v31223_v24  ;;  %28061 = vmatmul.mubr.f32.gmra.mxu0 %v31230_v15  ;;  %v33594_v54 = vand.u32 4294901760, %v31230_v15  ;;  %v13007_v15 = vsel %vm263_vm1, %v25851_v32, 0 }
 0x725   : > { %v12531_v50 = vsub.f32 %v11779_v41, %v31285_v60  ;;  %28087 = vmatprep.subr.mxu0 %v31285_v60  ;;  %28065 = vmatprep.mubr.f32.mxu1 %v33591_v55 }
 0x726   : > { %28073 = vmatprep.mubr.f32.mxu0 %v31140_v9 }
 0x727   : > { %v12532_v12 = vand.u32 4294901760, %v12531_v50 }
 0x728   : > { %28066 = vmatmul.mubr.f32.vlgmr.msra.gmra.mxu1 %v33592_v38  ;;  %28074 = vmatmul.mubr.f32.vlgmr.msra.gmra.mxu0 %v31215_v8  ;;  %v12482_v38 = vsub.f32 %v31290_v35, %v12481_v13 }
 0x729   : > { %28080 = vmatpush3.msra.mxu1 %v31240_v39  ;;  %28088 = vmatpush3.msra.mxu0 %v31285_v60  ;;  %v12533_v41 = vsub.f32 %v12531_v50, %v12532_v12  ;;  %v12473_v39 = vand.u32 4294901760, %v12472_v22 }
 0x72a   : > { %28103 = vmatprep.subr.mxu0 %v12531_v50  ;;  %28068 = vmatprep.mubr.f32.mxu1 %v33593_v36  ;;  %v12483_v53 = vand.u32 4294901760, %v12482_v38  ;;  %v33602_v36 = vand.u32 4294901760, %v31270_v21  ;;  %v33605_v38 = vand.u32 4294901760, %v31277_v27 }
 0x72b   : > { %v12534_v55 = vand.u32 4294901760, %v12533_v41  ;;  %28076 = vmatprep.mubr.f32.mxu0 %v31217_v63  ;;  %v12493_v41 = vand.u32 4294901760, %v12492_v1 }
 0x72c   : > { %28069 = vmatmul.mubr.f32.gmra.mxu1 %v33594_v54  ;;  %28077 = vmatmul.mubr.f32.gmra.mxu0 %v31223_v24  ;;  %v13005_v54 = vld [vmem:[%s33394_s0 + $0x8] sm:$0xff] }
 0x72d   : > { %28095 = vmatprep.subr.mxu1 %v12534_v55  ;;  %28081 = vmatprep.mubr.f32.mxu1 %v31140_v9  ;;  %v13004_v9 = vld [vmem:[%s33394_s0] sm:$0xff]  ;;  %v31345_v1 = vand.u32 4294901760, %v13005_v54 }
 0x72e   : > { %28089 = vmatprep.mubr.f32.mxu0 %v12463_v30 }
 0x72f   : > { %33596 = vst [vmem:[#allocation18_spill] sm:$0xff] %v31345_v1 }
 0x730   : > { %28082 = vmatmul.mubr.f32.vlgmr.msra.gmra.mxu1 %v31215_v8  ;;  %28090 = vmatmul.mubr.f32.vlgmr.msra.gmra.mxu0 %v12473_v39  ;;  %v31341_v8 = vand.u32 4294901760, %v13007_v15 }
 0x731   : > { %28096 = vmatpush3.msra.mxu1 %v12534_v55  ;;  %28104 = vmatpush3.msra.mxu0 %v12531_v50  ;;  %v31347_v50 = vand.u32 4294901760, %v13004_v9 }
 0x732   : > { %28111 = vmatprep.subr.mxu1 %v31285_v60  ;;  %28119 = vmatprep.subr.mxu0 %v12532_v12  ;;  %33595 = vst [vmem:[#allocation34_spill] sm:$0xff] %v31341_v8 }
 0x733   : > { %28084 = vmatprep.mubr.f32.mxu1 %v31217_v63  ;;  %28092 = vmatprep.mubr.f32.mxu0 %v12483_v53  ;;  %33597 = vst [vmem:[#allocation22_spill] sm:$0xff] %v31347_v50  ;;  %v31352_v63 = vsub.f32 %v13007_v15, %v31341_v8  ;;  %v31363_v22 = vsub.f32 %v13004_v9, %v31347_v50 }
 0x734   : > { %28085 = vmatmul.mubr.f32.gmra.mxu1 %v31223_v24  ;;  %28093 = vmatmul.mubr.f32.gmra.mxu0 %v12493_v41  ;;  %v31356_v24 = vsub.f32 %v13005_v54, %v31345_v1 }
 0x735   : > { %28097 = vmatprep.mubr.f32.mxu1 %v31259_v47  ;;  %28105 = vmatprep.mubr.f32.mxu0 %v31270_v21  ;;  %33598 = vst [vmem:[#allocation23_spill] sm:$0xff] %v31352_v63  ;;  %33600 = vst [vmem:[#allocation26_spill] sm:$0xff] %v31363_v22  ;;  %v31377_v55 = vand.u32 4294901760, %v31363_v22 }
 0x736   : > { %33599 = vst [vmem:[#allocation25_spill] sm:$0xff] %v31356_v24  ;;  %v31374_v30 = vand.u32 4294901760, %v31356_v24 }
 0x737   : > { %33604 = vst [vmem:[#allocation30_spill] sm:$0xff] %v31377_v55 }
 0x738   : > { %28098 = vmatmul.mubr.f32.vlgmr.msra.gmra.mxu1 %v31264_v14  ;;  %28106 = vmatmul.mubr.f32.vlgmr.msra.gmra.mxu0 %v31277_v27  ;;  %33603 = vst [vmem:[#allocation29_spill] sm:$0xff] %v31374_v30  ;;  %v13118_v21 = vsub.f32 %v31356_v24, %v31374_v30  ;;  %v13125_v27 = vsub.f32 %v31363_v22, %v31377_v55 }
 0x739   : > { %28112 = vmatpush3.msra.mxu1 %v31285_v60  ;;  %28120 = vmatpush3.msra.mxu0 %v12532_v12  ;;  %v31368_v12 = vand.u32 4294901760, %v31352_v63 }
 0x73a   : > { %28127 = vmatprep.subr.mxu1 %v31285_v60  ;;  %28100 = vmatprep.mubr.f32.mxu1 %v31272_v7 }
 0x73b   : > { %28108 = vmatprep.mubr.f32.mxu0 %v31290_v35  ;;  %28135 = vmatprep.subr.mxu0 %v33559_v57  ;;  %33601 = vst [vmem:[#allocation28_spill] sm:$0xff] %v31368_v12  ;;  %v13079_v39 = vsub.f32 %v31352_v63, %v31368_v12  ;;  %v13119_v35 = vand.u32 4294901760, %v13118_v21 }
 0x73c   : > { %28101 = vmatmul.mubr.f32.gmra.mxu1 %v31279_v26  ;;  %28109 = vmatmul.mubr.f32.gmra.mxu0 %v31296_v16 }
 0x73d   : > { %28113 = vmatprep.mubr.f32.mxu1 %v33602_v36  ;;  %28121 = vmatprep.mubr.f32.mxu0 %v31259_v47 }
 0x740   : > { %28114 = vmatmul.mubr.f32.vlgmr.msra.gmra.mxu1 %v33605_v38  ;;  %28122 = vmatmul.mubr.f32.vlgmr.msra.gmra.mxu0 %v31264_v14 }
 0x741   : > { %28128 = vmatpush3.msra.mxu1 %v31285_v60  ;;  %28116 = vmatprep.mubr.f32.mxu1 %v12481_v13  ;;  %v31398_v60 = vand.u32 4294901760, %v13079_v39  ;;  %v13126_v13 = vand.u32 4294901760, %v13125_v27 }
 0x742   : > { %28124 = vmatprep.mubr.f32.mxu0 %v31272_v7  ;;  %28136 = vmatpush3.msra.mxu0 %v31345_v1 }
 0x743   : > { %28137 = vmatprep.subr.mxu0 %v33559_v57  ;;  %28142 = vmatprep.subr.mxu1 %v33559_v57  ;;  %33606 = vst [vmem:[#allocation24_spill] sm:$0xff] %v31398_v60 }
 0x744   : > { %28117 = vmatmul.mubr.f32.gmra.mxu1 %v12491_v31  ;;  %28125 = vmatmul.mubr.f32.gmra.mxu0 %v31279_v26 }
 0x745   : > { %28129 = vmatprep.mubr.f32.mxu1 %v31259_v47  ;;  %28138 = vmatpush3.msra.mxu0 %v31347_v50 }
 0x746   : > { %28139 = vmatprep.mubr.msk.f32.mxu0 %vm29303_vm2, %v33559_v57  ;;  %28149 = vmatprep.subr.mxu0 %v33559_v57 }
 0x748   : > { %28130 = vmatmul.mubr.f32.vlgmr.msra.gmra.mxu1 %v31264_v14  ;;  %28140 = vmatmul.mubr.f32.vlgmr.msra.gmra.mxu0 %v31398_v60 }
 0x749   : > { %28132 = vmatprep.mubr.f32.mxu1 %v31272_v7  ;;  %28143 = vmatpush3.msra.mxu1 %v13119_v35 }
 0x74a   : > { %28144 = vmatprep.subr.mxu1 %v33559_v57  ;;  %28150 = vmatpush3.msra.mxu0 %v31356_v24 }
 0x74b   : > { %28145 = vmatpush3.msra.mxu1 %v13126_v13  ;;  %28151 = vmatprep.subr.mxu0 %v33559_v57 }
 0x74c   : > { %28133 = vmatmul.mubr.f32.gmra.mxu1 %v31279_v26  ;;  %28156 = vmatprep.subr.mxu1 %v33559_v57 }
 0x74d   : > { %28146 = vmatprep.mubr.msk.f32.mxu1 %vm29303_vm2, %v33559_v57  ;;  %28152 = vmatpush3.msra.mxu0 %v31363_v22 }
 0x74e   : > { %28153 = vmatprep.mubr.msk.f32.mxu0 %vm29303_vm2, %v33559_v57  ;;  %28163 = vmatprep.subr.mxu0 %v33559_v57 }
 0x74f   : > { %28154 = vmatmul.mubr.f32.vlgmr.msra.gmra.mxu0 %v31352_v63 }
 0x750   : > { %28147 = vmatmul.mubr.f32.vlgmr.msra.gmra.mxu1 %v31341_v8  ;;  %28164 = vmatpush3.msra.mxu0 %v31374_v30  ;;  %v7769_v30 = vadd.f32 %v30687_v44, %v30699_v33 }
 0x751   : > { %28157 = vmatpush3.msra.mxu1 %v31345_v1  ;;  %28160 = vmatprep.mubr.msk.f32.mxu1 %vm29303_vm2, %v33559_v57 }
 0x752   : > { %28158 = vmatprep.subr.mxu1 %v33559_v57  ;;  %28165 = vmatprep.subr.mxu0 %v33559_v57 }
 0x753   : > { %28159 = vmatpush3.msra.mxu1 %v31347_v50  ;;  %28166 = vmatpush3.msra.mxu0 %v31377_v55 }
 0x754   : > { %28161 = vmatmul.mubr.f32.vlgmr.msra.gmra.mxu1 %v31368_v12  ;;  %28170 = vmatprep.subr.mxu1 %v33559_v57 }
 0x755   : > { %28167 = vmatprep.mubr.msk.f32.mxu0 %vm29303_vm2, %v33559_v57  ;;  %28171 = vmatpush3.msra.mxu1 %v31345_v1 }
 0x756   : > { %28168 = vmatmul.mubr.f32.vlgmr.msra.gmra.mxu0 %v31341_v8  ;;  %28172 = vmatprep.subr.mxu1 %v33559_v57 }
 0x757   : > { %28173 = vmatpush3.msra.mxu1 %v31347_v50  ;;  %28174 = vmatprep.mubr.msk.f32.mxu1 %vm29303_vm2, %v33559_v57 }
 0x758   : > { %28175 = vmatmul.mubr.f32.vlgmr.msra.gmra.mxu1 %v31341_v8  ;;  %28184 = vmatprep.subr.mxu1 %v33559_v57 }
 0x759   : > { %28185 = vmatpush3.msra.mxu1 %v13119_v35  ;;  %28188 = vmatprep.mubr.msk.f32.mxu1 %vm29303_vm2, %v33559_v57 }
 0x75a   : > { %28186 = vmatprep.subr.mxu1 %v33559_v57  ;;  %28177 = vmatprep.subr.mxu0 %v33559_v57 }
 0x75b   : > { %28187 = vmatpush3.msra.mxu1 %v13126_v13  ;;  %28178 = vmatpush3.msra.mxu0 %v31345_v1  ;;  %v7757_v13 = vadd.f32 %v30676_v4, %v30692_v51  ;;  %v7863_v1 = vadd.f32 %v30717_v40, %v7769_v30 }
 0x75c   : > { %28198 = vmatprep.subr.mxu1 %v33559_v57  ;;  %28179 = vmatprep.subr.mxu0 %v33559_v57 }
 0x75d   : > { %28180 = vmatpush3.msra.mxu0 %v31347_v50  ;;  %28181 = vmatprep.mubr.msk.f32.mxu0 %vm29303_vm2, %v33559_v57  ;;  %v7849_v55 = vadd.f32 %v30706_v59, %v7757_v13  ;;  %v8352_v50 = vadd.f32 %v30870_v46, %v30864_v19  ;;  %v9867_v59 = vadd.f32 %v31154_v52, %v31150_v48 }
 0x75e   : > { %28191 = vmatprep.subr.mxu0 %v33559_v57  ;;  %v10462_v19 = vadd.f32 %v31180_v29, %v31173_v17  ;;  %v7960_v40 = vadd.f32 %v30701_v6, %v7863_v1 }
 0x75f   : > { %v7944_v57 = vadd.f32 %v30697_v45, %v7849_v55  ;;  %v8444_v33 = vadd.f32 %v30872_v37, %v8352_v50  ;;  %v9959_v52 = vadd.f32 %v31156_v0, %v9867_v59 }
 0x760   : > { %v10554_v50 = vadd.f32 %v31182_v43, %v10462_v19 }
 0x761   : > { %v8042_v45 = vadd.f32 %v30732_v11, %v7944_v57  ;;  %v8539_v48 = vadd.f32 %v30878_v49, %v8444_v33  ;;  %v10054_v29 = vadd.f32 %v31162_v20, %v9959_v52  ;;  %v10474_v11 = vadd.f32 %v31184_v5, %v31178_v23 }
 0x762   : > { %v8054_v49 = vadd.f32 %v30862_v18, %v7960_v40  ;;  %v33613_v40 = vld [vmem:[#allocation13_spill] sm:$0xff] }
 0x763   : > { %v8132_v6 = vadd.f32 %v30725_v56, %v8042_v45  ;;  %v8637_v0 = vadd.f32 %v30880_v58, %v8539_v48  ;;  %v33610_v58 = vld [vmem:[#allocation35_spill] sm:$0xff] }
 0x765   : > { %v8727_v56 = vadd.f32 %v30888_v34, %v8637_v0  ;;  %v8153_v5 = vadd.f32 %v8132_v6, %v33610_v58  ;;  %v33616_v34 = vld [vmem:[#allocation12_spill] sm:$0xff]  ;;  %v33618_v0 = vld [vmem:[#allocation6_spill] sm:$0xff] }
 0x767   : > { %v8748_v6 = vadd.f32 %v8727_v56, %v8153_v5 }
 0x7d8   : > { %v31452_v47 = vpop.f32.mrf.mxu0 }
 0x7da   : > { %v11870_v14 = vpop.f32.mrf.mxu0 }
 0x7dc   : > { %v31454_v7 = vpop.f32.mrf.mxu0 }
 0x7de   : > { %v11890_v26 = vpop.f32.mrf.mxu0 }
 0x7e0   : > { %v31456_v16 = vpop.f32.mrf.mxu1  ;;  %v31458_v31 = vpop.f32.mrf.mxu0 }
 0x7e2   : > { %v11976_v32 = vpop.f32.mrf.mxu1  ;;  %v12068_v53 = vpop.f32.mrf.mxu0 }
 0x7e4   : > { %v31460_v41 = vpop.f32.mrf.mxu1  ;;  %v31462_v15 = vpop.f32.mrf.mxu0 }
 0x7e6   : > { %v11988_v54 = vpop.f32.mrf.mxu1  ;;  %v31464_v9 = vpop.f32.mrf.mxu0 }
 0x7e8   : > { %v31466_v36 = vpop.f32.mrf.mxu1  ;;  %v31468_v38 = vpop.f32.mrf.mxu0 }
 0x7e9   : > { %33607 = vst [vmem:[#allocation21_spill] sm:$0xff] %v31468_v38 }
 0x7ea   : > { %v12163_v39 = vpop.f32.mrf.mxu1  ;;  %v31470_v21 = vpop.f32.mrf.mxu0 }
 0x7ec   : > { %v31472_v27 = vpop.f32.mrf.mxu1  ;;  %v31474_v35 = vpop.f32.mrf.mxu0 }
 0x7ee   : > { %v31478_v12 = vpop.f32.mrf.mxu1  ;;  %v31480_v8 = vpop.f32.mrf.mxu0 }
 0x7f0   : > { %v31482_v63 = vpop.f32.mrf.mxu1  ;;  %v31484_v60 = vpop.f32.mrf.mxu0 }
 0x7f1   : > { %33608 = vst [vmem:[#allocation27_spill] sm:$0xff] %v31482_v63  ;;  %v8364_v63 = vadd.f32 %v30874_v62, %v30868_v2  ;;  %v9879_v2 = vadd.f32 %v31158_v42, %v31152_v25  ;;  %v11977_v62 = vadd.f32 %v11976_v32, %v11870_v14  ;;  %v33609_v32 = vld [vmem:[#allocation11_spill] sm:$0xff] }
 0x7f2   : > { %v31489_v22 = vpop.f32.mrf.mxu1  ;;  %v12465_v24 = vpop.f32.mrf.mxu0  ;;  %v10152_v59 = vadd.f32 %v33609_v32, %v10054_v29 }
 0x7f3   : > { %v8458_v17 = vadd.f32 %v30876_v3, %v8364_v63  ;;  %v10649_v3 = vadd.f32 %v31188_v10, %v10554_v50  ;;  %v9973_v43 = vadd.f32 %v31160_v61, %v9879_v2  ;;  %v12069_v1 = vadd.f32 %v12068_v53, %v11977_v62  ;;  %v33612_v10 = vld [vmem:[#allocation10_spill] sm:$0xff]  ;;  %v33614_v53 = vld [vmem:[#allocation4_spill] sm:$0xff] }
 0x7f4   : > { %v31493_v4 = vpop.f32.mrf.mxu1  ;;  %v31495_v51 = vpop.f32.mrf.mxu0  ;;  %v11989_v63 = vadd.f32 %v11988_v54, %v11890_v26  ;;  %v10568_v19 = vadd.f32 %v33612_v10, %v10474_v11  ;;  %v8144_v61 = vadd.f32 %v33613_v40, %v8054_v49  ;;  %v33617_v2 = vld [vmem:[#allocation16_spill] sm:$0xff]  ;;  %v33621_v10 = vld [vmem:[#allocation9_spill] sm:$0xff] }
 0x7f5   : > { %v8555_v25 = vadd.f32 %v30882_v28, %v8458_v17  ;;  %v33611_v28 = vld [vmem:[#allocation14_spill] sm:$0xff]  ;;  %v12164_v45 = vadd.f32 %v12163_v39, %v12069_v1  ;;  %v10747_v48 = vadd.f32 %v33616_v34, %v10649_v3  ;;  %v33619_v39 = vld [vmem:[#allocation33_spill] sm:$0xff] }
 0x7f6   : > { %v31501_v13 = vpop.f32.mrf.mxu1  ;;  %v12485_v44 = vpop.f32.mrf.mxu0  ;;  %v10070_v33 = vadd.f32 %v33611_v28, %v9973_v43  ;;  %v10665_v62 = vadd.f32 %v33617_v2, %v10568_v19  ;;  %v12083_v17 = vadd.f32 %v31464_v9, %v11989_v63  ;;  %v8155_v19 = vadd.f32 %v8144_v61, %v33621_v10  ;;  %v33623_v63 = vld [vmem:[#allocation19_spill] sm:$0xff] }
 0x7f7   : > { %v8649_v26 = vadd.f32 %v33614_v53, %v8555_v25  ;;  %v10837_v43 = vadd.f32 %v33619_v39, %v10747_v48  ;;  %v33620_v25 = vld [vmem:[#allocation15_spill] sm:$0xff] }
 0x7f8   : > { %v31508_v46 = vpop.f32.mrf.mxu1  ;;  %v31510_v38 = vpop.f32.mrf.mxu0  ;;  %v10164_v32 = vadd.f32 %v33620_v25, %v10070_v33  ;;  %v12180_v3 = vadd.f32 %v31478_v12, %v12083_v17 }
 0x7f9   : > { %v8739_v11 = vadd.f32 %v33618_v0, %v8649_v26 }
 0x7fa   : > { %v12571_v30 = vpop.f32.mrf.mxu1  ;;  %v12663_v37 = vpop.f32.mrf.mxu0 }
 0x7fb   : > { %v12572_v14 = vadd.f32 %v12571_v30, %v12465_v24  ;;  %v33615_v24 = vld [vmem:[#allocation8_spill] sm:$0xff]  ;;  %v8750_v53 = vadd.f32 %v8739_v11, %v8155_v19 }
 0x7fc   : > { %v28102_v55 = vpop.f32.mrf.mxu1  ;;  %v31521_v57 = vpop.f32.mrf.mxu0  ;;  %v10242_v54 = vadd.f32 %v33615_v24, %v10152_v59  ;;  %v12262_v59 = vadd.f32 %v31470_v21, %v12164_v45  ;;  %v11995_v21 = vadd.f32 %v31460_v41, %v31454_v7  ;;  %v33624_v45 = vld [vmem:[#allocation32_spill] sm:$0xff]  ;;  %v12274_v24 = vadd.f32 %v31480_v8, %v12180_v3 }
 0x7fd   : > { %v12664_v29 = vadd.f32 %v12663_v37, %v12572_v14  ;;  %v10759_v14 = vadd.f32 %v33623_v63, %v10665_v62  ;;  %v12590_v48 = vadd.f32 %v28102_v55, %v31495_v51  ;;  %v11983_v8 = vadd.f32 %v31456_v16, %v31452_v47 }
 0x7fe   : > { %v12583_v42 = vpop.f32.mrf.mxu1  ;;  %v12677_v20 = vpop.f32.mrf.mxu0  ;;  %v10263_v40 = vadd.f32 %v10242_v54, %v8748_v6  ;;  %v12352_v56 = vadd.f32 %v31489_v22, %v12262_v59  ;;  %v12364_v62 = vadd.f32 %v31501_v13, %v12274_v24  ;;  %v12090_v7 = vadd.f32 %v31462_v15, %v11995_v21 }
 0x7ff   : > { %v12584_v50 = vadd.f32 %v12583_v42, %v12485_v44  ;;  %v33622_v44 = vld [vmem:[#allocation17_spill] sm:$0xff]  ;;  %v10849_v61 = vadd.f32 %v33624_v45, %v10759_v14  ;;  %v12685_v51 = vadd.f32 %v31521_v57, %v12590_v48  ;;  %v12578_v13 = vadd.f32 %v31508_v46, %v31484_v60 }
 0x800   : > { %v31533_v23 = vpop.f32.mrf.mxu1  ;;  %v31535_v18 = vpop.f32.mrf.mxu0  ;;  %v10254_v42 = vadd.f32 %v33622_v44, %v10164_v32  ;;  %v10858_v26 = vadd.f32 %v10837_v43, %v10263_v40  ;;  %v12076_v3 = vadd.f32 %v31458_v31, %v11983_v8  ;;  %v33625_v44 = vld [vmem:[#allocation21_spill] sm:$0xff] }
 0x801   : > { %v12678_v5 = vadd.f32 %v12677_v20, %v12584_v50  ;;  %v12671_v19 = vadd.f32 %v31510_v38, %v12578_v13 }
 0x802   : > { %v12758_v52 = vpop.f32.mrf.mxu1  ;;  %v12856_v30 = vpop.f32.mrf.mxu0  ;;  %v10265_v22 = vadd.f32 %v10254_v42, %v8750_v53  ;;  %v12373_v20 = vadd.f32 %v12352_v56, %v10858_v26  ;;  %v12172_v57 = vadd.f32 %v31466_v36, %v12076_v3  ;;  %v33626_v42 = vld [vmem:[#allocation20_spill] sm:$0xff]  ;;  %v33627_v56 = vld [vmem:[#allocation27_spill] sm:$0xff] }
 0x803   : > { %v12759_v28 = vadd.f32 %v12758_v52, %v12664_v29  ;;  %v12767_v60 = vadd.f32 %v31533_v23, %v12671_v19  ;;  %v33628_v26 = vld [vmem:[#allocation31_spill] sm:$0xff] }
 0x804   : > { %v28118_v49 = vpop.f32.mrf.mxu1  ;;  %v28126_v1 = vpop.f32.mrf.mxu0  ;;  %v10860_v29 = vadd.f32 %v10849_v61, %v10265_v22  ;;  %v12268_v31 = vadd.f32 %v33625_v44, %v12172_v57  ;;  %v12972_v22 = vld [vmem:[#allocation3] sm:$0xff]  ;;  %v33629_v57 = vld [vmem:[#allocation18_spill] sm:$0xff] }
 0x805   : > { %v12857_v54 = vadd.f32 %v12856_v30, %v12759_v28  ;;  %v12188_v30 = vadd.f32 %v31472_v27, %v12090_v7  ;;  %v12783_v15 = vadd.f32 %v28118_v49, %v12685_v51 }
 0x806   : > { %v12774_v9 = vpop.f32.mrf.mxu1  ;;  %v12868_v37 = vpop.f32.mrf.mxu0  ;;  %v12375_v0 = vadd.f32 %v12364_v62, %v10860_v29  ;;  %v12358_v36 = vadd.f32 %v33627_v56, %v12268_v31 }
 0x807   : > { %v12775_v34 = vadd.f32 %v12774_v9, %v12678_v5  ;;  %v12280_v47 = vadd.f32 %v31474_v35, %v12188_v30  ;;  %v12875_v40 = vadd.f32 %v28126_v1, %v12783_v15 }
 0x808   : > { %v28131_v33 = vpop.f32.mrf.mxu1  ;;  %v31557_v12 = vpop.f32.mrf.mxu0  ;;  %v12374_v21 = vadd.f32 %v12358_v36, %v33628_v26 }
 0x809   : > { %v12869_v50 = vadd.f32 %v12868_v37, %v12775_v34  ;;  %v12370_v28 = vadd.f32 %v31493_v4, %v12280_v47  ;;  %v12863_v4 = vadd.f32 %v31535_v18, %v12767_v60  ;;  %v13933_v47 = vld [vmem:[%s33396_s2 + $0x18] sm:$0xff] }
 0x80a   : > { %v12946_v52 = vpop.f32.mrf.mxu1  ;;  %v28141_v2 = vpop.f32.mrf.mxu0 }
 0x80b   : > { %v12947_v17 = vadd.f32 %v12946_v52, %v12857_v54  ;;  %v12376_v35 = vadd.f32 %v12370_v28, %v33626_v42  ;;  %v12953_v1 = vadd.f32 %v28131_v33, %v12863_v4  ;;  %v33630_v28 = vmov 0.0   ;;  %v33632_v4 = vld [vmem:[#allocation25_spill] sm:$0xff] }
 0x80c   : > { %v28134_v41 = vpop.f32.mrf.mxu1 }
 0x80d   : > { %v12968_v6 = vadd.f32 %v12947_v17, %v12373_v20  ;;  %v12965_v46 = vadd.f32 %v28134_v41, %v12875_v40  ;;  %v12969_v61 = vadd.f32 %v12953_v1, %v12374_v21  ;;  %v33633_v1 = vld [vmem:[#allocation26_spill] sm:$0xff]  ;;  %v33634_v21 = vld [vmem:[#allocation29_spill] sm:$0xff] }
 0x80e   : > { %v12958_v55 = vpop.f32.mrf.mxu1 }
 0x80f   : > { %v25848_v11 = vmul.f32 -1.442695, %v12968_v6  ;;  %v12959_v39 = vadd.f32 %v12958_v55, %v12869_v50  ;;  %v13239_v43 = vpop.f32.mrf.mxu0  ;;  %v12971_v5 = vadd.f32 %v12965_v46, %v12376_v35 }
 0x810   : > { %v13163_v25 = vpop.f32.mrf.mxu1 }
 0x811   : > { %29245 = vpow2.f32 %v25848_v11  ;;  %v12970_v32 = vadd.f32 %v12959_v39, %v12375_v0  ;;  %v28155_v59 = vpop.f32.mrf.mxu0  ;;  %v25849_v23 = vmul.f32 -1.442695, %v12971_v5  ;;  %v13164_v62 = vadd.f32 %v13163_v25, %v31557_v12  ;;  %v13930_v12 = vld [vmem:[%s33396_s2] sm:$0xff]  ;;  %v13931_v11 = vld [vmem:[%s33396_s2 + $0x8] sm:$0xff]  ;;  %v13932_v39 = vld [vmem:[%s33396_s2 + $0x10] sm:$0xff] }
 0x812   : > { %v28148_v16 = vpop.f32.mrf.mxu1  ;;  %v13935_v0 = vsel %vm1192_vm3, %v13930_v12, 0  ;;  %v13938_v25 = vsel %vm1192_vm3, %v13931_v11, 0  ;;  %v13941_v3 = vsel %vm1192_vm3, %v13932_v39, 0 }
 0x813   : > { %v25847_v27 = vmul.f32 -1.442695, %v12970_v32  ;;  %v13240_v7 = vadd.f32 %v13239_v43, %v13164_v62  ;;  %v31602_v15 = vand.u32 4294901760, %v13935_v0  ;;  %v31626_v40 = vand.u32 4294901760, %v13941_v3 }
 0x814   : > { %v13314_v9 = vpop.f32.mrf.mxu1 }
 0x815   : > { %29247 = vpow2.f32 %v25847_v27  ;;  %v13315_v41 = vadd.f32 %v13314_v9, %v13240_v7  ;;  %v31618_v27 = vand.u32 4294901760, %v13938_v25  ;;  %v31624_v19 = vsub.f32 %v13935_v0, %v31602_v15 }
 0x816   : > { %v28162_v49 = vpop.f32.mrf.mxu1  ;;  %v13391_v37 = vpop.f32.mrf.mxu0  ;;  %29249 = vpow2.f32 %v25849_v23  ;;  %v13944_v9 = vsel %vm1192_vm3, %v13933_v47, 0  ;;  %v14033_v35 = vsub.f32 %v13941_v3, %v31626_v40 }
 0x817   : > { %v13392_v29 = vadd.f32 %v13391_v37, %v13315_v41  ;;  %v33631_v49 = vld [vmem:[#allocation22_spill] sm:$0xff]  ;;  %v14023_v44 = vsub.f32 %v13938_v25, %v31618_v27  ;;  %v31641_v31 = vand.u32 4294901760, %v13944_v9  ;;  %v14014_v42 = vand.u32 4294901760, %v31624_v19  ;;  %v14527_v41 = vld [vmem:[%s33397_s3 + $0x10] sm:$0xff] }
 0x818   : > { %v13464_v63 = vpop.f32.mrf.mxu1  ;;  %v28169_v14 = vpop.f32.mrf.mxu0 }
 0x819   : > { %v13465_v8 = vadd.f32 %v13464_v63, %v13392_v29  ;;  %v14024_v56 = vand.u32 4294901760, %v14023_v44  ;;  %v14043_v36 = vsub.f32 %v13944_v9, %v31641_v31  ;;  %v14015_v5 = vsub.f32 %v31624_v19, %v14014_v42 }
 0x81a   : > { %v28176_v38 = vpop.f32.mrf.mxu1 }
 0x81b   : > { %v31586_v51 = vand.u32 4294901760, %v13465_v8  ;;  %v14034_v38 = vand.u32 4294901760, %v14033_v35  ;;  %v14044_v26 = vand.u32 4294901760, %v14043_v36  ;;  %v14016_v23 = vand.u32 4294901760, %v14015_v5 }
 0x81d   : > { %v31592_v55 = vsub.f32 %v13465_v8, %v31586_v51  ;;  %v14528_v8 = vld [vmem:[%s33397_s3 + $0x18] sm:$0xff] }
 0x81e   : > { %v29246_v53 = vpop.eup %29245  ;;  %v14539_v0 = vsel %vm1192_vm3, %v14528_v8, 0 }
 0x81f   : > { %v12983_v45 = vadd.f32 1.0, %v29246_v53  ;;  %v31608_v59 = vand.u32 4294901760, %v31592_v55  ;;  %v14025_v53 = vsub.f32 %v14023_v44, %v14024_v56 }
 0x821   : > { %29251 = vrcp.f32 %v12983_v45  ;;  %v14086_v46 = vsub.f32 %v31592_v55, %v31608_v59  ;;  %v14035_v45 = vsub.f32 %v14033_v35, %v14034_v38 }
 0x822   : > { %v29248_v24 = vpop.eup %29247  ;;  %29253 = vtanh.f32 %v12969_v61  ;;  %v33635_v61 = vld [vmem:[#allocation30_spill] sm:$0xff] }
 0x823   : > { %v12976_v54 = vadd.f32 1.0, %v29248_v24  ;;  %v29250_v34 = vpop.eup %29249  ;;  %v14087_v14 = vand.u32 4294901760, %v14086_v46  ;;  %v14026_v24 = vand.u32 4294901760, %v14025_v53 }
 0x824   : > { %v12993_v18 = vadd.f32 1.0, %v29250_v34  ;;  %v14036_v34 = vand.u32 4294901760, %v14035_v45 }
 0x825   : > { %29255 = vrcp.f32 %v12976_v54  ;;  %v14045_v54 = vsub.f32 %v14043_v36, %v14044_v26 }
 0x826   : > { %29257 = vrcp.f32 %v12993_v18 }
 0x82e   : > { %v29252_v48 = vpop.eup %29251 }
 0x82f   : > { %v29254_v52 = vpop.eup %29253 }
 0x830   : > { %v12987_v33 = vmul.f32 %v29254_v52, %v29252_v48  ;;  %v14046_v48 = vand.u32 4294901760, %v14045_v54  ;;  %v14525_v52 = vld [vmem:[%s33397_s3] sm:$0xff] }
 0x832   : > { %v29256_v2 = vpop.eup %29255 }
 0x833   : > { %v12979_v20 = vmul.f32 %v29256_v2, %v12972_v22  ;;  %v29258_v50 = vpop.eup %29257  ;;  %v14530_v2 = vsel %vm1192_vm3, %v14525_v52, 0 }
 0x834   : > { %v31696_v18 = vand.u32 4294901760, %v14530_v2 }
 0x835   : > { %v12988_v17 = vadd.f32 %v12987_v33, %v12979_v20 }
 0x836   : > { %v31699_v22 = vsub.f32 %v14530_v2, %v31696_v18 }
 0x837   : > { %29259 = vtanh.f32 %v12988_v17  ;;  %12997 = vst.msk [vmem:[#allocation3] sm:$0xff] %vm263_vm1, %v12988_v17  ;;  %v14526_v17 = vld [vmem:[%s33397_s3 + $0x8] sm:$0xff] }
 0x838   : > { %v14609_v33 = vand.u32 4294901760, %v31699_v22 }
 0x83a   : > { %v14610_v20 = vsub.f32 %v31699_v22, %v14609_v33 }
 0x83c   : > { %v14611_v62 = vand.u32 4294901760, %v14610_v20 }
 0x844   : > { %v29260_v6 = vpop.eup %29259 }
 0x845   : > { %v12996_v30 = vmul.f32 %v29260_v6, %v29258_v50  ;;  %v14533_v50 = vsel %vm1192_vm3, %v14526_v17, 0  ;;  %v14536_v6 = vsel %vm1192_vm3, %v14527_v41, 0 }
 0x847   : > { %12998 = vst.msk [vmem:[#allocation2] sm:$0xff] %vm263_vm1, %v12996_v30  ;;  %25850 = vst.msk [vmem:[%s29351_s27 + $0x8] sm:$0xff] %vm263_vm1, %v12996_v30 }
 0x84e   : > { %v13003_v43 = vld [vmem:[#allocation2] sm:$0xff] }
 0x84f   : > { %v13469_v13 = vsel %vm263_vm1, %v13003_v43, 0 }
 0x850   : > { %v31605_v32 = vand.u32 4294901760, %v13469_v13 }
 0x852   : > { %28189 = vmatmul.mubr.f32.vlgmr.msra.gmra.mxu1 %v31605_v32  ;;  %v31616_v16 = vsub.f32 %v13469_v13, %v31605_v32  ;;  %v31725_v13 = vand.u32 4294901760, %v14539_v0 }
 0x853   : > { %28199 = vmatpush3.msra.mxu1 %v33629_v57  ;;  %28202 = vmatprep.mubr.msk.f32.mxu1 %vm29303_vm2, %v33630_v28 }
 0x854   : > { %28200 = vmatprep.subr.mxu1 %v33630_v28  ;;  %v31631_v60 = vand.u32 4294901760, %v31616_v16 }
 0x855   : > { %28201 = vmatpush3.msra.mxu1 %v33631_v49 }
 0x856   : > { %28203 = vmatmul.mubr.f32.vlgmr.msra.gmra.mxu1 %v31631_v60  ;;  %28212 = vmatprep.subr.mxu1 %v33630_v28  ;;  %v13541_v37 = vsub.f32 %v31616_v16, %v31631_v60 }
 0x857   : > { %28213 = vmatpush3.msra.mxu1 %v33629_v57  ;;  %28216 = vmatprep.mubr.msk.f32.mxu1 %vm29303_vm2, %v33630_v28 }
 0x858   : > { %28214 = vmatprep.subr.mxu1 %v33630_v28  ;;  %v31649_v63 = vand.u32 4294901760, %v13541_v37 }
 0x859   : > { %28215 = vmatpush3.msra.mxu1 %v33631_v49 }
 0x85a   : > { %28182 = vmatmul.mubr.f32.vlgmr.msra.gmra.mxu0 %v31649_v63  ;;  %28217 = vmatmul.mubr.f32.vlgmr.msra.gmra.mxu1 %v31605_v32 }
 0x85b   : > { %28192 = vmatpush3.msra.mxu0 %v33632_v4  ;;  %28195 = vmatprep.mubr.msk.f32.mxu0 %vm29303_vm2, %v33630_v28 }
 0x85c   : > { %28193 = vmatprep.subr.mxu0 %v33630_v28  ;;  %28227 = vmatprep.subr.mxu1 %v14087_v14 }
 0x85d   : > { %28194 = vmatpush3.msra.mxu0 %v33633_v1  ;;  %28228 = vmatpush3.msra.mxu1 %v14087_v14 }
 0x85e   : > { %28196 = vmatmul.mubr.f32.vlgmr.msra.gmra.mxu0 %v31616_v16  ;;  %28205 = vmatprep.subr.mxu0 %v33630_v28 }
 0x85f   : > { %28206 = vmatpush3.msra.mxu0 %v33634_v21  ;;  %28209 = vmatprep.mubr.msk.f32.mxu0 %vm29303_vm2, %v33630_v28 }
 0x860   : > { %28207 = vmatprep.subr.mxu0 %v33630_v28  ;;  %28229 = vmatprep.mubr.f32.mxu1 %v31602_v15 }
 0x861   : > { %28208 = vmatpush3.msra.mxu0 %v33635_v61  ;;  %28230 = vmatmul.mubr.f32.vlgmr.msra.gmra.mxu1 %v31618_v27 }
 0x862   : > { %28210 = vmatmul.mubr.f32.vlgmr.msra.gmra.mxu0 %v31605_v32  ;;  %28219 = vmatprep.subr.mxu0 %v31586_v51 }
 0x863   : > { %28220 = vmatpush3.msra.mxu0 %v31586_v51  ;;  %28221 = vmatprep.mubr.f32.mxu0 %v14016_v23 }
 0x864   : > { %28232 = vmatprep.mubr.f32.mxu1 %v31626_v40  ;;  %28235 = vmatprep.subr.mxu0 %v31592_v55 }
 0x865   : > { %28233 = vmatmul.mubr.f32.gmra.mxu1 %v31641_v31  ;;  %28243 = vmatprep.subr.mxu1 %v31586_v51 }
 0x866   : > { %28222 = vmatmul.mubr.f32.vlgmr.msra.gmra.mxu0 %v14026_v24  ;;  %28244 = vmatpush3.msra.mxu1 %v31586_v51 }
 0x867   : > { %28224 = vmatprep.mubr.f32.mxu0 %v14036_v34  ;;  %28236 = vmatpush3.msra.mxu0 %v31592_v55  ;;  %v31719_v55 = vand.u32 4294901760, %v14536_v6 }
 0x868   : > { %28245 = vmatprep.mubr.f32.mxu1 %v14014_v42  ;;  %28251 = vmatprep.subr.mxu0 %v31608_v59 }
 0x869   : > { %28246 = vmatmul.mubr.f32.vlgmr.msra.gmra.mxu1 %v14024_v56  ;;  %28259 = vmatprep.subr.mxu1 %v31586_v51 }
 0x86a   : > { %28225 = vmatmul.mubr.f32.gmra.mxu0 %v14046_v48  ;;  %28248 = vmatprep.mubr.f32.mxu1 %v14034_v38 }
 0x86b   : > { %28237 = vmatprep.mubr.f32.mxu0 %v31624_v19  ;;  %28260 = vmatpush3.msra.mxu1 %v31586_v51  ;;  %v31717_v51 = vand.u32 4294901760, %v14533_v50  ;;  %v31732_v19 = vsub.f32 %v14539_v0, %v31725_v13 }
 0x86d   : > { %28249 = vmatmul.mubr.f32.gmra.mxu1 %v14044_v26  ;;  %v31723_v43 = vsub.f32 %v14533_v50, %v31717_v51 }
 0x86e   : > { %28238 = vmatmul.mubr.f32.vlgmr.msra.gmra.mxu0 %v14023_v44  ;;  %28261 = vmatprep.mubr.f32.mxu1 %v31602_v15 }
 0x86f   : > { %28240 = vmatprep.mubr.f32.mxu0 %v14033_v35  ;;  %28252 = vmatpush3.msra.mxu0 %v31608_v59  ;;  %v31728_v59 = vsub.f32 %v14536_v6, %v31719_v55  ;;  %v14619_v57 = vand.u32 4294901760, %v31723_v43  ;;  %v14639_v35 = vand.u32 4294901760, %v31732_v19  ;;  %v25853_v6 = vld [vmem:[%s33394_s0 + $0x18] sm:$0xff] }
 0x871   : > { %28262 = vmatmul.mubr.f32.vlgmr.msra.gmra.mxu1 %v31618_v27  ;;  %v14629_v9 = vand.u32 4294901760, %v31728_v59  ;;  %v14620_v42 = vsub.f32 %v31723_v43, %v14619_v57  ;;  %v14640_v21 = vsub.f32 %v31732_v19, %v14639_v35 }
 0x872   : > { %28241 = vmatmul.mubr.f32.gmra.mxu0 %v14043_v36  ;;  %28264 = vmatprep.mubr.f32.mxu1 %v31626_v40 }
 0x873   : > { %28253 = vmatprep.mubr.f32.mxu0 %v31602_v15  ;;  %v14630_v56 = vsub.f32 %v31728_v59, %v14629_v9  ;;  %v14621_v53 = vand.u32 4294901760, %v14620_v42  ;;  %v14641_v52 = vand.u32 4294901760, %v14640_v21 }
 0x875   : > { %28265 = vmatmul.mubr.f32.gmra.mxu1 %v31641_v31  ;;  %v14631_v45 = vand.u32 4294901760, %v14630_v56 }
 0x876   : > { %28254 = vmatmul.mubr.f32.vlgmr.msra.gmra.mxu0 %v31618_v27  ;;  %28277 = vmatprep.mubr.f32.mxu1 %v31696_v18 }
 0x877   : > { %28256 = vmatprep.mubr.f32.mxu0 %v31626_v40 }
 0x87a   : > { %28257 = vmatmul.mubr.f32.gmra.mxu0 %v31641_v31 }
 0x87b   : > { %28269 = vmatprep.mubr.f32.mxu0 %v14611_v62 }
 0x912   : > { %v13625_v7 = vpop.f32.mrf.mxu1 }
 0x914   : > { %v28190_v29 = vpop.f32.mrf.mxu1 }
 0x916   : > { %v13776_v30 = vpop.f32.mrf.mxu1 }
 0x918   : > { %v28204_v12 = vpop.f32.mrf.mxu1 }
 0x91a   : > { %v13544_v11 = vpop.f32.mrf.mxu0  ;;  %v13926_v39 = vpop.f32.mrf.mxu1 }
 0x91b   : > { %v13626_v3 = vadd.f32 %v13625_v7, %v13544_v11  ;;  %v31768_v11 = vand.u32 4294901760, %v25853_v6 }
 0x91c   : > { %v28183_v15 = vpop.f32.mrf.mxu0  ;;  %v28218_v25 = vpop.f32.mrf.mxu1 }
 0x91e   : > { %v13701_v47 = vpop.f32.mrf.mxu0 }
 0x91f   : > { %v13702_v27 = vadd.f32 %v13701_v47, %v13626_v3 }
 0x920   : > { %v28197_v40 = vpop.f32.mrf.mxu0 }
 0x921   : > { %v13777_v46 = vadd.f32 %v13776_v30, %v13702_v27  ;;  %v28231_v49 = vpop.f32.mrf.mxu1 }
 0x922   : > { %v13853_v37 = vpop.f32.mrf.mxu0 }
 0x923   : > { %v13854_v44 = vadd.f32 %v13853_v37, %v13777_v46  ;;  %v31735_v31 = vpop.f32.mrf.mxu1  ;;  %v31787_v46 = vsub.f32 %v25853_v6, %v31768_v11 }
 0x924   : > { %v28211_v14 = vpop.f32.mrf.mxu0 }
 0x925   : > { %v13927_v36 = vadd.f32 %v13926_v39, %v13854_v44  ;;  %v28234_v4 = vpop.f32.mrf.mxu1  ;;  %v25852_v39 = vld [vmem:[%s33394_s0 + $0x10] sm:$0xff] }
 0x926   : > { %v28223_v5 = vpop.f32.mrf.mxu0  ;;  %v31780_v47 = vand.u32 4294901760, %v25852_v39 }
 0x927   : > { %v31744_v38 = vand.u32 4294901760, %v13927_v36  ;;  %v14131_v1 = vadd.f32 %v28231_v49, %v28223_v5  ;;  %v31746_v26 = vpop.f32.mrf.mxu1 }
 0x928   : > { %v31751_v23 = vpop.f32.mrf.mxu0  ;;  %v31800_v42 = vsub.f32 %v25852_v39, %v31780_v47 }
 0x929   : > { %v14679_v61 = vsub.f32 %v13927_v36, %v31744_v38  ;;  %28267 = vmatprep.subr.mxu0 %v31744_v38  ;;  %v28247_v24 = vpop.f32.mrf.mxu1  ;;  %v31803_v36 = vand.u32 4294901760, %v31787_v46 }
 0x92a   : > { %v28226_v54 = vpop.f32.mrf.mxu0  ;;  %28268 = vmatpush3.msra.mxu0 %v31744_v38 }
 0x92b   : > { %28270 = vmatmul.mubr.f32.vlgmr.msra.gmra.mxu0 %v14621_v53  ;;  %28283 = vmatprep.subr.mxu0 %v14679_v61  ;;  %v14143_v34 = vadd.f32 %v28234_v4, %v28226_v54  ;;  %v14680_v48 = vand.u32 4294901760, %v14679_v61  ;;  %v31756_v2 = vpop.f32.mrf.mxu1 }
 0x92c   : > { %v31758_v20 = vpop.f32.mrf.mxu0  ;;  %28284 = vmatpush3.msra.mxu0 %v14679_v61  ;;  %28272 = vmatprep.mubr.f32.mxu0 %v14631_v45 }
 0x92d   : > { %28299 = vmatprep.subr.mxu0 %v14680_v48  ;;  %v14681_v62 = vsub.f32 %v14679_v61, %v14680_v48  ;;  %v28250_v17 = vpop.f32.mrf.mxu1 }
 0x92e   : > { %v28239_v7 = vpop.f32.mrf.mxu0 }
 0x92f   : > { %v14224_v41 = vadd.f32 %v28239_v7, %v14131_v1  ;;  %28273 = vmatmul.mubr.f32.gmra.mxu0 %v14641_v52  ;;  %v14682_v29 = vand.u32 4294901760, %v14681_v62  ;;  %v31760_v50 = vpop.f32.mrf.mxu1 }
 0x930   : > { %v31765_v8 = vpop.f32.mrf.mxu0  ;;  %28285 = vmatprep.mubr.f32.mxu0 %v31699_v22 }
 0x931   : > { %v14320_v30 = vadd.f32 %v28247_v24, %v14224_v41  ;;  %28275 = vmatprep.subr.mxu1 %v14682_v29  ;;  %v28263_v0 = vpop.f32.mrf.mxu1 }
 0x932   : > { %v28242_v12 = vpop.f32.mrf.mxu0  ;;  %28276 = vmatpush3.msra.mxu1 %v14682_v29 }
 0x933   : > { %v14238_v15 = vadd.f32 %v28242_v12, %v14143_v34  ;;  %28278 = vmatmul.mubr.f32.vlgmr.msra.gmra.mxu1 %v31717_v51  ;;  %28286 = vmatmul.mubr.f32.vlgmr.msra.gmra.mxu0 %v31723_v43  ;;  %v31784_v40 = vpop.f32.mrf.mxu1  ;;  %v15231_v43 = vsub.f32 %v31787_v46, %v31803_v36 }
 0x934   : > { %28291 = vmatprep.subr.mxu1 %v31744_v38  ;;  %28300 = vmatpush3.msra.mxu0 %v14680_v48  ;;  %v31776_v25 = vpop.f32.mrf.mxu0 }
 0x935   : > { %v14336_v3 = vadd.f32 %v28250_v17, %v14238_v15  ;;  %28292 = vmatpush3.msra.mxu1 %v31744_v38  ;;  %28280 = vmatprep.mubr.f32.mxu1 %v31719_v55  ;;  %v28266_v56 = vpop.f32.mrf.mxu1 }
 0x936   : > { %28307 = vmatprep.subr.mxu1 %v31744_v38  ;;  %v28255_v27 = vpop.f32.mrf.mxu0  ;;  %28288 = vmatprep.mubr.f32.mxu0 %v31728_v59 }
 0x937   : > { %v14416_v49 = vadd.f32 %v28255_v27, %v14320_v30  ;;  %28281 = vmatmul.mubr.f32.gmra.mxu1 %v31725_v13  ;;  %28289 = vmatmul.mubr.f32.gmra.mxu0 %v31732_v19  ;;  %v33637_v19 = vld [vmem:[#allocation23_spill] sm:$0xff]  ;;  %v31925_v34 = vpop.f32.mrf.mxu1 }
 0x938   : > { %v31791_v37 = vpop.f32.mrf.mxu0  ;;  %28293 = vmatprep.mubr.f32.mxu1 %v14609_v33  ;;  %28301 = vmatprep.mubr.f32.mxu0 %v31696_v18  ;;  %v31816_v33 = vand.u32 4294901760, %v31800_v42  ;;  %33640 = vst [vmem:[#allocation11_spill] sm:$0xff] %v31925_v34 }
 0x939   : > { %v31796_v44 = vadd.f32 %v28263_v0, %v14416_v49  ;;  %28315 = vmatprep.subr.mxu0 %v33630_v28 }
 0x93a   : > { %v28258_v14 = vpop.f32.mrf.mxu0  ;;  %v15238_v59 = vsub.f32 %v31800_v42, %v31816_v33 }
 0x93b   : > { %v14428_v4 = vadd.f32 %v28258_v14, %v14336_v3  ;;  %28294 = vmatmul.mubr.f32.vlgmr.msra.gmra.mxu1 %v14619_v57  ;;  %28302 = vmatmul.mubr.f32.vlgmr.msra.gmra.mxu0 %v31717_v51  ;;  %v15232_v57 = vand.u32 4294901760, %v15231_v43 }
 0x93c   : > { %28308 = vmatpush3.msra.mxu1 %v31744_v38  ;;  %28296 = vmatprep.mubr.f32.mxu1 %v14629_v9  ;;  %v33636_v9 = vld [vmem:[#allocation24_spill] sm:$0xff]  ;;  %v31921_v45 = vpop.f32.mrf.mxu0 }
 0x93d   : > { %v31811_v22 = vadd.f32 %v28266_v56, %v14428_v4  ;;  %28304 = vmatprep.mubr.f32.mxu0 %v31719_v55  ;;  %28316 = vmatpush3.msra.mxu0 %v31768_v11 }
 0x93e   : > { %28317 = vmatprep.subr.mxu0 %v33630_v28  ;;  %28322 = vmatprep.subr.mxu1 %v33630_v28 }
 0x93f   : > { %28297 = vmatmul.mubr.f32.gmra.mxu1 %v14639_v35  ;;  %28305 = vmatmul.mubr.f32.gmra.mxu0 %v31725_v13 }
 0x940   : > { %28309 = vmatprep.mubr.f32.mxu1 %v31696_v18  ;;  %28318 = vmatpush3.msra.mxu0 %v31780_v47  ;;  %v15239_v18 = vand.u32 4294901760, %v15238_v59 }
 0x941   : > { %28319 = vmatprep.mubr.msk.f32.mxu0 %vm29303_vm2, %v33630_v28  ;;  %28329 = vmatprep.subr.mxu0 %v33630_v28 }
 0x943   : > { %28310 = vmatmul.mubr.f32.vlgmr.msra.gmra.mxu1 %v31717_v51  ;;  %28320 = vmatmul.mubr.f32.vlgmr.msra.gmra.mxu0 %v33636_v9  ;;  %v33638_v51 = vld [vmem:[#allocation34_spill] sm:$0xff] }
 0x944   : > { %28330 = vmatpush3.msra.mxu0 %v31787_v46  ;;  %28312 = vmatprep.mubr.f32.mxu1 %v31719_v55  ;;  %v33639_v55 = vld [vmem:[#allocation28_spill] sm:$0xff] }
 0x945   : > { %28331 = vmatprep.subr.mxu0 %v33630_v28  ;;  %28333 = vmatprep.mubr.msk.f32.mxu0 %vm29303_vm2, %v33630_v28 }
 0x946   : > { %28332 = vmatpush3.msra.mxu0 %v31800_v42  ;;  %28323 = vmatpush3.msra.mxu1 %v15232_v57 }
 0x947   : > { %28313 = vmatmul.mubr.f32.gmra.mxu1 %v31725_v13  ;;  %28334 = vmatmul.mubr.f32.vlgmr.msra.gmra.mxu0 %v33637_v19  ;;  %v25854_v13 = vld [vmem:[%s33396_s2 + $0x20] sm:$0xff] }
 0x948   : > { %28343 = vmatprep.subr.mxu0 %v33630_v28  ;;  %28324 = vmatprep.subr.mxu1 %v33630_v28  ;;  %v16045_v35 = vsel %vm1192_vm3, %v25854_v13, 0 }
 0x949   : > { %28344 = vmatpush3.msra.mxu0 %v31803_v36  ;;  %28325 = vmatpush3.msra.mxu1 %v15239_v18  ;;  %v31911_v5 = vand.u32 4294901760, %v16045_v35 }
 0x94a   : > { %28345 = vmatprep.subr.mxu0 %v33630_v28  ;;  %28326 = vmatprep.mubr.msk.f32.mxu1 %vm29303_vm2, %v33630_v28 }
 0x94b   : > { %28346 = vmatpush3.msra.mxu0 %v31816_v33  ;;  %28347 = vmatprep.mubr.msk.f32.mxu0 %vm29303_vm2, %v33630_v28  ;;  %v31914_v38 = vsub.f32 %v16045_v35, %v31911_v5 }
 0x94c   : > { %28327 = vmatmul.mubr.f32.vlgmr.msra.gmra.mxu1 %v33638_v51  ;;  %28336 = vmatprep.subr.mxu1 %v33630_v28 }
 0x94d   : > { %28348 = vmatmul.mubr.f32.vlgmr.msra.gmra.mxu0 %v33638_v51  ;;  %28357 = vmatprep.subr.mxu0 %v33630_v28  ;;  %v33466_v1 = vand.u32 4294901760, %v31914_v38 }
 0x94e   : > { %28337 = vmatpush3.msra.mxu1 %v31768_v11  ;;  %28358 = vmatpush3.msra.mxu0 %v31768_v11 }
 0x94f   : > { %28338 = vmatprep.subr.mxu1 %v33630_v28  ;;  %28359 = vmatprep.subr.mxu0 %v33630_v28  ;;  %v16125_v53 = vsub.f32 %v31914_v38, %v33466_v1 }
 0x950   : > { %28339 = vmatpush3.msra.mxu1 %v31780_v47  ;;  %28340 = vmatprep.mubr.msk.f32.mxu1 %vm29303_vm2, %v33630_v28 }
 0x951   : > { %28360 = vmatpush3.msra.mxu0 %v31780_v47  ;;  %28361 = vmatprep.mubr.msk.f32.mxu0 %vm29303_vm2, %v33630_v28  ;;  %v16126_v21 = vand.u32 4294901760, %v16125_v53 }
 0x952   : > { %28341 = vmatmul.mubr.f32.vlgmr.msra.gmra.mxu1 %v33639_v55  ;;  %28350 = vmatprep.subr.mxu1 %v33630_v28 }
 0x953   : > { %28362 = vmatmul.mubr.f32.vlgmr.msra.gmra.mxu0 %v31649_v63  ;;  %28371 = vmatprep.subr.mxu0 %v33630_v28 }
 0x954   : > { %28351 = vmatpush3.msra.mxu1 %v31768_v11  ;;  %28372 = vmatpush3.msra.mxu0 %v31787_v46 }
 0x955   : > { %28352 = vmatprep.subr.mxu1 %v33630_v28  ;;  %28373 = vmatprep.subr.mxu0 %v33630_v28 }
 0x956   : > { %28353 = vmatpush3.msra.mxu1 %v31780_v47  ;;  %28354 = vmatprep.mubr.msk.f32.mxu1 %vm29303_vm2, %v33630_v28 }
 0x957   : > { %28374 = vmatpush3.msra.mxu0 %v31800_v42  ;;  %28375 = vmatprep.mubr.msk.f32.mxu0 %vm29303_vm2, %v33630_v28 }
 0x958   : > { %28355 = vmatmul.mubr.f32.vlgmr.msra.gmra.mxu1 %v33638_v51  ;;  %28364 = vmatprep.subr.mxu1 %v33630_v28 }
 0x959   : > { %28376 = vmatmul.mubr.f32.vlgmr.msra.gmra.mxu0 %v31616_v16  ;;  %28385 = vmatprep.subr.mxu0 %v33630_v28 }
 0x95a   : > { %28365 = vmatpush3.msra.mxu1 %v15232_v57  ;;  %28386 = vmatpush3.msra.mxu0 %v31803_v36  ;;  %v33642_v57 = vld [vmem:[#allocation5_spill] sm:$0xff] }
 0x95b   : > { %28366 = vmatprep.subr.mxu1 %v33630_v28  ;;  %28387 = vmatprep.subr.mxu0 %v33630_v28 }
 0x95c   : > { %28367 = vmatpush3.msra.mxu1 %v15239_v18  ;;  %28368 = vmatprep.mubr.msk.f32.mxu1 %vm29303_vm2, %v33630_v28  ;;  %v14522_v18 = vadd.f32 %v31796_v44, %v33642_v57 }
 0x95d   : > { %28388 = vmatpush3.msra.mxu0 %v31816_v33  ;;  %28389 = vmatprep.mubr.msk.f32.mxu0 %vm29303_vm2, %v33630_v28 }
 0x95e   : > { %28369 = vmatmul.mubr.f32.vlgmr.msra.gmra.mxu1 %v31605_v32  ;;  %28378 = vmatprep.subr.mxu1 %v33630_v28 }
 0x95f   : > { %28390 = vmatmul.mubr.f32.vlgmr.msra.gmra.mxu0 %v31605_v32  ;;  %28379 = vmatpush3.msra.mxu1 %v31768_v11 }
 0x960   : > { %28380 = vmatprep.subr.mxu1 %v33630_v28  ;;  %28382 = vmatprep.mubr.msk.f32.mxu1 %vm29303_vm2, %v33630_v28 }
 0x961   : > { %28381 = vmatpush3.msra.mxu1 %v31780_v47  ;;  %28401 = vmatprep.mubr.f32.mxu0 %v16126_v21  ;;  %v25855_v21 = vld [vmem:[%s33396_s2 + $0x28] sm:$0xff] }
 0x962   : > { %28383 = vmatmul.mubr.f32.vlgmr.msra.gmra.mxu1 %v31631_v60  ;;  %28392 = vmatprep.subr.mxu1 %v33630_v28 }
 0x963   : > { %28393 = vmatpush3.msra.mxu1 %v31768_v11  ;;  %28396 = vmatprep.mubr.msk.f32.mxu1 %vm29303_vm2, %v33630_v28 }
 0x964   : > { %28394 = vmatprep.subr.mxu1 %v33630_v28 }
 0x965   : > { %28395 = vmatpush3.msra.mxu1 %v31780_v47 }
 0x966   : > { %28397 = vmatmul.mubr.f32.vlgmr.msra.gmra.mxu1 %v31605_v32 }
 0x967   : > { %28409 = vmatprep.mubr.f32.mxu1 %v31911_v5 }
 0x9eb   : > { %v28271_v61 = vpop.f32.mrf.mxu0 }
 0x9ed   : > { %v31923_v24 = vpop.f32.mrf.mxu0 }
 0x9ef   : > { %v28274_v54 = vpop.f32.mrf.mxu0 }
 0x9f1   : > { %v31927_v48 = vpop.f32.mrf.mxu0 }
 0x9f3   : > { %v28279_v52 = vpop.f32.mrf.mxu1  ;;  %v28287_v62 = vpop.f32.mrf.mxu0 }
 0x9f4   : > { %v14726_v17 = vadd.f32 %v28279_v52, %v28271_v61 }
 0x9f5   : > { %v31929_v7 = vpop.f32.mrf.mxu1  ;;  %v31931_v41 = vpop.f32.mrf.mxu0 }
 0x9f6   : > { %v14819_v29 = vadd.f32 %v28287_v62, %v14726_v17  ;;  %v33643_v17 = vld [vmem:[#allocation7_spill] sm:$0xff] }
 0x9f7   : > { %v28282_v6 = vpop.f32.mrf.mxu1  ;;  %v28290_v30 = vpop.f32.mrf.mxu0 }
 0x9f8   : > { %v14738_v12 = vadd.f32 %v28282_v6, %v28274_v54  ;;  %v25856_v54 = vld [vmem:[%s33396_s2 + $0x30] sm:$0xff]  ;;  %v16048_v6 = vsel %vm1192_vm3, %v25855_v21, 0 }
 0x9f9   : > { %v31933_v0 = vpop.f32.mrf.mxu1  ;;  %v31935_v11 = vpop.f32.mrf.mxu0 }
 0x9fa   : > { %v14833_v39 = vadd.f32 %v28290_v30, %v14738_v12 }
 0x9fb   : > { %v28295_v15 = vpop.f32.mrf.mxu1  ;;  %v28303_v3 = vpop.f32.mrf.mxu0 }
 0x9fc   : > { %v14915_v47 = vadd.f32 %v28295_v15, %v14819_v29  ;;  %v14524_v29 = vadd.f32 %v31811_v22, %v33643_v17  ;;  %v25857_v15 = vld [vmem:[%s33396_s2 + $0x38] sm:$0xff] }
 0x9fd   : > { %v31937_v27 = vpop.f32.mrf.mxu1  ;;  %v31939_v46 = vpop.f32.mrf.mxu0  ;;  %v16054_v22 = vsel %vm1192_vm3, %v25857_v15, 0 }
 0x9fe   : > { %v15011_v49 = vadd.f32 %v28303_v3, %v14915_v47  ;;  %v31968_v47 = vand.u32 4294901760, %v16048_v6 }
 0x9ff   : > { %v28298_v42 = vpop.f32.mrf.mxu1  ;;  %v28306_v14 = vpop.f32.mrf.mxu0 }
 0xa00   : > { %v14931_v56 = vadd.f32 %v28298_v42, %v14833_v39  ;;  %v16051_v39 = vsel %vm1192_vm3, %v25856_v54, 0 }
 0xa01   : > { %v31941_v36 = vpop.f32.mrf.mxu1  ;;  %v31943_v4 = vpop.f32.mrf.mxu0  ;;  %v31970_v42 = vand.u32 4294901760, %v16051_v39 }
 0xa02   : > { %33641 = vst [vmem:[#allocation14_spill] sm:$0xff] %v31943_v4  ;;  %v15023_v33 = vadd.f32 %v28306_v14, %v14931_v56 }
 0xa03   : > { %v28311_v43 = vpop.f32.mrf.mxu1  ;;  %v15195_v59 = vpop.f32.mrf.mxu0  ;;  %v31979_v21 = vsub.f32 %v16051_v39, %v31970_v42 }
 0xa04   : > { %v15101_v13 = vadd.f32 %v28311_v43, %v15011_v49 }
 0xa05   : > { %v31947_v35 = vpop.f32.mrf.mxu1  ;;  %v28321_v53 = vpop.f32.mrf.mxu0  ;;  %v33469_v15 = vand.u32 4294901760, %v31979_v21 }
 0xa06   : > { %v31952_v61 = vadd.f32 %v15101_v13, %v14522_v18  ;;  %v31974_v13 = vsub.f32 %v16048_v6, %v31968_v47  ;;  %v31976_v53 = vand.u32 4294901760, %v16054_v22 }
 0xa07   : > { %v28314_v52 = vpop.f32.mrf.mxu1  ;;  %v15352_v62 = vpop.f32.mrf.mxu0 }
 0xa08   : > { %v15113_v44 = vadd.f32 %v28314_v52, %v15023_v33 }
 0xa09   : > { %v31960_v30 = vpop.f32.mrf.mxu1  ;;  %v28335_v12 = vpop.f32.mrf.mxu0 }
 0xa0a   : > { %33644 = vst [vmem:[#allocation10_spill] sm:$0xff] %v31960_v30  ;;  %v31966_v3 = vadd.f32 %v15113_v44, %v14524_v29  ;;  %v33467_v44 = vand.u32 4294901760, %v31974_v13  ;;  %v31983_v12 = vsub.f32 %v16054_v22, %v31976_v53 }
 0xa0c   : > { %v15276_v49 = vpop.f32.mrf.mxu1  ;;  %v16135_v6 = vsub.f32 %v31974_v13, %v33467_v44  ;;  %v33468_v39 = vand.u32 4294901760, %v31983_v12 }
 0xa0d   : > { %v15277_v14 = vadd.f32 %v15276_v49, %v15195_v59  ;;  %v15504_v56 = vpop.f32.mrf.mxu0 }
 0xa0e   : > { %v28328_v33 = vpop.f32.mrf.mxu1  ;;  %v16136_v1 = vand.u32 4294901760, %v16135_v6  ;;  %v25859_v6 = vld [vmem:[%s33397_s3 + $0x28] sm:$0xff] }
 0xa0f   : > { %v28349_v43 = vpop.f32.mrf.mxu0  ;;  %v15353_v18 = vadd.f32 %v15352_v62, %v15277_v14  ;;  %v16145_v33 = vsub.f32 %v31979_v21, %v33469_v15 }
 0xa12   : > { %v15427_v54 = vpop.f32.mrf.mxu1 }
 0xa13   : > { %v15428_v52 = vadd.f32 %v15427_v54, %v15353_v18  ;;  %v15654_v29 = vpop.f32.mrf.mxu0 }
 0xa14   : > { %v28342_v59 = vpop.f32.mrf.mxu1 }
 0xa15   : > { %v28363_v62 = vpop.f32.mrf.mxu0  ;;  %v15505_v49 = vadd.f32 %v15504_v56, %v15428_v52  ;;  %v16155_v56 = vsub.f32 %v31983_v12, %v33468_v39  ;;  %v25858_v52 = vld [vmem:[%s33397_s3 + $0x20] sm:$0xff] }
 0xa16   : > { %v16146_v62 = vand.u32 4294901760, %v16145_v33 }
 0xa17   : > { %v16156_v15 = vand.u32 4294901760, %v16155_v56 }
 0xa18   : > { %v15577_v14 = vpop.f32.mrf.mxu1 }
 0xa19   : > { %v15578_v43 = vadd.f32 %v15577_v14, %v15505_v49  ;;  %v15811_v18 = vpop.f32.mrf.mxu0  ;;  %v16640_v14 = vsel %vm1192_vm3, %v25858_v52, 0  ;;  %v16643_v52 = vsel %vm1192_vm3, %v25859_v6, 0 }
 0xa1a   : > { %v28356_v22 = vpop.f32.mrf.mxu1  ;;  %v32008_v10 = vand.u32 4294901760, %v16640_v14 }
 0xa1b   : > { %v31993_v54 = vand.u32 4294901760, %v15578_v43  ;;  %v28377_v59 = vpop.f32.mrf.mxu0 }
 0xa1d   : > { %v16194_v44 = vsub.f32 %v15578_v43, %v31993_v54  ;;  %28399 = vmatprep.subr.mxu0 %v31993_v54 }
 0xa1e   : > { %v15735_v49 = vpop.f32.mrf.mxu1  ;;  %28400 = vmatpush3.msra.mxu0 %v31993_v54 }
 0xa1f   : > { %v15736_v22 = vadd.f32 %v15735_v49, %v15654_v29  ;;  %v15963_v59 = vpop.f32.mrf.mxu0  ;;  %28402 = vmatmul.mubr.f32.vlgmr.msra.gmra.mxu0 %v16136_v1  ;;  %28415 = vmatprep.subr.mxu0 %v16194_v44  ;;  %v16195_v39 = vand.u32 4294901760, %v16194_v44  ;;  %v25860_v29 = vld [vmem:[%s33397_s3 + $0x30] sm:$0xff]  ;;  %v25861_v1 = vld [vmem:[%s33397_s3 + $0x38] sm:$0xff] }
 0xa20   : > { %v28370_v33 = vpop.f32.mrf.mxu1  ;;  %28416 = vmatpush3.msra.mxu0 %v16194_v44  ;;  %28404 = vmatprep.mubr.f32.mxu0 %v16146_v62 }
 0xa21   : > { %v28391_v43 = vpop.f32.mrf.mxu0  ;;  %v15812_v17 = vadd.f32 %v15811_v18, %v15736_v22  ;;  %28431 = vmatprep.subr.mxu0 %v16195_v39  ;;  %v16196_v57 = vsub.f32 %v16194_v44, %v16195_v39  ;;  %v32018_v44 = vand.u32 4294901760, %v16643_v52  ;;  %v16646_v18 = vsel %vm1192_vm3, %v25860_v29, 0 }
 0xa22   : > { %v15886_v49 = vpop.f32.mrf.mxu1  ;;  %v32022_v22 = vsub.f32 %v16640_v14, %v32008_v10  ;;  %v16649_v43 = vsel %vm1192_vm3, %v25861_v1, 0 }
 0xa23   : > { %v15887_v56 = vadd.f32 %v15886_v49, %v15812_v17  ;;  %28405 = vmatmul.mubr.f32.gmra.mxu0 %v16156_v15  ;;  %v16197_v62 = vand.u32 4294901760, %v16196_v57  ;;  %v32027_v57 = vand.u32 4294901760, %v16646_v18  ;;  %v32031_v15 = vsub.f32 %v16643_v52, %v32018_v44 }
 0xa24   : > { %v28384_v33 = vpop.f32.mrf.mxu1  ;;  %28417 = vmatprep.mubr.f32.mxu0 %v31914_v38  ;;  %v32033_v14 = vand.u32 4294901760, %v16649_v43  ;;  %v33645_v52 = vand.u32 4294901760, %v31914_v38 }
 0xa25   : > { %v15964_v6 = vadd.f32 %v15963_v59, %v15887_v56  ;;  %28407 = vmatprep.subr.mxu1 %v16197_v62  ;;  %v16729_v49 = vand.u32 4294901760, %v32031_v15 }
 0xa26   : > { %v16036_v30 = vpop.f32.mrf.mxu1  ;;  %28408 = vmatpush3.msra.mxu1 %v16197_v62  ;;  %v32053_v1 = vsub.f32 %v16649_v43, %v32033_v14  ;;  %v33646_v62 = vand.u32 4294901760, %v31974_v13 }
 0xa27   : > { %v16037_v4 = vadd.f32 %v16036_v30, %v15964_v6  ;;  %28410 = vmatmul.mubr.f32.vlgmr.msra.gmra.mxu1 %v31968_v47  ;;  %28418 = vmatmul.mubr.f32.vlgmr.msra.gmra.mxu0 %v31974_v13  ;;  %v16719_v30 = vand.u32 4294901760, %v32022_v22  ;;  %v16730_v38 = vsub.f32 %v32031_v15, %v16729_v49  ;;  %v33648_v13 = vand.u32 4294901760, %v31983_v12 }
 0xa28   : > { %v28398_v17 = vpop.f32.mrf.mxu1  ;;  %28423 = vmatprep.subr.mxu1 %v31993_v54  ;;  %28432 = vmatpush3.msra.mxu0 %v16195_v39  ;;  %v32046_v39 = vsub.f32 %v16646_v18, %v32027_v57  ;;  %v16749_v6 = vand.u32 4294901760, %v32053_v1 }
 0xa29   : > { %v32035_v59 = vand.u32 4294901760, %v16037_v4  ;;  %28424 = vmatpush3.msra.mxu1 %v31993_v54  ;;  %28412 = vmatprep.mubr.f32.mxu1 %v31970_v42  ;;  %v16720_v56 = vsub.f32 %v32022_v22, %v16719_v30  ;;  %v33647_v17 = vand.u32 4294901760, %v31979_v21 }
 0xa2a   : > { %28439 = vmatprep.subr.mxu1 %v31993_v54  ;;  %28420 = vmatprep.mubr.f32.mxu0 %v31979_v21  ;;  %v16739_v18 = vand.u32 4294901760, %v32046_v39 }
 0xa2b   : > { %v16789_v29 = vsub.f32 %v16037_v4, %v32035_v59  ;;  %28447 = vmatprep.subr.mxu0 %v32035_v59  ;;  %28413 = vmatmul.mubr.f32.gmra.mxu1 %v31976_v53 }
 0xa2c   : > { %28421 = vmatmul.mubr.f32.gmra.mxu0 %v31983_v12  ;;  %28425 = vmatprep.mubr.f32.mxu1 %v33645_v52  ;;  %v16721_v52 = vand.u32 4294901760, %v16720_v56 }
 0xa2d   : > { %28433 = vmatprep.mubr.f32.mxu0 %v31911_v5  ;;  %v16790_v4 = vand.u32 4294901760, %v16789_v29 }
 0xa2f   : > { %28426 = vmatmul.mubr.f32.vlgmr.msra.gmra.mxu1 %v33646_v62  ;;  %v16791_v33 = vsub.f32 %v16789_v29, %v16790_v4  ;;  %v16731_v62 = vand.u32 4294901760, %v16730_v38 }
 0xa30   : > { %28434 = vmatmul.mubr.f32.vlgmr.msra.gmra.mxu0 %v31968_v47  ;;  %28440 = vmatpush3.msra.mxu1 %v31993_v54  ;;  %v16740_v54 = vsub.f32 %v32046_v39, %v16739_v18 }
 0xa31   : > { %28448 = vmatpush3.msra.mxu0 %v32035_v59  ;;  %v16792_v43 = vand.u32 4294901760, %v16791_v33  ;;  %28428 = vmatprep.mubr.f32.mxu1 %v33647_v17  ;;  %v16750_v33 = vsub.f32 %v32053_v1, %v16749_v6 }
 0xa32   : > { %28463 = vmatprep.subr.mxu0 %v16789_v29  ;;  %28436 = vmatprep.mubr.f32.mxu0 %v31970_v42  ;;  %v16741_v21 = vand.u32 4294901760, %v16740_v54 }
 0xa33   : > { %28455 = vmatprep.subr.mxu1 %v16792_v43  ;;  %28429 = vmatmul.mubr.f32.gmra.mxu1 %v33648_v13  ;;  %v16751_v56 = vand.u32 4294901760, %v16750_v33 }
 0xa34   : > { %28437 = vmatmul.mubr.f32.gmra.mxu0 %v31976_v53  ;;  %28441 = vmatprep.mubr.f32.mxu1 %v31911_v5  ;;  %v25863_v5 = vld [vmem:[%s33394_s0 + $0x28] sm:$0xff] }
 0xa35   : > { %28449 = vmatprep.mubr.f32.mxu0 %v16721_v52 }
 0xa37   : > { %28442 = vmatmul.mubr.f32.vlgmr.msra.gmra.mxu1 %v31968_v47  ;;  %v32085_v47 = vand.u32 4294901760, %v25863_v5 }
 0xa38   : > { %28450 = vmatmul.mubr.f32.vlgmr.msra.gmra.mxu0 %v16731_v62  ;;  %28456 = vmatpush3.msra.mxu1 %v16792_v43 }
 0xa39   : > { %28464 = vmatpush3.msra.mxu0 %v16789_v29  ;;  %28471 = vmatprep.subr.mxu1 %v32035_v59  ;;  %v17339_v12 = vsub.f32 %v25863_v5, %v32085_v47 }
 0xa3a   : > { %28479 = vmatprep.subr.mxu0 %v16790_v4  ;;  %28444 = vmatprep.mubr.f32.mxu1 %v31970_v42  ;;  %v25862_v42 = vld [vmem:[%s33394_s0 + $0x20] sm:$0xff] }
 0xa3b   : > { %28452 = vmatprep.mubr.f32.mxu0 %v16741_v21  ;;  %28445 = vmatmul.mubr.f32.gmra.mxu1 %v31976_v53  ;;  %v32096_v53 = vand.u32 4294901760, %v25862_v42  ;;  %v32106_v29 = vand.u32 4294901760, %v17339_v12 }
 0xa3c   : > { %28453 = vmatmul.mubr.f32.gmra.mxu0 %v16751_v56  ;;  %28457 = vmatprep.mubr.f32.mxu1 %v32008_v10 }
 0xa3d   : > { %28465 = vmatprep.mubr.f32.mxu0 %v32022_v22  ;;  %v17341_v22 = vsub.f32 %v17339_v12, %v32106_v29 }
 0xa3f   : > { %28458 = vmatmul.mubr.f32.vlgmr.msra.gmra.mxu1 %v32018_v44 }
 0xa40   : > { %28466 = vmatmul.mubr.f32.vlgmr.msra.gmra.mxu0 %v32031_v15  ;;  %28472 = vmatpush3.msra.mxu1 %v32035_v59  ;;  %v17346_v15 = vsub.f32 %v25862_v42, %v32096_v53 }
 0xa41   : > { %28480 = vmatpush3.msra.mxu0 %v16790_v4  ;;  %28487 = vmatprep.subr.mxu1 %v32035_v59 }
 0xa42   : > { %28460 = vmatprep.mubr.f32.mxu1 %v32027_v57  ;;  %28468 = vmatprep.mubr.f32.mxu0 %v32046_v39 }
 0xa43   : > { %28461 = vmatmul.mubr.f32.gmra.mxu1 %v32033_v14  ;;  %28495 = vmatprep.subr.mxu0 %v33630_v28 }
 0xa44   : > { %28469 = vmatmul.mubr.f32.gmra.mxu0 %v32053_v1  ;;  %28473 = vmatprep.mubr.f32.mxu1 %v16719_v30  ;;  %v32114_v30 = vand.u32 4294901760, %v17346_v15 }
 0xa45   : > { %28481 = vmatprep.mubr.f32.mxu0 %v32008_v10 }
 0xa46   : > { %v17348_v39 = vsub.f32 %v17346_v15, %v32114_v30 }
 0xa47   : > { %28474 = vmatmul.mubr.f32.vlgmr.msra.gmra.mxu1 %v16729_v49 }
 0xa48   : > { %28482 = vmatmul.mubr.f32.vlgmr.msra.gmra.mxu0 %v32018_v44  ;;  %28488 = vmatpush3.msra.mxu1 %v32035_v59  ;;  %v17342_v59 = vand.u32 4294901760, %v17341_v22 }
 0xa49   : > { %28476 = vmatprep.mubr.f32.mxu1 %v16739_v18  ;;  %28484 = vmatprep.mubr.f32.mxu0 %v32027_v57 }
 0xa4a   : > { %28496 = vmatpush3.msra.mxu0 %v32085_v47  ;;  %28502 = vmatprep.subr.mxu1 %v33630_v28 }
 0xa4b   : > { %28477 = vmatmul.mubr.f32.gmra.mxu1 %v16749_v6  ;;  %28497 = vmatprep.subr.mxu0 %v33630_v28 }
 0xa4c   : > { %28485 = vmatmul.mubr.f32.gmra.mxu0 %v32033_v14  ;;  %28489 = vmatprep.mubr.f32.mxu1 %v32008_v10  ;;  %v17349_v10 = vand.u32 4294901760, %v17348_v39 }
 0xa4d   : > { %28498 = vmatpush3.msra.mxu0 %v32096_v53  ;;  %28499 = vmatprep.mubr.msk.f32.mxu0 %vm29303_vm2, %v33630_v28 }
 0xa4e   : > { %28509 = vmatprep.subr.mxu0 %v33630_v28 }
 0xa4f   : > { %28490 = vmatmul.mubr.f32.vlgmr.msra.gmra.mxu1 %v32018_v44 }
 0xa50   : > { %28500 = vmatmul.mubr.f32.vlgmr.msra.gmra.mxu0 %v33636_v9  ;;  %28492 = vmatprep.mubr.f32.mxu1 %v32027_v57 }
 0xa51   : > { %28510 = vmatpush3.msra.mxu0 %v17339_v12  ;;  %28513 = vmatprep.mubr.msk.f32.mxu0 %vm29303_vm2, %v33630_v28 }
 0xa52   : > { %28511 = vmatprep.subr.mxu0 %v33630_v28  ;;  %28503 = vmatpush3.msra.mxu1 %v17342_v59 }
 0xa53   : > { %28512 = vmatpush3.msra.mxu0 %v17346_v15  ;;  %28493 = vmatmul.mubr.f32.gmra.mxu1 %v32033_v14 }
 0xa54   : > { %28514 = vmatmul.mubr.f32.vlgmr.msra.gmra.mxu0 %v33637_v19  ;;  %28523 = vmatprep.subr.mxu0 %v33630_v28 }
 0xa55   : > { %28524 = vmatpush3.msra.mxu0 %v32106_v29  ;;  %28504 = vmatprep.subr.mxu1 %v33630_v28 }
 0xa56   : > { %28525 = vmatprep.subr.mxu0 %v33630_v28  ;;  %28505 = vmatpush3.msra.mxu1 %v17349_v10 }
 0xa57   : > { %28506 = vmatprep.mubr.msk.f32.mxu1 %vm29303_vm2, %v33630_v28  ;;  %28526 = vmatpush3.msra.mxu0 %v32114_v30 }
 0xa58   : > { %28527 = vmatprep.mubr.msk.f32.mxu0 %vm29303_vm2, %v33630_v28  ;;  %28507 = vmatmul.mubr.f32.vlgmr.msra.gmra.mxu1 %v33638_v51 }
 0xa59   : > { %28516 = vmatprep.subr.mxu1 %v33630_v28  ;;  %28528 = vmatmul.mubr.f32.vlgmr.msra.gmra.mxu0 %v33638_v51 }
 0xa5a   : > { %28537 = vmatprep.subr.mxu0 %v33630_v28  ;;  %28517 = vmatpush3.msra.mxu1 %v32085_v47 }
 0xa5b   : > { %28538 = vmatpush3.msra.mxu0 %v32085_v47  ;;  %28518 = vmatprep.subr.mxu1 %v33630_v28 }
 0xa5c   : > { %28539 = vmatprep.subr.mxu0 %v33630_v28  ;;  %28519 = vmatpush3.msra.mxu1 %v32096_v53 }
 0xa5d   : > { %28520 = vmatprep.mubr.msk.f32.mxu1 %vm29303_vm2, %v33630_v28  ;;  %28540 = vmatpush3.msra.mxu0 %v32096_v53 }
 0xa5e   : > { %28541 = vmatprep.mubr.msk.f32.mxu0 %vm29303_vm2, %v33630_v28  ;;  %28521 = vmatmul.mubr.f32.vlgmr.msra.gmra.mxu1 %v33639_v55 }
 0xa5f   : > { %28530 = vmatprep.subr.mxu1 %v33630_v28  ;;  %28542 = vmatmul.mubr.f32.vlgmr.msra.gmra.mxu0 %v31649_v63 }
 0xa60   : > { %28551 = vmatprep.subr.mxu0 %v33630_v28  ;;  %28531 = vmatpush3.msra.mxu1 %v32085_v47 }
 0xa61   : > { %28552 = vmatpush3.msra.mxu0 %v17339_v12  ;;  %28532 = vmatprep.subr.mxu1 %v33630_v28 }
 0xa62   : > { %28553 = vmatprep.subr.mxu0 %v33630_v28  ;;  %28533 = vmatpush3.msra.mxu1 %v32096_v53 }
 0xa63   : > { %28534 = vmatprep.mubr.msk.f32.mxu1 %vm29303_vm2, %v33630_v28  ;;  %28554 = vmatpush3.msra.mxu0 %v17346_v15 }
 0xa64   : > { %28555 = vmatprep.mubr.msk.f32.mxu0 %vm29303_vm2, %v33630_v28  ;;  %28535 = vmatmul.mubr.f32.vlgmr.msra.gmra.mxu1 %v33638_v51 }
 0xa65   : > { %28544 = vmatprep.subr.mxu1 %v33630_v28  ;;  %28556 = vmatmul.mubr.f32.vlgmr.msra.gmra.mxu0 %v31616_v16  ;;  %v25864_v16 = vld [vmem:[%s33396_s2 + $0x40] sm:$0xff] }
 0xa66   : > { %28565 = vmatprep.subr.mxu0 %v33630_v28  ;;  %28545 = vmatpush3.msra.mxu1 %v17342_v59  ;;  %v18155_v63 = vsel %vm1192_vm3, %v25864_v16, 0 }
 0xa67   : > { %28566 = vmatpush3.msra.mxu0 %v32106_v29  ;;  %28546 = vmatprep.subr.mxu1 %v33630_v28 }
 0xa68   : > { %28567 = vmatprep.subr.mxu0 %v33630_v28  ;;  %28547 = vmatpush3.msra.mxu1 %v17349_v10 }
 0xa69   : > { %28548 = vmatprep.mubr.msk.f32.mxu1 %vm29303_vm2, %v33630_v28  ;;  %28568 = vmatpush3.msra.mxu0 %v32114_v30 }
 0xa6a   : > { %28569 = vmatprep.mubr.msk.f32.mxu0 %vm29303_vm2, %v33630_v28  ;;  %28549 = vmatmul.mubr.f32.vlgmr.msra.gmra.mxu1 %v31605_v32 }
 0xa6b   : > { %28558 = vmatprep.subr.mxu1 %v33630_v28  ;;  %28570 = vmatmul.mubr.f32.vlgmr.msra.gmra.mxu0 %v31605_v32 }
 0xa6c   : > { %28559 = vmatpush3.msra.mxu1 %v32085_v47  ;;  %28562 = vmatprep.mubr.msk.f32.mxu1 %vm29303_vm2, %v33630_v28 }
 0xa6d   : > { %28560 = vmatprep.subr.mxu1 %v33630_v28 }
 0xa6e   : > { %28561 = vmatpush3.msra.mxu1 %v32096_v53 }
 0xa6f   : > { %28563 = vmatmul.mubr.f32.vlgmr.msra.gmra.mxu1 %v31631_v60  ;;  %28572 = vmatprep.subr.mxu1 %v33630_v28  ;;  %v32199_v60 = vand.u32 4294901760, %v18155_v63 }
 0xa70   : > { %28573 = vmatpush3.msra.mxu1 %v32085_v47  ;;  %28576 = vmatprep.mubr.msk.f32.mxu1 %vm29303_vm2, %v33630_v28 }
 0xa71   : > { %28574 = vmatprep.subr.mxu1 %v33630_v28  ;;  %v32202_v9 = vsub.f32 %v18155_v63, %v32199_v60 }
 0xa72   : > { %28575 = vmatpush3.msra.mxu1 %v32096_v53 }
 0xa73   : > { %28577 = vmatmul.mubr.f32.vlgmr.msra.gmra.mxu1 %v31605_v32  ;;  %v33470_v19 = vand.u32 4294901760, %v32202_v9 }
 0xa74   : > { %28589 = vmatprep.mubr.f32.mxu1 %v32199_v60 }
 0xa75   : > { %v18235_v51 = vsub.f32 %v32202_v9, %v33470_v19 }
 0xa77   : > { %v18236_v32 = vand.u32 4294901760, %v18235_v51 }
 0xa79   : > { %28581 = vmatprep.mubr.f32.mxu0 %v18236_v32 }
 0xadf   : > { %v28403_v55 = vpop.f32.mrf.mxu0 }
 0xae1   : > { %v32209_v44 = vpop.f32.mrf.mxu0 }
 0xae3   : > { %v28406_v57 = vpop.f32.mrf.mxu0 }
 0xae5   : > { %v32211_v14 = vpop.f32.mrf.mxu0 }
 0xae7   : > { %v28411_v49 = vpop.f32.mrf.mxu1  ;;  %v28419_v1 = vpop.f32.mrf.mxu0 }
 0xae8   : > { %v16241_v4 = vadd.f32 %v28411_v49, %v28403_v55 }
 0xae9   : > { %v32213_v18 = vpop.f32.mrf.mxu1  ;;  %v32215_v38 = vpop.f32.mrf.mxu0 }
 0xaea   : > { %v16334_v6 = vadd.f32 %v28419_v1, %v16241_v4 }
 0xaeb   : > { %v28414_v43 = vpop.f32.mrf.mxu1 }
 0xaec   : > { %v16253_v17 = vadd.f32 %v28414_v43, %v28406_v57  ;;  %v28422_v52 = vpop.f32.mrf.mxu0 }
 0xaed   : > { %v32217_v13 = vpop.f32.mrf.mxu1 }
 0xaee   : > { %v16348_v54 = vadd.f32 %v28422_v52, %v16253_v17  ;;  %v32219_v62 = vpop.f32.mrf.mxu0 }
 0xaef   : > { %v28427_v33 = vpop.f32.mrf.mxu1 }
 0xaf0   : > { %v16430_v21 = vadd.f32 %v28427_v33, %v16334_v6  ;;  %v28435_v56 = vpop.f32.mrf.mxu0 }
 0xaf1   : > { %v32221_v5 = vpop.f32.mrf.mxu1 }
 0xaf2   : > { %v16526_v47 = vadd.f32 %v28435_v56, %v16430_v21  ;;  %v32223_v42 = vpop.f32.mrf.mxu0 }
 0xaf3   : > { %33649 = vst [vmem:[#allocation13_spill] sm:$0xff] %v32223_v42  ;;  %v28430_v53 = vpop.f32.mrf.mxu1 }
 0xaf4   : > { %v16446_v12 = vadd.f32 %v28430_v53, %v16348_v54  ;;  %v28438_v15 = vpop.f32.mrf.mxu0 }
 0xaf5   : > { %v32225_v29 = vpop.f32.mrf.mxu1 }
 0xaf6   : > { %33650 = vst [vmem:[#allocation4_spill] sm:$0xff] %v32225_v29  ;;  %v16538_v22 = vadd.f32 %v28438_v15, %v16446_v12  ;;  %v32227_v30 = vpop.f32.mrf.mxu0 }
 0xaf7   : > { %33651 = vst [vmem:[#allocation8_spill] sm:$0xff] %v32227_v30  ;;  %v28443_v59 = vpop.f32.mrf.mxu1 }
 0xaf8   : > { %v16616_v39 = vadd.f32 %v28443_v59, %v16526_v47  ;;  %v28451_v10 = vpop.f32.mrf.mxu0 }
 0xaf9   : > { %v32229_v16 = vpop.f32.mrf.mxu1 }
 0xafa   : > { %33652 = vst [vmem:[#allocation12_spill] sm:$0xff] %v32229_v16  ;;  %v16632_v63 = vadd.f32 %v16616_v39, %v31952_v61  ;;  %v32232_v51 = vpop.f32.mrf.mxu0 }
 0xafb   : > { %v28446_v32 = vpop.f32.mrf.mxu1 }
 0xafc   : > { %v16628_v55 = vadd.f32 %v28446_v32, %v16538_v22  ;;  %v28454_v57 = vpop.f32.mrf.mxu0 }
 0xafd   : > { %v32234_v49 = vpop.f32.mrf.mxu1 }
 0xafe   : > { %33653 = vst [vmem:[#allocation16_spill] sm:$0xff] %v32234_v49  ;;  %v16634_v1 = vadd.f32 %v16628_v55, %v31966_v3  ;;  %v32237_v4 = vpop.f32.mrf.mxu0 }
 0xaff   : > { %v28459_v6 = vpop.f32.mrf.mxu1 }
 0xb00   : > { %v16836_v43 = vadd.f32 %v28459_v6, %v28451_v10  ;;  %v28467_v17 = vpop.f32.mrf.mxu0 }
 0xb01   : > { %v32239_v52 = vpop.f32.mrf.mxu1 }
 0xb02   : > { %v16929_v54 = vadd.f32 %v28467_v17, %v16836_v43  ;;  %v32241_v33 = vpop.f32.mrf.mxu0 }
 0xb03   : > { %v28462_v61 = vpop.f32.mrf.mxu1 }
 0xb04   : > { %v16848_v21 = vadd.f32 %v28462_v61, %v28454_v57  ;;  %v28470_v56 = vpop.f32.mrf.mxu0 }
 0xb05   : > { %v32243_v47 = vpop.f32.mrf.mxu1 }
 0xb06   : > { %v16943_v53 = vadd.f32 %v28470_v56, %v16848_v21  ;;  %v32245_v12 = vpop.f32.mrf.mxu0 }
 0xb07   : > { %33654 = vst [vmem:[#allocation6_spill] sm:$0xff] %v32245_v12  ;;  %v28475_v15 = vpop.f32.mrf.mxu1  ;;  %v25870_v12 = vld [vmem:[%s33397_s3 + $0x50] sm:$0xff] }
 0xb08   : > { %v17025_v3 = vadd.f32 %v28475_v15, %v16929_v54  ;;  %v28483_v22 = vpop.f32.mrf.mxu0  ;;  %v25865_v54 = vld [vmem:[%s33396_s2 + $0x48] sm:$0xff] }
 0xb09   : > { %v32247_v59 = vpop.f32.mrf.mxu1 }
 0xb0a   : > { %v17121_v39 = vadd.f32 %v28483_v22, %v17025_v3  ;;  %v32249_v10 = vpop.f32.mrf.mxu0 }
 0xb0b   : > { %33655 = vst [vmem:[#allocation33_spill] sm:$0xff] %v32249_v10  ;;  %v28478_v32 = vpop.f32.mrf.mxu1 }
 0xb0c   : > { %v17041_v55 = vadd.f32 %v28478_v32, %v16943_v53  ;;  %v28486_v6 = vpop.f32.mrf.mxu0  ;;  %v25866_v53 = vld [vmem:[%s33396_s2 + $0x50] sm:$0xff] }
 0xb0d   : > { %v32251_v43 = vpop.f32.mrf.mxu1 }
 0xb0e   : > { %33656 = vst [vmem:[#allocation15_spill] sm:$0xff] %v32251_v43  ;;  %v17133_v57 = vadd.f32 %v28486_v6, %v17041_v55  ;;  %v32253_v17 = vpop.f32.mrf.mxu0  ;;  %v18158_v6 = vsel %vm1192_vm3, %v25865_v54, 0 }
 0xb0f   : > { %33657 = vst [vmem:[#allocation17_spill] sm:$0xff] %v32253_v17  ;;  %v28491_v61 = vpop.f32.mrf.mxu1  ;;  %v25867_v17 = vld [vmem:[%s33396_s2 + $0x58] sm:$0xff] }
 0xb10   : > { %v17211_v21 = vadd.f32 %v28491_v61, %v17121_v39  ;;  %v17305_v56 = vpop.f32.mrf.mxu0  ;;  %v18161_v61 = vsel %vm1192_vm3, %v25866_v53, 0 }
 0xb11   : > { %v32255_v19 = vpop.f32.mrf.mxu1  ;;  %v32276_v49 = vand.u32 4294901760, %v18161_v61 }
 0xb12   : > { %33658 = vst [vmem:[#allocation19_spill] sm:$0xff] %v32255_v19  ;;  %v32260_v15 = vadd.f32 %v17211_v21, %v16632_v63  ;;  %v28501_v3 = vpop.f32.mrf.mxu0 }
 0xb13   : > { %v28494_v22 = vpop.f32.mrf.mxu1  ;;  %v32274_v3 = vand.u32 4294901760, %v18158_v6 }
 0xb14   : > { %33659 = vst [vmem:[#allocation32_spill] sm:$0xff] %v32260_v15  ;;  %v17223_v32 = vadd.f32 %v28494_v22, %v17133_v57  ;;  %v17462_v55 = vpop.f32.mrf.mxu0  ;;  %v18164_v57 = vsel %vm1192_vm3, %v25867_v17, 0 }
 0xb15   : > { %v32266_v39 = vpop.f32.mrf.mxu1  ;;  %v32280_v53 = vsub.f32 %v18158_v6, %v32274_v3  ;;  %v32282_v43 = vand.u32 4294901760, %v18164_v57 }
 0xb16   : > { %33660 = vst [vmem:[#allocation21_spill] sm:$0xff] %v32266_v39  ;;  %v32272_v63 = vadd.f32 %v17223_v32, %v16634_v1  ;;  %v28515_v21 = vpop.f32.mrf.mxu0  ;;  %v32285_v1 = vsub.f32 %v18161_v61, %v32276_v49 }
 0xb17   : > { %v33471_v10 = vand.u32 4294901760, %v32280_v53  ;;  %v32289_v17 = vsub.f32 %v18164_v57, %v32282_v43 }
 0xb18   : > { %33661 = vst [vmem:[#allocation20_spill] sm:$0xff] %v32272_v63  ;;  %v17386_v15 = vpop.f32.mrf.mxu1 }
 0xb19   : > { %v17387_v22 = vadd.f32 %v17386_v15, %v17305_v56  ;;  %v17614_v54 = vpop.f32.mrf.mxu0  ;;  %v18245_v6 = vsub.f32 %v32280_v53, %v33471_v10 }
 0xb1a   : > { %v28508_v30 = vpop.f32.mrf.mxu1 }
 0xb1b   : > { %v28529_v39 = vpop.f32.mrf.mxu0  ;;  %v17463_v19 = vadd.f32 %v17462_v55, %v17387_v22  ;;  %v33473_v30 = vand.u32 4294901760, %v32285_v1  ;;  %v18246_v34 = vand.u32 4294901760, %v18245_v6 }
 0xb1c   : > { %v33472_v39 = vand.u32 4294901760, %v32289_v17 }
 0xb1e   : > { %v17537_v32 = vpop.f32.mrf.mxu1 }
 0xb1f   : > { %v17538_v21 = vadd.f32 %v17537_v32, %v17463_v19  ;;  %v17764_v63 = vpop.f32.mrf.mxu0  ;;  %v18255_v19 = vsub.f32 %v32285_v1, %v33473_v30 }
 0xb20   : > { %v28522_v56 = vpop.f32.mrf.mxu1 }
 0xb21   : > { %v28543_v15 = vpop.f32.mrf.mxu0  ;;  %v17615_v55 = vadd.f32 %v17614_v54, %v17538_v21  ;;  %v18265_v54 = vsub.f32 %v32289_v17, %v33472_v39  ;;  %v25868_v21 = vld [vmem:[%s33397_s3 + $0x40] sm:$0xff] }
 0xb22   : > { %v18256_v15 = vand.u32 4294901760, %v18255_v19  ;;  %v18750_v6 = vsel %vm1192_vm3, %v25868_v21, 0 }
 0xb23   : > { %v18266_v30 = vand.u32 4294901760, %v18265_v54  ;;  %v32318_v21 = vand.u32 4294901760, %v18750_v6 }
 0xb24   : > { %v17687_v61 = vpop.f32.mrf.mxu1 }
 0xb25   : > { %v17688_v22 = vadd.f32 %v17687_v61, %v17615_v55  ;;  %v17921_v32 = vpop.f32.mrf.mxu0  ;;  %v25869_v55 = vld [vmem:[%s33397_s3 + $0x48] sm:$0xff] }
 0xb26   : > { %v28536_v57 = vpop.f32.mrf.mxu1 }
 0xb27   : > { %v32299_v16 = vand.u32 4294901760, %v17688_v22  ;;  %v28557_v56 = vpop.f32.mrf.mxu0 }
 0xb29   : > { %v18304_v10 = vsub.f32 %v17688_v22, %v32299_v16  ;;  %28579 = vmatprep.subr.mxu0 %v32299_v16  ;;  %v18753_v22 = vsel %vm1192_vm3, %v25869_v55, 0  ;;  %v18756_v55 = vsel %vm1192_vm3, %v25870_v12, 0 }
 0xb2a   : > { %v17845_v61 = vpop.f32.mrf.mxu1  ;;  %28580 = vmatpush3.msra.mxu0 %v32299_v16 }
 0xb2b   : > { %v17846_v57 = vadd.f32 %v17845_v61, %v17764_v63  ;;  %v18073_v56 = vpop.f32.mrf.mxu0  ;;  %28582 = vmatmul.mubr.f32.vlgmr.msra.gmra.mxu0 %v18246_v34  ;;  %28595 = vmatprep.subr.mxu0 %v18304_v10  ;;  %v18305_v39 = vand.u32 4294901760, %v18304_v10  ;;  %v25871_v34 = vld [vmem:[%s33397_s3 + $0x58] sm:$0xff] }
 0xb2c   : > { %v28550_v19 = vpop.f32.mrf.mxu1  ;;  %28596 = vmatpush3.msra.mxu0 %v18304_v10  ;;  %28584 = vmatprep.mubr.f32.mxu0 %v18256_v15  ;;  %v32323_v15 = vand.u32 4294901760, %v18753_v22 }
 0xb2d   : > { %v28571_v29 = vpop.f32.mrf.mxu0  ;;  %v17922_v58 = vadd.f32 %v17921_v32, %v17846_v57  ;;  %28611 = vmatprep.subr.mxu0 %v18305_v39  ;;  %v18306_v42 = vsub.f32 %v18304_v10, %v18305_v39  ;;  %v32329_v10 = vsub.f32 %v18750_v6, %v32318_v21  ;;  %v32331_v19 = vand.u32 4294901760, %v18756_v55 }
 0xb2e   : > { %v18759_v29 = vsel %vm1192_vm3, %v25871_v34, 0 }
 0xb2f   : > { %v17996_v63 = vpop.f32.mrf.mxu1  ;;  %28585 = vmatmul.mubr.f32.gmra.mxu0 %v18266_v30  ;;  %v18307_v54 = vand.u32 4294901760, %v18306_v42  ;;  %v32338_v42 = vand.u32 4294901760, %v18759_v29 }
 0xb30   : > { %v17997_v61 = vadd.f32 %v17996_v63, %v17922_v58  ;;  %28597 = vmatprep.mubr.f32.mxu0 %v32202_v9  ;;  %v32336_v58 = vsub.f32 %v18753_v22, %v32323_v15  ;;  %v32349_v22 = vsub.f32 %v18756_v55, %v32331_v19 }
 0xb31   : > { %v28564_v32 = vpop.f32.mrf.mxu1  ;;  %28587 = vmatprep.subr.mxu1 %v18307_v54  ;;  %v32355_v63 = vsub.f32 %v18759_v29, %v32338_v42 }
 0xb32   : > { %v18074_v57 = vadd.f32 %v18073_v56, %v17997_v61  ;;  %28588 = vmatpush3.msra.mxu1 %v18307_v54  ;;  %v33475_v56 = vand.u32 4294901760, %v32329_v10  ;;  %v33662_v61 = vand.u32 4294901760, %v32202_v9 }
 0xb33   : > { %v18146_v30 = vpop.f32.mrf.mxu1  ;;  %28590 = vmatmul.mubr.f32.vlgmr.msra.gmra.mxu1 %v32274_v3  ;;  %28598 = vmatmul.mubr.f32.vlgmr.msra.gmra.mxu0 %v32280_v53  ;;  %v18859_v9 = vand.u32 4294901760, %v32355_v63 }
 0xb34   : > { %v18147_v12 = vadd.f32 %v18146_v30, %v18074_v57  ;;  %28603 = vmatprep.subr.mxu1 %v32299_v16  ;;  %28612 = vmatpush3.msra.mxu0 %v18305_v39  ;;  %v33474_v39 = vand.u32 4294901760, %v32336_v58  ;;  %v18830_v55 = vsub.f32 %v32329_v10, %v33475_v56  ;;  %v18849_v57 = vand.u32 4294901760, %v32349_v22 }
 0xb35   : > { %v28578_v6 = vpop.f32.mrf.mxu1  ;;  %28604 = vmatpush3.msra.mxu1 %v32299_v16  ;;  %28592 = vmatprep.mubr.f32.mxu1 %v32276_v49  ;;  %v33663_v30 = vand.u32 4294901760, %v32280_v53  ;;  %v18860_v56 = vsub.f32 %v32355_v63, %v18859_v9 }
 0xb36   : > { %v32344_v34 = vand.u32 4294901760, %v18147_v12  ;;  %28619 = vmatprep.subr.mxu1 %v32299_v16  ;;  %28600 = vmatprep.mubr.f32.mxu0 %v32285_v1  ;;  %v18840_v29 = vsub.f32 %v32336_v58, %v33474_v39  ;;  %v33664_v6 = vand.u32 4294901760, %v32285_v1  ;;  %v18831_v53 = vand.u32 4294901760, %v18830_v55  ;;  %v25876_v1 = vld [vmem:[%s29346_s24 + $0x18] sm:$0xff] }
 0xb37   : > { %28593 = vmatmul.mubr.f32.gmra.mxu1 %v32282_v43  ;;  %28601 = vmatmul.mubr.f32.gmra.mxu0 %v32289_v17  ;;  %v33665_v39 = vand.u32 4294901760, %v32289_v17  ;;  %v19375_v17 = vsel %vm263_vm1, %v25876_v1, 0 }
 0xb38   : > { %v18899_v54 = vsub.f32 %v18147_v12, %v32344_v34  ;;  %28627 = vmatprep.subr.mxu0 %v32344_v34  ;;  %28605 = vmatprep.mubr.f32.mxu1 %v33662_v61 }
 0xb39   : > { %28613 = vmatprep.mubr.f32.mxu0 %v32199_v60 }
 0xb3a   : > { %v18900_v32 = vand.u32 4294901760, %v18899_v54 }
 0xb3b   : > { %28606 = vmatmul.mubr.f32.vlgmr.msra.gmra.mxu1 %v33663_v30  ;;  %28614 = vmatmul.mubr.f32.vlgmr.msra.gmra.mxu0 %v32274_v3  ;;  %v18850_v30 = vsub.f32 %v32349_v22, %v18849_v57 }
 0xb3c   : > { %28620 = vmatpush3.msra.mxu1 %v32299_v16  ;;  %28628 = vmatpush3.msra.mxu0 %v32344_v34  ;;  %v18901_v12 = vsub.f32 %v18899_v54, %v18900_v32  ;;  %v18841_v16 = vand.u32 4294901760, %v18840_v29 }
 0xb3d   : > { %28643 = vmatprep.subr.mxu0 %v18899_v54  ;;  %28608 = vmatprep.mubr.f32.mxu1 %v33664_v6  ;;  %v18851_v55 = vand.u32 4294901760, %v18850_v30  ;;  %v33673_v6 = vand.u32 4294901760, %v32329_v10  ;;  %v33676_v30 = vand.u32 4294901760, %v32336_v58 }
 0xb3e   : > { %v18902_v61 = vand.u32 4294901760, %v18901_v12  ;;  %28616 = vmatprep.mubr.f32.mxu0 %v32276_v49  ;;  %v18861_v12 = vand.u32 4294901760, %v18860_v56 }
 0xb3f   : > { %28609 = vmatmul.mubr.f32.gmra.mxu1 %v33665_v39  ;;  %28617 = vmatmul.mubr.f32.gmra.mxu0 %v32282_v43  ;;  %v19373_v39 = vld [vmem:[%s33394_s0 + $0x8] sm:$0xff] }
 0xb40   : > { %28635 = vmatprep.subr.mxu1 %v18902_v61  ;;  %28621 = vmatprep.mubr.f32.mxu1 %v32199_v60  ;;  %v19372_v60 = vld [vmem:[%s33394_s0] sm:$0xff]  ;;  %v32404_v56 = vand.u32 4294901760, %v19373_v39 }
 0xb41   : > { %28629 = vmatprep.mubr.f32.mxu0 %v18831_v53 }
 0xb42   : > { %33667 = vst [vmem:[#allocation31_spill] sm:$0xff] %v32404_v56 }
 0xb43   : > { %28622 = vmatmul.mubr.f32.vlgmr.msra.gmra.mxu1 %v32274_v3  ;;  %28630 = vmatmul.mubr.f32.vlgmr.msra.gmra.mxu0 %v18841_v16  ;;  %v32400_v3 = vand.u32 4294901760, %v19375_v17 }
 0xb44   : > { %28636 = vmatpush3.msra.mxu1 %v18902_v61  ;;  %28644 = vmatpush3.msra.mxu0 %v18899_v54  ;;  %v32406_v54 = vand.u32 4294901760, %v19372_v60 }
 0xb45   : > { %28651 = vmatprep.subr.mxu1 %v32344_v34  ;;  %28659 = vmatprep.subr.mxu0 %v18900_v32  ;;  %33666 = vst [vmem:[#allocation27_spill] sm:$0xff] %v32400_v3 }
 0xb46   : > { %28624 = vmatprep.mubr.f32.mxu1 %v32276_v49  ;;  %28632 = vmatprep.mubr.f32.mxu0 %v18851_v55  ;;  %33668 = vst [vmem:[#allocation18_spill] sm:$0xff] %v32406_v54  ;;  %v32411_v49 = vsub.f32 %v19375_v17, %v32400_v3  ;;  %v32422_v29 = vsub.f32 %v19372_v60, %v32406_v54 }
 0xb47   : > { %28625 = vmatmul.mubr.f32.gmra.mxu1 %v32282_v43  ;;  %28633 = vmatmul.mubr.f32.gmra.mxu0 %v18861_v12  ;;  %v32415_v43 = vsub.f32 %v19373_v39, %v32404_v56 }
 0xb48   : > { %28637 = vmatprep.mubr.f32.mxu1 %v32318_v21  ;;  %28645 = vmatprep.mubr.f32.mxu0 %v32329_v10  ;;  %33669 = vst [vmem:[#allocation22_spill] sm:$0xff] %v32411_v49  ;;  %33671 = vst [vmem:[#allocation26_spill] sm:$0xff] %v32422_v29  ;;  %v32436_v61 = vand.u32 4294901760, %v32422_v29 }
 0xb49   : > { %33670 = vst [vmem:[#allocation25_spill] sm:$0xff] %v32415_v43  ;;  %v32433_v53 = vand.u32 4294901760, %v32415_v43 }
 0xb4a   : > { %33675 = vst [vmem:[#allocation24_spill] sm:$0xff] %v32436_v61 }
 0xb4b   : > { %28638 = vmatmul.mubr.f32.vlgmr.msra.gmra.mxu1 %v32323_v15  ;;  %28646 = vmatmul.mubr.f32.vlgmr.msra.gmra.mxu0 %v32336_v58  ;;  %33674 = vst [vmem:[#allocation30_spill] sm:$0xff] %v32433_v53  ;;  %v19486_v10 = vsub.f32 %v32415_v43, %v32433_v53  ;;  %v19493_v58 = vsub.f32 %v32422_v29, %v32436_v61 }
 0xb4c   : > { %28652 = vmatpush3.msra.mxu1 %v32344_v34  ;;  %28660 = vmatpush3.msra.mxu0 %v18900_v32  ;;  %v32427_v32 = vand.u32 4294901760, %v32411_v49 }
 0xb4d   : > { %28667 = vmatprep.subr.mxu1 %v32344_v34  ;;  %28640 = vmatprep.mubr.f32.mxu1 %v32331_v19 }
 0xb4e   : > { %28648 = vmatprep.mubr.f32.mxu0 %v32349_v22  ;;  %28675 = vmatprep.subr.mxu0 %v33630_v28  ;;  %33672 = vst [vmem:[#allocation29_spill] sm:$0xff] %v32427_v32  ;;  %v19447_v16 = vsub.f32 %v32411_v49, %v32427_v32  ;;  %v19487_v22 = vand.u32 4294901760, %v19486_v10 }
 0xb4f   : > { %28641 = vmatmul.mubr.f32.gmra.mxu1 %v32338_v42  ;;  %28649 = vmatmul.mubr.f32.gmra.mxu0 %v32355_v63 }
 0xb50   : > { %28653 = vmatprep.mubr.f32.mxu1 %v33673_v6  ;;  %28661 = vmatprep.mubr.f32.mxu0 %v32318_v21 }
 0xb53   : > { %28654 = vmatmul.mubr.f32.vlgmr.msra.gmra.mxu1 %v33676_v30  ;;  %28662 = vmatmul.mubr.f32.vlgmr.msra.gmra.mxu0 %v32323_v15 }
 0xb54   : > { %28668 = vmatpush3.msra.mxu1 %v32344_v34  ;;  %28656 = vmatprep.mubr.f32.mxu1 %v18849_v57  ;;  %v32457_v34 = vand.u32 4294901760, %v19447_v16  ;;  %v19494_v57 = vand.u32 4294901760, %v19493_v58 }
 0xb55   : > { %28664 = vmatprep.mubr.f32.mxu0 %v32331_v19  ;;  %28676 = vmatpush3.msra.mxu0 %v32404_v56 }
 0xb56   : > { %28677 = vmatprep.subr.mxu0 %v33630_v28  ;;  %28682 = vmatprep.subr.mxu1 %v33630_v28  ;;  %33677 = vst [vmem:[#allocation23_spill] sm:$0xff] %v32457_v34 }
 0xb57   : > { %28657 = vmatmul.mubr.f32.gmra.mxu1 %v18859_v9  ;;  %28665 = vmatmul.mubr.f32.gmra.mxu0 %v32338_v42 }
 0xb58   : > { %28669 = vmatprep.mubr.f32.mxu1 %v32318_v21  ;;  %28678 = vmatpush3.msra.mxu0 %v32406_v54 }
 0xb59   : > { %28679 = vmatprep.mubr.msk.f32.mxu0 %vm29303_vm2, %v33630_v28  ;;  %28689 = vmatprep.subr.mxu0 %v33630_v28 }
 0xb5b   : > { %28670 = vmatmul.mubr.f32.vlgmr.msra.gmra.mxu1 %v32323_v15  ;;  %28680 = vmatmul.mubr.f32.vlgmr.msra.gmra.mxu0 %v32457_v34 }
 0xb5c   : > { %28672 = vmatprep.mubr.f32.mxu1 %v32331_v19  ;;  %28683 = vmatpush3.msra.mxu1 %v19487_v22 }
 0xb5d   : > { %28684 = vmatprep.subr.mxu1 %v33630_v28  ;;  %28690 = vmatpush3.msra.mxu0 %v32415_v43 }
 0xb5e   : > { %28685 = vmatpush3.msra.mxu1 %v19494_v57  ;;  %28691 = vmatprep.subr.mxu0 %v33630_v28 }
 0xb5f   : > { %28673 = vmatmul.mubr.f32.gmra.mxu1 %v32338_v42  ;;  %28696 = vmatprep.subr.mxu1 %v33630_v28 }
 0xb60   : > { %28686 = vmatprep.mubr.msk.f32.mxu1 %vm29303_vm2, %v33630_v28  ;;  %28692 = vmatpush3.msra.mxu0 %v32422_v29 }
 0xb61   : > { %28693 = vmatprep.mubr.msk.f32.mxu0 %vm29303_vm2, %v33630_v28  ;;  %28703 = vmatprep.subr.mxu0 %v33630_v28 }
 0xb62   : > { %28694 = vmatmul.mubr.f32.vlgmr.msra.gmra.mxu0 %v32411_v49 }
 0xb63   : > { %28687 = vmatmul.mubr.f32.vlgmr.msra.gmra.mxu1 %v32400_v3  ;;  %28704 = vmatpush3.msra.mxu0 %v32433_v53  ;;  %v14137_v53 = vadd.f32 %v31746_v26, %v31758_v20 }
 0xb64   : > { %28697 = vmatpush3.msra.mxu1 %v32404_v56  ;;  %28700 = vmatprep.mubr.msk.f32.mxu1 %vm29303_vm2, %v33630_v28 }
 0xb65   : > { %28698 = vmatprep.subr.mxu1 %v33630_v28  ;;  %28705 = vmatprep.subr.mxu0 %v33630_v28 }
 0xb66   : > { %28699 = vmatpush3.msra.mxu1 %v32406_v54  ;;  %28706 = vmatpush3.msra.mxu0 %v32436_v61 }
 0xb67   : > { %28701 = vmatmul.mubr.f32.vlgmr.msra.gmra.mxu1 %v32427_v32  ;;  %28710 = vmatprep.subr.mxu1 %v33630_v28 }
 0xb68   : > { %28707 = vmatprep.mubr.msk.f32.mxu0 %vm29303_vm2, %v33630_v28  ;;  %28711 = vmatpush3.msra.mxu1 %v32404_v56 }
 0xb69   : > { %28708 = vmatmul.mubr.f32.vlgmr.msra.gmra.mxu0 %v32400_v3  ;;  %28712 = vmatprep.subr.mxu1 %v33630_v28 }
 0xb6a   : > { %28713 = vmatpush3.msra.mxu1 %v32406_v54  ;;  %28714 = vmatprep.mubr.msk.f32.mxu1 %vm29303_vm2, %v33630_v28 }
 0xb6b   : > { %28715 = vmatmul.mubr.f32.vlgmr.msra.gmra.mxu1 %v32400_v3  ;;  %28724 = vmatprep.subr.mxu1 %v33630_v28 }
 0xb6c   : > { %28725 = vmatpush3.msra.mxu1 %v19487_v22  ;;  %28728 = vmatprep.mubr.msk.f32.mxu1 %vm29303_vm2, %v33630_v28 }
 0xb6d   : > { %28726 = vmatprep.subr.mxu1 %v33630_v28  ;;  %28717 = vmatprep.subr.mxu0 %v33630_v28 }
 0xb6e   : > { %28727 = vmatpush3.msra.mxu1 %v19494_v57  ;;  %28718 = vmatpush3.msra.mxu0 %v32404_v56  ;;  %v14125_v57 = vadd.f32 %v31735_v31, %v31751_v23  ;;  %v14231_v56 = vadd.f32 %v31776_v25, %v14137_v53 }
 0xb6f   : > { %28738 = vmatprep.subr.mxu1 %v33630_v28  ;;  %28719 = vmatprep.subr.mxu0 %v33630_v28 }
 0xb70   : > { %28720 = vmatpush3.msra.mxu0 %v32406_v54  ;;  %28721 = vmatprep.mubr.msk.f32.mxu0 %vm29303_vm2, %v33630_v28  ;;  %v14217_v61 = vadd.f32 %v31765_v8, %v14125_v57  ;;  %v14720_v54 = vadd.f32 %v31929_v7, %v31923_v24  ;;  %v16235_v8 = vadd.f32 %v32213_v18, %v32209_v44 }
 0xb71   : > { %28731 = vmatprep.subr.mxu0 %v33630_v28  ;;  %v16830_v24 = vadd.f32 %v32239_v52, %v32232_v51  ;;  %v14328_v25 = vadd.f32 %v31760_v50, %v14231_v56 }
 0xb72   : > { %v14312_v28 = vadd.f32 %v31756_v2, %v14217_v61  ;;  %v14812_v20 = vadd.f32 %v31931_v41, %v14720_v54  ;;  %v16327_v18 = vadd.f32 %v32215_v38, %v16235_v8 }
 0xb73   : > { %v16922_v54 = vadd.f32 %v32241_v33, %v16830_v24 }
 0xb74   : > { %v14410_v2 = vadd.f32 %v31791_v37, %v14312_v28  ;;  %v14907_v44 = vadd.f32 %v31937_v27, %v14812_v20  ;;  %v16422_v52 = vadd.f32 %v32221_v5, %v16327_v18  ;;  %v16842_v37 = vadd.f32 %v32243_v47, %v32237_v4 }
 0xb75   : > { %v14422_v27 = vadd.f32 %v31921_v45, %v14328_v25  ;;  %v33684_v25 = vld [vmem:[#allocation11_spill] sm:$0xff] }
 0xb76   : > { %v14500_v50 = vadd.f32 %v31784_v40, %v14410_v2  ;;  %v15005_v38 = vadd.f32 %v31939_v46, %v14907_v44  ;;  %v33681_v46 = vld [vmem:[#allocation35_spill] sm:$0xff] }
 0xb78   : > { %v15095_v40 = vadd.f32 %v31947_v35, %v15005_v38  ;;  %v14521_v47 = vadd.f32 %v14500_v50, %v33681_v46  ;;  %v33687_v35 = vld [vmem:[#allocation33_spill] sm:$0xff]  ;;  %v33689_v38 = vld [vmem:[#allocation10_spill] sm:$0xff] }
 0xb7a   : > { %v15116_v50 = vadd.f32 %v15095_v40, %v14521_v47 }
 0xbeb   : > { %v32511_v21 = vpop.f32.mrf.mxu0 }
 0xbed   : > { %v18238_v15 = vpop.f32.mrf.mxu0 }
 0xbef   : > { %v32513_v19 = vpop.f32.mrf.mxu0 }
 0xbf1   : > { %v18258_v42 = vpop.f32.mrf.mxu0 }
 0xbf3   : > { %v32515_v63 = vpop.f32.mrf.mxu1  ;;  %v32517_v9 = vpop.f32.mrf.mxu0 }
 0xbf5   : > { %v18344_v1 = vpop.f32.mrf.mxu1  ;;  %v18436_v55 = vpop.f32.mrf.mxu0 }
 0xbf7   : > { %v32519_v12 = vpop.f32.mrf.mxu1  ;;  %v32521_v17 = vpop.f32.mrf.mxu0 }
 0xbf9   : > { %v18356_v39 = vpop.f32.mrf.mxu1  ;;  %v32523_v60 = vpop.f32.mrf.mxu0 }
 0xbfb   : > { %v32525_v6 = vpop.f32.mrf.mxu1  ;;  %v32527_v30 = vpop.f32.mrf.mxu0 }
 0xbfc   : > { %33678 = vst [vmem:[#allocation34_spill] sm:$0xff] %v32527_v30 }
 0xbfd   : > { %v18531_v16 = vpop.f32.mrf.mxu1  ;;  %v32529_v10 = vpop.f32.mrf.mxu0 }
 0xbff   : > { %v32531_v58 = vpop.f32.mrf.mxu1  ;;  %v32533_v22 = vpop.f32.mrf.mxu0 }
 0xc01   : > { %v32537_v32 = vpop.f32.mrf.mxu1  ;;  %v32539_v3 = vpop.f32.mrf.mxu0 }
 0xc03   : > { %v32541_v49 = vpop.f32.mrf.mxu1  ;;  %v32543_v34 = vpop.f32.mrf.mxu0 }
 0xc04   : > { %33679 = vst [vmem:[#allocation28_spill] sm:$0xff] %v32541_v49  ;;  %v14732_v49 = vadd.f32 %v31933_v0, %v31927_v48  ;;  %v16247_v48 = vadd.f32 %v32217_v13, %v32211_v14  ;;  %v18345_v0 = vadd.f32 %v18344_v1, %v18238_v15  ;;  %v33680_v1 = vld [vmem:[#allocation13_spill] sm:$0xff] }
 0xc05   : > { %v32548_v29 = vpop.f32.mrf.mxu1  ;;  %v18833_v43 = vpop.f32.mrf.mxu0  ;;  %v16520_v8 = vadd.f32 %v33680_v1, %v16422_v52 }
 0xc06   : > { %v14826_v51 = vadd.f32 %v31935_v11, %v14732_v49  ;;  %v17017_v11 = vadd.f32 %v32247_v59, %v16922_v54  ;;  %v16341_v33 = vadd.f32 %v32219_v62, %v16247_v48  ;;  %v18437_v56 = vadd.f32 %v18436_v55, %v18345_v0  ;;  %v33683_v59 = vld [vmem:[#allocation6_spill] sm:$0xff]  ;;  %v33688_v48 = vld [vmem:[#allocation15_spill] sm:$0xff] }
 0xc07   : > { %v32552_v31 = vpop.f32.mrf.mxu1  ;;  %v32554_v23 = vpop.f32.mrf.mxu0  ;;  %v18357_v49 = vadd.f32 %v18356_v39, %v18258_v42  ;;  %v16936_v24 = vadd.f32 %v33683_v59, %v16842_v37  ;;  %v14512_v62 = vadd.f32 %v33684_v25, %v14422_v27  ;;  %v33685_v55 = vld [vmem:[#allocation14_spill] sm:$0xff]  ;;  %v33692_v59 = vld [vmem:[#allocation9_spill] sm:$0xff] }
 0xc08   : > { %v14923_v14 = vadd.f32 %v31941_v36, %v14826_v51  ;;  %v33682_v36 = vld [vmem:[#allocation4_spill] sm:$0xff]  ;;  %v18532_v2 = vadd.f32 %v18531_v16, %v18437_v56  ;;  %v17115_v44 = vadd.f32 %v33687_v35, %v17017_v11  ;;  %v33690_v16 = vld [vmem:[#allocation19_spill] sm:$0xff] }
 0xc09   : > { %v32560_v57 = vpop.f32.mrf.mxu1  ;;  %v18853_v26 = vpop.f32.mrf.mxu0  ;;  %v16438_v20 = vadd.f32 %v33682_v36, %v16341_v33  ;;  %v17033_v0 = vadd.f32 %v33688_v48, %v16936_v24  ;;  %v18451_v51 = vadd.f32 %v32523_v60, %v18357_v49  ;;  %v14523_v24 = vadd.f32 %v14512_v62, %v33692_v59  ;;  %v33694_v49 = vld [vmem:[#allocation17_spill] sm:$0xff] }
 0xc0a   : > { %v15017_v42 = vadd.f32 %v33685_v55, %v14923_v14  ;;  %v17205_v33 = vadd.f32 %v33690_v16, %v17115_v44  ;;  %v33691_v14 = vld [vmem:[#allocation8_spill] sm:$0xff] }
 0xc0b   : > { %v32567_v7 = vpop.f32.mrf.mxu1  ;;  %v32569_v30 = vpop.f32.mrf.mxu0  ;;  %v16532_v1 = vadd.f32 %v33691_v14, %v16438_v20  ;;  %v18548_v11 = vadd.f32 %v32537_v32, %v18451_v51 }
 0xc0c   : > { %v15107_v37 = vadd.f32 %v33689_v38, %v15017_v42 }
 0xc0d   : > { %v18939_v53 = vpop.f32.mrf.mxu1  ;;  %v19031_v41 = vpop.f32.mrf.mxu0 }
 0xc0e   : > { %v18940_v15 = vadd.f32 %v18939_v53, %v18833_v43  ;;  %v33686_v43 = vld [vmem:[#allocation12_spill] sm:$0xff]  ;;  %v15118_v55 = vadd.f32 %v15107_v37, %v14523_v24 }
 0xc0f   : > { %v28642_v61 = vpop.f32.mrf.mxu1  ;;  %v32580_v28 = vpop.f32.mrf.mxu0  ;;  %v16610_v39 = vadd.f32 %v33686_v43, %v16520_v8  ;;  %v18630_v8 = vadd.f32 %v32529_v10, %v18532_v2  ;;  %v18363_v10 = vadd.f32 %v32519_v12, %v32513_v19  ;;  %v33695_v2 = vld [vmem:[#allocation21_spill] sm:$0xff]  ;;  %v18642_v43 = vadd.f32 %v32539_v3, %v18548_v11 }
 0xc10   : > { %v19032_v52 = vadd.f32 %v19031_v41, %v18940_v15  ;;  %v17127_v15 = vadd.f32 %v33694_v49, %v17033_v0  ;;  %v18958_v44 = vadd.f32 %v28642_v61, %v32554_v23  ;;  %v18351_v3 = vadd.f32 %v32515_v63, %v32511_v21 }
 0xc11   : > { %v18951_v13 = vpop.f32.mrf.mxu1  ;;  %v19045_v5 = vpop.f32.mrf.mxu0  ;;  %v16631_v25 = vadd.f32 %v16610_v39, %v15116_v50  ;;  %v18720_v40 = vadd.f32 %v32548_v29, %v18630_v8  ;;  %v18732_v0 = vadd.f32 %v32560_v57, %v18642_v43  ;;  %v18458_v19 = vadd.f32 %v32521_v17, %v18363_v10 }
 0xc12   : > { %v18952_v54 = vadd.f32 %v18951_v13, %v18853_v26  ;;  %v33693_v26 = vld [vmem:[#allocation16_spill] sm:$0xff]  ;;  %v17217_v62 = vadd.f32 %v33695_v2, %v17127_v15  ;;  %v19053_v23 = vadd.f32 %v32580_v28, %v18958_v44  ;;  %v18946_v57 = vadd.f32 %v32567_v7, %v32543_v34 }
 0xc13   : > { %v32592_v4 = vpop.f32.mrf.mxu1  ;;  %v32594_v45 = vpop.f32.mrf.mxu0  ;;  %v16622_v13 = vadd.f32 %v33693_v26, %v16532_v1  ;;  %v17226_v42 = vadd.f32 %v17205_v33, %v16631_v25  ;;  %v18444_v11 = vadd.f32 %v32517_v9, %v18351_v3  ;;  %v33696_v26 = vld [vmem:[#allocation34_spill] sm:$0xff] }
 0xc14   : > { %v19046_v47 = vadd.f32 %v19045_v5, %v18952_v54  ;;  %v19039_v24 = vadd.f32 %v32569_v30, %v18946_v57 }
 0xc15   : > { %v19126_v18 = vpop.f32.mrf.mxu1  ;;  %v19224_v53 = vpop.f32.mrf.mxu0  ;;  %v16633_v29 = vadd.f32 %v16622_v13, %v15118_v55  ;;  %v18741_v5 = vadd.f32 %v18720_v40, %v17226_v42  ;;  %v18540_v28 = vadd.f32 %v32525_v6, %v18444_v11  ;;  %v33697_v13 = vld [vmem:[#allocation20_spill] sm:$0xff] }
 0xc16   : > { %v19127_v36 = vadd.f32 %v19126_v18, %v19032_v52  ;;  %v19135_v34 = vadd.f32 %v32592_v4, %v19039_v24  ;;  %v33698_v40 = vld [vmem:[#allocation28_spill] sm:$0xff] }
 0xc17   : > { %v28658_v27 = vpop.f32.mrf.mxu1  ;;  %v28666_v56 = vpop.f32.mrf.mxu0  ;;  %v17228_v52 = vadd.f32 %v17217_v62, %v16633_v29  ;;  %v18636_v9 = vadd.f32 %v33696_v26, %v18540_v28  ;;  %v33699_v42 = vld [vmem:[#allocation32_spill] sm:$0xff]  ;;  %v19340_v29 = vld [vmem:[#allocation3] sm:$0xff] }
 0xc18   : > { %v19225_v39 = vadd.f32 %v19224_v53, %v19127_v36  ;;  %v18556_v53 = vadd.f32 %v32531_v58, %v18458_v19  ;;  %v19151_v17 = vadd.f32 %v28658_v27, %v19053_v23  ;;  %v33700_v28 = vld [vmem:[#allocation31_spill] sm:$0xff] }
 0xc19   : > { %v19142_v60 = vpop.f32.mrf.mxu1  ;;  %v19236_v41 = vpop.f32.mrf.mxu0  ;;  %v18743_v38 = vadd.f32 %v18732_v0, %v17228_v52  ;;  %v18726_v6 = vadd.f32 %v33698_v40, %v18636_v9 }
 0xc1a   : > { %v19143_v35 = vadd.f32 %v19142_v60, %v19046_v47  ;;  %v18648_v21 = vadd.f32 %v32533_v22, %v18556_v53  ;;  %v19243_v25 = vadd.f32 %v28666_v56, %v19151_v17 }
 0xc1b   : > { %v28671_v20 = vpop.f32.mrf.mxu1  ;;  %v32616_v32 = vpop.f32.mrf.mxu0  ;;  %v18742_v10 = vadd.f32 %v18726_v6, %v33699_v42 }
 0xc1c   : > { %v19237_v54 = vadd.f32 %v19236_v41, %v19143_v35  ;;  %v18738_v36 = vadd.f32 %v32552_v31, %v18648_v21  ;;  %v19231_v31 = vadd.f32 %v32594_v45, %v19135_v34  ;;  %v20301_v21 = vld [vmem:[%s33396_s2 + $0x18] sm:$0xff] }
 0xc1d   : > { %v19314_v18 = vpop.f32.mrf.mxu1  ;;  %v28681_v48 = vpop.f32.mrf.mxu0 }
 0xc1e   : > { %v19315_v51 = vadd.f32 %v19314_v18, %v19225_v39  ;;  %v18744_v22 = vadd.f32 %v18738_v36, %v33697_v13  ;;  %v19321_v56 = vadd.f32 %v28671_v20, %v19231_v31  ;;  %v33701_v36 = vmov 0.0   ;;  %v33703_v31 = vld [vmem:[#allocation25_spill] sm:$0xff] }
 0xc1f   : > { %v28674_v12 = vpop.f32.mrf.mxu1 }
 0xc20   : > { %v19336_v50 = vadd.f32 %v19315_v51, %v18741_v5  ;;  %v19333_v7 = vadd.f32 %v28674_v12, %v19243_v25  ;;  %v19337_v62 = vadd.f32 %v19321_v56, %v18742_v10  ;;  %v33704_v56 = vld [vmem:[#allocation26_spill] sm:$0xff] }
 0xc21   : > { %v19326_v61 = vpop.f32.mrf.mxu1  ;;  %v33705_v10 = vld [vmem:[#allocation30_spill] sm:$0xff] }
 0xc22   : > { %v25873_v37 = vmul.f32 -1.442695, %v19336_v50  ;;  %v19327_v16 = vadd.f32 %v19326_v61, %v19237_v54  ;;  %v19607_v33 = vpop.f32.mrf.mxu0  ;;  %v19339_v47 = vadd.f32 %v19333_v7, %v18744_v22 }
 0xc23   : > { %v19531_v14 = vpop.f32.mrf.mxu1 }
 0xc24   : > { %29261 = vpow2.f32 %v25873_v37  ;;  %v19338_v1 = vadd.f32 %v19327_v16, %v18743_v38  ;;  %v28695_v8 = vpop.f32.mrf.mxu0  ;;  %v25874_v4 = vmul.f32 -1.442695, %v19339_v47  ;;  %v19532_v0 = vadd.f32 %v19531_v14, %v32616_v32  ;;  %v20298_v32 = vld [vmem:[%s33396_s2] sm:$0xff]  ;;  %v20299_v37 = vld [vmem:[%s33396_s2 + $0x8] sm:$0xff]  ;;  %v20300_v16 = vld [vmem:[%s33396_s2 + $0x10] sm:$0xff] }
 0xc25   : > { %v28688_v63 = vpop.f32.mrf.mxu1  ;;  %v20303_v38 = vsel %vm1192_vm3, %v20298_v32, 0  ;;  %v20306_v14 = vsel %vm1192_vm3, %v20299_v37, 0  ;;  %v20309_v11 = vsel %vm1192_vm3, %v20300_v16, 0 }
 0xc26   : > { %v25872_v58 = vmul.f32 -1.442695, %v19338_v1  ;;  %v19608_v19 = vadd.f32 %v19607_v33, %v19532_v0  ;;  %v32661_v17 = vand.u32 4294901760, %v20303_v38  ;;  %v32685_v25 = vand.u32 4294901760, %v20309_v11 }
 0xc27   : > { %v19682_v60 = vpop.f32.mrf.mxu1 }
 0xc28   : > { %29263 = vpow2.f32 %v25872_v58  ;;  %v19683_v12 = vadd.f32 %v19682_v60, %v19608_v19  ;;  %v32677_v58 = vand.u32 4294901760, %v20306_v14  ;;  %v32683_v24 = vsub.f32 %v20303_v38, %v32661_v17 }
 0xc29   : > { %v28702_v27 = vpop.f32.mrf.mxu1  ;;  %v19759_v41 = vpop.f32.mrf.mxu0  ;;  %29265 = vpow2.f32 %v25874_v4  ;;  %v20312_v60 = vsel %vm1192_vm3, %v20301_v21, 0  ;;  %v20401_v22 = vsub.f32 %v20309_v11, %v32685_v25 }
 0xc2a   : > { %v19760_v52 = vadd.f32 %v19759_v41, %v19683_v12  ;;  %v33702_v27 = vld [vmem:[#allocation18_spill] sm:$0xff]  ;;  %v20391_v26 = vsub.f32 %v20306_v14, %v32677_v58  ;;  %v32700_v9 = vand.u32 4294901760, %v20312_v60  ;;  %v20382_v13 = vand.u32 4294901760, %v32683_v24  ;;  %v20895_v12 = vld [vmem:[%s33397_s3 + $0x10] sm:$0xff] }
 0xc2b   : > { %v19832_v49 = vpop.f32.mrf.mxu1  ;;  %v28709_v15 = vpop.f32.mrf.mxu0 }
 0xc2c   : > { %v19833_v3 = vadd.f32 %v19832_v49, %v19760_v52  ;;  %v20392_v40 = vand.u32 4294901760, %v20391_v26  ;;  %v20411_v6 = vsub.f32 %v20312_v60, %v32700_v9  ;;  %v20383_v47 = vsub.f32 %v32683_v24, %v20382_v13 }
 0xc2d   : > { %v28716_v30 = vpop.f32.mrf.mxu1 }
 0xc2e   : > { %v32645_v23 = vand.u32 4294901760, %v19833_v3  ;;  %v20402_v30 = vand.u32 4294901760, %v20401_v22  ;;  %v20412_v42 = vand.u32 4294901760, %v20411_v6  ;;  %v20384_v4 = vand.u32 4294901760, %v20383_v47 }
 0xc30   : > { %v32651_v61 = vsub.f32 %v19833_v3, %v32645_v23  ;;  %v20896_v3 = vld [vmem:[%s33397_s3 + $0x18] sm:$0xff] }
 0xc31   : > { %v29262_v55 = vpop.eup %29261  ;;  %v20907_v38 = vsel %vm1192_vm3, %v20896_v3, 0 }
 0xc32   : > { %v19351_v2 = vadd.f32 1.0, %v29262_v55  ;;  %v32667_v8 = vand.u32 4294901760, %v32651_v61  ;;  %v20393_v55 = vsub.f32 %v20391_v26, %v20392_v40 }
 0xc34   : > { %29267 = vrcp.f32 %v19351_v2  ;;  %v20454_v7 = vsub.f32 %v32651_v61, %v32667_v8  ;;  %v20403_v2 = vsub.f32 %v20401_v22, %v20402_v30 }
 0xc35   : > { %v29264_v43 = vpop.eup %29263  ;;  %29269 = vtanh.f32 %v19337_v62  ;;  %v33706_v62 = vld [vmem:[#allocation24_spill] sm:$0xff] }
 0xc36   : > { %v19344_v39 = vadd.f32 1.0, %v29264_v43  ;;  %v29266_v35 = vpop.eup %29265  ;;  %v20455_v15 = vand.u32 4294901760, %v20454_v7  ;;  %v20394_v43 = vand.u32 4294901760, %v20393_v55 }
 0xc37   : > { %v19361_v45 = vadd.f32 1.0, %v29266_v35  ;;  %v20404_v35 = vand.u32 4294901760, %v20403_v2 }
 0xc38   : > { %29271 = vrcp.f32 %v19344_v39  ;;  %v20413_v39 = vsub.f32 %v20411_v6, %v20412_v42 }
 0xc39   : > { %29273 = vrcp.f32 %v19361_v45 }
 0xc41   : > { %v29268_v44 = vpop.eup %29267 }
 0xc42   : > { %v29270_v18 = vpop.eup %29269 }
 0xc43   : > { %v19355_v20 = vmul.f32 %v29270_v18, %v29268_v44  ;;  %v20414_v44 = vand.u32 4294901760, %v20413_v39  ;;  %v20893_v18 = vld [vmem:[%s33397_s3] sm:$0xff] }
 0xc45   : > { %v29272_v48 = vpop.eup %29271 }
 0xc46   : > { %v19347_v5 = vmul.f32 %v29272_v48, %v19340_v29  ;;  %v29274_v54 = vpop.eup %29273  ;;  %v20898_v48 = vsel %vm1192_vm3, %v20893_v18, 0 }
 0xc47   : > { %v32755_v45 = vand.u32 4294901760, %v20898_v48 }
 0xc48   : > { %v19356_v51 = vadd.f32 %v19355_v20, %v19347_v5 }
 0xc49   : > { %v32758_v29 = vsub.f32 %v20898_v48, %v32755_v45 }
 0xc4a   : > { %29275 = vtanh.f32 %v19356_v51  ;;  %19365 = vst.msk [vmem:[#allocation3] sm:$0xff] %vm263_vm1, %v19356_v51  ;;  %v20894_v51 = vld [vmem:[%s33397_s3 + $0x8] sm:$0xff] }
 0xc4b   : > { %v20977_v20 = vand.u32 4294901760, %v32758_v29 }
 0xc4d   : > { %v20978_v5 = vsub.f32 %v32758_v29, %v20977_v20 }
 0xc4f   : > { %v20979_v0 = vand.u32 4294901760, %v20978_v5 }
 0xc57   : > { %v29276_v50 = vpop.eup %29275 }
 0xc58   : > { %v19364_v53 = vmul.f32 %v29276_v50, %v29274_v54  ;;  %v20901_v54 = vsel %vm1192_vm3, %v20894_v51, 0  ;;  %v20904_v50 = vsel %vm1192_vm3, %v20895_v12, 0 }
 0xc5a   : > { %19366 = vst.msk [vmem:[#allocation2] sm:$0xff] %vm263_vm1, %v19364_v53  ;;  %25875 = vst.msk [vmem:[%s29351_s27 + $0x10] sm:$0xff] %vm263_vm1, %v19364_v53 }
 0xc61   : > { %v19371_v33 = vld [vmem:[#allocation2] sm:$0xff] }
 0xc62   : > { %v19837_v57 = vsel %vm263_vm1, %v19371_v33, 0 }
 0xc63   : > { %v32664_v1 = vand.u32 4294901760, %v19837_v57 }
 0xc65   : > { %28729 = vmatmul.mubr.f32.vlgmr.msra.gmra.mxu1 %v32664_v1  ;;  %v32675_v63 = vsub.f32 %v19837_v57, %v32664_v1  ;;  %v32784_v57 = vand.u32 4294901760, %v20907_v38 }
 0xc66   : > { %28739 = vmatpush3.msra.mxu1 %v33700_v28  ;;  %28742 = vmatprep.mubr.msk.f32.mxu1 %vm29303_vm2, %v33701_v36 }
 0xc67   : > { %28740 = vmatprep.subr.mxu1 %v33701_v36  ;;  %v32690_v34 = vand.u32 4294901760, %v32675_v63 }
 0xc68   : > { %28741 = vmatpush3.msra.mxu1 %v33702_v27 }
 0xc69   : > { %28743 = vmatmul.mubr.f32.vlgmr.msra.gmra.mxu1 %v32690_v34  ;;  %28752 = vmatprep.subr.mxu1 %v33701_v36  ;;  %v19909_v41 = vsub.f32 %v32675_v63, %v32690_v34 }
 0xc6a   : > { %28753 = vmatpush3.msra.mxu1 %v33700_v28  ;;  %28756 = vmatprep.mubr.msk.f32.mxu1 %vm29303_vm2, %v33701_v36 }
 0xc6b   : > { %28754 = vmatprep.subr.mxu1 %v33701_v36  ;;  %v32708_v49 = vand.u32 4294901760, %v19909_v41 }
 0xc6c   : > { %28755 = vmatpush3.msra.mxu1 %v33702_v27 }
 0xc6d   : > { %28722 = vmatmul.mubr.f32.vlgmr.msra.gmra.mxu0 %v32708_v49  ;;  %28757 = vmatmul.mubr.f32.vlgmr.msra.gmra.mxu1 %v32664_v1 }
 0xc6e   : > { %28732 = vmatpush3.msra.mxu0 %v33703_v31  ;;  %28735 = vmatprep.mubr.msk.f32.mxu0 %vm29303_vm2, %v33701_v36 }
 0xc6f   : > { %28733 = vmatprep.subr.mxu0 %v33701_v36  ;;  %28767 = vmatprep.subr.mxu1 %v20455_v15 }
 0xc70   : > { %28734 = vmatpush3.msra.mxu0 %v33704_v56  ;;  %28768 = vmatpush3.msra.mxu1 %v20455_v15 }
 0xc71   : > { %28736 = vmatmul.mubr.f32.vlgmr.msra.gmra.mxu0 %v32675_v63  ;;  %28745 = vmatprep.subr.mxu0 %v33701_v36 }
 0xc72   : > { %28746 = vmatpush3.msra.mxu0 %v33705_v10  ;;  %28749 = vmatprep.mubr.msk.f32.mxu0 %vm29303_vm2, %v33701_v36 }
 0xc73   : > { %28747 = vmatprep.subr.mxu0 %v33701_v36  ;;  %28769 = vmatprep.mubr.f32.mxu1 %v32661_v17 }
 0xc74   : > { %28748 = vmatpush3.msra.mxu0 %v33706_v62  ;;  %28770 = vmatmul.mubr.f32.vlgmr.msra.gmra.mxu1 %v32677_v58 }
 0xc75   : > { %28750 = vmatmul.mubr.f32.vlgmr.msra.gmra.mxu0 %v32664_v1  ;;  %28759 = vmatprep.subr.mxu0 %v32645_v23 }
 0xc76   : > { %28760 = vmatpush3.msra.mxu0 %v32645_v23  ;;  %28761 = vmatprep.mubr.f32.mxu0 %v20384_v4 }
 0xc77   : > { %28772 = vmatprep.mubr.f32.mxu1 %v32685_v25  ;;  %28775 = vmatprep.subr.mxu0 %v32651_v61 }
 0xc78   : > { %28773 = vmatmul.mubr.f32.gmra.mxu1 %v32700_v9  ;;  %28783 = vmatprep.subr.mxu1 %v32645_v23 }
 0xc79   : > { %28762 = vmatmul.mubr.f32.vlgmr.msra.gmra.mxu0 %v20394_v43  ;;  %28784 = vmatpush3.msra.mxu1 %v32645_v23 }
 0xc7a   : > { %28764 = vmatprep.mubr.f32.mxu0 %v20404_v35  ;;  %28776 = vmatpush3.msra.mxu0 %v32651_v61  ;;  %v32778_v61 = vand.u32 4294901760, %v20904_v50 }
 0xc7b   : > { %28785 = vmatprep.mubr.f32.mxu1 %v20382_v13  ;;  %28791 = vmatprep.subr.mxu0 %v32667_v8 }
 0xc7c   : > { %28786 = vmatmul.mubr.f32.vlgmr.msra.gmra.mxu1 %v20392_v40  ;;  %28799 = vmatprep.subr.mxu1 %v32645_v23 }
 0xc7d   : > { %28765 = vmatmul.mubr.f32.gmra.mxu0 %v20414_v44  ;;  %28788 = vmatprep.mubr.f32.mxu1 %v20402_v30 }
 0xc7e   : > { %28777 = vmatprep.mubr.f32.mxu0 %v32683_v24  ;;  %28800 = vmatpush3.msra.mxu1 %v32645_v23  ;;  %v32776_v23 = vand.u32 4294901760, %v20901_v54  ;;  %v32791_v24 = vsub.f32 %v20907_v38, %v32784_v57 }
 0xc80   : > { %28789 = vmatmul.mubr.f32.gmra.mxu1 %v20412_v42  ;;  %v32782_v33 = vsub.f32 %v20901_v54, %v32776_v23 }
 0xc81   : > { %28778 = vmatmul.mubr.f32.vlgmr.msra.gmra.mxu0 %v20391_v26  ;;  %28801 = vmatprep.mubr.f32.mxu1 %v32661_v17 }
 0xc82   : > { %28780 = vmatprep.mubr.f32.mxu0 %v20401_v22  ;;  %28792 = vmatpush3.msra.mxu0 %v32667_v8  ;;  %v32787_v8 = vsub.f32 %v20904_v50, %v32778_v61  ;;  %v20987_v28 = vand.u32 4294901760, %v32782_v33  ;;  %v21007_v22 = vand.u32 4294901760, %v32791_v24 }
 0xc84   : > { %28802 = vmatmul.mubr.f32.vlgmr.msra.gmra.mxu1 %v32677_v58  ;;  %v20997_v60 = vand.u32 4294901760, %v32787_v8  ;;  %v20988_v13 = vsub.f32 %v32782_v33, %v20987_v28  ;;  %v21008_v10 = vsub.f32 %v32791_v24, %v21007_v22 }
 0xc85   : > { %28781 = vmatmul.mubr.f32.gmra.mxu0 %v20411_v6  ;;  %28804 = vmatprep.mubr.f32.mxu1 %v32685_v25 }
 0xc86   : > { %28793 = vmatprep.mubr.f32.mxu0 %v32661_v17  ;;  %v20998_v40 = vsub.f32 %v32787_v8, %v20997_v60  ;;  %v20989_v55 = vand.u32 4294901760, %v20988_v13  ;;  %v21009_v48 = vand.u32 4294901760, %v21008_v10 }
 0xc88   : > { %28805 = vmatmul.mubr.f32.gmra.mxu1 %v32700_v9  ;;  %v20999_v2 = vand.u32 4294901760, %v20998_v40 }
 0xc89   : > { %28794 = vmatmul.mubr.f32.vlgmr.msra.gmra.mxu0 %v32677_v58  ;;  %28817 = vmatprep.mubr.f32.mxu1 %v32755_v45 }
 0xc8a   : > { %28796 = vmatprep.mubr.f32.mxu0 %v32685_v25 }
 0xc8d   : > { %28797 = vmatmul.mubr.f32.gmra.mxu0 %v32700_v9 }
 0xc8e   : > { %28809 = vmatprep.mubr.f32.mxu0 %v20979_v0 }
 0xd25   : > { %v19993_v19 = vpop.f32.mrf.mxu1 }
 0xd27   : > { %v28730_v52 = vpop.f32.mrf.mxu1 }
 0xd29   : > { %v20144_v53 = vpop.f32.mrf.mxu1 }
 0xd2b   : > { %v28744_v32 = vpop.f32.mrf.mxu1 }
 0xd2d   : > { %v19912_v37 = vpop.f32.mrf.mxu0  ;;  %v20294_v16 = vpop.f32.mrf.mxu1 }
 0xd2e   : > { %v19994_v11 = vadd.f32 %v19993_v19, %v19912_v37 }
 0xd2f   : > { %v28723_v17 = vpop.f32.mrf.mxu0  ;;  %v28758_v14 = vpop.f32.mrf.mxu1 }
 0xd31   : > { %v20069_v21 = vpop.f32.mrf.mxu0 }
 0xd32   : > { %v20070_v58 = vadd.f32 %v20069_v21, %v19994_v11  ;;  %v25877_v11 = vld [vmem:[%s33394_s0 + $0x10] sm:$0xff] }
 0xd33   : > { %v28737_v25 = vpop.f32.mrf.mxu0 }
 0xd34   : > { %v20145_v7 = vadd.f32 %v20144_v53, %v20070_v58  ;;  %v28771_v27 = vpop.f32.mrf.mxu1  ;;  %v25878_v53 = vld [vmem:[%s33394_s0 + $0x18] sm:$0xff] }
 0xd35   : > { %v20221_v41 = vpop.f32.mrf.mxu0  ;;  %v32813_v14 = vand.u32 4294901760, %v25878_v53 }
 0xd36   : > { %v20222_v26 = vadd.f32 %v20221_v41, %v20145_v7  ;;  %v20492_v9 = vpop.f32.mrf.mxu1  ;;  %v32823_v41 = vand.u32 4294901760, %v25877_v11 }
 0xd37   : > { %v28751_v15 = vpop.f32.mrf.mxu0  ;;  %v32828_v13 = vsub.f32 %v25878_v53, %v32813_v14 }
 0xd38   : > { %v20295_v6 = vadd.f32 %v20294_v16, %v20222_v26  ;;  %v28774_v31 = vpop.f32.mrf.mxu1 }
 0xd39   : > { %v28763_v47 = vpop.f32.mrf.mxu0  ;;  %v32844_v10 = vand.u32 4294901760, %v32828_v13 }
 0xd3a   : > { %v32801_v30 = vand.u32 4294901760, %v20295_v6  ;;  %v20499_v56 = vadd.f32 %v28771_v27, %v28763_v47  ;;  %v20504_v42 = vpop.f32.mrf.mxu1 }
 0xd3b   : > { %v20386_v4 = vpop.f32.mrf.mxu0 }
 0xd3c   : > { %v21047_v62 = vsub.f32 %v20295_v6, %v32801_v30  ;;  %28807 = vmatprep.subr.mxu0 %v32801_v30  ;;  %v20493_v43 = vadd.f32 %v20492_v9, %v20386_v4  ;;  %v28787_v39 = vpop.f32.mrf.mxu1 }
 0xd3d   : > { %v28766_v35 = vpop.f32.mrf.mxu0  ;;  %28808 = vmatpush3.msra.mxu0 %v32801_v30 }
 0xd3e   : > { %28810 = vmatmul.mubr.f32.vlgmr.msra.gmra.mxu0 %v20989_v55  ;;  %28823 = vmatprep.subr.mxu0 %v21047_v62  ;;  %v20511_v44 = vadd.f32 %v28774_v31, %v28766_v35  ;;  %v21048_v18 = vand.u32 4294901760, %v21047_v62  ;;  %v20679_v5 = vpop.f32.mrf.mxu1 }
 0xd3f   : > { %v20406_v0 = vpop.f32.mrf.mxu0  ;;  %28824 = vmatpush3.msra.mxu0 %v21047_v62  ;;  %28812 = vmatprep.mubr.f32.mxu0 %v20999_v2 }
 0xd40   : > { %28839 = vmatprep.subr.mxu0 %v21048_v18  ;;  %v20505_v51 = vadd.f32 %v20504_v42, %v20406_v0  ;;  %v21049_v19 = vsub.f32 %v21047_v62, %v21048_v18  ;;  %v28790_v12 = vpop.f32.mrf.mxu1 }
 0xd41   : > { %v28779_v52 = vpop.f32.mrf.mxu0 }
 0xd42   : > { %v20592_v54 = vadd.f32 %v28779_v52, %v20499_v56  ;;  %28813 = vmatmul.mubr.f32.gmra.mxu0 %v21009_v48  ;;  %v21050_v50 = vand.u32 4294901760, %v21049_v19  ;;  %v20695_v3 = vpop.f32.mrf.mxu1  ;;  %v32841_v56 = vsub.f32 %v25877_v11, %v32823_v41 }
 0xd43   : > { %v20584_v32 = vpop.f32.mrf.mxu0  ;;  %28825 = vmatprep.mubr.f32.mxu0 %v32758_v29 }
 0xd44   : > { %v20585_v38 = vadd.f32 %v20584_v32, %v20493_v43  ;;  %v20688_v37 = vadd.f32 %v28787_v39, %v20592_v54  ;;  %28815 = vmatprep.subr.mxu1 %v21050_v50  ;;  %v28803_v17 = vpop.f32.mrf.mxu1 }
 0xd45   : > { %v28782_v16 = vpop.f32.mrf.mxu0  ;;  %28816 = vmatpush3.msra.mxu1 %v21050_v50 }
 0xd46   : > { %v20606_v21 = vadd.f32 %v28782_v16, %v20511_v44  ;;  %v20680_v58 = vadd.f32 %v20679_v5, %v20585_v38  ;;  %28818 = vmatmul.mubr.f32.vlgmr.msra.gmra.mxu1 %v32776_v23  ;;  %28826 = vmatmul.mubr.f32.vlgmr.msra.gmra.mxu0 %v32782_v33  ;;  %v20867_v9 = vpop.f32.mrf.mxu1  ;;  %v21599_v33 = vsub.f32 %v32828_v13, %v32844_v10 }
 0xd47   : > { %28831 = vmatprep.subr.mxu1 %v32801_v30  ;;  %28840 = vmatpush3.msra.mxu0 %v21048_v18  ;;  %v20598_v25 = vpop.f32.mrf.mxu0 }
 0xd48   : > { %v20599_v7 = vadd.f32 %v20598_v25, %v20505_v51  ;;  %v20704_v27 = vadd.f32 %v28790_v12, %v20606_v21  ;;  %28832 = vmatpush3.msra.mxu1 %v32801_v30  ;;  %28820 = vmatprep.mubr.f32.mxu1 %v32778_v61  ;;  %v28806_v42 = vpop.f32.mrf.mxu1 }
 0xd49   : > { %28847 = vmatprep.subr.mxu1 %v32801_v30  ;;  %v28795_v26 = vpop.f32.mrf.mxu0  ;;  %28828 = vmatprep.mubr.f32.mxu0 %v32787_v8 }
 0xd4a   : > { %v32830_v15 = vadd.f32 %v20695_v3, %v20599_v7  ;;  %v20784_v40 = vadd.f32 %v28795_v26, %v20688_v37  ;;  %28821 = vmatmul.mubr.f32.gmra.mxu1 %v32784_v57  ;;  %28829 = vmatmul.mubr.f32.gmra.mxu0 %v32791_v24  ;;  %v33708_v24 = vld [vmem:[#allocation22_spill] sm:$0xff]  ;;  %v20879_v0 = vpop.f32.mrf.mxu1 }
 0xd4b   : > { %v20777_v6 = vpop.f32.mrf.mxu0  ;;  %28833 = vmatprep.mubr.f32.mxu1 %v20977_v20  ;;  %28841 = vmatprep.mubr.f32.mxu0 %v32755_v45  ;;  %v32859_v20 = vand.u32 4294901760, %v32841_v56 }
 0xd4c   : > { %v20778_v31 = vadd.f32 %v20777_v6, %v20680_v58  ;;  %v32837_v47 = vadd.f32 %v28803_v17, %v20784_v40  ;;  %28855 = vmatprep.subr.mxu0 %v33701_v36 }
 0xd4d   : > { %v28798_v55 = vpop.f32.mrf.mxu0  ;;  %v21606_v8 = vsub.f32 %v32841_v56, %v32859_v20 }
 0xd4e   : > { %v20796_v4 = vadd.f32 %v28798_v55, %v20704_v27  ;;  %v32846_v2 = vadd.f32 %v20867_v9, %v20778_v31  ;;  %28834 = vmatmul.mubr.f32.vlgmr.msra.gmra.mxu1 %v20987_v28  ;;  %28842 = vmatmul.mubr.f32.vlgmr.msra.gmra.mxu0 %v32776_v23  ;;  %v21600_v28 = vand.u32 4294901760, %v21599_v33 }
 0xd4f   : > { %28848 = vmatpush3.msra.mxu1 %v32801_v30  ;;  %28836 = vmatprep.mubr.f32.mxu1 %v20997_v60  ;;  %v33707_v60 = vld [vmem:[#allocation23_spill] sm:$0xff]  ;;  %v20789_v44 = vpop.f32.mrf.mxu0 }
 0xd50   : > { %v32854_v29 = vadd.f32 %v28806_v42, %v20796_v4  ;;  %28844 = vmatprep.mubr.f32.mxu0 %v32778_v61  ;;  %28856 = vmatpush3.msra.mxu0 %v32813_v14 }
 0xd51   : > { %28857 = vmatprep.subr.mxu0 %v33701_v36  ;;  %28862 = vmatprep.subr.mxu1 %v33701_v36 }
 0xd52   : > { %28837 = vmatmul.mubr.f32.gmra.mxu1 %v21007_v22  ;;  %28845 = vmatmul.mubr.f32.gmra.mxu0 %v32784_v57 }
 0xd53   : > { %28849 = vmatprep.mubr.f32.mxu1 %v32755_v45  ;;  %28858 = vmatpush3.msra.mxu0 %v32823_v41  ;;  %v21607_v45 = vand.u32 4294901760, %v21606_v8 }
 0xd54   : > { %28859 = vmatprep.mubr.msk.f32.mxu0 %vm29303_vm2, %v33701_v36  ;;  %28869 = vmatprep.subr.mxu0 %v33701_v36 }
 0xd56   : > { %28850 = vmatmul.mubr.f32.vlgmr.msra.gmra.mxu1 %v32776_v23  ;;  %28860 = vmatmul.mubr.f32.vlgmr.msra.gmra.mxu0 %v33707_v60  ;;  %v33709_v23 = vld [vmem:[#allocation27_spill] sm:$0xff] }
 0xd57   : > { %28870 = vmatpush3.msra.mxu0 %v32828_v13  ;;  %28852 = vmatprep.mubr.f32.mxu1 %v32778_v61  ;;  %v33710_v61 = vld [vmem:[#allocation29_spill] sm:$0xff] }
 0xd58   : > { %28871 = vmatprep.subr.mxu0 %v33701_v36  ;;  %28873 = vmatprep.mubr.msk.f32.mxu0 %vm29303_vm2, %v33701_v36 }
 0xd59   : > { %28872 = vmatpush3.msra.mxu0 %v32841_v56  ;;  %28863 = vmatpush3.msra.mxu1 %v21600_v28 }
 0xd5a   : > { %28853 = vmatmul.mubr.f32.gmra.mxu1 %v32784_v57  ;;  %28874 = vmatmul.mubr.f32.vlgmr.msra.gmra.mxu0 %v33708_v24  ;;  %v25879_v57 = vld [vmem:[%s33396_s2 + $0x20] sm:$0xff] }
 0xd5b   : > { %28883 = vmatprep.subr.mxu0 %v33701_v36  ;;  %28864 = vmatprep.subr.mxu1 %v33701_v36  ;;  %v22413_v22 = vsel %vm1192_vm3, %v25879_v57, 0 }
 0xd5c   : > { %28884 = vmatpush3.msra.mxu0 %v32844_v10  ;;  %28865 = vmatpush3.msra.mxu1 %v21607_v45  ;;  %v32954_v30 = vand.u32 4294901760, %v22413_v22 }
 0xd5d   : > { %28885 = vmatprep.subr.mxu0 %v33701_v36  ;;  %28866 = vmatprep.mubr.msk.f32.mxu1 %vm29303_vm2, %v33701_v36 }
 0xd5e   : > { %28886 = vmatpush3.msra.mxu0 %v32859_v20  ;;  %28887 = vmatprep.mubr.msk.f32.mxu0 %vm29303_vm2, %v33701_v36  ;;  %v32957_v62 = vsub.f32 %v22413_v22, %v32954_v30 }
 0xd5f   : > { %28867 = vmatmul.mubr.f32.vlgmr.msra.gmra.mxu1 %v33709_v23  ;;  %28876 = vmatprep.subr.mxu1 %v33701_v36 }
 0xd60   : > { %28888 = vmatmul.mubr.f32.vlgmr.msra.gmra.mxu0 %v33709_v23  ;;  %28897 = vmatprep.subr.mxu0 %v33701_v36  ;;  %v22492_v43 = vand.u32 4294901760, %v32957_v62 }
 0xd61   : > { %28877 = vmatpush3.msra.mxu1 %v32813_v14  ;;  %28898 = vmatpush3.msra.mxu0 %v32813_v14 }
 0xd62   : > { %28878 = vmatprep.subr.mxu1 %v33701_v36  ;;  %28899 = vmatprep.subr.mxu0 %v33701_v36  ;;  %v22493_v39 = vsub.f32 %v32957_v62, %v22492_v43 }
 0xd63   : > { %28879 = vmatpush3.msra.mxu1 %v32823_v41  ;;  %28880 = vmatprep.mubr.msk.f32.mxu1 %vm29303_vm2, %v33701_v36 }
 0xd64   : > { %28900 = vmatpush3.msra.mxu0 %v32823_v41  ;;  %28901 = vmatprep.mubr.msk.f32.mxu0 %vm29303_vm2, %v33701_v36  ;;  %v22494_v35 = vand.u32 4294901760, %v22493_v39 }
 0xd65   : > { %28881 = vmatmul.mubr.f32.vlgmr.msra.gmra.mxu1 %v33710_v61  ;;  %28890 = vmatprep.subr.mxu1 %v33701_v36 }
 0xd66   : > { %28902 = vmatmul.mubr.f32.vlgmr.msra.gmra.mxu0 %v32708_v49  ;;  %28911 = vmatprep.subr.mxu0 %v33701_v36 }
 0xd67   : > { %28891 = vmatpush3.msra.mxu1 %v32813_v14  ;;  %28912 = vmatpush3.msra.mxu0 %v32828_v13 }
 0xd68   : > { %28892 = vmatprep.subr.mxu1 %v33701_v36  ;;  %28913 = vmatprep.subr.mxu0 %v33701_v36 }
 0xd69   : > { %28893 = vmatpush3.msra.mxu1 %v32823_v41  ;;  %28894 = vmatprep.mubr.msk.f32.mxu1 %vm29303_vm2, %v33701_v36 }
 0xd6a   : > { %28914 = vmatpush3.msra.mxu0 %v32841_v56  ;;  %28915 = vmatprep.mubr.msk.f32.mxu0 %vm29303_vm2, %v33701_v36 }
 0xd6b   : > { %28895 = vmatmul.mubr.f32.vlgmr.msra.gmra.mxu1 %v33709_v23  ;;  %28904 = vmatprep.subr.mxu1 %v33701_v36 }
 0xd6c   : > { %28916 = vmatmul.mubr.f32.vlgmr.msra.gmra.mxu0 %v32675_v63  ;;  %28925 = vmatprep.subr.mxu0 %v33701_v36 }
 0xd6d   : > { %28905 = vmatpush3.msra.mxu1 %v21600_v28  ;;  %28926 = vmatpush3.msra.mxu0 %v32844_v10  ;;  %v20790_v10 = vadd.f32 %v20789_v44, %v32830_v15  ;;  %v33711_v28 = vld [vmem:[#allocation5_spill] sm:$0xff] }
 0xd6e   : > { %28906 = vmatprep.subr.mxu1 %v33701_v36  ;;  %28927 = vmatprep.subr.mxu0 %v33701_v36 }
 0xd6f   : > { %28907 = vmatpush3.msra.mxu1 %v21607_v45  ;;  %28908 = vmatprep.mubr.msk.f32.mxu1 %vm29303_vm2, %v33701_v36  ;;  %v20890_v45 = vadd.f32 %v32837_v47, %v33711_v28 }
 0xd70   : > { %28928 = vmatpush3.msra.mxu0 %v32859_v20  ;;  %28929 = vmatprep.mubr.msk.f32.mxu0 %vm29303_vm2, %v33701_v36 }
 0xd71   : > { %28909 = vmatmul.mubr.f32.vlgmr.msra.gmra.mxu1 %v32664_v1  ;;  %28918 = vmatprep.subr.mxu1 %v33701_v36 }
 0xd72   : > { %28930 = vmatmul.mubr.f32.vlgmr.msra.gmra.mxu0 %v32664_v1  ;;  %28919 = vmatpush3.msra.mxu1 %v32813_v14 }
 0xd73   : > { %28920 = vmatprep.subr.mxu1 %v33701_v36  ;;  %28922 = vmatprep.mubr.msk.f32.mxu1 %vm29303_vm2, %v33701_v36 }
 0xd74   : > { %28921 = vmatpush3.msra.mxu1 %v32823_v41  ;;  %28941 = vmatprep.mubr.f32.mxu0 %v22494_v35 }
 0xd75   : > { %28923 = vmatmul.mubr.f32.vlgmr.msra.gmra.mxu1 %v32690_v34  ;;  %28932 = vmatprep.subr.mxu1 %v33701_v36 }
 0xd76   : > { %28933 = vmatpush3.msra.mxu1 %v32813_v14  ;;  %28936 = vmatprep.mubr.msk.f32.mxu1 %vm29303_vm2, %v33701_v36 }
 0xd77   : > { %28934 = vmatprep.subr.mxu1 %v33701_v36 }
 0xd78   : > { %28935 = vmatpush3.msra.mxu1 %v32823_v41 }
 0xd79   : > { %28937 = vmatmul.mubr.f32.vlgmr.msra.gmra.mxu1 %v32664_v1 }
 0xd7a   : > { %28949 = vmatprep.mubr.f32.mxu1 %v32954_v30 }
 0xdfe   : > { %v28811_v18 = vpop.f32.mrf.mxu0 }
 0xe00   : > { %v20981_v48 = vpop.f32.mrf.mxu0 }
 0xe02   : > { %v28814_v5 = vpop.f32.mrf.mxu0 }
 0xe04   : > { %v21001_v51 = vpop.f32.mrf.mxu0 }
 0xe06   : > { %v28819_v19 = vpop.f32.mrf.mxu1  ;;  %v28827_v12 = vpop.f32.mrf.mxu0 }
 0xe07   : > { %v21094_v52 = vadd.f32 %v28819_v19, %v28811_v18  ;;  %v25880_v18 = vld [vmem:[%s33396_s2 + $0x28] sm:$0xff] }
 0xe08   : > { %v21087_v54 = vpop.f32.mrf.mxu1  ;;  %v21179_v50 = vpop.f32.mrf.mxu0 }
 0xe09   : > { %v21187_v3 = vadd.f32 %v28827_v12, %v21094_v52  ;;  %v21088_v53 = vadd.f32 %v21087_v54, %v20981_v48  ;;  %v20889_v48 = vadd.f32 %v32846_v2, %v33681_v46  ;;  %v33712_v12 = vld [vmem:[#allocation7_spill] sm:$0xff] }
 0xe0a   : > { %v28822_v32 = vpop.f32.mrf.mxu1  ;;  %v28830_v38 = vpop.f32.mrf.mxu0  ;;  %v20892_v52 = vadd.f32 %v32854_v29, %v33712_v12 }
 0xe0b   : > { %v21180_v37 = vadd.f32 %v21179_v50, %v21088_v53  ;;  %v21106_v16 = vadd.f32 %v28822_v32, %v28814_v5  ;;  %v20880_v5 = vadd.f32 %v20879_v0, %v20790_v10  ;;  %v25882_v0 = vld [vmem:[%s33396_s2 + $0x38] sm:$0xff] }
 0xe0c   : > { %v21099_v17 = vpop.f32.mrf.mxu1  ;;  %v21193_v14 = vpop.f32.mrf.mxu0 }
 0xe0d   : > { %v21201_v11 = vadd.f32 %v28830_v38, %v21106_v16  ;;  %v21100_v21 = vadd.f32 %v21099_v17, %v21001_v51  ;;  %v25881_v51 = vld [vmem:[%s33396_s2 + $0x30] sm:$0xff]  ;;  %v20891_v32 = vadd.f32 %v20880_v5, %v33692_v59 }
 0xe0e   : > { %v28835_v58 = vpop.f32.mrf.mxu1  ;;  %v28843_v25 = vpop.f32.mrf.mxu0  ;;  %v22419_v2 = vsel %vm1192_vm3, %v25881_v51, 0 }
 0xe0f   : > { %v21194_v7 = vadd.f32 %v21193_v14, %v21100_v21  ;;  %v21283_v27 = vadd.f32 %v28835_v58, %v21187_v3  ;;  %v22416_v3 = vsel %vm1192_vm3, %v25880_v18, 0  ;;  %v32993_v14 = vand.u32 4294901760, %v22419_v2 }
 0xe10   : > { %v21274_v41 = vpop.f32.mrf.mxu1  ;;  %v21372_v26 = vpop.f32.mrf.mxu0  ;;  %v32989_v16 = vand.u32 4294901760, %v22416_v3 }
 0xe11   : > { %v21379_v9 = vadd.f32 %v28843_v25, %v21283_v27  ;;  %v21275_v13 = vadd.f32 %v21274_v41, %v21180_v37 }
 0xe12   : > { %v28838_v40 = vpop.f32.mrf.mxu1  ;;  %v28846_v6 = vpop.f32.mrf.mxu0  ;;  %v32997_v41 = vsub.f32 %v22416_v3, %v32989_v16 }
 0xe13   : > { %v21373_v31 = vadd.f32 %v21372_v26, %v21275_v13  ;;  %v21299_v56 = vadd.f32 %v28838_v40, %v21201_v11  ;;  %v22422_v11 = vsel %vm1192_vm3, %v25882_v0, 0  ;;  %v33002_v26 = vsub.f32 %v22419_v2, %v32993_v14 }
 0xe14   : > { %v21290_v55 = vpop.f32.mrf.mxu1  ;;  %v21384_v42 = vpop.f32.mrf.mxu0  ;;  %v32999_v59 = vand.u32 4294901760, %v22422_v11 }
 0xe15   : > { %v21391_v4 = vadd.f32 %v28846_v6, %v21299_v56  ;;  %v21291_v20 = vadd.f32 %v21290_v55, %v21194_v7  ;;  %v22502_v6 = vand.u32 4294901760, %v32997_v41  ;;  %v22512_v55 = vand.u32 4294901760, %v33002_v26 }
 0xe16   : > { %v28851_v33 = vpop.f32.mrf.mxu1  ;;  %v21563_v8 = vpop.f32.mrf.mxu0 }
 0xe17   : > { %v21385_v57 = vadd.f32 %v21384_v42, %v21291_v20  ;;  %v21469_v22 = vadd.f32 %v28851_v33, %v21379_v9 }
 0xe18   : > { %v21462_v39 = vpop.f32.mrf.mxu1  ;;  %v28861_v35 = vpop.f32.mrf.mxu0 }
 0xe19   : > { %v32972_v15 = vadd.f32 %v21469_v22, %v20890_v45  ;;  %v21463_v44 = vadd.f32 %v21462_v39, %v21373_v31  ;;  %v33006_v31 = vsub.f32 %v22422_v11, %v32999_v59 }
 0xe1a   : > { %v28854_v47 = vpop.f32.mrf.mxu1  ;;  %v21720_v19 = vpop.f32.mrf.mxu0 }
 0xe1b   : > { %v32979_v54 = vadd.f32 %v21463_v44, %v20889_v48  ;;  %v21481_v50 = vadd.f32 %v28854_v47, %v21391_v4  ;;  %v22503_v4 = vsub.f32 %v32997_v41, %v22502_v6  ;;  %v22522_v20 = vand.u32 4294901760, %v33006_v31  ;;  %v25883_v48 = vld [vmem:[%s33397_s3 + $0x20] sm:$0xff] }
 0xe1c   : > { %v21474_v53 = vpop.f32.mrf.mxu1  ;;  %v28875_v46 = vpop.f32.mrf.mxu0  ;;  %v23008_v47 = vsel %vm1192_vm3, %v25883_v48, 0 }
 0xe1d   : > { %v32987_v38 = vadd.f32 %v21481_v50, %v20892_v52  ;;  %v21475_v37 = vadd.f32 %v21474_v53, %v21385_v57  ;;  %v22504_v35 = vand.u32 4294901760, %v22503_v4  ;;  %v22523_v18 = vsub.f32 %v33006_v31, %v22522_v20 }
 0xe1f   : > { %v32991_v29 = vadd.f32 %v21475_v37, %v20891_v32  ;;  %v21644_v17 = vpop.f32.mrf.mxu1  ;;  %v22524_v3 = vand.u32 4294901760, %v22523_v18  ;;  %v33031_v32 = vand.u32 4294901760, %v23008_v47 }
 0xe20   : > { %v21645_v21 = vadd.f32 %v21644_v17, %v21563_v8  ;;  %v21872_v58 = vpop.f32.mrf.mxu0  ;;  %v22513_v8 = vsub.f32 %v33002_v26, %v22512_v55  ;;  %v25885_v17 = vld [vmem:[%s33397_s3 + $0x30] sm:$0xff] }
 0xe21   : > { %v28868_v25 = vpop.f32.mrf.mxu1 }
 0xe22   : > { %v28889_v7 = vpop.f32.mrf.mxu0  ;;  %v21721_v27 = vadd.f32 %v21720_v19, %v21645_v21  ;;  %v22514_v5 = vand.u32 4294901760, %v22513_v8  ;;  %v25884_v19 = vld [vmem:[%s33397_s3 + $0x28] sm:$0xff]  ;;  %v25886_v21 = vld [vmem:[%s33397_s3 + $0x38] sm:$0xff] }
 0xe23   : > { %v23011_v37 = vsel %vm1192_vm3, %v25884_v19, 0 }
 0xe25   : > { %v21795_v9 = vpop.f32.mrf.mxu1 }
 0xe26   : > { %v21796_v13 = vadd.f32 %v21795_v9, %v21721_v27  ;;  %v22022_v40 = vpop.f32.mrf.mxu0  ;;  %v33041_v27 = vand.u32 4294901760, %v23011_v37  ;;  %v23014_v9 = vsel %vm1192_vm3, %v25885_v17, 0 }
 0xe27   : > { %v28882_v56 = vpop.f32.mrf.mxu1  ;;  %v33050_v4 = vand.u32 4294901760, %v23014_v9 }
 0xe28   : > { %v28903_v42 = vpop.f32.mrf.mxu0  ;;  %v21873_v10 = vadd.f32 %v21872_v58, %v21796_v13  ;;  %v23017_v56 = vsel %vm1192_vm3, %v25886_v21, 0  ;;  %v33054_v8 = vsub.f32 %v23011_v37, %v33041_v27 }
 0xe2a   : > { %v23097_v18 = vand.u32 4294901760, %v33054_v8 }
 0xe2b   : > { %v21945_v33 = vpop.f32.mrf.mxu1 }
 0xe2c   : > { %v21946_v28 = vadd.f32 %v21945_v33, %v21873_v10  ;;  %v22179_v45 = vpop.f32.mrf.mxu0 }
 0xe2d   : > { %v28896_v57 = vpop.f32.mrf.mxu1 }
 0xe2e   : > { %v33016_v22 = vand.u32 4294901760, %v21946_v28  ;;  %v28917_v39 = vpop.f32.mrf.mxu0 }
 0xe30   : > { %v22562_v44 = vsub.f32 %v21946_v28, %v33016_v22  ;;  %28939 = vmatprep.subr.mxu0 %v33016_v22  ;;  %v33056_v28 = vand.u32 4294901760, %v23017_v56 }
 0xe31   : > { %v22103_v51 = vpop.f32.mrf.mxu1  ;;  %28940 = vmatpush3.msra.mxu0 %v33016_v22 }
 0xe32   : > { %v22104_v12 = vadd.f32 %v22103_v51, %v22022_v40  ;;  %v22331_v52 = vpop.f32.mrf.mxu0  ;;  %28942 = vmatmul.mubr.f32.vlgmr.msra.gmra.mxu0 %v22504_v35  ;;  %28955 = vmatprep.subr.mxu0 %v22562_v44  ;;  %v22563_v50 = vand.u32 4294901760, %v22562_v44  ;;  %v33045_v40 = vsub.f32 %v23008_v47, %v33031_v32  ;;  %v33069_v35 = vsub.f32 %v23014_v9, %v33050_v4 }
 0xe33   : > { %v28910_v53 = vpop.f32.mrf.mxu1  ;;  %28956 = vmatpush3.msra.mxu0 %v22562_v44  ;;  %28944 = vmatprep.mubr.f32.mxu0 %v22514_v5  ;;  %v33076_v48 = vsub.f32 %v23017_v56, %v33056_v28 }
 0xe34   : > { %v28931_v46 = vpop.f32.mrf.mxu0  ;;  %v22180_v2 = vadd.f32 %v22179_v45, %v22104_v12  ;;  %28971 = vmatprep.subr.mxu0 %v22563_v50  ;;  %v22564_v0 = vsub.f32 %v22562_v44, %v22563_v50  ;;  %v23087_v57 = vand.u32 4294901760, %v33045_v40  ;;  %v23107_v47 = vand.u32 4294901760, %v33069_v35 }
 0xe35   : > { %v22254_v11 = vpop.f32.mrf.mxu1 }
 0xe36   : > { %v22255_v58 = vadd.f32 %v22254_v11, %v22180_v2  ;;  %28945 = vmatmul.mubr.f32.gmra.mxu0 %v22524_v3  ;;  %v22565_v25 = vand.u32 4294901760, %v22564_v0  ;;  %v23088_v44 = vsub.f32 %v33045_v40, %v23087_v57 }
 0xe37   : > { %v28924_v7 = vpop.f32.mrf.mxu1  ;;  %28957 = vmatprep.mubr.f32.mxu0 %v32957_v62  ;;  %v23098_v62 = vsub.f32 %v33054_v8, %v23097_v18 }
 0xe38   : > { %v22332_v13 = vadd.f32 %v22331_v52, %v22255_v58  ;;  %28947 = vmatprep.subr.mxu1 %v22565_v25  ;;  %v23089_v12 = vand.u32 4294901760, %v23088_v44 }
 0xe39   : > { %v22404_v42 = vpop.f32.mrf.mxu1  ;;  %28948 = vmatpush3.msra.mxu1 %v22565_v25 }
 0xe3a   : > { %v22405_v10 = vadd.f32 %v22404_v42, %v22332_v13  ;;  %28950 = vmatmul.mubr.f32.vlgmr.msra.gmra.mxu1 %v32989_v16  ;;  %28958 = vmatmul.mubr.f32.vlgmr.msra.gmra.mxu0 %v32997_v41  ;;  %v23108_v41 = vsub.f32 %v33069_v35, %v23107_v47 }
 0xe3b   : > { %v28938_v33 = vpop.f32.mrf.mxu1  ;;  %28963 = vmatprep.subr.mxu1 %v33016_v22  ;;  %28972 = vmatpush3.msra.mxu0 %v22563_v50 }
 0xe3c   : > { %v33058_v45 = vand.u32 4294901760, %v22405_v10  ;;  %28964 = vmatpush3.msra.mxu1 %v33016_v22  ;;  %28952 = vmatprep.mubr.f32.mxu1 %v32993_v14 }
 0xe3d   : > { %28979 = vmatprep.subr.mxu1 %v33016_v22  ;;  %28960 = vmatprep.mubr.f32.mxu0 %v33002_v26  ;;  %v23109_v26 = vand.u32 4294901760, %v23108_v41 }
 0xe3e   : > { %v23157_v39 = vsub.f32 %v22405_v10, %v33058_v45  ;;  %28987 = vmatprep.subr.mxu0 %v33058_v45  ;;  %28953 = vmatmul.mubr.f32.gmra.mxu1 %v32999_v59 }
 0xe3f   : > { %28961 = vmatmul.mubr.f32.gmra.mxu0 %v33006_v31  ;;  %28965 = vmatprep.mubr.f32.mxu1 %v22492_v43  ;;  %v23117_v43 = vand.u32 4294901760, %v33076_v48 }
 0xe40   : > { %28973 = vmatprep.mubr.f32.mxu0 %v32954_v30  ;;  %v23158_v5 = vand.u32 4294901760, %v23157_v39 }
 0xe42   : > { %28966 = vmatmul.mubr.f32.vlgmr.msra.gmra.mxu1 %v22502_v6  ;;  %v23159_v51 = vsub.f32 %v23157_v39, %v23158_v5  ;;  %v23099_v6 = vand.u32 4294901760, %v23098_v62 }
 0xe43   : > { %28974 = vmatmul.mubr.f32.vlgmr.msra.gmra.mxu0 %v32989_v16  ;;  %28980 = vmatpush3.msra.mxu1 %v33016_v22  ;;  %v23118_v22 = vsub.f32 %v33076_v48, %v23117_v43 }
 0xe44   : > { %28988 = vmatpush3.msra.mxu0 %v33058_v45  ;;  %v23160_v19 = vand.u32 4294901760, %v23159_v51  ;;  %28968 = vmatprep.mubr.f32.mxu1 %v22512_v55 }
 0xe45   : > { %29003 = vmatprep.subr.mxu0 %v23157_v39  ;;  %28976 = vmatprep.mubr.f32.mxu0 %v32993_v14  ;;  %v23119_v55 = vand.u32 4294901760, %v23118_v22 }
 0xe46   : > { %28995 = vmatprep.subr.mxu1 %v23160_v19  ;;  %28969 = vmatmul.mubr.f32.gmra.mxu1 %v22522_v20 }
 0xe47   : > { %28977 = vmatmul.mubr.f32.gmra.mxu0 %v32999_v59  ;;  %28981 = vmatprep.mubr.f32.mxu1 %v32954_v30  ;;  %v25888_v30 = vld [vmem:[%s33394_s0 + $0x28] sm:$0xff] }
 0xe48   : > { %28989 = vmatprep.mubr.f32.mxu0 %v23089_v12 }
 0xe4a   : > { %28982 = vmatmul.mubr.f32.vlgmr.msra.gmra.mxu1 %v32989_v16  ;;  %v33108_v16 = vand.u32 4294901760, %v25888_v30 }
 0xe4b   : > { %28990 = vmatmul.mubr.f32.vlgmr.msra.gmra.mxu0 %v23099_v6  ;;  %28996 = vmatpush3.msra.mxu1 %v23160_v19 }
 0xe4c   : > { %29004 = vmatpush3.msra.mxu0 %v23157_v39  ;;  %29011 = vmatprep.subr.mxu1 %v33058_v45  ;;  %v23707_v31 = vsub.f32 %v25888_v30, %v33108_v16 }
 0xe4d   : > { %29019 = vmatprep.subr.mxu0 %v23158_v5  ;;  %28984 = vmatprep.mubr.f32.mxu1 %v32993_v14  ;;  %v25887_v14 = vld [vmem:[%s33394_s0 + $0x20] sm:$0xff] }
 0xe4e   : > { %28992 = vmatprep.mubr.f32.mxu0 %v23109_v26  ;;  %28985 = vmatmul.mubr.f32.gmra.mxu1 %v32999_v59  ;;  %v33119_v59 = vand.u32 4294901760, %v25887_v14  ;;  %v33129_v52 = vand.u32 4294901760, %v23707_v31 }
 0xe4f   : > { %28993 = vmatmul.mubr.f32.gmra.mxu0 %v23119_v55  ;;  %28997 = vmatprep.mubr.f32.mxu1 %v33031_v32 }
 0xe50   : > { %29005 = vmatprep.mubr.f32.mxu0 %v33045_v40  ;;  %v23714_v20 = vsub.f32 %v25887_v14, %v33119_v59  ;;  %v23709_v50 = vsub.f32 %v23707_v31, %v33129_v52 }
 0xe52   : > { %28998 = vmatmul.mubr.f32.vlgmr.msra.gmra.mxu1 %v33041_v27  ;;  %v33137_v3 = vand.u32 4294901760, %v23714_v20  ;;  %v23710_v53 = vand.u32 4294901760, %v23709_v50 }
 0xe53   : > { %29006 = vmatmul.mubr.f32.vlgmr.msra.gmra.mxu0 %v33054_v8  ;;  %29012 = vmatpush3.msra.mxu1 %v33058_v45 }
 0xe54   : > { %29020 = vmatpush3.msra.mxu0 %v23158_v5  ;;  %29027 = vmatprep.subr.mxu1 %v33058_v45  ;;  %v23716_v46 = vsub.f32 %v23714_v20, %v33137_v3 }
 0xe55   : > { %29000 = vmatprep.mubr.f32.mxu1 %v33050_v4  ;;  %29008 = vmatprep.mubr.f32.mxu0 %v33069_v35 }
 0xe56   : > { %29001 = vmatmul.mubr.f32.gmra.mxu1 %v33056_v28  ;;  %29035 = vmatprep.subr.mxu0 %v33701_v36  ;;  %v23717_v2 = vand.u32 4294901760, %v23716_v46 }
 0xe57   : > { %29009 = vmatmul.mubr.f32.gmra.mxu0 %v33076_v48  ;;  %29013 = vmatprep.mubr.f32.mxu1 %v23087_v57 }
 0xe58   : > { %29021 = vmatprep.mubr.f32.mxu0 %v33031_v32 }
 0xe5a   : > { %29014 = vmatmul.mubr.f32.vlgmr.msra.gmra.mxu1 %v23097_v18 }
 0xe5b   : > { %29022 = vmatmul.mubr.f32.vlgmr.msra.gmra.mxu0 %v33041_v27  ;;  %29028 = vmatpush3.msra.mxu1 %v33058_v45 }
 0xe5c   : > { %29016 = vmatprep.mubr.f32.mxu1 %v23107_v47  ;;  %29024 = vmatprep.mubr.f32.mxu0 %v33050_v4 }
 0xe5d   : > { %29036 = vmatpush3.msra.mxu0 %v33108_v16  ;;  %29042 = vmatprep.subr.mxu1 %v33701_v36 }
 0xe5e   : > { %29017 = vmatmul.mubr.f32.gmra.mxu1 %v23117_v43  ;;  %29037 = vmatprep.subr.mxu0 %v33701_v36 }
 0xe5f   : > { %29025 = vmatmul.mubr.f32.gmra.mxu0 %v33056_v28  ;;  %29029 = vmatprep.mubr.f32.mxu1 %v33031_v32 }
 0xe60   : > { %29038 = vmatpush3.msra.mxu0 %v33119_v59  ;;  %29039 = vmatprep.mubr.msk.f32.mxu0 %vm29303_vm2, %v33701_v36 }
 0xe61   : > { %29049 = vmatprep.subr.mxu0 %v33701_v36 }
 0xe62   : > { %29030 = vmatmul.mubr.f32.vlgmr.msra.gmra.mxu1 %v33041_v27 }
 0xe63   : > { %29040 = vmatmul.mubr.f32.vlgmr.msra.gmra.mxu0 %v33707_v60  ;;  %29032 = vmatprep.mubr.f32.mxu1 %v33050_v4 }
 0xe64   : > { %29050 = vmatpush3.msra.mxu0 %v23707_v31  ;;  %29053 = vmatprep.mubr.msk.f32.mxu0 %vm29303_vm2, %v33701_v36 }
 0xe65   : > { %29051 = vmatprep.subr.mxu0 %v33701_v36  ;;  %29043 = vmatpush3.msra.mxu1 %v23710_v53 }
 0xe66   : > { %29052 = vmatpush3.msra.mxu0 %v23714_v20  ;;  %29033 = vmatmul.mubr.f32.gmra.mxu1 %v33056_v28 }
 0xe67   : > { %29054 = vmatmul.mubr.f32.vlgmr.msra.gmra.mxu0 %v33708_v24  ;;  %29063 = vmatprep.subr.mxu0 %v33701_v36 }
 0xe68   : > { %29064 = vmatpush3.msra.mxu0 %v33129_v52  ;;  %29044 = vmatprep.subr.mxu1 %v33701_v36 }
 0xe69   : > { %29065 = vmatprep.subr.mxu0 %v33701_v36  ;;  %29045 = vmatpush3.msra.mxu1 %v23717_v2 }
 0xe6a   : > { %29046 = vmatprep.mubr.msk.f32.mxu1 %vm29303_vm2, %v33701_v36  ;;  %29066 = vmatpush3.msra.mxu0 %v33137_v3 }
 0xe6b   : > { %29067 = vmatprep.mubr.msk.f32.mxu0 %vm29303_vm2, %v33701_v36  ;;  %29047 = vmatmul.mubr.f32.vlgmr.msra.gmra.mxu1 %v33709_v23 }
 0xe6c   : > { %29056 = vmatprep.subr.mxu1 %v33701_v36  ;;  %29068 = vmatmul.mubr.f32.vlgmr.msra.gmra.mxu0 %v33709_v23 }
 0xe6d   : > { %29077 = vmatprep.subr.mxu0 %v33701_v36  ;;  %29057 = vmatpush3.msra.mxu1 %v33108_v16 }
 0xe6e   : > { %29078 = vmatpush3.msra.mxu0 %v33108_v16  ;;  %29058 = vmatprep.subr.mxu1 %v33701_v36 }
 0xe6f   : > { %29079 = vmatprep.subr.mxu0 %v33701_v36  ;;  %29059 = vmatpush3.msra.mxu1 %v33119_v59 }
 0xe70   : > { %29060 = vmatprep.mubr.msk.f32.mxu1 %vm29303_vm2, %v33701_v36  ;;  %29080 = vmatpush3.msra.mxu0 %v33119_v59 }
 0xe71   : > { %29081 = vmatprep.mubr.msk.f32.mxu0 %vm29303_vm2, %v33701_v36  ;;  %29061 = vmatmul.mubr.f32.vlgmr.msra.gmra.mxu1 %v33710_v61 }
 0xe72   : > { %29070 = vmatprep.subr.mxu1 %v33701_v36  ;;  %29082 = vmatmul.mubr.f32.vlgmr.msra.gmra.mxu0 %v32708_v49 }
 0xe73   : > { %29091 = vmatprep.subr.mxu0 %v33701_v36  ;;  %29071 = vmatpush3.msra.mxu1 %v33108_v16 }
 0xe74   : > { %29092 = vmatpush3.msra.mxu0 %v23707_v31  ;;  %29072 = vmatprep.subr.mxu1 %v33701_v36 }
 0xe75   : > { %29093 = vmatprep.subr.mxu0 %v33701_v36  ;;  %29073 = vmatpush3.msra.mxu1 %v33119_v59 }
 0xe76   : > { %29074 = vmatprep.mubr.msk.f32.mxu1 %vm29303_vm2, %v33701_v36  ;;  %29094 = vmatpush3.msra.mxu0 %v23714_v20 }
 0xe77   : > { %29095 = vmatprep.mubr.msk.f32.mxu0 %vm29303_vm2, %v33701_v36  ;;  %29075 = vmatmul.mubr.f32.vlgmr.msra.gmra.mxu1 %v33709_v23 }
 0xe78   : > { %29084 = vmatprep.subr.mxu1 %v33701_v36  ;;  %29096 = vmatmul.mubr.f32.vlgmr.msra.gmra.mxu0 %v32675_v63  ;;  %v25889_v63 = vld [vmem:[%s33396_s2 + $0x40] sm:$0xff] }
 0xe79   : > { %29105 = vmatprep.subr.mxu0 %v33701_v36  ;;  %29085 = vmatpush3.msra.mxu1 %v23710_v53  ;;  %v24523_v49 = vsel %vm1192_vm3, %v25889_v63, 0 }
 0xe7a   : > { %29106 = vmatpush3.msra.mxu0 %v33129_v52  ;;  %29086 = vmatprep.subr.mxu1 %v33701_v36 }
 0xe7b   : > { %29107 = vmatprep.subr.mxu0 %v33701_v36  ;;  %29087 = vmatpush3.msra.mxu1 %v23717_v2 }
 0xe7c   : > { %29088 = vmatprep.mubr.msk.f32.mxu1 %vm29303_vm2, %v33701_v36  ;;  %29108 = vmatpush3.msra.mxu0 %v33137_v3 }
 0xe7d   : > { %29109 = vmatprep.mubr.msk.f32.mxu0 %vm29303_vm2, %v33701_v36  ;;  %29089 = vmatmul.mubr.f32.vlgmr.msra.gmra.mxu1 %v32664_v1 }
 0xe7e   : > { %29098 = vmatprep.subr.mxu1 %v33701_v36  ;;  %29110 = vmatmul.mubr.f32.vlgmr.msra.gmra.mxu0 %v32664_v1 }
 0xe7f   : > { %29099 = vmatpush3.msra.mxu1 %v33108_v16  ;;  %29102 = vmatprep.mubr.msk.f32.mxu1 %vm29303_vm2, %v33701_v36 }
 0xe80   : > { %29100 = vmatprep.subr.mxu1 %v33701_v36 }
 0xe81   : > { %29101 = vmatpush3.msra.mxu1 %v33119_v59 }
 0xe82   : > { %29103 = vmatmul.mubr.f32.vlgmr.msra.gmra.mxu1 %v32690_v34  ;;  %29112 = vmatprep.subr.mxu1 %v33701_v36  ;;  %v33222_v34 = vand.u32 4294901760, %v24523_v49 }
 0xe83   : > { %29113 = vmatpush3.msra.mxu1 %v33108_v16  ;;  %29116 = vmatprep.mubr.msk.f32.mxu1 %vm29303_vm2, %v33701_v36 }
 0xe84   : > { %29114 = vmatprep.subr.mxu1 %v33701_v36  ;;  %v33225_v60 = vsub.f32 %v24523_v49, %v33222_v34 }
 0xe85   : > { %29115 = vmatpush3.msra.mxu1 %v33119_v59 }
 0xe86   : > { %29117 = vmatmul.mubr.f32.vlgmr.msra.gmra.mxu1 %v32664_v1  ;;  %v24602_v24 = vand.u32 4294901760, %v33225_v60 }
 0xe87   : > { %29129 = vmatprep.mubr.f32.mxu1 %v33222_v34 }
 0xe88   : > { %v24603_v36 = vsub.f32 %v33225_v60, %v24602_v24 }
 0xe8a   : > { %v24604_v1 = vand.u32 4294901760, %v24603_v36 }
 0xe8c   : > { %29121 = vmatprep.mubr.f32.mxu0 %v24604_v1 }
 0xef2   : > { %v28943_v23 = vpop.f32.mrf.mxu0 }
 0xef4   : > { %v22496_v61 = vpop.f32.mrf.mxu0 }
 0xef6   : > { %v28946_v0 = vpop.f32.mrf.mxu0 }
 0xef8   : > { %v22516_v32 = vpop.f32.mrf.mxu0 }
 0xefa   : > { %v28951_v37 = vpop.f32.mrf.mxu1  ;;  %v28959_v17 = vpop.f32.mrf.mxu0 }
 0xefb   : > { %v22609_v11 = vadd.f32 %v28951_v37, %v28943_v23 }
 0xefc   : > { %v22602_v21 = vpop.f32.mrf.mxu1  ;;  %v22694_v58 = vpop.f32.mrf.mxu0 }
 0xefd   : > { %v22702_v25 = vadd.f32 %v28959_v17, %v22609_v11  ;;  %v22603_v7 = vadd.f32 %v22602_v21, %v22496_v61 }
 0xefe   : > { %v28954_v27 = vpop.f32.mrf.mxu1 }
 0xeff   : > { %v22695_v9 = vadd.f32 %v22694_v58, %v22603_v7  ;;  %v22621_v13 = vadd.f32 %v28954_v27, %v28946_v0  ;;  %v28962_v40 = vpop.f32.mrf.mxu0 }
 0xf00   : > { %v22614_v56 = vpop.f32.mrf.mxu1 }
 0xf01   : > { %v22716_v42 = vadd.f32 %v28962_v40, %v22621_v13  ;;  %v22615_v10 = vadd.f32 %v22614_v56, %v22516_v32  ;;  %v22708_v4 = vpop.f32.mrf.mxu0 }
 0xf02   : > { %v28967_v33 = vpop.f32.mrf.mxu1 }
 0xf03   : > { %v22709_v8 = vadd.f32 %v22708_v4, %v22615_v10  ;;  %v22798_v28 = vadd.f32 %v28967_v33, %v22702_v25  ;;  %v28975_v45 = vpop.f32.mrf.mxu0 }
 0xf04   : > { %v22789_v57 = vpop.f32.mrf.mxu1 }
 0xf05   : > { %v22894_v39 = vadd.f32 %v28975_v45, %v22798_v28  ;;  %v22790_v35 = vadd.f32 %v22789_v57, %v22695_v9  ;;  %v22887_v18 = vpop.f32.mrf.mxu0 }
 0xf06   : > { %v28970_v48 = vpop.f32.mrf.mxu1 }
 0xf07   : > { %v22888_v5 = vadd.f32 %v22887_v18, %v22790_v35  ;;  %v22814_v44 = vadd.f32 %v28970_v48, %v22716_v42  ;;  %v28978_v51 = vpop.f32.mrf.mxu0  ;;  %v25890_v48 = vld [vmem:[%s33396_s2 + $0x48] sm:$0xff] }
 0xf08   : > { %v22805_v47 = vpop.f32.mrf.mxu1 }
 0xf09   : > { %v22906_v62 = vadd.f32 %v28978_v51, %v22814_v44  ;;  %v22806_v43 = vadd.f32 %v22805_v47, %v22709_v8  ;;  %v22899_v19 = vpop.f32.mrf.mxu0  ;;  %v25891_v47 = vld [vmem:[%s33396_s2 + $0x50] sm:$0xff] }
 0xf0a   : > { %v28983_v12 = vpop.f32.mrf.mxu1 }
 0xf0b   : > { %v22900_v41 = vadd.f32 %v22899_v19, %v22806_v43  ;;  %v22984_v6 = vadd.f32 %v28983_v12, %v22894_v39  ;;  %v28991_v22 = vpop.f32.mrf.mxu0 }
 0xf0c   : > { %v22977_v26 = vpop.f32.mrf.mxu1 }
 0xf0d   : > { %v23000_v55 = vadd.f32 %v22984_v6, %v32972_v15  ;;  %v22978_v30 = vadd.f32 %v22977_v26, %v22888_v5  ;;  %v23091_v16 = vpop.f32.mrf.mxu0  ;;  %v25892_v26 = vld [vmem:[%s33396_s2 + $0x58] sm:$0xff] }
 0xf0e   : > { %v28986_v14 = vpop.f32.mrf.mxu1 }
 0xf0f   : > { %v22999_v59 = vadd.f32 %v22978_v30, %v32979_v54  ;;  %v22996_v31 = vadd.f32 %v28986_v14, %v22906_v62  ;;  %v28994_v20 = vpop.f32.mrf.mxu0 }
 0xf10   : > { %v22989_v52 = vpop.f32.mrf.mxu1 }
 0xf11   : > { %v23002_v50 = vadd.f32 %v22996_v31, %v32987_v38  ;;  %v22990_v3 = vadd.f32 %v22989_v52, %v22900_v41  ;;  %v23111_v53 = vpop.f32.mrf.mxu0  ;;  %v24526_v41 = vsel %vm1192_vm3, %v25890_v48, 0  ;;  %v24532_v52 = vsel %vm1192_vm3, %v25892_v26, 0  ;;  %v25895_v48 = vld [vmem:[%s33397_s3 + $0x50] sm:$0xff] }
 0xf12   : > { %v28999_v46 = vpop.f32.mrf.mxu1  ;;  %v33253_v14 = vand.u32 4294901760, %v24526_v41 }
 0xf13   : > { %v23001_v2 = vadd.f32 %v22990_v3, %v32991_v29  ;;  %v23204_v63 = vadd.f32 %v28999_v46, %v28991_v22  ;;  %v29007_v49 = vpop.f32.mrf.mxu0  ;;  %v24529_v22 = vsel %vm1192_vm3, %v25891_v47, 0 }
 0xf14   : > { %v23197_v36 = vpop.f32.mrf.mxu1 }
 0xf15   : > { %v23297_v1 = vadd.f32 %v29007_v49, %v23204_v63  ;;  %v23198_v15 = vadd.f32 %v23197_v36, %v23091_v16  ;;  %v23289_v23 = vpop.f32.mrf.mxu0  ;;  %v33261_v36 = vsub.f32 %v24526_v41, %v33253_v14 }
 0xf16   : > { %v29002_v61 = vpop.f32.mrf.mxu1 }
 0xf17   : > { %v23290_v0 = vadd.f32 %v23289_v23, %v23198_v15  ;;  %v23216_v32 = vadd.f32 %v29002_v61, %v28994_v20  ;;  %v29010_v54 = vpop.f32.mrf.mxu0  ;;  %v33257_v20 = vand.u32 4294901760, %v24529_v22  ;;  %v24612_v61 = vand.u32 4294901760, %v33261_v36 }
 0xf18   : > { %v23209_v37 = vpop.f32.mrf.mxu1 }
 0xf19   : > { %v23311_v17 = vadd.f32 %v29010_v54, %v23216_v32  ;;  %v23210_v11 = vadd.f32 %v23209_v37, %v23111_v53  ;;  %v23303_v21 = vpop.f32.mrf.mxu0 }
 0xf1a   : > { %v29015_v38 = vpop.f32.mrf.mxu1 }
 0xf1b   : > { %v23304_v58 = vadd.f32 %v23303_v21, %v23210_v11  ;;  %v23393_v25 = vadd.f32 %v29015_v38, %v23297_v1  ;;  %v29023_v7 = vpop.f32.mrf.mxu0  ;;  %v33266_v1 = vsub.f32 %v24529_v22, %v33257_v20  ;;  %v24613_v11 = vsub.f32 %v33261_v36, %v24612_v61 }
 0xf1c   : > { %v23384_v27 = vpop.f32.mrf.mxu1  ;;  %v25124_v22 = vsel %vm1192_vm3, %v25895_v48, 0 }
 0xf1d   : > { %v23489_v29 = vadd.f32 %v29023_v7, %v23393_v25  ;;  %v23385_v9 = vadd.f32 %v23384_v27, %v23290_v0  ;;  %v23482_v13 = vpop.f32.mrf.mxu0  ;;  %v24622_v54 = vand.u32 4294901760, %v33266_v1 }
 0xf1e   : > { %v29018_v40 = vpop.f32.mrf.mxu1 }
 0xf1f   : > { %v23483_v56 = vadd.f32 %v23482_v13, %v23385_v9  ;;  %v23409_v42 = vadd.f32 %v29018_v40, %v23311_v17  ;;  %v29026_v10 = vpop.f32.mrf.mxu0  ;;  %v24614_v13 = vand.u32 4294901760, %v24613_v11 }
 0xf20   : > { %v23400_v4 = vpop.f32.mrf.mxu1 }
 0xf21   : > { %v23501_v33 = vadd.f32 %v29026_v10, %v23409_v42  ;;  %v23401_v8 = vadd.f32 %v23400_v4, %v23304_v58  ;;  %v23494_v28 = vpop.f32.mrf.mxu0  ;;  %v24623_v58 = vsub.f32 %v33266_v1, %v24622_v54  ;;  %v25894_v4 = vld [vmem:[%s33397_s3 + $0x48] sm:$0xff] }
 0xf22   : > { %v29031_v45 = vpop.f32.mrf.mxu1 }
 0xf23   : > { %v23495_v57 = vadd.f32 %v23494_v28, %v23401_v8  ;;  %v23579_v39 = vadd.f32 %v29031_v45, %v23489_v29  ;;  %v23673_v35 = vpop.f32.mrf.mxu0  ;;  %v24624_v42 = vand.u32 4294901760, %v24623_v58 }
 0xf24   : > { %v23572_v18 = vpop.f32.mrf.mxu1 }
 0xf25   : > { %v33239_v5 = vadd.f32 %v23579_v39, %v23000_v55  ;;  %v23573_v44 = vadd.f32 %v23572_v18, %v23483_v56  ;;  %v29041_v51 = vpop.f32.mrf.mxu0  ;;  %v25893_v56 = vld [vmem:[%s33397_s3 + $0x40] sm:$0xff]  ;;  %v25121_v18 = vsel %vm1192_vm3, %v25894_v4, 0 }
 0xf26   : > { %v29034_v62 = vpop.f32.mrf.mxu1  ;;  %v25118_v8 = vsel %vm1192_vm3, %v25893_v56, 0 }
 0xf27   : > { %v33244_v43 = vadd.f32 %v23573_v44, %v22999_v59  ;;  %v23591_v19 = vadd.f32 %v29034_v62, %v23501_v33  ;;  %v23830_v12 = vpop.f32.mrf.mxu0  ;;  %v33299_v62 = vand.u32 4294901760, %v25118_v8 }
 0xf28   : > { %v23584_v6 = vpop.f32.mrf.mxu1 }
 0xf29   : > { %v33251_v55 = vadd.f32 %v23591_v19, %v23002_v50  ;;  %v23585_v30 = vadd.f32 %v23584_v6, %v23495_v57  ;;  %v29055_v16 = vpop.f32.mrf.mxu0  ;;  %v33263_v50 = vand.u32 4294901760, %v24532_v52  ;;  %v25896_v19 = vld [vmem:[%s33397_s3 + $0x58] sm:$0xff]  ;;  %v33304_v6 = vand.u32 4294901760, %v25121_v18 }
 0xf2b   : > { %v33255_v31 = vadd.f32 %v23585_v30, %v23001_v2  ;;  %v23754_v59 = vpop.f32.mrf.mxu1  ;;  %v33270_v0 = vsub.f32 %v24532_v52, %v33263_v50  ;;  %v25127_v30 = vsel %vm1192_vm3, %v25896_v19, 0 }
 0xf2c   : > { %v23755_v3 = vadd.f32 %v23754_v59, %v23673_v35  ;;  %v23982_v53 = vpop.f32.mrf.mxu0  ;;  %v33310_v59 = vsub.f32 %v25118_v8, %v33299_v62 }
 0xf2d   : > { %v29048_v46 = vpop.f32.mrf.mxu1  ;;  %v24632_v21 = vand.u32 4294901760, %v33270_v0 }
 0xf2e   : > { %v29069_v63 = vpop.f32.mrf.mxu0  ;;  %v23831_v49 = vadd.f32 %v23830_v12, %v23755_v3  ;;  %v33312_v3 = vand.u32 4294901760, %v25124_v22  ;;  %v33317_v46 = vsub.f32 %v25121_v18, %v33304_v6 }
 0xf2f   : > { %v24633_v40 = vsub.f32 %v33270_v0, %v24632_v21  ;;  %v33319_v63 = vand.u32 4294901760, %v25127_v30 }
 0xf31   : > { %v23905_v2 = vpop.f32.mrf.mxu1  ;;  %v24634_v39 = vand.u32 4294901760, %v24633_v40 }
 0xf32   : > { %v23906_v15 = vadd.f32 %v23905_v2, %v23831_v49  ;;  %v24132_v23 = vpop.f32.mrf.mxu0 }
 0xf33   : > { %v29062_v32 = vpop.f32.mrf.mxu1 }
 0xf34   : > { %v29083_v37 = vpop.f32.mrf.mxu0  ;;  %v23983_v17 = vadd.f32 %v23982_v53, %v23906_v15  ;;  %v25197_v15 = vand.u32 4294901760, %v33310_v59  ;;  %v25216_v32 = vsub.f32 %v25124_v22, %v33312_v3 }
 0xf35   : > { %v25207_v37 = vand.u32 4294901760, %v33317_v46 }
 0xf37   : > { %v24055_v38 = vpop.f32.mrf.mxu1 }
 0xf38   : > { %v24056_v25 = vadd.f32 %v24055_v38, %v23983_v17  ;;  %v24289_v7 = vpop.f32.mrf.mxu0  ;;  %v25226_v17 = vsub.f32 %v25127_v30, %v33319_v63  ;;  %v25198_v38 = vsub.f32 %v33310_v59, %v25197_v15 }
 0xf39   : > { %v29076_v27 = vpop.f32.mrf.mxu1 }
 0xf3a   : > { %v33280_v29 = vand.u32 4294901760, %v24056_v25  ;;  %v29097_v9 = vpop.f32.mrf.mxu0  ;;  %v25227_v27 = vand.u32 4294901760, %v25226_v17 }
 0xf3c   : > { %v24672_v10 = vsub.f32 %v24056_v25, %v33280_v29  ;;  %29119 = vmatprep.subr.mxu0 %v33280_v29  ;;  %v25217_v25 = vand.u32 4294901760, %v25216_v32 }
 0xf3d   : > { %v24213_v33 = vpop.f32.mrf.mxu1  ;;  %29120 = vmatpush3.msra.mxu0 %v33280_v29 }
 0xf3e   : > { %v24214_v28 = vadd.f32 %v24213_v33, %v24132_v23  ;;  %v24441_v45 = vpop.f32.mrf.mxu0  ;;  %29122 = vmatmul.mubr.f32.vlgmr.msra.gmra.mxu0 %v24614_v13  ;;  %29135 = vmatprep.subr.mxu0 %v24672_v10  ;;  %v24673_v57 = vand.u32 4294901760, %v24672_v10  ;;  %v25218_v13 = vsub.f32 %v25216_v32, %v25217_v25 }
 0xf3f   : > { %v29090_v35 = vpop.f32.mrf.mxu1  ;;  %29136 = vmatpush3.msra.mxu0 %v24672_v10  ;;  %29124 = vmatprep.mubr.f32.mxu0 %v24624_v42 }
 0xf40   : > { %v29111_v44 = vpop.f32.mrf.mxu0  ;;  %v24290_v51 = vadd.f32 %v24289_v7, %v24214_v28  ;;  %29151 = vmatprep.subr.mxu0 %v24673_v57  ;;  %v24674_v47 = vsub.f32 %v24672_v10, %v24673_v57  ;;  %v25208_v7 = vsub.f32 %v33317_v46, %v25207_v37 }
 0xf42   : > { %v24364_v12 = vpop.f32.mrf.mxu1  ;;  %29125 = vmatmul.mubr.f32.gmra.mxu0 %v24634_v39  ;;  %v24675_v41 = vand.u32 4294901760, %v24674_v47 }
 0xf43   : > { %v24365_v26 = vadd.f32 %v24364_v12, %v24290_v51  ;;  %29137 = vmatprep.mubr.f32.mxu0 %v33225_v60  ;;  %v25199_v60 = vand.u32 4294901760, %v25198_v38 }
 0xf44   : > { %v29104_v16 = vpop.f32.mrf.mxu1  ;;  %29127 = vmatprep.subr.mxu1 %v24675_v41 }
 0xf45   : > { %v24442_v52 = vadd.f32 %v24441_v45, %v24365_v26  ;;  %29128 = vmatpush3.msra.mxu1 %v24675_v41 }
 0xf46   : > { %v24514_v53 = vpop.f32.mrf.mxu1  ;;  %29130 = vmatmul.mubr.f32.vlgmr.msra.gmra.mxu1 %v33253_v14  ;;  %29138 = vmatmul.mubr.f32.vlgmr.msra.gmra.mxu0 %v33261_v36  ;;  %v25209_v36 = vand.u32 4294901760, %v25208_v7 }
 0xf47   : > { %v24515_v49 = vadd.f32 %v24514_v53, %v24442_v52  ;;  %29143 = vmatprep.subr.mxu1 %v33280_v29  ;;  %29152 = vmatpush3.msra.mxu0 %v24673_v57 }
 0xf48   : > { %v29118_v2 = vpop.f32.mrf.mxu1  ;;  %29144 = vmatpush3.msra.mxu1 %v33280_v29  ;;  %29132 = vmatprep.mubr.f32.mxu1 %v33257_v20 }
 0xf49   : > { %v25160_v23 = vand.u32 4294901760, %v24515_v49  ;;  %29159 = vmatprep.subr.mxu1 %v33280_v29  ;;  %29140 = vmatprep.mubr.f32.mxu0 %v33266_v1 }
 0xf4a   : > { %29133 = vmatmul.mubr.f32.gmra.mxu1 %v33263_v50  ;;  %29141 = vmatmul.mubr.f32.gmra.mxu0 %v33270_v0 }
 0xf4b   : > { %v25267_v11 = vsub.f32 %v24515_v49, %v25160_v23  ;;  %29167 = vmatprep.subr.mxu0 %v25160_v23  ;;  %29145 = vmatprep.mubr.f32.mxu1 %v24602_v24 }
 0xf4c   : > { %29153 = vmatprep.mubr.f32.mxu0 %v33222_v34 }
 0xf4d   : > { %v25268_v58 = vand.u32 4294901760, %v25267_v11 }
 0xf4e   : > { %29146 = vmatmul.mubr.f32.vlgmr.msra.gmra.mxu1 %v24612_v61  ;;  %29154 = vmatmul.mubr.f32.vlgmr.msra.gmra.mxu0 %v33253_v14  ;;  %v25228_v61 = vsub.f32 %v25226_v17, %v25227_v27 }
 0xf4f   : > { %29160 = vmatpush3.msra.mxu1 %v33280_v29  ;;  %29168 = vmatpush3.msra.mxu0 %v25160_v23  ;;  %v25269_v9 = vsub.f32 %v25267_v11, %v25268_v58  ;;  %v25219_v29 = vand.u32 4294901760, %v25218_v13 }
 0xf50   : > { %29183 = vmatprep.subr.mxu0 %v25267_v11  ;;  %29148 = vmatprep.mubr.f32.mxu1 %v24622_v54  ;;  %v25229_v1 = vand.u32 4294901760, %v25228_v61 }
 0xf51   : > { %v25270_v24 = vand.u32 4294901760, %v25269_v9  ;;  %29156 = vmatprep.mubr.f32.mxu0 %v33257_v20 }
 0xf52   : > { %29149 = vmatmul.mubr.f32.gmra.mxu1 %v24632_v21  ;;  %29157 = vmatmul.mubr.f32.gmra.mxu0 %v33263_v50 }
 0xf53   : > { %29175 = vmatprep.subr.mxu1 %v25270_v24  ;;  %29161 = vmatprep.mubr.f32.mxu1 %v33222_v34 }
 0xf54   : > { %29169 = vmatprep.mubr.f32.mxu0 %v25199_v60 }
 0xf56   : > { %29162 = vmatmul.mubr.f32.vlgmr.msra.gmra.mxu1 %v33253_v14  ;;  %29170 = vmatmul.mubr.f32.vlgmr.msra.gmra.mxu0 %v25209_v36 }
 0xf57   : > { %29176 = vmatpush3.msra.mxu1 %v25270_v24  ;;  %29184 = vmatpush3.msra.mxu0 %v25267_v11 }
 0xf58   : > { %29191 = vmatprep.subr.mxu1 %v25160_v23  ;;  %29199 = vmatprep.subr.mxu0 %v25268_v58 }
 0xf59   : > { %29164 = vmatprep.mubr.f32.mxu1 %v33257_v20  ;;  %29172 = vmatprep.mubr.f32.mxu0 %v25219_v29 }
 0xf5a   : > { %29165 = vmatmul.mubr.f32.gmra.mxu1 %v33263_v50  ;;  %29173 = vmatmul.mubr.f32.gmra.mxu0 %v25229_v1 }
 0xf5b   : > { %29177 = vmatprep.mubr.f32.mxu1 %v33299_v62  ;;  %29185 = vmatprep.mubr.f32.mxu0 %v33310_v59 }
 0xf5e   : > { %29178 = vmatmul.mubr.f32.vlgmr.msra.gmra.mxu1 %v33304_v6  ;;  %29186 = vmatmul.mubr.f32.vlgmr.msra.gmra.mxu0 %v33317_v46 }
 0xf5f   : > { %29192 = vmatpush3.msra.mxu1 %v25160_v23  ;;  %29200 = vmatpush3.msra.mxu0 %v25268_v58 }
 0xf60   : > { %29207 = vmatprep.subr.mxu1 %v25160_v23  ;;  %29180 = vmatprep.mubr.f32.mxu1 %v33312_v3 }
 0xf61   : > { %29188 = vmatprep.mubr.f32.mxu0 %v25216_v32 }
 0xf62   : > { %29181 = vmatmul.mubr.f32.gmra.mxu1 %v33319_v63  ;;  %29189 = vmatmul.mubr.f32.gmra.mxu0 %v25226_v17 }
 0xf63   : > { %29193 = vmatprep.mubr.f32.mxu1 %v25197_v15  ;;  %29201 = vmatprep.mubr.f32.mxu0 %v33299_v62 }
 0xf66   : > { %29194 = vmatmul.mubr.f32.vlgmr.msra.gmra.mxu1 %v25207_v37  ;;  %29202 = vmatmul.mubr.f32.vlgmr.msra.gmra.mxu0 %v33304_v6 }
 0xf67   : > { %29208 = vmatpush3.msra.mxu1 %v25160_v23  ;;  %29196 = vmatprep.mubr.f32.mxu1 %v25217_v25 }
 0xf68   : > { %29204 = vmatprep.mubr.f32.mxu0 %v33312_v3 }
 0xf6a   : > { %29197 = vmatmul.mubr.f32.gmra.mxu1 %v25227_v27  ;;  %29205 = vmatmul.mubr.f32.gmra.mxu0 %v33319_v63 }
 0xf6b   : > { %29209 = vmatprep.mubr.f32.mxu1 %v33299_v62 }
 0xf6e   : > { %29210 = vmatmul.mubr.f32.vlgmr.msra.gmra.mxu1 %v33304_v6 }
 0xf6f   : > { %29212 = vmatprep.mubr.f32.mxu1 %v33312_v3 }
 0xf72   : > { %29213 = vmatmul.mubr.f32.gmra.mxu1 %v33319_v63 }
 0xffe   : > { %v29123_v34 = vpop.f32.mrf.mxu0 }
0x1000   : > { %v24606_v14 = vpop.f32.mrf.mxu0 }
0x1002   : > { %v29126_v20 = vpop.f32.mrf.mxu0 }
0x1004   : > { %v24626_v50 = vpop.f32.mrf.mxu0 }
0x1006   : > { %v29131_v0 = vpop.f32.mrf.mxu1  ;;  %v33365_v54 = vpop.f32.mrf.mxu0 }
0x1008   : > { %v24712_v21 = vpop.f32.mrf.mxu1  ;;  %v24804_v40 = vpop.f32.mrf.mxu0 }
0x1009   : > { %v24713_v16 = vadd.f32 %v24712_v21, %v24606_v14 }
0x100a   : > { %v29134_v56 = vpop.f32.mrf.mxu1  ;;  %v29142_v42 = vpop.f32.mrf.mxu0 }
0x100b   : > { %v24805_v46 = vadd.f32 %v24804_v40, %v24713_v16  ;;  %v24731_v36 = vadd.f32 %v29134_v56, %v29126_v20 }
0x100c   : > { %v24724_v10 = vpop.f32.mrf.mxu1  ;;  %v24818_v4 = vpop.f32.mrf.mxu0 }
0x100d   : > { %v24725_v63 = vadd.f32 %v24724_v10, %v24626_v50  ;;  %v24719_v50 = vadd.f32 %v29131_v0, %v29123_v34 }
0x100e   : > { %v33367_v33 = vpop.f32.mrf.mxu1  ;;  %v33369_v8 = vpop.f32.mrf.mxu0 }
0x100f   : > { %v24819_v17 = vadd.f32 %v24818_v4, %v24725_v63 }
0x1010   : > { %v24899_v28 = vpop.f32.mrf.mxu1  ;;  %v24997_v45 = vpop.f32.mrf.mxu0 }
0x1011   : > { %v24900_v23 = vadd.f32 %v24899_v28, %v24805_v46 }
0x1012   : > { %v29150_v57 = vpop.f32.mrf.mxu1  ;;  %v33371_v39 = vpop.f32.mrf.mxu0 }
0x1013   : > { %v24998_v25 = vadd.f32 %v24997_v45, %v24900_v23  ;;  %v24826_v45 = vadd.f32 %v29142_v42, %v24731_v36 }
0x1014   : > { %v24915_v35 = vpop.f32.mrf.mxu1  ;;  %v25009_v18 = vpop.f32.mrf.mxu0 }
0x1015   : > { %v24916_v7 = vadd.f32 %v24915_v35, %v24819_v17  ;;  %v24924_v20 = vadd.f32 %v29150_v57, %v24826_v45 }
0x1016   : > { %v33373_v48 = vpop.f32.mrf.mxu1  ;;  %v29171_v44 = vpop.f32.mrf.mxu0 }
0x1017   : > { %v25010_v29 = vadd.f32 %v25009_v18, %v24916_v7  ;;  %v25016_v42 = vadd.f32 %v33371_v39, %v24924_v20 }
0x1018   : > { %v25087_v51 = vpop.f32.mrf.mxu1  ;;  %v25201_v47 = vpop.f32.mrf.mxu0 }
0x1019   : > { %v25088_v24 = vadd.f32 %v25087_v51, %v24998_v25  ;;  %v24812_v51 = vadd.f32 %v33365_v54, %v24719_v50 }
0x101a   : > { %v33375_v62 = vpop.f32.mrf.mxu1  ;;  %v29174_v19 = vpop.f32.mrf.mxu0 }
0x101b   : > { %v25109_v4 = vadd.f32 %v25088_v24, %v33244_v43  ;;  %v25106_v54 = vadd.f32 %v33375_v62, %v25016_v42 }
0x101c   : > { %v25099_v12 = vpop.f32.mrf.mxu1  ;;  %v25221_v41 = vpop.f32.mrf.mxu0 }
0x101d   : > { %v25100_v28 = vadd.f32 %v25099_v12, %v25010_v29 }
0x101e   : > { %v29179_v6 = vpop.f32.mrf.mxu1  ;;  %v29187_v22 = vpop.f32.mrf.mxu0 }
0x101f   : > { %v25314_v35 = vadd.f32 %v29179_v6, %v29171_v44  ;;  %v25111_v16 = vadd.f32 %v25100_v28, %v33255_v31 }
0x1020   : > { %v25307_v26 = vpop.f32.mrf.mxu1  ;;  %v25399_v30 = vpop.f32.mrf.mxu0 }
0x1021   : > { %v25308_v49 = vadd.f32 %v25307_v26, %v25201_v47 }
0x1022   : > { %v29182_v59 = vpop.f32.mrf.mxu1  ;;  %v29190_v52 = vpop.f32.mrf.mxu0 }
0x1023   : > { %v25400_v11 = vadd.f32 %v25399_v30, %v25308_v49  ;;  %v25326_v21 = vadd.f32 %v29182_v59, %v29174_v19  ;;  %v24908_v19 = vadd.f32 %v33367_v33, %v24812_v51  ;;  %v25407_v59 = vadd.f32 %v29187_v22, %v25314_v35 }
0x1024   : > { %v25319_v3 = vpop.f32.mrf.mxu1  ;;  %v25413_v53 = vpop.f32.mrf.mxu0  ;;  %v25112_v33 = vadd.f32 %v25106_v54, %v33251_v55 }
0x1025   : > { %v25320_v38 = vadd.f32 %v25319_v3, %v25221_v41  ;;  %v25421_v56 = vadd.f32 %v29190_v52, %v25326_v21  ;;  %v25004_v3 = vadd.f32 %v33369_v8, %v24908_v19 }
0x1026   : > { %v29195_v2 = vpop.f32.mrf.mxu1  ;;  %v29203_v15 = vpop.f32.mrf.mxu0 }
0x1027   : > { %v25414_v13 = vadd.f32 %v25413_v53, %v25320_v38  ;;  %v25503_v44 = vadd.f32 %v29195_v2, %v25407_v59  ;;  %v25094_v31 = vadd.f32 %v33373_v48, %v25004_v3 }
0x1028   : > { %v25494_v32 = vpop.f32.mrf.mxu1  ;;  %v25592_v37 = vpop.f32.mrf.mxu0 }
0x1029   : > { %v25495_v27 = vadd.f32 %v25494_v32, %v25400_v11  ;;  %v25599_v52 = vadd.f32 %v29203_v15, %v25503_v44  ;;  %v25110_v46 = vadd.f32 %v25094_v31, %v33239_v5  ;;  %v25708_v11 = vld [vmem:[#allocation3] sm:$0xff] }
0x102a   : > { %v29198_v58 = vpop.f32.mrf.mxu1  ;;  %v29206_v60 = vpop.f32.mrf.mxu0 }
0x102b   : > { %v25593_v1 = vadd.f32 %v25592_v37, %v25495_v27  ;;  %v25519_v43 = vadd.f32 %v29198_v58, %v25421_v56 }
0x102c   : > { %v25510_v9 = vpop.f32.mrf.mxu1  ;;  %v25604_v40 = vpop.f32.mrf.mxu0 }
0x102d   : > { %v25511_v14 = vadd.f32 %v25510_v9, %v25414_v13  ;;  %v25611_v57 = vadd.f32 %v29206_v60, %v25519_v43 }
0x102e   : > { %v29211_v61 = vpop.f32.mrf.mxu1 }
0x102f   : > { %v25605_v26 = vadd.f32 %v25604_v40, %v25511_v14  ;;  %v25689_v22 = vadd.f32 %v29211_v61, %v25599_v52 }
0x1030   : > { %v25682_v10 = vpop.f32.mrf.mxu1 }
0x1031   : > { %v25683_v47 = vadd.f32 %v25682_v10, %v25593_v1  ;;  %v25705_v49 = vadd.f32 %v25689_v22, %v25110_v46 }
0x1032   : > { %v29214_v41 = vpop.f32.mrf.mxu1 }
0x1033   : > { %v25704_v30 = vadd.f32 %v25683_v47, %v25109_v4  ;;  %v25701_v53 = vadd.f32 %v29214_v41, %v25611_v57 }
0x1034   : > { %v25694_v18 = vpop.f32.mrf.mxu1 }
0x1035   : > { %v25898_v34 = vmul.f32 -1.442695, %v25704_v30  ;;  %v25695_v0 = vadd.f32 %v25694_v18, %v25605_v26  ;;  %v25707_v63 = vadd.f32 %v25701_v53, %v25112_v33 }
0x1037   : > { %29277 = vpow2.f32 %v25898_v34  ;;  %v25706_v12 = vadd.f32 %v25695_v0, %v25111_v16  ;;  %v25899_v2 = vmul.f32 -1.442695, %v25707_v63 }
0x1039   : > { %v25897_v6 = vmul.f32 -1.442695, %v25706_v12 }
0x103b   : > { %29279 = vpow2.f32 %v25897_v6 }
0x103c   : > { %29281 = vtanh.f32 %v25705_v49 }
0x1044   : > { %v29278_v39 = vpop.eup %29277 }
0x1045   : > { %v25719_v23 = vadd.f32 1.0, %v29278_v39 }
0x1047   : > { %29283 = vrcp.f32 %v25719_v23 }
0x1048   : > { %v29280_v8 = vpop.eup %29279  ;;  %29285 = vpow2.f32 %v25899_v2 }
0x1049   : > { %v25712_v62 = vadd.f32 1.0, %v29280_v8  ;;  %v29282_v32 = vpop.eup %29281 }
0x104b   : > { %29287 = vrcp.f32 %v25712_v62 }
0x1054   : > { %v29284_v48 = vpop.eup %29283 }
0x1055   : > { %v29286_v15 = vpop.eup %29285  ;;  %v25723_v37 = vmul.f32 %v29284_v48, %v29282_v32 }
0x1056   : > { %v25729_v17 = vadd.f32 1.0, %v29286_v15 }
0x1058   : > { %v29288_v55 = vpop.eup %29287  ;;  %29289 = vrcp.f32 %v25729_v17 }
0x1059   : > { %v25715_v5 = vmul.f32 %v29288_v55, %v25708_v11 }
0x105b   : > { %v25724_v38 = vadd.f32 %v25723_v37, %v25715_v5 }
0x105d   : > { %29291 = vtanh.f32 %v25724_v38  ;;  %25733 = vst.msk [vmem:[#allocation3] sm:$0xff] %vm263_vm1, %v25724_v38 }
0x1065   : > { %v29290_v58 = vpop.eup %29289 }
0x106a   : > { %v29292_v25 = vpop.eup %29291 }
0x106b   : > { %v25732_v7 = vmul.f32 %v29292_v25, %v29290_v58 }
0x106d   : > { %25734 = vst.msk [vmem:[#allocation2] sm:$0xff] %vm263_vm1, %v25732_v7  ;;  %25900 = vst.msk [vmem:[%s29351_s27 + $0x18] sm:$0xff] %vm263_vm1, %v25732_v7 }
0x106e PF: > { %s15_s18 = sadd.s32 1, %s29299_s18  }
0x106f   : > { %p12_p5 = scmp.ge.s32.totalorder %s15_s18, 4  }
0x1071   :  { %14 = sbr.rel (!%p12_p5) target bundleno = 1 (0x1), region = 86 }

</bundles_post_ra>
